<compile_context>
chip_gen: v6e
topology: v6e:2x2x1
jax: 0.10.0
libtpu: 0.0.40
codegen_flags: <defaults>
</compile_context>

<pallas_src>
import jax
import jax.numpy as jnp
from jax import lax
from jax.experimental import pallas as pl
from jax.experimental.pallas import tpu as pltpu

N_CLASSES = 35
NC_PAD = 128          # classifier output padded to a full lane register
OFF = 16              # left margin of each per-sample slot inside the slab
REACH = 10            # max conv reach beyond a sample (b4: pad = dil*(K-1)-pad = 10)

# name -> (K, pad, dil, C_in, C_out) of the main convs, in execution order.
# Blocks 1..3 additionally carry a fused 1x1 residual conv (64 extra output rows).
CONV_CFG = {
    "b0":   (5, 2, 1, 160, 64),
    "blk1": (13, 5, 1, 64, 64),
    "blk2": (15, 7, 1, 64, 64),
    "blk3": (17, 8, 1, 64, 64),
    "b4":   (11, 10, 2, 64, 96),
    "b5":   (1, 0, 1, 96, 96),
}
IM2COL_ROWS = max(K * ci for (K, _, _, ci, _) in CONV_CFG.values())   # 1088


# ----------------------------------------------------------------------------
# Fused kernel
# ----------------------------------------------------------------------------
def _rotate(x, amt, W):
    """result[:, j] = x[:, (j - amt) % W]  (same convention as jnp.roll; amt static)."""
    amt = amt % W
    if amt == 0:
        return x
    return jnp.concatenate([x[:, W - amt:], x[:, :W - amt]], axis=1)


def _make_kernel(T, T_slot, bb):
    W = bb * T_slot

    def conv(a, w_ref, K, pad, dil, c_in, im2col_ref):
        """a: (c_in, W) bf16 slab with zero margins.  Output is slot-aligned f32."""
        if K == 1 and pad == 0:
            rhs = a
        else:
            for k in range(K):
                # tap k needs a[:, j - pad + k*dil]; margins (>= REACH wide) make the
                # wrapped columns of the rotation exact zeros, so this equals a
                # zero-extended shift.
                im2col_ref[k * c_in:(k + 1) * c_in, :] = _rotate(a, pad - k * dil, W)
            rhs = im2col_ref[0:K * c_in, :]
        return jnp.dot(w_ref[...], rhs, preferred_element_type=jnp.float32)

    def kernel(x_ref, mask_ref, mask1_ref, pool_ref,
               w0_ref, b0_ref, w1_ref, b1_ref, w2_ref, b2_ref, w3_ref, b3_ref,
               w4_ref, b4_ref, w5_ref, b5_ref, fcw_ref, fcb_ref,
               o_ref, im2col_ref):
        mask = mask_ref[...]      # (1, W): 1.0 on the T valid columns of each slot
        mask1 = mask1_ref[...]    # (1, W): 1.0 on the first T-2 columns (block1 mconv)

        # ---- assemble the (160, W) bf16 input slab (zero margins per slot) --------
        zl = jnp.zeros((160, OFF), jnp.bfloat16)
        zr = jnp.zeros((160, T_slot - OFF - T), jnp.bfloat16)
        pieces = []
        for s in range(bb):
            pieces += [zl, x_ref[s].astype(jnp.bfloat16), zr]
        a = jnp.concatenate(pieces, axis=1)                          # (160, W)

        # ---- QJasperBlock0: QConv(k=5,p=2) + BN(folded) + ReLU ---------------------
        y = conv(a, w0_ref, 5, 2, 1, 160, im2col_ref) + b0_ref[...]
        a = (jnp.maximum(y, 0.0) * mask).astype(jnp.bfloat16)        # (64, W)

        # ---- QJasperBlock1..3: fused [mconv ; 1x1 res], tail-pad, add, ReLU --------
        for w_ref, b_ref, K, pad, m_mask in ((w1_ref, b1_ref, 13, 5, mask1),
                                             (w2_ref, b2_ref, 15, 7, None),
                                             (w3_ref, b3_ref, 17, 8, None)):
            y = conv(a, w_ref, K, pad, 1, 64, im2col_ref) + b_ref[...]   # (128, W)
            om, orr = y[:64], y[64:]
            if m_mask is not None:          # block1: T_out = T-2 -> tail-pad before add
                om = om * m_mask
            a = (jnp.maximum(om + orr, 0.0) * mask).astype(jnp.bfloat16)  # (64, W)

        # ---- QJasperBlock4: dilated QConv(k=11,p=10,d=2) + BN + ReLU ---------------
        y = conv(a, w4_ref, 11, 10, 2, 64, im2col_ref) + b4_ref[...]
        a = (jnp.maximum(y, 0.0) * mask).astype(jnp.bfloat16)        # (96, W)

        # ---- QJasperBlock5: 1x1 QConv + BN + ReLU (kept f32 for the pooling) -------
        y = conv(a, w5_ref, 1, 0, 1, 96, im2col_ref) + b5_ref[...]
        o5 = jnp.maximum(y, 0.0) * mask                              # (96, W) f32

        # ---- head: adaptive avg pool (per-slot averaging matmul), Linear, logsoftmax
        # pooled[s, c] = sum_j pool[s, j] * o5[c, j]   -> (bb, 96) f32
        pooled = lax.dot_general(pool_ref[...], o5, (((1,), (1,)), ((), ())),
                                 preferred_element_type=jnp.float32)
        logits = jnp.dot(pooled.astype(jnp.bfloat16), fcw_ref[...],
                         preferred_element_type=jnp.float32) + fcb_ref[...]  # (bb,128)
        m = jnp.max(logits, axis=-1, keepdims=True)
        lse = jnp.log(jnp.sum(jnp.exp(logits - m), axis=-1, keepdims=True)) + m
        o_ref[0] = (logits - lse).astype(o_ref.dtype)                # lane-dense store

    return kernel


# ----------------------------------------------------------------------------
# Host-side plumbing
# ----------------------------------------------------------------------------
def _choose_bb(B, T_slot, target_lanes=256):
    """Smallest divisor of B making the slab >= target lanes, keeping >=2 grid steps."""
    divisors = [d for d in range(1, B + 1) if B % d == 0]
    prefer = [d for d in divisors if B // d >= 2] or divisors
    for d in prefer:
        if d * T_slot >= target_lanes:
            return d
    return prefer[-1]


def _slab_constants(T, T_slot, bb):
    W = bb * T_slot
    pos = jnp.arange(W) % T_slot
    valid = (pos >= OFF) & (pos < OFF + T)
    mask = valid.astype(jnp.float32).reshape(1, W)
    mask1 = ((pos >= OFF) & (pos < OFF + T - 2)).astype(jnp.float32).reshape(1, W)
    slot = jnp.arange(W) // T_slot
    pool = ((slot[None, :] == jnp.arange(bb)[:, None]) & valid[None, :])
    pool = pool.astype(jnp.float32) / jnp.float32(T)                 # (bb, W)
    return mask, mask1, pool


def _cost(B, T):
    flops = 0
    weight_bytes = 0
    for name, (K, _, _, ci, co) in CONV_CFG.items():
        rows = co + (64 if name.startswith("blk") else 0)
        flops += 2 * rows * K * ci * T
        weight_bytes += rows * K * ci * 2 + rows * 4
    flops = B * (flops + 2 * 96 * N_CLASSES)
    weight_bytes += 96 * NC_PAD * 2 + NC_PAD * 4
    bytes_accessed = B * (160 * T * 4 + NC_PAD * 4) + weight_bytes
    return flops, B * NC_PAD, bytes_accessed


@jax.jit
def forward(x, params):
    """x: (B, 4, H, T) with 4*H == 160 (the 'off' preprocessing branch)."""
    B, four, H, T = x.shape
    assert four == 4 and 4 * H == 160
    o = x.reshape(B, 4 * H, T)                                       # (B, 160, T)

    T_slot = ((T + OFF + REACH + 31) // 32) * 32                     # per-sample slot
    bb = _choose_bb(B, T_slot)
    G = B // bb
    W = bb * T_slot
    mask, mask1, pool = _slab_constants(T, T_slot, bb)

    const_inputs = [mask, mask1, pool,
                    params["w0"], params["b0"],
                    params["w_blk1"], params["b_blk1"],
                    params["w_blk2"], params["b_blk2"],
                    params["w_blk3"], params["b_blk3"],
                    params["w4"], params["b4"],
                    params["w5"], params["b5"],
                    params["fc_w"], params["fc_b"]]

    in_specs = [pl.BlockSpec((bb, 160, T), lambda i: (i, 0, 0))]
    in_specs += [pl.BlockSpec(a.shape, lambda i: (0, 0)) for a in const_inputs]

    flops, transc, bytes_acc = _cost(B, T)
    out = pl.pallas_call(
        _make_kernel(T, T_slot, bb),
        out_shape=jax.ShapeDtypeStruct((G, bb, NC_PAD), jnp.float32),
        grid=(G,),
        in_specs=in_specs,
        out_specs=pl.BlockSpec((1, bb, NC_PAD), lambda i: (i, 0, 0)),
        scratch_shapes=[pltpu.VMEM((IM2COL_ROWS, W), jnp.bfloat16)],
        compiler_params=pltpu.CompilerParams(
            dimension_semantics=("parallel",)),                      # v7x: 2 TCs
        cost_estimate=pl.CostEstimate(flops=flops, transcendentals=transc,
                                      bytes_accessed=bytes_acc),
    )(o, *const_inputs)
    return out.reshape(B, NC_PAD)[:, :N_CLASSES]


# ----------------------------------------------------------------------------
# Deterministic parameter construction (BN folded into weights, blocks fused)
# ----------------------------------------------------------------------------
def _quaternion_conv_weight(key, in_ch, out_ch, K):
    """Real-valued Hamilton-product weight (out_ch, in_ch, K), f32."""
    ko, ki = out_ch // 4, in_ch // 4
    kr, kii, kj, kk = jax.random.split(key, 4)
    scale = 1.0 / jnp.sqrt(jnp.float32(in_ch * K))
    r = jax.random.normal(kr, (ko, ki, K), jnp.float32) * scale
    i = jax.random.normal(kii, (ko, ki, K), jnp.float32) * scale
    j = jax.random.normal(kj, (ko, ki, K), jnp.float32) * scale
    k = jax.random.normal(kk, (ko, ki, K), jnp.float32) * scale
    row_r = jnp.concatenate([r, -i, -j, -k], axis=1)
    row_i = jnp.concatenate([i, r, -k, j], axis=1)
    row_j = jnp.concatenate([j, k, r, -i], axis=1)
    row_k = jnp.concatenate([k, -j, i, r], axis=1)
    return jnp.concatenate([row_r, row_i, row_j, row_k], axis=0)     # (out, in, K)


def _bn_fold(key, C, eps=1e-3):
    kg, kb, km, kv = jax.random.split(key, 4)
    gamma = 0.5 + jax.random.uniform(kg, (C,), jnp.float32)
    beta = 0.1 * jax.random.normal(kb, (C,), jnp.float32)
    mean = 0.1 * jax.random.normal(km, (C,), jnp.float32)
    var = 0.5 + jax.random.uniform(kv, (C,), jnp.float32)
    scale = gamma / jnp.sqrt(var + eps)
    return scale, beta - mean * scale


def _flatten_tap_major(w, scale):
    """(C_out, C_in, K) f32, fold BN scale, -> (C_out, K*C_in) bf16 (tap-major)."""
    w = w * scale[:, None, None]
    co, ci, K = w.shape
    return jnp.transpose(w, (0, 2, 1)).reshape(co, K * ci).astype(jnp.bfloat16)


def build_params(key):
    keys = jax.random.split(key, 32)
    it = iter(range(32))

    def conv_bn(ci, co, K):
        w = _quaternion_conv_weight(keys[next(it)], ci, co, K)
        s, b = _bn_fold(keys[next(it)], co)
        return _flatten_tap_major(w, s), b.reshape(co, 1)

    p = {}
    p["w0"], p["b0"] = conv_bn(160, 64, 5)
    for blk, (K, pad) in enumerate(((13, 5), (15, 7), (17, 8)), start=1):
        wm, bm = conv_bn(64, 64, K)                  # (64, K*64), (64, 1)
        wr, br = conv_bn(64, 64, 1)                  # (64, 64),   (64, 1)
        wr_embed = jnp.zeros((64, K * 64), jnp.bfloat16)
        wr_embed = wr_embed.at[:, pad * 64:(pad + 1) * 64].set(wr)   # zero-shift tap
        p[f"w_blk{blk}"] = jnp.concatenate([wm, wr_embed], axis=0)   # (128, K*64)
        p[f"b_blk{blk}"] = jnp.concatenate([bm, br], axis=0)         # (128, 1)
    p["w4"], p["b4"] = conv_bn(64, 96, 11)
    p["w5"], p["b5"] = conv_bn(96, 96, 1)

    # classifier padded to NC_PAD: extra columns have zero weight and a very
    # negative bias so they vanish in the softmax.
    fw = jax.random.normal(keys[next(it)], (96, N_CLASSES), jnp.float32) / jnp.sqrt(96.0)
    fb = 0.1 * jax.random.normal(keys[next(it)], (N_CLASSES,), jnp.float32)
    p["fc_w"] = jnp.zeros((96, NC_PAD), jnp.float32).at[:, :N_CLASSES].set(fw) \
                   .astype(jnp.bfloat16)
    p["fc_b"] = jnp.full((1, NC_PAD), -1e30, jnp.float32).at[0, :N_CLASSES].set(fb)
    return p


# ----------------------------------------------------------------------------
# Pure-JAX reference with the same bf16-operand / f32-accumulate rounding points
# ----------------------------------------------------------------------------
def reference_forward(x, params):
    B, _, H, T = x.shape
    o = x.reshape(B, 4 * H, T).astype(jnp.float32)

    def conv(o, w_flat, K, pad, dil):
        co, ci = w_flat.shape[0], o.shape[1]
        w = w_flat.astype(jnp.float32).reshape(co, K, ci)            # tap-major
        ob = o.astype(jnp.bfloat16).astype(jnp.float32)              # matmul operand dtype
        op = jnp.pad(ob, ((0, 0), (0, 0), (pad, pad)))
        T_out = op.shape[-1] - dil * (K - 1)
        acc = jnp.zeros((B, co, T_out), jnp.float32)
        for k in range(K):
            acc = acc + jnp.einsum("oc,bct->bot", w[:, k],
                                   op[:, :, k * dil:k * dil + T_out])
        return acc

    o = jax.nn.relu(conv(o, params["w0"], 5, 2, 1) + params["b0"][None])
    for blk, (K, pad) in enumerate(((13, 5), (15, 7), (17, 8)), start=1):
        wb, bcat = params[f"w_blk{blk}"], params[f"b_blk{blk}"]
        wm, wr = wb[:64], wb[64:, pad * 64:(pad + 1) * 64]
        om = conv(o, wm, K, pad, 1) + bcat[None, :64]
        orr = conv(o, wr, 1, 0, 1) + bcat[None, 64:]
        om = jnp.pad(om, ((0, 0), (0, 0), (0, orr.shape[-1] - om.shape[-1])))
        o = jax.nn.relu(om + orr)
    o = jax.nn.relu(conv(o, params["w4"], 11, 10, 2) + params["b4"][None])
    o = jax.nn.relu(conv(o, params["w5"], 1, 0, 1) + params["b5"][None])

    pooled = jnp.mean(o, axis=-1)                                    # (B, 96) f32
    logits = (pooled.astype(jnp.bfloat16).astype(jnp.float32)
              @ params["fc_w"].astype(jnp.float32)[:, :N_CLASSES]
              + params["fc_b"][0, :N_CLASSES])
    return jax.nn.log_softmax(logits, axis=-1)


# ----------------------------------------------------------------------------
if __name__ == "__main__":
    key = jax.random.PRNGKey(0)
    kx, kp = jax.random.split(key)

    B, T = 8, 32
    # 'off' mode needs 4 * H == 160  =>  H = 40
    x = jax.random.normal(kx, (B, 4, 40, T), jnp.float32)
    params = build_params(kp)

    out = forward(x, params)
    jax.block_until_ready(out)

    assert out.shape == (B, N_CLASSES)
    # log_softmax rows should sum (in prob space) to 1
    assert bool(jnp.allclose(jnp.sum(jnp.exp(out), axis=-1), 1.0, atol=1e-4))
    ref = reference_forward(x, params)
    err = float(jnp.max(jnp.abs(out - ref)))
    assert err < 5e-2, err
    print("KERNEL_OK")
</pallas_src>

<mosaic_0001>
module attributes {stable_mosaic.version = 11 : i64} {
  func.func @kernel(%arg0: i32, %arg1: memref<4x160x32xf32, #tpu.memory_space<vmem>>, %arg2: memref<1x256xf32, #tpu.memory_space<vmem>>, %arg3: memref<1x256xf32, #tpu.memory_space<vmem>>, %arg4: memref<4x256xf32, #tpu.memory_space<vmem>>, %arg5: memref<64x800xbf16, #tpu.memory_space<vmem>>, %arg6: memref<64x1xf32, #tpu.memory_space<vmem>>, %arg7: memref<128x832xbf16, #tpu.memory_space<vmem>>, %arg8: memref<128x1xf32, #tpu.memory_space<vmem>>, %arg9: memref<128x960xbf16, #tpu.memory_space<vmem>>, %arg10: memref<128x1xf32, #tpu.memory_space<vmem>>, %arg11: memref<128x1088xbf16, #tpu.memory_space<vmem>>, %arg12: memref<128x1xf32, #tpu.memory_space<vmem>>, %arg13: memref<96x704xbf16, #tpu.memory_space<vmem>>, %arg14: memref<96x1xf32, #tpu.memory_space<vmem>>, %arg15: memref<96x96xbf16, #tpu.memory_space<vmem>>, %arg16: memref<96x1xf32, #tpu.memory_space<vmem>>, %arg17: memref<96x128xbf16, #tpu.memory_space<vmem>>, %arg18: memref<1x128xf32, #tpu.memory_space<vmem>>, %arg19: memref<1x4x128xf32, #tpu.memory_space<vmem>>, %arg20: memref<1088x256xbf16, #tpu.memory_space<vmem>>) attributes {dimension_semantics = [#tpu.dimension_semantics<parallel>], iteration_bounds = array<i64: 2>, scalar_prefetch = 0 : i64, scratch_operands = 1 : i64, tpu.core_type = #tpu.core_type<tc>, window_params = [{transform_indices = @transform_0, window_bounds = array<i64: 4, 160, 32>}, {pipeline_mode = #tpu.pipeline_mode<synchronous>, transform_indices = @transform_1, window_bounds = array<i64: 1, 256>}, {pipeline_mode = #tpu.pipeline_mode<synchronous>, transform_indices = @transform_2, window_bounds = array<i64: 1, 256>}, {pipeline_mode = #tpu.pipeline_mode<synchronous>, transform_indices = @transform_3, window_bounds = array<i64: 4, 256>}, {pipeline_mode = #tpu.pipeline_mode<synchronous>, transform_indices = @transform_4, window_bounds = array<i64: 64, 800>}, {pipeline_mode = #tpu.pipeline_mode<synchronous>, transform_indices = @transform_5, window_bounds = array<i64: 64, 1>}, {pipeline_mode = #tpu.pipeline_mode<synchronous>, transform_indices = @transform_6, window_bounds = array<i64: 128, 832>}, {pipeline_mode = #tpu.pipeline_mode<synchronous>, transform_indices = @transform_7, window_bounds = array<i64: 128, 1>}, {pipeline_mode = #tpu.pipeline_mode<synchronous>, transform_indices = @transform_8, window_bounds = array<i64: 128, 960>}, {pipeline_mode = #tpu.pipeline_mode<synchronous>, transform_indices = @transform_9, window_bounds = array<i64: 128, 1>}, {pipeline_mode = #tpu.pipeline_mode<synchronous>, transform_indices = @transform_10, window_bounds = array<i64: 128, 1088>}, {pipeline_mode = #tpu.pipeline_mode<synchronous>, transform_indices = @transform_11, window_bounds = array<i64: 128, 1>}, {pipeline_mode = #tpu.pipeline_mode<synchronous>, transform_indices = @transform_12, window_bounds = array<i64: 96, 704>}, {pipeline_mode = #tpu.pipeline_mode<synchronous>, transform_indices = @transform_13, window_bounds = array<i64: 96, 1>}, {pipeline_mode = #tpu.pipeline_mode<synchronous>, transform_indices = @transform_14, window_bounds = array<i64: 96, 96>}, {pipeline_mode = #tpu.pipeline_mode<synchronous>, transform_indices = @transform_15, window_bounds = array<i64: 96, 1>}, {pipeline_mode = #tpu.pipeline_mode<synchronous>, transform_indices = @transform_16, window_bounds = array<i64: 96, 128>}, {pipeline_mode = #tpu.pipeline_mode<synchronous>, transform_indices = @transform_17, window_bounds = array<i64: 1, 128>}, {transform_indices = @transform_18, window_bounds = array<i64: 1, 4, 128>}]} {
    %c0 = arith.constant 0 : index
    %c0_0 = arith.constant 0 : index
    %0 = vector.load %arg2[%c0, %c0_0] : memref<1x256xf32, #tpu.memory_space<vmem>>, vector<1x256xf32>
    %c0_1 = arith.constant 0 : index
    %c0_2 = arith.constant 0 : index
    %1 = vector.load %arg3[%c0_1, %c0_2] : memref<1x256xf32, #tpu.memory_space<vmem>>, vector<1x256xf32>
    %cst = arith.constant 0.000000e+00 : bf16
    %2 = vector.broadcast %cst : bf16 to vector<160x16xbf16>
    %cst_3 = arith.constant 0.000000e+00 : bf16
    %3 = vector.broadcast %cst_3 : bf16 to vector<160x16xbf16>
    %c0_4 = arith.constant 0 : index
    %c0_5 = arith.constant 0 : index
    %c0_6 = arith.constant 0 : index
    %4 = vector.load %arg1[%c0_4, %c0_5, %c0_6] : memref<4x160x32xf32, #tpu.memory_space<vmem>>, vector<1x160x32xf32>
    %5 = vector.shape_cast %4 : vector<1x160x32xf32> to vector<160x32xf32>
    %6 = arith.truncf %5 : vector<160x32xf32> to vector<160x32xbf16>
    %c1 = arith.constant 1 : index
    %c0_7 = arith.constant 0 : index
    %c0_8 = arith.constant 0 : index
    %7 = vector.load %arg1[%c1, %c0_7, %c0_8] : memref<4x160x32xf32, #tpu.memory_space<vmem>>, vector<1x160x32xf32>
    %8 = vector.shape_cast %7 : vector<1x160x32xf32> to vector<160x32xf32>
    %9 = arith.truncf %8 : vector<160x32xf32> to vector<160x32xbf16>
    %c2 = arith.constant 2 : index
    %c0_9 = arith.constant 0 : index
    %c0_10 = arith.constant 0 : index
    %10 = vector.load %arg1[%c2, %c0_9, %c0_10] : memref<4x160x32xf32, #tpu.memory_space<vmem>>, vector<1x160x32xf32>
    %11 = vector.shape_cast %10 : vector<1x160x32xf32> to vector<160x32xf32>
    %12 = arith.truncf %11 : vector<160x32xf32> to vector<160x32xbf16>
    %c3 = arith.constant 3 : index
    %c0_11 = arith.constant 0 : index
    %c0_12 = arith.constant 0 : index
    %13 = vector.load %arg1[%c3, %c0_11, %c0_12] : memref<4x160x32xf32, #tpu.memory_space<vmem>>, vector<1x160x32xf32>
    %14 = vector.shape_cast %13 : vector<1x160x32xf32> to vector<160x32xf32>
    %15 = arith.truncf %14 : vector<160x32xf32> to vector<160x32xbf16>
    %16 = tpu.concatenate %2, %6, %3, %2, %9, %3, %2, %12, %3, %2, %15, %3 in 1 : vector<160x16xbf16>, vector<160x32xbf16>, vector<160x16xbf16>, vector<160x16xbf16>, vector<160x32xbf16>, vector<160x16xbf16>, vector<160x16xbf16>, vector<160x32xbf16>, vector<160x16xbf16>, vector<160x16xbf16>, vector<160x32xbf16>, vector<160x16xbf16> -> vector<160x256xbf16>
    %17 = vector.extract_strided_slice %16 {offsets = [0, 254], sizes = [160, 2], strides = [1, 1]} : vector<160x256xbf16> to vector<160x2xbf16>
    %18 = vector.extract_strided_slice %16 {offsets = [0, 0], sizes = [160, 254], strides = [1, 1]} : vector<160x256xbf16> to vector<160x254xbf16>
    %19 = tpu.concatenate %17, %18 in 1 : vector<160x2xbf16>, vector<160x254xbf16> -> vector<160x256xbf16>
    %c0_13 = arith.constant 0 : index
    %c0_14 = arith.constant 0 : index
    %20 = vector.load %arg20[%c0_13, %c0_14] : memref<1088x256xbf16, #tpu.memory_space<vmem>>, vector<160x256xbf16>
    tpu.vector_store %arg20[%c0_13, %c0_14], %19 {strides = array<i32>} : memref<1088x256xbf16, #tpu.memory_space<vmem>>, vector<160x256xbf16>,
    %21 = vector.extract_strided_slice %16 {offsets = [0, 255], sizes = [160, 1], strides = [1, 1]} : vector<160x256xbf16> to vector<160x1xbf16>
    %22 = vector.extract_strided_slice %16 {offsets = [0, 0], sizes = [160, 255], strides = [1, 1]} : vector<160x256xbf16> to vector<160x255xbf16>
    %23 = tpu.concatenate %21, %22 in 1 : vector<160x1xbf16>, vector<160x255xbf16> -> vector<160x256xbf16>
    %c160 = arith.constant 160 : index
    %c0_15 = arith.constant 0 : index
    %24 = vector.load %arg20[%c160, %c0_15] : memref<1088x256xbf16, #tpu.memory_space<vmem>>, vector<160x256xbf16>
    tpu.vector_store %arg20[%c160, %c0_15], %23 {strides = array<i32>} : memref<1088x256xbf16, #tpu.memory_space<vmem>>, vector<160x256xbf16>,
    %c320 = arith.constant 320 : index
    %c0_16 = arith.constant 0 : index
    %25 = vector.load %arg20[%c320, %c0_16] : memref<1088x256xbf16, #tpu.memory_space<vmem>>, vector<160x256xbf16>
    tpu.vector_store %arg20[%c320, %c0_16], %16 {strides = array<i32>} : memref<1088x256xbf16, #tpu.memory_space<vmem>>, vector<160x256xbf16>,
    %26 = vector.extract_strided_slice %16 {offsets = [0, 1], sizes = [160, 255], strides = [1, 1]} : vector<160x256xbf16> to vector<160x255xbf16>
    %27 = vector.extract_strided_slice %16 {offsets = [0, 0], sizes = [160, 1], strides = [1, 1]} : vector<160x256xbf16> to vector<160x1xbf16>
    %28 = tpu.concatenate %26, %27 in 1 : vector<160x255xbf16>, vector<160x1xbf16> -> vector<160x256xbf16>
    %c480 = arith.constant 480 : index
    %c0_17 = arith.constant 0 : index
    %29 = vector.load %arg20[%c480, %c0_17] : memref<1088x256xbf16, #tpu.memory_space<vmem>>, vector<160x256xbf16>
    tpu.vector_store %arg20[%c480, %c0_17], %28 {strides = array<i32>} : memref<1088x256xbf16, #tpu.memory_space<vmem>>, vector<160x256xbf16>,
    %30 = vector.extract_strided_slice %16 {offsets = [0, 2], sizes = [160, 254], strides = [1, 1]} : vector<160x256xbf16> to vector<160x254xbf16>
    %31 = vector.extract_strided_slice %16 {offsets = [0, 0], sizes = [160, 2], strides = [1, 1]} : vector<160x256xbf16> to vector<160x2xbf16>
    %32 = tpu.concatenate %30, %31 in 1 : vector<160x254xbf16>, vector<160x2xbf16> -> vector<160x256xbf16>
    %c640 = arith.constant 640 : index
    %c0_18 = arith.constant 0 : index
    %33 = vector.load %arg20[%c640, %c0_18] : memref<1088x256xbf16, #tpu.memory_space<vmem>>, vector<160x256xbf16>
    tpu.vector_store %arg20[%c640, %c0_18], %32 {strides = array<i32>} : memref<1088x256xbf16, #tpu.memory_space<vmem>>, vector<160x256xbf16>,
    %c0_19 = arith.constant 0 : index
    %c0_20 = arith.constant 0 : index
    %34 = vector.load %arg20[%c0_19, %c0_20] : memref<1088x256xbf16, #tpu.memory_space<vmem>>, vector<800x256xbf16>
    %c0_21 = arith.constant 0 : index
    %c0_22 = arith.constant 0 : index
    %35 = vector.load %arg5[%c0_21, %c0_22] : memref<64x800xbf16, #tpu.memory_space<vmem>>, vector<64x800xbf16>
    %cst_23 = arith.constant dense<0.000000e+00> : vector<64x256xf32>
    %36 = tpu.matmul %35, %34, %cst_23 {dimension_numbers = #tpu.dot_dimension_numbers<[1], [0], [0], [1], [0, 0, 1, 1], [], []>} : vector<64x800xbf16>, vector<800x256xbf16>, vector<64x256xf32> -> vector<64x256xf32>
    %c0_24 = arith.constant 0 : index
    %c0_25 = arith.constant 0 : index
    %37 = vector.load %arg6[%c0_24, %c0_25] : memref<64x1xf32, #tpu.memory_space<vmem>>, vector<64x1xf32>
    %38 = vector.broadcast %37 : vector<64x1xf32> to vector<64x256xf32>
    %39 = arith.addf %36, %38 : vector<64x256xf32>
    %cst_26 = arith.constant 0.000000e+00 : f32
    %40 = vector.broadcast %cst_26 : f32 to vector<64x256xf32>
    %41 = arith.maximumf %39, %40 : vector<64x256xf32>
    %42 = vector.broadcast %0 : vector<1x256xf32> to vector<64x256xf32>
    %43 = arith.mulf %41, %42 : vector<64x256xf32>
    %44 = arith.truncf %43 : vector<64x256xf32> to vector<64x256xbf16>
    %45 = vector.extract_strided_slice %44 {offsets = [0, 251], sizes = [64, 5], strides = [1, 1]} : vector<64x256xbf16> to vector<64x5xbf16>
    %46 = vector.extract_strided_slice %44 {offsets = [0, 0], sizes = [64, 251], strides = [1, 1]} : vector<64x256xbf16> to vector<64x251xbf16>
    %47 = tpu.concatenate %45, %46 in 1 : vector<64x5xbf16>, vector<64x251xbf16> -> vector<64x256xbf16>
    %c0_27 = arith.constant 0 : index
    %c0_28 = arith.constant 0 : index
    %48 = vector.load %arg20[%c0_27, %c0_28] : memref<1088x256xbf16, #tpu.memory_space<vmem>>, vector<64x256xbf16>
    tpu.vector_store %arg20[%c0_27, %c0_28], %47 {strides = array<i32>} : memref<1088x256xbf16, #tpu.memory_space<vmem>>, vector<64x256xbf16>,
    %49 = vector.extract_strided_slice %44 {offsets = [0, 252], sizes = [64, 4], strides = [1, 1]} : vector<64x256xbf16> to vector<64x4xbf16>
    %50 = vector.extract_strided_slice %44 {offsets = [0, 0], sizes = [64, 252], strides = [1, 1]} : vector<64x256xbf16> to vector<64x252xbf16>
    %51 = tpu.concatenate %49, %50 in 1 : vector<64x4xbf16>, vector<64x252xbf16> -> vector<64x256xbf16>
    %c64 = arith.constant 64 : index
    %c0_29 = arith.constant 0 : index
    %52 = vector.load %arg20[%c64, %c0_29] : memref<1088x256xbf16, #tpu.memory_space<vmem>>, vector<64x256xbf16>
    tpu.vector_store %arg20[%c64, %c0_29], %51 {strides = array<i32>} : memref<1088x256xbf16, #tpu.memory_space<vmem>>, vector<64x256xbf16>,
    %53 = vector.extract_strided_slice %44 {offsets = [0, 253], sizes = [64, 3], strides = [1, 1]} : vector<64x256xbf16> to vector<64x3xbf16>
    %54 = vector.extract_strided_slice %44 {offsets = [0, 0], sizes = [64, 253], strides = [1, 1]} : vector<64x256xbf16> to vector<64x253xbf16>
    %55 = tpu.concatenate %53, %54 in 1 : vector<64x3xbf16>, vector<64x253xbf16> -> vector<64x256xbf16>
    %c128 = arith.constant 128 : index
    %c0_30 = arith.constant 0 : index
    %56 = vector.load %arg20[%c128, %c0_30] : memref<1088x256xbf16, #tpu.memory_space<vmem>>, vector<64x256xbf16>
    tpu.vector_store %arg20[%c128, %c0_30], %55 {strides = array<i32>} : memref<1088x256xbf16, #tpu.memory_space<vmem>>, vector<64x256xbf16>,
    %57 = vector.extract_strided_slice %44 {offsets = [0, 254], sizes = [64, 2], strides = [1, 1]} : vector<64x256xbf16> to vector<64x2xbf16>
    %58 = vector.extract_strided_slice %44 {offsets = [0, 0], sizes = [64, 254], strides = [1, 1]} : vector<64x256xbf16> to vector<64x254xbf16>
    %59 = tpu.concatenate %57, %58 in 1 : vector<64x2xbf16>, vector<64x254xbf16> -> vector<64x256xbf16>
    %c192 = arith.constant 192 : index
    %c0_31 = arith.constant 0 : index
    %60 = vector.load %arg20[%c192, %c0_31] : memref<1088x256xbf16, #tpu.memory_space<vmem>>, vector<64x256xbf16>
    tpu.vector_store %arg20[%c192, %c0_31], %59 {strides = array<i32>} : memref<1088x256xbf16, #tpu.memory_space<vmem>>, vector<64x256xbf16>,
    %61 = vector.extract_strided_slice %44 {offsets = [0, 255], sizes = [64, 1], strides = [1, 1]} : vector<64x256xbf16> to vector<64x1xbf16>
    %62 = vector.extract_strided_slice %44 {offsets = [0, 0], sizes = [64, 255], strides = [1, 1]} : vector<64x256xbf16> to vector<64x255xbf16>
    %63 = tpu.concatenate %61, %62 in 1 : vector<64x1xbf16>, vector<64x255xbf16> -> vector<64x256xbf16>
    %c256 = arith.constant 256 : index
    %c0_32 = arith.constant 0 : index
    %64 = vector.load %arg20[%c256, %c0_32] : memref<1088x256xbf16, #tpu.memory_space<vmem>>, vector<64x256xbf16>
    tpu.vector_store %arg20[%c256, %c0_32], %63 {strides = array<i32>} : memref<1088x256xbf16, #tpu.memory_space<vmem>>, vector<64x256xbf16>,
    %c320_33 = arith.constant 320 : index
    %c0_34 = arith.constant 0 : index
    %65 = vector.load %arg20[%c320_33, %c0_34] : memref<1088x256xbf16, #tpu.memory_space<vmem>>, vector<64x256xbf16>
    tpu.vector_store %arg20[%c320_33, %c0_34], %44 {strides = array<i32>} : memref<1088x256xbf16, #tpu.memory_space<vmem>>, vector<64x256xbf16>,
    %66 = vector.extract_strided_slice %44 {offsets = [0, 1], sizes = [64, 255], strides = [1, 1]} : vector<64x256xbf16> to vector<64x255xbf16>
    %67 = vector.extract_strided_slice %44 {offsets = [0, 0], sizes = [64, 1], strides = [1, 1]} : vector<64x256xbf16> to vector<64x1xbf16>
    %68 = tpu.concatenate %66, %67 in 1 : vector<64x255xbf16>, vector<64x1xbf16> -> vector<64x256xbf16>
    %c384 = arith.constant 384 : index
    %c0_35 = arith.constant 0 : index
    %69 = vector.load %arg20[%c384, %c0_35] : memref<1088x256xbf16, #tpu.memory_space<vmem>>, vector<64x256xbf16>
    tpu.vector_store %arg20[%c384, %c0_35], %68 {strides = array<i32>} : memref<1088x256xbf16, #tpu.memory_space<vmem>>, vector<64x256xbf16>,
    %70 = vector.extract_strided_slice %44 {offsets = [0, 2], sizes = [64, 254], strides = [1, 1]} : vector<64x256xbf16> to vector<64x254xbf16>
    %71 = vector.extract_strided_slice %44 {offsets = [0, 0], sizes = [64, 2], strides = [1, 1]} : vector<64x256xbf16> to vector<64x2xbf16>
    %72 = tpu.concatenate %70, %71 in 1 : vector<64x254xbf16>, vector<64x2xbf16> -> vector<64x256xbf16>
    %c448 = arith.constant 448 : index
    %c0_36 = arith.constant 0 : index
    %73 = vector.load %arg20[%c448, %c0_36] : memref<1088x256xbf16, #tpu.memory_space<vmem>>, vector<64x256xbf16>
    tpu.vector_store %arg20[%c448, %c0_36], %72 {strides = array<i32>} : memref<1088x256xbf16, #tpu.memory_space<vmem>>, vector<64x256xbf16>,
    %74 = vector.extract_strided_slice %44 {offsets = [0, 3], sizes = [64, 253], strides = [1, 1]} : vector<64x256xbf16> to vector<64x253xbf16>
    %75 = vector.extract_strided_slice %44 {offsets = [0, 0], sizes = [64, 3], strides = [1, 1]} : vector<64x256xbf16> to vector<64x3xbf16>
    %76 = tpu.concatenate %74, %75 in 1 : vector<64x253xbf16>, vector<64x3xbf16> -> vector<64x256xbf16>
    %c512 = arith.constant 512 : index
    %c0_37 = arith.constant 0 : index
    %77 = vector.load %arg20[%c512, %c0_37] : memref<1088x256xbf16, #tpu.memory_space<vmem>>, vector<64x256xbf16>
    tpu.vector_store %arg20[%c512, %c0_37], %76 {strides = array<i32>} : memref<1088x256xbf16, #tpu.memory_space<vmem>>, vector<64x256xbf16>,
    %78 = vector.extract_strided_slice %44 {offsets = [0, 4], sizes = [64, 252], strides = [1, 1]} : vector<64x256xbf16> to vector<64x252xbf16>
    %79 = vector.extract_strided_slice %44 {offsets = [0, 0], sizes = [64, 4], strides = [1, 1]} : vector<64x256xbf16> to vector<64x4xbf16>
    %80 = tpu.concatenate %78, %79 in 1 : vector<64x252xbf16>, vector<64x4xbf16> -> vector<64x256xbf16>
    %c576 = arith.constant 576 : index
    %c0_38 = arith.constant 0 : index
    %81 = vector.load %arg20[%c576, %c0_38] : memref<1088x256xbf16, #tpu.memory_space<vmem>>, vector<64x256xbf16>
    tpu.vector_store %arg20[%c576, %c0_38], %80 {strides = array<i32>} : memref<1088x256xbf16, #tpu.memory_space<vmem>>, vector<64x256xbf16>,
    %82 = vector.extract_strided_slice %44 {offsets = [0, 5], sizes = [64, 251], strides = [1, 1]} : vector<64x256xbf16> to vector<64x251xbf16>
    %83 = vector.extract_strided_slice %44 {offsets = [0, 0], sizes = [64, 5], strides = [1, 1]} : vector<64x256xbf16> to vector<64x5xbf16>
    %84 = tpu.concatenate %82, %83 in 1 : vector<64x251xbf16>, vector<64x5xbf16> -> vector<64x256xbf16>
    %c640_39 = arith.constant 640 : index
    %c0_40 = arith.constant 0 : index
    %85 = vector.load %arg20[%c640_39, %c0_40] : memref<1088x256xbf16, #tpu.memory_space<vmem>>, vector<64x256xbf16>
    tpu.vector_store %arg20[%c640_39, %c0_40], %84 {strides = array<i32>} : memref<1088x256xbf16, #tpu.memory_space<vmem>>, vector<64x256xbf16>,
    %86 = vector.extract_strided_slice %44 {offsets = [0, 6], sizes = [64, 250], strides = [1, 1]} : vector<64x256xbf16> to vector<64x250xbf16>
    %87 = vector.extract_strided_slice %44 {offsets = [0, 0], sizes = [64, 6], strides = [1, 1]} : vector<64x256xbf16> to vector<64x6xbf16>
    %88 = tpu.concatenate %86, %87 in 1 : vector<64x250xbf16>, vector<64x6xbf16> -> vector<64x256xbf16>
    %c704 = arith.constant 704 : index
    %c0_41 = arith.constant 0 : index
    %89 = vector.load %arg20[%c704, %c0_41] : memref<1088x256xbf16, #tpu.memory_space<vmem>>, vector<64x256xbf16>
    tpu.vector_store %arg20[%c704, %c0_41], %88 {strides = array<i32>} : memref<1088x256xbf16, #tpu.memory_space<vmem>>, vector<64x256xbf16>,
    %90 = vector.extract_strided_slice %44 {offsets = [0, 7], sizes = [64, 249], strides = [1, 1]} : vector<64x256xbf16> to vector<64x249xbf16>
    %91 = vector.extract_strided_slice %44 {offsets = [0, 0], sizes = [64, 7], strides = [1, 1]} : vector<64x256xbf16> to vector<64x7xbf16>
    %92 = tpu.concatenate %90, %91 in 1 : vector<64x249xbf16>, vector<64x7xbf16> -> vector<64x256xbf16>
    %c768 = arith.constant 768 : index
    %c0_42 = arith.constant 0 : index
    %93 = vector.load %arg20[%c768, %c0_42] : memref<1088x256xbf16, #tpu.memory_space<vmem>>, vector<64x256xbf16>
    tpu.vector_store %arg20[%c768, %c0_42], %92 {strides = array<i32>} : memref<1088x256xbf16, #tpu.memory_space<vmem>>, vector<64x256xbf16>,
    %c0_43 = arith.constant 0 : index
    %c0_44 = arith.constant 0 : index
    %94 = vector.load %arg20[%c0_43, %c0_44] : memref<1088x256xbf16, #tpu.memory_space<vmem>>, vector<832x256xbf16>
    %c0_45 = arith.constant 0 : index
    %c0_46 = arith.constant 0 : index
    %95 = vector.load %arg7[%c0_45, %c0_46] : memref<128x832xbf16, #tpu.memory_space<vmem>>, vector<128x832xbf16>
    %cst_47 = arith.constant dense<0.000000e+00> : vector<128x256xf32>
    %96 = tpu.matmul %95, %94, %cst_47 {dimension_numbers = #tpu.dot_dimension_numbers<[1], [0], [0], [1], [0, 0, 1, 1], [], []>} : vector<128x832xbf16>, vector<832x256xbf16>, vector<128x256xf32> -> vector<128x256xf32>
    %c0_48 = arith.constant 0 : index
    %c0_49 = arith.constant 0 : index
    %97 = vector.load %arg8[%c0_48, %c0_49] : memref<128x1xf32, #tpu.memory_space<vmem>>, vector<128x1xf32>
    %98 = vector.broadcast %97 : vector<128x1xf32> to vector<128x256xf32>
    %99 = arith.addf %96, %98 : vector<128x256xf32>
    %100 = vector.extract_strided_slice %99 {offsets = [0, 0], sizes = [64, 256], strides = [1, 1]} : vector<128x256xf32> to vector<64x256xf32>
    %101 = vector.extract_strided_slice %99 {offsets = [64, 0], sizes = [64, 256], strides = [1, 1]} : vector<128x256xf32> to vector<64x256xf32>
    %102 = vector.broadcast %1 : vector<1x256xf32> to vector<64x256xf32>
    %103 = arith.mulf %100, %102 : vector<64x256xf32>
    %104 = arith.addf %103, %101 : vector<64x256xf32>
    %cst_50 = arith.constant 0.000000e+00 : f32
    %105 = vector.broadcast %cst_50 : f32 to vector<64x256xf32>
    %106 = arith.maximumf %104, %105 : vector<64x256xf32>
    %107 = vector.broadcast %0 : vector<1x256xf32> to vector<64x256xf32>
    %108 = arith.mulf %106, %107 : vector<64x256xf32>
    %109 = arith.truncf %108 : vector<64x256xf32> to vector<64x256xbf16>
    %110 = vector.extract_strided_slice %109 {offsets = [0, 249], sizes = [64, 7], strides = [1, 1]} : vector<64x256xbf16> to vector<64x7xbf16>
    %111 = vector.extract_strided_slice %109 {offsets = [0, 0], sizes = [64, 249], strides = [1, 1]} : vector<64x256xbf16> to vector<64x249xbf16>
    %112 = tpu.concatenate %110, %111 in 1 : vector<64x7xbf16>, vector<64x249xbf16> -> vector<64x256xbf16>
    %c0_51 = arith.constant 0 : index
    %c0_52 = arith.constant 0 : index
    %113 = vector.load %arg20[%c0_51, %c0_52] : memref<1088x256xbf16, #tpu.memory_space<vmem>>, vector<64x256xbf16>
    tpu.vector_store %arg20[%c0_51, %c0_52], %112 {strides = array<i32>} : memref<1088x256xbf16, #tpu.memory_space<vmem>>, vector<64x256xbf16>,
    %114 = vector.extract_strided_slice %109 {offsets = [0, 250], sizes = [64, 6], strides = [1, 1]} : vector<64x256xbf16> to vector<64x6xbf16>
    %115 = vector.extract_strided_slice %109 {offsets = [0, 0], sizes = [64, 250], strides = [1, 1]} : vector<64x256xbf16> to vector<64x250xbf16>
    %116 = tpu.concatenate %114, %115 in 1 : vector<64x6xbf16>, vector<64x250xbf16> -> vector<64x256xbf16>
    %c64_53 = arith.constant 64 : index
    %c0_54 = arith.constant 0 : index
    %117 = vector.load %arg20[%c64_53, %c0_54] : memref<1088x256xbf16, #tpu.memory_space<vmem>>, vector<64x256xbf16>
    tpu.vector_store %arg20[%c64_53, %c0_54], %116 {strides = array<i32>} : memref<1088x256xbf16, #tpu.memory_space<vmem>>, vector<64x256xbf16>,
    %118 = vector.extract_strided_slice %109 {offsets = [0, 251], sizes = [64, 5], strides = [1, 1]} : vector<64x256xbf16> to vector<64x5xbf16>
    %119 = vector.extract_strided_slice %109 {offsets = [0, 0], sizes = [64, 251], strides = [1, 1]} : vector<64x256xbf16> to vector<64x251xbf16>
    %120 = tpu.concatenate %118, %119 in 1 : vector<64x5xbf16>, vector<64x251xbf16> -> vector<64x256xbf16>
    %c128_55 = arith.constant 128 : index
    %c0_56 = arith.constant 0 : index
    %121 = vector.load %arg20[%c128_55, %c0_56] : memref<1088x256xbf16, #tpu.memory_space<vmem>>, vector<64x256xbf16>
    tpu.vector_store %arg20[%c128_55, %c0_56], %120 {strides = array<i32>} : memref<1088x256xbf16, #tpu.memory_space<vmem>>, vector<64x256xbf16>,
    %122 = vector.extract_strided_slice %109 {offsets = [0, 252], sizes = [64, 4], strides = [1, 1]} : vector<64x256xbf16> to vector<64x4xbf16>
    %123 = vector.extract_strided_slice %109 {offsets = [0, 0], sizes = [64, 252], strides = [1, 1]} : vector<64x256xbf16> to vector<64x252xbf16>
    %124 = tpu.concatenate %122, %123 in 1 : vector<64x4xbf16>, vector<64x252xbf16> -> vector<64x256xbf16>
    %c192_57 = arith.constant 192 : index
    %c0_58 = arith.constant 0 : index
    %125 = vector.load %arg20[%c192_57, %c0_58] : memref<1088x256xbf16, #tpu.memory_space<vmem>>, vector<64x256xbf16>
    tpu.vector_store %arg20[%c192_57, %c0_58], %124 {strides = array<i32>} : memref<1088x256xbf16, #tpu.memory_space<vmem>>, vector<64x256xbf16>,
    %126 = vector.extract_strided_slice %109 {offsets = [0, 253], sizes = [64, 3], strides = [1, 1]} : vector<64x256xbf16> to vector<64x3xbf16>
    %127 = vector.extract_strided_slice %109 {offsets = [0, 0], sizes = [64, 253], strides = [1, 1]} : vector<64x256xbf16> to vector<64x253xbf16>
    %128 = tpu.concatenate %126, %127 in 1 : vector<64x3xbf16>, vector<64x253xbf16> -> vector<64x256xbf16>
    %c256_59 = arith.constant 256 : index
    %c0_60 = arith.constant 0 : index
    %129 = vector.load %arg20[%c256_59, %c0_60] : memref<1088x256xbf16, #tpu.memory_space<vmem>>, vector<64x256xbf16>
    tpu.vector_store %arg20[%c256_59, %c0_60], %128 {strides = array<i32>} : memref<1088x256xbf16, #tpu.memory_space<vmem>>, vector<64x256xbf16>,
    %130 = vector.extract_strided_slice %109 {offsets = [0, 254], sizes = [64, 2], strides = [1, 1]} : vector<64x256xbf16> to vector<64x2xbf16>
    %131 = vector.extract_strided_slice %109 {offsets = [0, 0], sizes = [64, 254], strides = [1, 1]} : vector<64x256xbf16> to vector<64x254xbf16>
    %132 = tpu.concatenate %130, %131 in 1 : vector<64x2xbf16>, vector<64x254xbf16> -> vector<64x256xbf16>
    %c320_61 = arith.constant 320 : index
    %c0_62 = arith.constant 0 : index
    %133 = vector.load %arg20[%c320_61, %c0_62] : memref<1088x256xbf16, #tpu.memory_space<vmem>>, vector<64x256xbf16>
    tpu.vector_store %arg20[%c320_61, %c0_62], %132 {strides = array<i32>} : memref<1088x256xbf16, #tpu.memory_space<vmem>>, vector<64x256xbf16>,
    %134 = vector.extract_strided_slice %109 {offsets = [0, 255], sizes = [64, 1], strides = [1, 1]} : vector<64x256xbf16> to vector<64x1xbf16>
    %135 = vector.extract_strided_slice %109 {offsets = [0, 0], sizes = [64, 255], strides = [1, 1]} : vector<64x256xbf16> to vector<64x255xbf16>
    %136 = tpu.concatenate %134, %135 in 1 : vector<64x1xbf16>, vector<64x255xbf16> -> vector<64x256xbf16>
    %c384_63 = arith.constant 384 : index
    %c0_64 = arith.constant 0 : index
    %137 = vector.load %arg20[%c384_63, %c0_64] : memref<1088x256xbf16, #tpu.memory_space<vmem>>, vector<64x256xbf16>
    tpu.vector_store %arg20[%c384_63, %c0_64], %136 {strides = array<i32>} : memref<1088x256xbf16, #tpu.memory_space<vmem>>, vector<64x256xbf16>,
    %c448_65 = arith.constant 448 : index
    %c0_66 = arith.constant 0 : index
    %138 = vector.load %arg20[%c448_65, %c0_66] : memref<1088x256xbf16, #tpu.memory_space<vmem>>, vector<64x256xbf16>
    tpu.vector_store %arg20[%c448_65, %c0_66], %109 {strides = array<i32>} : memref<1088x256xbf16, #tpu.memory_space<vmem>>, vector<64x256xbf16>,
    %139 = vector.extract_strided_slice %109 {offsets = [0, 1], sizes = [64, 255], strides = [1, 1]} : vector<64x256xbf16> to vector<64x255xbf16>
    %140 = vector.extract_strided_slice %109 {offsets = [0, 0], sizes = [64, 1], strides = [1, 1]} : vector<64x256xbf16> to vector<64x1xbf16>
    %141 = tpu.concatenate %139, %140 in 1 : vector<64x255xbf16>, vector<64x1xbf16> -> vector<64x256xbf16>
    %c512_67 = arith.constant 512 : index
    %c0_68 = arith.constant 0 : index
    %142 = vector.load %arg20[%c512_67, %c0_68] : memref<1088x256xbf16, #tpu.memory_space<vmem>>, vector<64x256xbf16>
    tpu.vector_store %arg20[%c512_67, %c0_68], %141 {strides = array<i32>} : memref<1088x256xbf16, #tpu.memory_space<vmem>>, vector<64x256xbf16>,
    %143 = vector.extract_strided_slice %109 {offsets = [0, 2], sizes = [64, 254], strides = [1, 1]} : vector<64x256xbf16> to vector<64x254xbf16>
    %144 = vector.extract_strided_slice %109 {offsets = [0, 0], sizes = [64, 2], strides = [1, 1]} : vector<64x256xbf16> to vector<64x2xbf16>
    %145 = tpu.concatenate %143, %144 in 1 : vector<64x254xbf16>, vector<64x2xbf16> -> vector<64x256xbf16>
    %c576_69 = arith.constant 576 : index
    %c0_70 = arith.constant 0 : index
    %146 = vector.load %arg20[%c576_69, %c0_70] : memref<1088x256xbf16, #tpu.memory_space<vmem>>, vector<64x256xbf16>
    tpu.vector_store %arg20[%c576_69, %c0_70], %145 {strides = array<i32>} : memref<1088x256xbf16, #tpu.memory_space<vmem>>, vector<64x256xbf16>,
    %147 = vector.extract_strided_slice %109 {offsets = [0, 3], sizes = [64, 253], strides = [1, 1]} : vector<64x256xbf16> to vector<64x253xbf16>
    %148 = vector.extract_strided_slice %109 {offsets = [0, 0], sizes = [64, 3], strides = [1, 1]} : vector<64x256xbf16> to vector<64x3xbf16>
    %149 = tpu.concatenate %147, %148 in 1 : vector<64x253xbf16>, vector<64x3xbf16> -> vector<64x256xbf16>
    %c640_71 = arith.constant 640 : index
    %c0_72 = arith.constant 0 : index
    %150 = vector.load %arg20[%c640_71, %c0_72] : memref<1088x256xbf16, #tpu.memory_space<vmem>>, vector<64x256xbf16>
    tpu.vector_store %arg20[%c640_71, %c0_72], %149 {strides = array<i32>} : memref<1088x256xbf16, #tpu.memory_space<vmem>>, vector<64x256xbf16>,
    %151 = vector.extract_strided_slice %109 {offsets = [0, 4], sizes = [64, 252], strides = [1, 1]} : vector<64x256xbf16> to vector<64x252xbf16>
    %152 = vector.extract_strided_slice %109 {offsets = [0, 0], sizes = [64, 4], strides = [1, 1]} : vector<64x256xbf16> to vector<64x4xbf16>
    %153 = tpu.concatenate %151, %152 in 1 : vector<64x252xbf16>, vector<64x4xbf16> -> vector<64x256xbf16>
    %c704_73 = arith.constant 704 : index
    %c0_74 = arith.constant 0 : index
    %154 = vector.load %arg20[%c704_73, %c0_74] : memref<1088x256xbf16, #tpu.memory_space<vmem>>, vector<64x256xbf16>
    tpu.vector_store %arg20[%c704_73, %c0_74], %153 {strides = array<i32>} : memref<1088x256xbf16, #tpu.memory_space<vmem>>, vector<64x256xbf16>,
    %155 = vector.extract_strided_slice %109 {offsets = [0, 5], sizes = [64, 251], strides = [1, 1]} : vector<64x256xbf16> to vector<64x251xbf16>
    %156 = vector.extract_strided_slice %109 {offsets = [0, 0], sizes = [64, 5], strides = [1, 1]} : vector<64x256xbf16> to vector<64x5xbf16>
    %157 = tpu.concatenate %155, %156 in 1 : vector<64x251xbf16>, vector<64x5xbf16> -> vector<64x256xbf16>
    %c768_75 = arith.constant 768 : index
    %c0_76 = arith.constant 0 : index
    %158 = vector.load %arg20[%c768_75, %c0_76] : memref<1088x256xbf16, #tpu.memory_space<vmem>>, vector<64x256xbf16>
    tpu.vector_store %arg20[%c768_75, %c0_76], %157 {strides = array<i32>} : memref<1088x256xbf16, #tpu.memory_space<vmem>>, vector<64x256xbf16>,
    %159 = vector.extract_strided_slice %109 {offsets = [0, 6], sizes = [64, 250], strides = [1, 1]} : vector<64x256xbf16> to vector<64x250xbf16>
    %160 = vector.extract_strided_slice %109 {offsets = [0, 0], sizes = [64, 6], strides = [1, 1]} : vector<64x256xbf16> to vector<64x6xbf16>
    %161 = tpu.concatenate %159, %160 in 1 : vector<64x250xbf16>, vector<64x6xbf16> -> vector<64x256xbf16>
    %c832 = arith.constant 832 : index
    %c0_77 = arith.constant 0 : index
    %162 = vector.load %arg20[%c832, %c0_77] : memref<1088x256xbf16, #tpu.memory_space<vmem>>, vector<64x256xbf16>
    tpu.vector_store %arg20[%c832, %c0_77], %161 {strides = array<i32>} : memref<1088x256xbf16, #tpu.memory_space<vmem>>, vector<64x256xbf16>,
    %163 = vector.extract_strided_slice %109 {offsets = [0, 7], sizes = [64, 249], strides = [1, 1]} : vector<64x256xbf16> to vector<64x249xbf16>
    %164 = vector.extract_strided_slice %109 {offsets = [0, 0], sizes = [64, 7], strides = [1, 1]} : vector<64x256xbf16> to vector<64x7xbf16>
    %165 = tpu.concatenate %163, %164 in 1 : vector<64x249xbf16>, vector<64x7xbf16> -> vector<64x256xbf16>
    %c896 = arith.constant 896 : index
    %c0_78 = arith.constant 0 : index
    %166 = vector.load %arg20[%c896, %c0_78] : memref<1088x256xbf16, #tpu.memory_space<vmem>>, vector<64x256xbf16>
    tpu.vector_store %arg20[%c896, %c0_78], %165 {strides = array<i32>} : memref<1088x256xbf16, #tpu.memory_space<vmem>>, vector<64x256xbf16>,
    %c0_79 = arith.constant 0 : index
    %c0_80 = arith.constant 0 : index
    %167 = vector.load %arg20[%c0_79, %c0_80] : memref<1088x256xbf16, #tpu.memory_space<vmem>>, vector<960x256xbf16>
    %c0_81 = arith.constant 0 : index
    %c0_82 = arith.constant 0 : index
    %168 = vector.load %arg9[%c0_81, %c0_82] : memref<128x960xbf16, #tpu.memory_space<vmem>>, vector<128x960xbf16>
    %cst_83 = arith.constant dense<0.000000e+00> : vector<128x256xf32>
    %169 = tpu.matmul %168, %167, %cst_83 {dimension_numbers = #tpu.dot_dimension_numbers<[1], [0], [0], [1], [0, 0, 1, 1], [], []>} : vector<128x960xbf16>, vector<960x256xbf16>, vector<128x256xf32> -> vector<128x256xf32>
    %c0_84 = arith.constant 0 : index
    %c0_85 = arith.constant 0 : index
    %170 = vector.load %arg10[%c0_84, %c0_85] : memref<128x1xf32, #tpu.memory_space<vmem>>, vector<128x1xf32>
    %171 = vector.broadcast %170 : vector<128x1xf32> to vector<128x256xf32>
    %172 = arith.addf %169, %171 : vector<128x256xf32>
    %173 = vector.extract_strided_slice %172 {offsets = [0, 0], sizes = [64, 256], strides = [1, 1]} : vector<128x256xf32> to vector<64x256xf32>
    %174 = vector.extract_strided_slice %172 {offsets = [64, 0], sizes = [64, 256], strides = [1, 1]} : vector<128x256xf32> to vector<64x256xf32>
    %175 = arith.addf %173, %174 : vector<64x256xf32>
    %cst_86 = arith.constant 0.000000e+00 : f32
    %176 = vector.broadcast %cst_86 : f32 to vector<64x256xf32>
    %177 = arith.maximumf %175, %176 : vector<64x256xf32>
    %178 = vector.broadcast %0 : vector<1x256xf32> to vector<64x256xf32>
    %179 = arith.mulf %177, %178 : vector<64x256xf32>
    %180 = arith.truncf %179 : vector<64x256xf32> to vector<64x256xbf16>
    %181 = vector.extract_strided_slice %180 {offsets = [0, 248], sizes = [64, 8], strides = [1, 1]} : vector<64x256xbf16> to vector<64x8xbf16>
    %182 = vector.extract_strided_slice %180 {offsets = [0, 0], sizes = [64, 248], strides = [1, 1]} : vector<64x256xbf16> to vector<64x248xbf16>
    %183 = tpu.concatenate %181, %182 in 1 : vector<64x8xbf16>, vector<64x248xbf16> -> vector<64x256xbf16>
    %c0_87 = arith.constant 0 : index
    %c0_88 = arith.constant 0 : index
    %184 = vector.load %arg20[%c0_87, %c0_88] : memref<1088x256xbf16, #tpu.memory_space<vmem>>, vector<64x256xbf16>
    tpu.vector_store %arg20[%c0_87, %c0_88], %183 {strides = array<i32>} : memref<1088x256xbf16, #tpu.memory_space<vmem>>, vector<64x256xbf16>,
    %185 = vector.extract_strided_slice %180 {offsets = [0, 249], sizes = [64, 7], strides = [1, 1]} : vector<64x256xbf16> to vector<64x7xbf16>
    %186 = vector.extract_strided_slice %180 {offsets = [0, 0], sizes = [64, 249], strides = [1, 1]} : vector<64x256xbf16> to vector<64x249xbf16>
    %187 = tpu.concatenate %185, %186 in 1 : vector<64x7xbf16>, vector<64x249xbf16> -> vector<64x256xbf16>
    %c64_89 = arith.constant 64 : index
    %c0_90 = arith.constant 0 : index
    %188 = vector.load %arg20[%c64_89, %c0_90] : memref<1088x256xbf16, #tpu.memory_space<vmem>>, vector<64x256xbf16>
    tpu.vector_store %arg20[%c64_89, %c0_90], %187 {strides = array<i32>} : memref<1088x256xbf16, #tpu.memory_space<vmem>>, vector<64x256xbf16>,
    %189 = vector.extract_strided_slice %180 {offsets = [0, 250], sizes = [64, 6], strides = [1, 1]} : vector<64x256xbf16> to vector<64x6xbf16>
    %190 = vector.extract_strided_slice %180 {offsets = [0, 0], sizes = [64, 250], strides = [1, 1]} : vector<64x256xbf16> to vector<64x250xbf16>
    %191 = tpu.concatenate %189, %190 in 1 : vector<64x6xbf16>, vector<64x250xbf16> -> vector<64x256xbf16>
    %c128_91 = arith.constant 128 : index
    %c0_92 = arith.constant 0 : index
    %192 = vector.load %arg20[%c128_91, %c0_92] : memref<1088x256xbf16, #tpu.memory_space<vmem>>, vector<64x256xbf16>
    tpu.vector_store %arg20[%c128_91, %c0_92], %191 {strides = array<i32>} : memref<1088x256xbf16, #tpu.memory_space<vmem>>, vector<64x256xbf16>,
    %193 = vector.extract_strided_slice %180 {offsets = [0, 251], sizes = [64, 5], strides = [1, 1]} : vector<64x256xbf16> to vector<64x5xbf16>
    %194 = vector.extract_strided_slice %180 {offsets = [0, 0], sizes = [64, 251], strides = [1, 1]} : vector<64x256xbf16> to vector<64x251xbf16>
    %195 = tpu.concatenate %193, %194 in 1 : vector<64x5xbf16>, vector<64x251xbf16> -> vector<64x256xbf16>
    %c192_93 = arith.constant 192 : index
    %c0_94 = arith.constant 0 : index
    %196 = vector.load %arg20[%c192_93, %c0_94] : memref<1088x256xbf16, #tpu.memory_space<vmem>>, vector<64x256xbf16>
    tpu.vector_store %arg20[%c192_93, %c0_94], %195 {strides = array<i32>} : memref<1088x256xbf16, #tpu.memory_space<vmem>>, vector<64x256xbf16>,
    %197 = vector.extract_strided_slice %180 {offsets = [0, 252], sizes = [64, 4], strides = [1, 1]} : vector<64x256xbf16> to vector<64x4xbf16>
    %198 = vector.extract_strided_slice %180 {offsets = [0, 0], sizes = [64, 252], strides = [1, 1]} : vector<64x256xbf16> to vector<64x252xbf16>
    %199 = tpu.concatenate %197, %198 in 1 : vector<64x4xbf16>, vector<64x252xbf16> -> vector<64x256xbf16>
    %c256_95 = arith.constant 256 : index
    %c0_96 = arith.constant 0 : index
    %200 = vector.load %arg20[%c256_95, %c0_96] : memref<1088x256xbf16, #tpu.memory_space<vmem>>, vector<64x256xbf16>
    tpu.vector_store %arg20[%c256_95, %c0_96], %199 {strides = array<i32>} : memref<1088x256xbf16, #tpu.memory_space<vmem>>, vector<64x256xbf16>,
    %201 = vector.extract_strided_slice %180 {offsets = [0, 253], sizes = [64, 3], strides = [1, 1]} : vector<64x256xbf16> to vector<64x3xbf16>
    %202 = vector.extract_strided_slice %180 {offsets = [0, 0], sizes = [64, 253], strides = [1, 1]} : vector<64x256xbf16> to vector<64x253xbf16>
    %203 = tpu.concatenate %201, %202 in 1 : vector<64x3xbf16>, vector<64x253xbf16> -> vector<64x256xbf16>
    %c320_97 = arith.constant 320 : index
    %c0_98 = arith.constant 0 : index
    %204 = vector.load %arg20[%c320_97, %c0_98] : memref<1088x256xbf16, #tpu.memory_space<vmem>>, vector<64x256xbf16>
    tpu.vector_store %arg20[%c320_97, %c0_98], %203 {strides = array<i32>} : memref<1088x256xbf16, #tpu.memory_space<vmem>>, vector<64x256xbf16>,
    %205 = vector.extract_strided_slice %180 {offsets = [0, 254], sizes = [64, 2], strides = [1, 1]} : vector<64x256xbf16> to vector<64x2xbf16>
    %206 = vector.extract_strided_slice %180 {offsets = [0, 0], sizes = [64, 254], strides = [1, 1]} : vector<64x256xbf16> to vector<64x254xbf16>
    %207 = tpu.concatenate %205, %206 in 1 : vector<64x2xbf16>, vector<64x254xbf16> -> vector<64x256xbf16>
    %c384_99 = arith.constant 384 : index
    %c0_100 = arith.constant 0 : index
    %208 = vector.load %arg20[%c384_99, %c0_100] : memref<1088x256xbf16, #tpu.memory_space<vmem>>, vector<64x256xbf16>
    tpu.vector_store %arg20[%c384_99, %c0_100], %207 {strides = array<i32>} : memref<1088x256xbf16, #tpu.memory_space<vmem>>, vector<64x256xbf16>,
    %209 = vector.extract_strided_slice %180 {offsets = [0, 255], sizes = [64, 1], strides = [1, 1]} : vector<64x256xbf16> to vector<64x1xbf16>
    %210 = vector.extract_strided_slice %180 {offsets = [0, 0], sizes = [64, 255], strides = [1, 1]} : vector<64x256xbf16> to vector<64x255xbf16>
    %211 = tpu.concatenate %209, %210 in 1 : vector<64x1xbf16>, vector<64x255xbf16> -> vector<64x256xbf16>
    %c448_101 = arith.constant 448 : index
    %c0_102 = arith.constant 0 : index
    %212 = vector.load %arg20[%c448_101, %c0_102] : memref<1088x256xbf16, #tpu.memory_space<vmem>>, vector<64x256xbf16>
    tpu.vector_store %arg20[%c448_101, %c0_102], %211 {strides = array<i32>} : memref<1088x256xbf16, #tpu.memory_space<vmem>>, vector<64x256xbf16>,
    %c512_103 = arith.constant 512 : index
    %c0_104 = arith.constant 0 : index
    %213 = vector.load %arg20[%c512_103, %c0_104] : memref<1088x256xbf16, #tpu.memory_space<vmem>>, vector<64x256xbf16>
    tpu.vector_store %arg20[%c512_103, %c0_104], %180 {strides = array<i32>} : memref<1088x256xbf16, #tpu.memory_space<vmem>>, vector<64x256xbf16>,
    %214 = vector.extract_strided_slice %180 {offsets = [0, 1], sizes = [64, 255], strides = [1, 1]} : vector<64x256xbf16> to vector<64x255xbf16>
    %215 = vector.extract_strided_slice %180 {offsets = [0, 0], sizes = [64, 1], strides = [1, 1]} : vector<64x256xbf16> to vector<64x1xbf16>
    %216 = tpu.concatenate %214, %215 in 1 : vector<64x255xbf16>, vector<64x1xbf16> -> vector<64x256xbf16>
    %c576_105 = arith.constant 576 : index
    %c0_106 = arith.constant 0 : index
    %217 = vector.load %arg20[%c576_105, %c0_106] : memref<1088x256xbf16, #tpu.memory_space<vmem>>, vector<64x256xbf16>
    tpu.vector_store %arg20[%c576_105, %c0_106], %216 {strides = array<i32>} : memref<1088x256xbf16, #tpu.memory_space<vmem>>, vector<64x256xbf16>,
    %218 = vector.extract_strided_slice %180 {offsets = [0, 2], sizes = [64, 254], strides = [1, 1]} : vector<64x256xbf16> to vector<64x254xbf16>
    %219 = vector.extract_strided_slice %180 {offsets = [0, 0], sizes = [64, 2], strides = [1, 1]} : vector<64x256xbf16> to vector<64x2xbf16>
    %220 = tpu.concatenate %218, %219 in 1 : vector<64x254xbf16>, vector<64x2xbf16> -> vector<64x256xbf16>
    %c640_107 = arith.constant 640 : index
    %c0_108 = arith.constant 0 : index
    %221 = vector.load %arg20[%c640_107, %c0_108] : memref<1088x256xbf16, #tpu.memory_space<vmem>>, vector<64x256xbf16>
    tpu.vector_store %arg20[%c640_107, %c0_108], %220 {strides = array<i32>} : memref<1088x256xbf16, #tpu.memory_space<vmem>>, vector<64x256xbf16>,
    %222 = vector.extract_strided_slice %180 {offsets = [0, 3], sizes = [64, 253], strides = [1, 1]} : vector<64x256xbf16> to vector<64x253xbf16>
    %223 = vector.extract_strided_slice %180 {offsets = [0, 0], sizes = [64, 3], strides = [1, 1]} : vector<64x256xbf16> to vector<64x3xbf16>
    %224 = tpu.concatenate %222, %223 in 1 : vector<64x253xbf16>, vector<64x3xbf16> -> vector<64x256xbf16>
    %c704_109 = arith.constant 704 : index
    %c0_110 = arith.constant 0 : index
    %225 = vector.load %arg20[%c704_109, %c0_110] : memref<1088x256xbf16, #tpu.memory_space<vmem>>, vector<64x256xbf16>
    tpu.vector_store %arg20[%c704_109, %c0_110], %224 {strides = array<i32>} : memref<1088x256xbf16, #tpu.memory_space<vmem>>, vector<64x256xbf16>,
    %226 = vector.extract_strided_slice %180 {offsets = [0, 4], sizes = [64, 252], strides = [1, 1]} : vector<64x256xbf16> to vector<64x252xbf16>
    %227 = vector.extract_strided_slice %180 {offsets = [0, 0], sizes = [64, 4], strides = [1, 1]} : vector<64x256xbf16> to vector<64x4xbf16>
    %228 = tpu.concatenate %226, %227 in 1 : vector<64x252xbf16>, vector<64x4xbf16> -> vector<64x256xbf16>
    %c768_111 = arith.constant 768 : index
    %c0_112 = arith.constant 0 : index
    %229 = vector.load %arg20[%c768_111, %c0_112] : memref<1088x256xbf16, #tpu.memory_space<vmem>>, vector<64x256xbf16>
    tpu.vector_store %arg20[%c768_111, %c0_112], %228 {strides = array<i32>} : memref<1088x256xbf16, #tpu.memory_space<vmem>>, vector<64x256xbf16>,
    %230 = vector.extract_strided_slice %180 {offsets = [0, 5], sizes = [64, 251], strides = [1, 1]} : vector<64x256xbf16> to vector<64x251xbf16>
    %231 = vector.extract_strided_slice %180 {offsets = [0, 0], sizes = [64, 5], strides = [1, 1]} : vector<64x256xbf16> to vector<64x5xbf16>
    %232 = tpu.concatenate %230, %231 in 1 : vector<64x251xbf16>, vector<64x5xbf16> -> vector<64x256xbf16>
    %c832_113 = arith.constant 832 : index
    %c0_114 = arith.constant 0 : index
    %233 = vector.load %arg20[%c832_113, %c0_114] : memref<1088x256xbf16, #tpu.memory_space<vmem>>, vector<64x256xbf16>
    tpu.vector_store %arg20[%c832_113, %c0_114], %232 {strides = array<i32>} : memref<1088x256xbf16, #tpu.memory_space<vmem>>, vector<64x256xbf16>,
    %234 = vector.extract_strided_slice %180 {offsets = [0, 6], sizes = [64, 250], strides = [1, 1]} : vector<64x256xbf16> to vector<64x250xbf16>
    %235 = vector.extract_strided_slice %180 {offsets = [0, 0], sizes = [64, 6], strides = [1, 1]} : vector<64x256xbf16> to vector<64x6xbf16>
    %236 = tpu.concatenate %234, %235 in 1 : vector<64x250xbf16>, vector<64x6xbf16> -> vector<64x256xbf16>
    %c896_115 = arith.constant 896 : index
    %c0_116 = arith.constant 0 : index
    %237 = vector.load %arg20[%c896_115, %c0_116] : memref<1088x256xbf16, #tpu.memory_space<vmem>>, vector<64x256xbf16>
    tpu.vector_store %arg20[%c896_115, %c0_116], %236 {strides = array<i32>} : memref<1088x256xbf16, #tpu.memory_space<vmem>>, vector<64x256xbf16>,
    %238 = vector.extract_strided_slice %180 {offsets = [0, 7], sizes = [64, 249], strides = [1, 1]} : vector<64x256xbf16> to vector<64x249xbf16>
    %239 = vector.extract_strided_slice %180 {offsets = [0, 0], sizes = [64, 7], strides = [1, 1]} : vector<64x256xbf16> to vector<64x7xbf16>
    %240 = tpu.concatenate %238, %239 in 1 : vector<64x249xbf16>, vector<64x7xbf16> -> vector<64x256xbf16>
    %c960 = arith.constant 960 : index
    %c0_117 = arith.constant 0 : index
    %241 = vector.load %arg20[%c960, %c0_117] : memref<1088x256xbf16, #tpu.memory_space<vmem>>, vector<64x256xbf16>
    tpu.vector_store %arg20[%c960, %c0_117], %240 {strides = array<i32>} : memref<1088x256xbf16, #tpu.memory_space<vmem>>, vector<64x256xbf16>,
    %242 = vector.extract_strided_slice %180 {offsets = [0, 8], sizes = [64, 248], strides = [1, 1]} : vector<64x256xbf16> to vector<64x248xbf16>
    %243 = vector.extract_strided_slice %180 {offsets = [0, 0], sizes = [64, 8], strides = [1, 1]} : vector<64x256xbf16> to vector<64x8xbf16>
    %244 = tpu.concatenate %242, %243 in 1 : vector<64x248xbf16>, vector<64x8xbf16> -> vector<64x256xbf16>
    %c1024 = arith.constant 1024 : index
    %c0_118 = arith.constant 0 : index
    %245 = vector.load %arg20[%c1024, %c0_118] : memref<1088x256xbf16, #tpu.memory_space<vmem>>, vector<64x256xbf16>
    tpu.vector_store %arg20[%c1024, %c0_118], %244 {strides = array<i32>} : memref<1088x256xbf16, #tpu.memory_space<vmem>>, vector<64x256xbf16>,
    %c0_119 = arith.constant 0 : index
    %c0_120 = arith.constant 0 : index
    %246 = vector.load %arg20[%c0_119, %c0_120] : memref<1088x256xbf16, #tpu.memory_space<vmem>>, vector<1088x256xbf16>
    %c0_121 = arith.constant 0 : index
    %c0_122 = arith.constant 0 : index
    %247 = vector.load %arg11[%c0_121, %c0_122] : memref<128x1088xbf16, #tpu.memory_space<vmem>>, vector<128x1088xbf16>
    %cst_123 = arith.constant dense<0.000000e+00> : vector<128x256xf32>
    %248 = tpu.matmul %247, %246, %cst_123 {dimension_numbers = #tpu.dot_dimension_numbers<[1], [0], [0], [1], [0, 0, 1, 1], [], []>} : vector<128x1088xbf16>, vector<1088x256xbf16>, vector<128x256xf32> -> vector<128x256xf32>
    %c0_124 = arith.constant 0 : index
    %c0_125 = arith.constant 0 : index
    %249 = vector.load %arg12[%c0_124, %c0_125] : memref<128x1xf32, #tpu.memory_space<vmem>>, vector<128x1xf32>
    %250 = vector.broadcast %249 : vector<128x1xf32> to vector<128x256xf32>
    %251 = arith.addf %248, %250 : vector<128x256xf32>
    %252 = vector.extract_strided_slice %251 {offsets = [0, 0], sizes = [64, 256], strides = [1, 1]} : vector<128x256xf32> to vector<64x256xf32>
    %253 = vector.extract_strided_slice %251 {offsets = [64, 0], sizes = [64, 256], strides = [1, 1]} : vector<128x256xf32> to vector<64x256xf32>
    %254 = arith.addf %252, %253 : vector<64x256xf32>
    %cst_126 = arith.constant 0.000000e+00 : f32
    %255 = vector.broadcast %cst_126 : f32 to vector<64x256xf32>
    %256 = arith.maximumf %254, %255 : vector<64x256xf32>
    %257 = vector.broadcast %0 : vector<1x256xf32> to vector<64x256xf32>
    %258 = arith.mulf %256, %257 : vector<64x256xf32>
    %259 = arith.truncf %258 : vector<64x256xf32> to vector<64x256xbf16>
    %260 = vector.extract_strided_slice %259 {offsets = [0, 246], sizes = [64, 10], strides = [1, 1]} : vector<64x256xbf16> to vector<64x10xbf16>
    %261 = vector.extract_strided_slice %259 {offsets = [0, 0], sizes = [64, 246], strides = [1, 1]} : vector<64x256xbf16> to vector<64x246xbf16>
    %262 = tpu.concatenate %260, %261 in 1 : vector<64x10xbf16>, vector<64x246xbf16> -> vector<64x256xbf16>
    %c0_127 = arith.constant 0 : index
    %c0_128 = arith.constant 0 : index
    %263 = vector.load %arg20[%c0_127, %c0_128] : memref<1088x256xbf16, #tpu.memory_space<vmem>>, vector<64x256xbf16>
    tpu.vector_store %arg20[%c0_127, %c0_128], %262 {strides = array<i32>} : memref<1088x256xbf16, #tpu.memory_space<vmem>>, vector<64x256xbf16>,
    %264 = vector.extract_strided_slice %259 {offsets = [0, 248], sizes = [64, 8], strides = [1, 1]} : vector<64x256xbf16> to vector<64x8xbf16>
    %265 = vector.extract_strided_slice %259 {offsets = [0, 0], sizes = [64, 248], strides = [1, 1]} : vector<64x256xbf16> to vector<64x248xbf16>
    %266 = tpu.concatenate %264, %265 in 1 : vector<64x8xbf16>, vector<64x248xbf16> -> vector<64x256xbf16>
    %c64_129 = arith.constant 64 : index
    %c0_130 = arith.constant 0 : index
    %267 = vector.load %arg20[%c64_129, %c0_130] : memref<1088x256xbf16, #tpu.memory_space<vmem>>, vector<64x256xbf16>
    tpu.vector_store %arg20[%c64_129, %c0_130], %266 {strides = array<i32>} : memref<1088x256xbf16, #tpu.memory_space<vmem>>, vector<64x256xbf16>,
    %268 = vector.extract_strided_slice %259 {offsets = [0, 250], sizes = [64, 6], strides = [1, 1]} : vector<64x256xbf16> to vector<64x6xbf16>
    %269 = vector.extract_strided_slice %259 {offsets = [0, 0], sizes = [64, 250], strides = [1, 1]} : vector<64x256xbf16> to vector<64x250xbf16>
    %270 = tpu.concatenate %268, %269 in 1 : vector<64x6xbf16>, vector<64x250xbf16> -> vector<64x256xbf16>
    %c128_131 = arith.constant 128 : index
    %c0_132 = arith.constant 0 : index
    %271 = vector.load %arg20[%c128_131, %c0_132] : memref<1088x256xbf16, #tpu.memory_space<vmem>>, vector<64x256xbf16>
    tpu.vector_store %arg20[%c128_131, %c0_132], %270 {strides = array<i32>} : memref<1088x256xbf16, #tpu.memory_space<vmem>>, vector<64x256xbf16>,
    %272 = vector.extract_strided_slice %259 {offsets = [0, 252], sizes = [64, 4], strides = [1, 1]} : vector<64x256xbf16> to vector<64x4xbf16>
    %273 = vector.extract_strided_slice %259 {offsets = [0, 0], sizes = [64, 252], strides = [1, 1]} : vector<64x256xbf16> to vector<64x252xbf16>
    %274 = tpu.concatenate %272, %273 in 1 : vector<64x4xbf16>, vector<64x252xbf16> -> vector<64x256xbf16>
    %c192_133 = arith.constant 192 : index
    %c0_134 = arith.constant 0 : index
    %275 = vector.load %arg20[%c192_133, %c0_134] : memref<1088x256xbf16, #tpu.memory_space<vmem>>, vector<64x256xbf16>
    tpu.vector_store %arg20[%c192_133, %c0_134], %274 {strides = array<i32>} : memref<1088x256xbf16, #tpu.memory_space<vmem>>, vector<64x256xbf16>,
    %276 = vector.extract_strided_slice %259 {offsets = [0, 254], sizes = [64, 2], strides = [1, 1]} : vector<64x256xbf16> to vector<64x2xbf16>
    %277 = vector.extract_strided_slice %259 {offsets = [0, 0], sizes = [64, 254], strides = [1, 1]} : vector<64x256xbf16> to vector<64x254xbf16>
    %278 = tpu.concatenate %276, %277 in 1 : vector<64x2xbf16>, vector<64x254xbf16> -> vector<64x256xbf16>
    %c256_135 = arith.constant 256 : index
    %c0_136 = arith.constant 0 : index
    %279 = vector.load %arg20[%c256_135, %c0_136] : memref<1088x256xbf16, #tpu.memory_space<vmem>>, vector<64x256xbf16>
    tpu.vector_store %arg20[%c256_135, %c0_136], %278 {strides = array<i32>} : memref<1088x256xbf16, #tpu.memory_space<vmem>>, vector<64x256xbf16>,
    %c320_137 = arith.constant 320 : index
    %c0_138 = arith.constant 0 : index
    %280 = vector.load %arg20[%c320_137, %c0_138] : memref<1088x256xbf16, #tpu.memory_space<vmem>>, vector<64x256xbf16>
    tpu.vector_store %arg20[%c320_137, %c0_138], %259 {strides = array<i32>} : memref<1088x256xbf16, #tpu.memory_space<vmem>>, vector<64x256xbf16>,
    %281 = vector.extract_strided_slice %259 {offsets = [0, 2], sizes = [64, 254], strides = [1, 1]} : vector<64x256xbf16> to vector<64x254xbf16>
    %282 = vector.extract_strided_slice %259 {offsets = [0, 0], sizes = [64, 2], strides = [1, 1]} : vector<64x256xbf16> to vector<64x2xbf16>
    %283 = tpu.concatenate %281, %282 in 1 : vector<64x254xbf16>, vector<64x2xbf16> -> vector<64x256xbf16>
    %c384_139 = arith.constant 384 : index
    %c0_140 = arith.constant 0 : index
    %284 = vector.load %arg20[%c384_139, %c0_140] : memref<1088x256xbf16, #tpu.memory_space<vmem>>, vector<64x256xbf16>
    tpu.vector_store %arg20[%c384_139, %c0_140], %283 {strides = array<i32>} : memref<1088x256xbf16, #tpu.memory_space<vmem>>, vector<64x256xbf16>,
    %285 = vector.extract_strided_slice %259 {offsets = [0, 4], sizes = [64, 252], strides = [1, 1]} : vector<64x256xbf16> to vector<64x252xbf16>
    %286 = vector.extract_strided_slice %259 {offsets = [0, 0], sizes = [64, 4], strides = [1, 1]} : vector<64x256xbf16> to vector<64x4xbf16>
    %287 = tpu.concatenate %285, %286 in 1 : vector<64x252xbf16>, vector<64x4xbf16> -> vector<64x256xbf16>
    %c448_141 = arith.constant 448 : index
    %c0_142 = arith.constant 0 : index
    %288 = vector.load %arg20[%c448_141, %c0_142] : memref<1088x256xbf16, #tpu.memory_space<vmem>>, vector<64x256xbf16>
    tpu.vector_store %arg20[%c448_141, %c0_142], %287 {strides = array<i32>} : memref<1088x256xbf16, #tpu.memory_space<vmem>>, vector<64x256xbf16>,
    %289 = vector.extract_strided_slice %259 {offsets = [0, 6], sizes = [64, 250], strides = [1, 1]} : vector<64x256xbf16> to vector<64x250xbf16>
    %290 = vector.extract_strided_slice %259 {offsets = [0, 0], sizes = [64, 6], strides = [1, 1]} : vector<64x256xbf16> to vector<64x6xbf16>
    %291 = tpu.concatenate %289, %290 in 1 : vector<64x250xbf16>, vector<64x6xbf16> -> vector<64x256xbf16>
    %c512_143 = arith.constant 512 : index
    %c0_144 = arith.constant 0 : index
    %292 = vector.load %arg20[%c512_143, %c0_144] : memref<1088x256xbf16, #tpu.memory_space<vmem>>, vector<64x256xbf16>
    tpu.vector_store %arg20[%c512_143, %c0_144], %291 {strides = array<i32>} : memref<1088x256xbf16, #tpu.memory_space<vmem>>, vector<64x256xbf16>,
    %293 = vector.extract_strided_slice %259 {offsets = [0, 8], sizes = [64, 248], strides = [1, 1]} : vector<64x256xbf16> to vector<64x248xbf16>
    %294 = vector.extract_strided_slice %259 {offsets = [0, 0], sizes = [64, 8], strides = [1, 1]} : vector<64x256xbf16> to vector<64x8xbf16>
    %295 = tpu.concatenate %293, %294 in 1 : vector<64x248xbf16>, vector<64x8xbf16> -> vector<64x256xbf16>
    %c576_145 = arith.constant 576 : index
    %c0_146 = arith.constant 0 : index
    %296 = vector.load %arg20[%c576_145, %c0_146] : memref<1088x256xbf16, #tpu.memory_space<vmem>>, vector<64x256xbf16>
    tpu.vector_store %arg20[%c576_145, %c0_146], %295 {strides = array<i32>} : memref<1088x256xbf16, #tpu.memory_space<vmem>>, vector<64x256xbf16>,
    %297 = vector.extract_strided_slice %259 {offsets = [0, 10], sizes = [64, 246], strides = [1, 1]} : vector<64x256xbf16> to vector<64x246xbf16>
    %298 = vector.extract_strided_slice %259 {offsets = [0, 0], sizes = [64, 10], strides = [1, 1]} : vector<64x256xbf16> to vector<64x10xbf16>
    %299 = tpu.concatenate %297, %298 in 1 : vector<64x246xbf16>, vector<64x10xbf16> -> vector<64x256xbf16>
    %c640_147 = arith.constant 640 : index
    %c0_148 = arith.constant 0 : index
    %300 = vector.load %arg20[%c640_147, %c0_148] : memref<1088x256xbf16, #tpu.memory_space<vmem>>, vector<64x256xbf16>
    tpu.vector_store %arg20[%c640_147, %c0_148], %299 {strides = array<i32>} : memref<1088x256xbf16, #tpu.memory_space<vmem>>, vector<64x256xbf16>,
    %c0_149 = arith.constant 0 : index
    %c0_150 = arith.constant 0 : index
    %301 = vector.load %arg20[%c0_149, %c0_150] : memref<1088x256xbf16, #tpu.memory_space<vmem>>, vector<704x256xbf16>
    %c0_151 = arith.constant 0 : index
    %c0_152 = arith.constant 0 : index
    %302 = vector.load %arg13[%c0_151, %c0_152] : memref<96x704xbf16, #tpu.memory_space<vmem>>, vector<96x704xbf16>
    %cst_153 = arith.constant dense<0.000000e+00> : vector<96x256xf32>
    %303 = tpu.matmul %302, %301, %cst_153 {dimension_numbers = #tpu.dot_dimension_numbers<[1], [0], [0], [1], [0, 0, 1, 1], [], []>} : vector<96x704xbf16>, vector<704x256xbf16>, vector<96x256xf32> -> vector<96x256xf32>
    %c0_154 = arith.constant 0 : index
    %c0_155 = arith.constant 0 : index
    %304 = vector.load %arg14[%c0_154, %c0_155] : memref<96x1xf32, #tpu.memory_space<vmem>>, vector<96x1xf32>
    %305 = vector.broadcast %304 : vector<96x1xf32> to vector<96x256xf32>
    %306 = arith.addf %303, %305 : vector<96x256xf32>
    %cst_156 = arith.constant 0.000000e+00 : f32
    %307 = vector.broadcast %cst_156 : f32 to vector<96x256xf32>
    %308 = arith.maximumf %306, %307 : vector<96x256xf32>
    %309 = vector.broadcast %0 : vector<1x256xf32> to vector<96x256xf32>
    %310 = arith.mulf %308, %309 : vector<96x256xf32>
    %311 = arith.truncf %310 : vector<96x256xf32> to vector<96x256xbf16>
    %c0_157 = arith.constant 0 : index
    %c0_158 = arith.constant 0 : index
    %312 = vector.load %arg15[%c0_157, %c0_158] : memref<96x96xbf16, #tpu.memory_space<vmem>>, vector<96x96xbf16>
    %cst_159 = arith.constant dense<0.000000e+00> : vector<96x256xf32>
    %313 = tpu.matmul %312, %311, %cst_159 {dimension_numbers = #tpu.dot_dimension_numbers<[1], [0], [0], [1], [0, 0, 1, 1], [], []>} : vector<96x96xbf16>, vector<96x256xbf16>, vector<96x256xf32> -> vector<96x256xf32>
    %c0_160 = arith.constant 0 : index
    %c0_161 = arith.constant 0 : index
    %314 = vector.load %arg16[%c0_160, %c0_161] : memref<96x1xf32, #tpu.memory_space<vmem>>, vector<96x1xf32>
    %315 = vector.broadcast %314 : vector<96x1xf32> to vector<96x256xf32>
    %316 = arith.addf %313, %315 : vector<96x256xf32>
    %cst_162 = arith.constant 0.000000e+00 : f32
    %317 = vector.broadcast %cst_162 : f32 to vector<96x256xf32>
    %318 = arith.maximumf %316, %317 : vector<96x256xf32>
    %319 = vector.broadcast %0 : vector<1x256xf32> to vector<96x256xf32>
    %320 = arith.mulf %318, %319 : vector<96x256xf32>
    %c0_163 = arith.constant 0 : index
    %c0_164 = arith.constant 0 : index
    %321 = vector.load %arg4[%c0_163, %c0_164] : memref<4x256xf32, #tpu.memory_space<vmem>>, vector<4x256xf32>
    %cst_165 = arith.constant dense<0.000000e+00> : vector<4x96xf32>
    %322 = tpu.matmul %321, %320, %cst_165 {dimension_numbers = #tpu.dot_dimension_numbers<[1], [1], [0], [0], [0, 0, 1, 0], [], []>} : vector<4x256xf32>, vector<96x256xf32>, vector<4x96xf32> -> vector<4x96xf32>
    %323 = arith.truncf %322 : vector<4x96xf32> to vector<4x96xbf16>
    %c0_166 = arith.constant 0 : index
    %c0_167 = arith.constant 0 : index
    %324 = vector.load %arg17[%c0_166, %c0_167] : memref<96x128xbf16, #tpu.memory_space<vmem>>, vector<96x128xbf16>
    %cst_168 = arith.constant dense<0.000000e+00> : vector<4x128xf32>
    %325 = tpu.matmul %323, %324, %cst_168 {dimension_numbers = #tpu.dot_dimension_numbers<[1], [0], [0], [1], [0, 0, 1, 1], [], []>} : vector<4x96xbf16>, vector<96x128xbf16>, vector<4x128xf32> -> vector<4x128xf32>
    %c0_169 = arith.constant 0 : index
    %c0_170 = arith.constant 0 : index
    %326 = vector.load %arg18[%c0_169, %c0_170] : memref<1x128xf32, #tpu.memory_space<vmem>>, vector<1x128xf32>
    %327 = vector.broadcast %326 : vector<1x128xf32> to vector<4x128xf32>
    %328 = arith.addf %325, %327 : vector<4x128xf32>
    %cst_171 = arith.constant dense<0xFF800000> : vector<4xf32>
    %329 = vector.multi_reduction <maximumf>, %328, %cst_171 [1] : vector<4x128xf32> to vector<4xf32>
    %330 = vector.shape_cast %329 : vector<4xf32> to vector<4x1xf32>
    %331 = vector.broadcast %330 : vector<4x1xf32> to vector<4x128xf32>
    %332 = arith.subf %328, %331 : vector<4x128xf32>
    %333 = math.exp %332 : vector<4x128xf32>
    %cst_172 = arith.constant dense<0.000000e+00> : vector<4xf32>
    %334 = vector.multi_reduction <add>, %333, %cst_172 [1] : vector<4x128xf32> to vector<4xf32>
    %335 = vector.shape_cast %334 : vector<4xf32> to vector<4x1xf32>
    %336 = math.log %335 : vector<4x1xf32>
    %337 = arith.addf %336, %330 : vector<4x1xf32>
    %338 = vector.broadcast %337 : vector<4x1xf32> to vector<4x128xf32>
    %339 = arith.subf %328, %338 : vector<4x128xf32>
    %c0_173 = arith.constant 0 : index
    %c0_174 = arith.constant 0 : index
    %c0_175 = arith.constant 0 : index
    %340 = vector.load %arg19[%c0_173, %c0_174, %c0_175] : memref<1x4x128xf32, #tpu.memory_space<vmem>>, vector<1x4x128xf32>
    %341 = vector.shape_cast %340 : vector<1x4x128xf32> to vector<4x128xf32>
    %342 = vector.shape_cast %339 : vector<4x128xf32> to vector<1x4x128xf32>
    tpu.vector_store %arg19[%c0_173, %c0_174, %c0_175], %342 {strides = array<i32>} : memref<1x4x128xf32, #tpu.memory_space<vmem>>, vector<1x4x128xf32>,
    return
  }
  func.func @transform_0(%arg0: i32) -> (i32, i32, i32) {
    %c0_i32 = arith.constant 0 : i32
    %c0_i32_0 = arith.constant 0 : i32
    %c0_i32_1 = arith.constant 0 : i32
    return %arg0, %c0_i32, %c0_i32_0 : i32, i32, i32
  }
  func.func @transform_1(%arg0: i32) -> (i32, i32) {
    %c0_i32 = arith.constant 0 : i32
    %c0_i32_0 = arith.constant 0 : i32
    %c0_i32_1 = arith.constant 0 : i32
    return %c0_i32, %c0_i32_0 : i32, i32
  }
  func.func @transform_2(%arg0: i32) -> (i32, i32) {
    %c0_i32 = arith.constant 0 : i32
    %c0_i32_0 = arith.constant 0 : i32
    %c0_i32_1 = arith.constant 0 : i32
    return %c0_i32, %c0_i32_0 : i32, i32
  }
  func.func @transform_3(%arg0: i32) -> (i32, i32) {
    %c0_i32 = arith.constant 0 : i32
    %c0_i32_0 = arith.constant 0 : i32
    %c0_i32_1 = arith.constant 0 : i32
    return %c0_i32, %c0_i32_0 : i32, i32
  }
  func.func @transform_4(%arg0: i32) -> (i32, i32) {
    %c0_i32 = arith.constant 0 : i32
    %c0_i32_0 = arith.constant 0 : i32
    %c0_i32_1 = arith.constant 0 : i32
    return %c0_i32, %c0_i32_0 : i32, i32
  }
  func.func @transform_5(%arg0: i32) -> (i32, i32) {
    %c0_i32 = arith.constant 0 : i32
    %c0_i32_0 = arith.constant 0 : i32
    %c0_i32_1 = arith.constant 0 : i32
    return %c0_i32, %c0_i32_0 : i32, i32
  }
  func.func @transform_6(%arg0: i32) -> (i32, i32) {
    %c0_i32 = arith.constant 0 : i32
    %c0_i32_0 = arith.constant 0 : i32
    %c0_i32_1 = arith.constant 0 : i32
    return %c0_i32, %c0_i32_0 : i32, i32
  }
  func.func @transform_7(%arg0: i32) -> (i32, i32) {
    %c0_i32 = arith.constant 0 : i32
    %c0_i32_0 = arith.constant 0 : i32
    %c0_i32_1 = arith.constant 0 : i32
    return %c0_i32, %c0_i32_0 : i32, i32
  }
  func.func @transform_8(%arg0: i32) -> (i32, i32) {
    %c0_i32 = arith.constant 0 : i32
    %c0_i32_0 = arith.constant 0 : i32
    %c0_i32_1 = arith.constant 0 : i32
    return %c0_i32, %c0_i32_0 : i32, i32
  }
  func.func @transform_9(%arg0: i32) -> (i32, i32) {
    %c0_i32 = arith.constant 0 : i32
    %c0_i32_0 = arith.constant 0 : i32
    %c0_i32_1 = arith.constant 0 : i32
    return %c0_i32, %c0_i32_0 : i32, i32
  }
  func.func @transform_10(%arg0: i32) -> (i32, i32) {
    %c0_i32 = arith.constant 0 : i32
    %c0_i32_0 = arith.constant 0 : i32
    %c0_i32_1 = arith.constant 0 : i32
    return %c0_i32, %c0_i32_0 : i32, i32
  }
  func.func @transform_11(%arg0: i32) -> (i32, i32) {
    %c0_i32 = arith.constant 0 : i32
    %c0_i32_0 = arith.constant 0 : i32
    %c0_i32_1 = arith.constant 0 : i32
    return %c0_i32, %c0_i32_0 : i32, i32
  }
  func.func @transform_12(%arg0: i32) -> (i32, i32) {
    %c0_i32 = arith.constant 0 : i32
    %c0_i32_0 = arith.constant 0 : i32
    %c0_i32_1 = arith.constant 0 : i32
    return %c0_i32, %c0_i32_0 : i32, i32
  }
  func.func @transform_13(%arg0: i32) -> (i32, i32) {
    %c0_i32 = arith.constant 0 : i32
    %c0_i32_0 = arith.constant 0 : i32
    %c0_i32_1 = arith.constant 0 : i32
    return %c0_i32, %c0_i32_0 : i32, i32
  }
  func.func @transform_14(%arg0: i32) -> (i32, i32) {
    %c0_i32 = arith.constant 0 : i32
    %c0_i32_0 = arith.constant 0 : i32
    %c0_i32_1 = arith.constant 0 : i32
    return %c0_i32, %c0_i32_0 : i32, i32
  }
  func.func @transform_15(%arg0: i32) -> (i32, i32) {
    %c0_i32 = arith.constant 0 : i32
    %c0_i32_0 = arith.constant 0 : i32
    %c0_i32_1 = arith.constant 0 : i32
    return %c0_i32, %c0_i32_0 : i32, i32
  }
  func.func @transform_16(%arg0: i32) -> (i32, i32) {
    %c0_i32 = arith.constant 0 : i32
    %c0_i32_0 = arith.constant 0 : i32
    %c0_i32_1 = arith.constant 0 : i32
    return %c0_i32, %c0_i32_0 : i32, i32
  }
  func.func @transform_17(%arg0: i32) -> (i32, i32) {
    %c0_i32 = arith.constant 0 : i32
    %c0_i32_0 = arith.constant 0 : i32
    %c0_i32_1 = arith.constant 0 : i32
    return %c0_i32, %c0_i32_0 : i32, i32
  }
  func.func @transform_18(%arg0: i32) -> (i32, i32, i32) {
    %c0_i32 = arith.constant 0 : i32
    %c0_i32_0 = arith.constant 0 : i32
    %c0_i32_1 = arith.constant 0 : i32
    return %arg0, %c0_i32, %c0_i32_0 : i32, i32, i32
  }
}

</mosaic_0001>

<bundles_post_ra>
// kernel: forward.1
= control target key start
LH: loop header
LB: loop body
LE: loop exit
PB: predicated region body
PF: predicated region fallthrough
CT: control target
= control target key end

     0   :  { %s21707_s0 = inlined_call_operand.vmem [shape: f32[8,160,32], index: 0, kind: input, shape index: {}]   ;;  %s21708_s1 = inlined_call_operand.vmem [shape: f32[1,256], index: 1, kind: input, shape index: {}]   ;;  %s21709_s2 = inlined_call_operand.vmem [shape: f32[1,256], index: 2, kind: input, shape index: {}]   ;;  %s21710_s3 = inlined_call_operand.vmem [shape: f32[4,256], index: 3, kind: input, shape index: {}]   ;;  %s21711_s4 = inlined_call_operand.vmem [shape: bf16[64,800], index: 4, kind: input, shape index: {}]   ;;  %s21712_s5 = inlined_call_operand.vmem [shape: f32[64,1], index: 5, kind: input, shape index: {}]   ;;  %s21713_s6 = inlined_call_operand.vmem [shape: bf16[128,832], index: 6, kind: input, shape index: {}]   ;;  %s21714_s7 = inlined_call_operand.vmem [shape: f32[128,1], index: 7, kind: input, shape index: {}]   ;;  %s21715_s8 = inlined_call_operand.vmem [shape: bf16[128,960], index: 8, kind: input, shape index: {}]   ;;  %s21716_s9 = inlined_call_operand.vmem [shape: f32[128,1], index: 9, kind: input, shape index: {}]   ;;  %s21717_s10 = inlined_call_operand.vmem [shape: bf16[128,1088], index: 10, kind: input, shape index: {}]   ;;  %s21718_s11 = inlined_call_operand.vmem [shape: f32[128,1], index: 11, kind: input, shape index: {}]   ;;  %s21719_s12 = inlined_call_operand.vmem [shape: bf16[96,704], index: 12, kind: input, shape index: {}]   ;;  %s21720_s13 = inlined_call_operand.vmem [shape: f32[96,1], index: 13, kind: input, shape index: {}]   ;;  %s21721_s14 = inlined_call_operand.vmem [shape: bf16[96,96], index: 14, kind: input, shape index: {}]   ;;  %s21722_s15 = inlined_call_operand.vmem [shape: f32[96,1], index: 15, kind: input, shape index: {}]   ;;  %s21723_s16 = inlined_call_operand.vmem [shape: bf16[96,128], index: 16, kind: input, shape index: {}]   ;;  %s21724_s17 = inlined_call_operand.vmem [shape: f32[1,128], index: 17, kind: input, shape index: {}]   ;;  %s21725_s18 = inlined_call_operand.hbm [shape: f32[2,4,128], index: 18, kind: output, shape index: {}]  }
   0x1   :  { %21787 = sst [smem:[#allocation42_spill]] %s21707_s0 }
   0x2   :  { %21788 = sst [smem:[#allocation43_spill]] %s21708_s1 }
   0x3   :  { %21789 = sst [smem:[#allocation44_spill]] %s21709_s2 }
   0x4   :  { %21790 = sst [smem:[#allocation45_spill]] %s21711_s4 }
   0x5   :  { %21791 = sst [smem:[#allocation46_spill]] %s21712_s5 }
   0x6   :  { %21792 = sst [smem:[#allocation47_spill]] %s21713_s6 }
   0x7   :  { %21793 = sst [smem:[#allocation48_spill]] %s21714_s7 }
   0x8   :  { %21794 = sst [smem:[#allocation49_spill]] %s21716_s9 }
   0x9   :  { %21795 = sst [smem:[#allocation50_spill]] %s21725_s18 }
   0xa   :  { %23 = vsyncpa [#allocation4], 0 }
   0xb   :  { %25 = vsyncpa [#allocation4 + $0x1], 0  ;;  %s16368_s27 = smov 0   ;;  %s16370_s28 = smov 0  }
   0xc   :  { %s16372_s29 = smov 0   ;;  %s16374_s30 = smov 0  }
   0xd LB: > { %21796 = sst [smem:[#allocation6_spill]] %s16235_s27  ;;  %s16389_s0 = sadd.s32 4294967295, %s16247_s30   ;;  %s16247_s30 = sphi %s16374_s30, %s22001_s30   ;;  %s16243_s29 = sphi %s16372_s29, %s22003_s29   ;;  %s16239_s28 = sphi %s16370_s28, %s22005_s28   ;;  %s16235_s27 = sphi %s16368_s27, %s22004_s27  }
   0xe   : > { %21797 = sst [smem:[#allocation7_spill]] %s16243_s29  ;;  %s14253_s19 = sadd.s32 4294967294, %s16247_s30  }
   0xf   : > { %21798 = sst [smem:[#allocation8_spill]] %s16247_s30  ;;  %s16393_s1 = sadd.s32 1, %s16247_s30  }
  0x10   : > { %21799 = sst [smem:[#allocation9_spill]] %s16389_s0  ;;  %s421_s20 = sadd.s32 1, %s16243_s29 }
  0x11   : > { %21800 = sst [smem:[#allocation10_spill]] %s16393_s1  ;;  %s418_s21 = ssub.s32 %s16247_s30, %s16393_s1 }
  0x12   : > { %p431_p0 = scmp.ne.s32.totalorder %s16243_s29, %s16239_s28  ;;  %p419_p1 = scmp.eq.s32.totalorder %s418_s21, 0 }
  0x13   : > { %p432_p2 = scmp.eq.s32.totalorder %s16389_s0, 1  ;;  %p437_p3 = scmp.ne.s32.totalorder %s16239_s28, %s16235_s27 }
  0x14   : > { %p438_p4 = scmp.eq.s32.totalorder %s14253_s19, 1  ;;  %p14256_p7 = scmp.ge.s32.totalorder %s16247_s30, 1 }
  0x15   : > { %s16404_s22 = scalar_select %p419_p1, %s16243_s29, %s421_s20  }
  0x16   : > { %p16406_p5 = por %p432_p2, %p431_p0  ;;  %p16410_p6 = por %p438_p4, %p437_p3 }
  0x17   : > { %21801 = sst [smem:[#allocation11_spill]] %s16404_s22  ;;  %p517_p8 = scmp.lt.s32.totalorder %s16247_s30, 3 }
  0x18   : > { %s21802_s2 = scalar_select %p16406_p5, 1, 0 }
  0x19   : > { %s21804_s23 = scalar_select %p16410_p6, 1, 0 }
  0x1a   : > { %21803 = sst [smem:[#allocation12_spill]] %s21802_s2  ;;  %p518_p9 = pnand %p14256_p7, %p517_p8 }
  0x1b   : > { %21805 = sst [smem:[#allocation13_spill]] %s21804_s23 }
  0x1c   : > { %521 = sbr.rel (%p518_p9) target bundleno = 3978 (0xf8a), region = 92 }
  0x21   : > { %s14258_s24 = sshll.u32 %s16389_s0, 2  ;;  %s21806_s20 = sld [smem:[#allocation42_spill]]  ;;  %vm825_vm0 = vcmask 130048   ;;  %vm847_vm1 = vcmask 392192   ;;  %vm858_vm2 = vcmask 523264   ;;  %vm869_vm3 = vcmask 654336  }
  0x22   : > { %p573_p10 = scmp.lt.s32.totalorder %s14258_s24, 7  ;;  %vm890_vm4 = vcmask 916480   ;;  %s21728_s26 = smov 2   ;;  %vm1031_vm5 = vcmask 15360   ;;  %vm1223_vm6 = vcmask 7168   ;;  %vm1515_vm7 = vcmask 1039360  }
  0x23   : > { %s21732_s19 = smov 1   ;;  %s21807_s4 = sld [smem:[#allocation45_spill]]  ;;  %vm1707_vm8 = vcmask 1031168   ;;  %vm2679_vm9 = vcmask 261120   ;;  %vm3137_vm10 = vcmask 31744   ;;  %vm3059_vm11 = vcmask 39936  }
  0x24   : > { %s22007_s24 = smov (!%p573_p10, %s14258_s24), 7  ;;  %s21808_s5 = sld [smem:[#allocation46_spill]]  ;;  %vm3215_vm12 = vcmask 23552   ;;  %vm3715_vm13 = vcmask 1014784   ;;  %vm3637_vm14 = vcmask 1022976   ;;  %vm3871_vm15 = vcmask 998400  }
  0x25   : > { %s15827_s25 = smul.u32 160, %s22007_s24  ;;  %s16249_s24 = smov 80  }
  0x26   : > { %s21812_s22 = smov 1   ;;  %s21816_s6 = sld [smem:[#allocation47_spill]] }
  0x27   : > { %s16420_s21 = scalar_lea.vmem %s21806_s20, %s15827_s25  ;;  %s16250_s25 = smov 16  }
  0x28   : > { %v14274_v0 = vld [vmem:[%s16420_s21 + $0x110] sm:$0xff]  ;;  %v14275_v1 = vld [vmem:[%s16420_s21 + $0x118] sm:$0xff]  ;;  %v14292_v12 = vld [vmem:[%s16420_s21 + $0x1a0] sm:$0xff]  ;;  %s21736_s20 = smov 4   ;;  %s21817_s7 = sld [smem:[#allocation48_spill]] }
  0x29   : > { %v596_v2 = vld [vmem:[%s16420_s21 + $0x70] sm:$0xff]  ;;  %v640_v3 = vpack.c.bf16 %v14275_v1, %v14274_v0  ;;  %v597_v4 = vld [vmem:[%s16420_s21 + $0x78] sm:$0xff]  ;;  %v14293_v13 = vld [vmem:[%s16420_s21 + $0x1a8] sm:$0xff]  ;;  %s21763_s29 = smov 7   ;;  %s21857_s1 = smov 3  }
  0x2a   : > { %v14314_v5 = vld [vmem:[%s16420_s21 + $0x250] sm:$0xff]  ;;  %v14315_v6 = vld [vmem:[%s16420_s21 + $0x258] sm:$0xff]  ;;  %v609_v7 = vpack.c.bf16 %v597_v4, %v596_v2  ;;  %v594_v14 = vld [vmem:[%s16420_s21 + $0x60] sm:$0xff]  ;;  %v670_v16 = vpack.c.bf16 %v14293_v13, %v14292_v12  ;;  %s21877_s9 = sld [smem:[#allocation49_spill]]  ;;  %s16266_s18 = smov 8  }
  0x2b   : > { %v14294_v8 = vld [vmem:[%s16420_s21 + $0x1b0] sm:$0xff]  ;;  %v14295_v9 = vld [vmem:[%s16420_s21 + $0x1b8] sm:$0xff]  ;;  %759 = vrot.lane.b32.xlu1 %v640_v3, %s16249_s24  ;;  %v702_v10 = vpack.c.bf16 %v14315_v6, %v14314_v5  ;;  %v595_v15 = vld [vmem:[%s16420_s21 + $0x68] sm:$0xff]  ;;  %s21922_s0 = smov 6   ;;  %s21996_s30 = sld [smem:[#allocation50_spill]] }
  0x2c   : > { %729 = vrot.lane.b32.xlu0 %v609_v7, %s16250_s25  ;;  %v671_v11 = vpack.c.bf16 %v14295_v9, %v14294_v8  ;;  %v608_v17 = vpack.c.bf16 %v595_v15, %v594_v14  ;;  %v14312_v18 = vld [vmem:[%s16420_s21 + $0x240] sm:$0xff]  ;;  %v14313_v19 = vld [vmem:[%s16420_s21 + $0x248] sm:$0xff]  ;;  %v14290_v24 = vld [vmem:[%s16420_s21 + $0x190] sm:$0xff] }
  0x2d   : > { %v14272_v20 = vld [vmem:[%s16420_s21 + $0x100] sm:$0xff]  ;;  %v14273_v21 = vld [vmem:[%s16420_s21 + $0x108] sm:$0xff]  ;;  %v701_v22 = vpack.c.bf16 %v14313_v19, %v14312_v18  ;;  %v14291_v25 = vld [vmem:[%s16420_s21 + $0x198] sm:$0xff] }
  0x2e   : > { %v639_v23 = vpack.c.bf16 %v14273_v21, %v14272_v20  ;;  %v592_v26 = vld [vmem:[%s16420_s21 + $0x50] sm:$0xff]  ;;  %v593_v27 = vld [vmem:[%s16420_s21 + $0x58] sm:$0xff]  ;;  %v669_v28 = vpack.c.bf16 %v14291_v25, %v14290_v24  ;;  %v14288_v36 = vld [vmem:[%s16420_s21 + $0x180] sm:$0xff] }
  0x2f   : > { %819 = vrot.lane.b32.xlu1 %v702_v10, %s16249_s24  ;;  %v607_v29 = vpack.c.bf16 %v593_v27, %v592_v26  ;;  %v14310_v30 = vld [vmem:[%s16420_s21 + $0x230] sm:$0xff]  ;;  %v14311_v31 = vld [vmem:[%s16420_s21 + $0x238] sm:$0xff]  ;;  %v14289_v37 = vld [vmem:[%s16420_s21 + $0x188] sm:$0xff] }
  0x30   : > { %789 = vrot.lane.b32.xlu0 %v671_v11, %s16250_s25  ;;  %v14270_v32 = vld [vmem:[%s16420_s21 + $0xf0] sm:$0xff]  ;;  %v14271_v33 = vld [vmem:[%s16420_s21 + $0xf8] sm:$0xff]  ;;  %v700_v34 = vpack.c.bf16 %v14311_v31, %v14310_v30  ;;  %v590_v38 = vld [vmem:[%s16420_s21 + $0x40] sm:$0xff]  ;;  %v668_v40 = vpack.c.bf16 %v14289_v37, %v14288_v36 }
  0x31   : > { %v638_v35 = vpack.c.bf16 %v14271_v33, %v14270_v32  ;;  %v591_v39 = vld [vmem:[%s16420_s21 + $0x48] sm:$0xff]  ;;  %v14308_v42 = vld [vmem:[%s16420_s21 + $0x220] sm:$0xff]  ;;  %v14286_v46 = vld [vmem:[%s16420_s21 + $0x170] sm:$0xff] }
  0x32   : > { %v606_v41 = vpack.c.bf16 %v591_v39, %v590_v38  ;;  %v14309_v43 = vld [vmem:[%s16420_s21 + $0x228] sm:$0xff]  ;;  %v14268_v44 = vld [vmem:[%s16420_s21 + $0xe0] sm:$0xff]  ;;  %v14287_v47 = vld [vmem:[%s16420_s21 + $0x178] sm:$0xff] }
  0x33   : > { %787 = vrot.lane.b32.xlu1 %v670_v16, %s16250_s25  ;;  %v14269_v45 = vld [vmem:[%s16420_s21 + $0xe8] sm:$0xff]  ;;  %v699_v48 = vpack.c.bf16 %v14309_v43, %v14308_v42  ;;  %v588_v49 = vld [vmem:[%s16420_s21 + $0x30] sm:$0xff]  ;;  %v589_v50 = vld [vmem:[%s16420_s21 + $0x38] sm:$0xff]  ;;  %v667_v54 = vpack.c.bf16 %v14287_v47, %v14286_v46 }
  0x34   : > { %727 = vrot.lane.b32.xlu0 %v608_v17, %s16250_s25  ;;  %v637_v51 = vpack.c.bf16 %v14269_v45, %v14268_v44  ;;  %v14306_v52 = vld [vmem:[%s16420_s21 + $0x210] sm:$0xff]  ;;  %v14307_v53 = vld [vmem:[%s16420_s21 + $0x218] sm:$0xff]  ;;  %v605_v57 = vpack.c.bf16 %v589_v50, %v588_v49  ;;  %v14284_v58 = vld [vmem:[%s16420_s21 + $0x160] sm:$0xff] }
  0x35   : > { %v14266_v55 = vld [vmem:[%s16420_s21 + $0xd0] sm:$0xff]  ;;  %v14267_v56 = vld [vmem:[%s16420_s21 + $0xd8] sm:$0xff]  ;;  %v14285_v59 = vld [vmem:[%s16420_s21 + $0x168] sm:$0xff]  ;;  %v698_v60 = vpack.c.bf16 %v14307_v53, %v14306_v52 }
  0x36   : > { %v586_v61 = vld [vmem:[%s16420_s21 + $0x20] sm:$0xff]  ;;  %v587_v62 = vld [vmem:[%s16420_s21 + $0x28] sm:$0xff]  ;;  %v636_v63 = vpack.c.bf16 %v14267_v56, %v14266_v55  ;;  %v666_v2 = vpack.c.bf16 %v14285_v59, %v14284_v58  ;;  %v14282_v6 = vld [vmem:[%s16420_s21 + $0x150] sm:$0xff] }
  0x37   : > { %817 = vrot.lane.b32.xlu1 %v701_v22, %s16249_s24  ;;  %v14304_v0 = vld [vmem:[%s16420_s21 + $0x200] sm:$0xff]  ;;  %v14305_v1 = vld [vmem:[%s16420_s21 + $0x208] sm:$0xff]  ;;  %v604_v5 = vpack.c.bf16 %v587_v62, %v586_v61  ;;  %v14283_v7 = vld [vmem:[%s16420_s21 + $0x158] sm:$0xff] }
  0x38   : > { %757 = vrot.lane.b32.xlu0 %v639_v23, %s16249_s24  ;;  %v14264_v3 = vld [vmem:[%s16420_s21 + $0xc0] sm:$0xff]  ;;  %v14265_v4 = vld [vmem:[%s16420_s21 + $0xc8] sm:$0xff]  ;;  %v697_v8 = vpack.c.bf16 %v14305_v1, %v14304_v0  ;;  %v584_v9 = vld [vmem:[%s16420_s21 + $0x10] sm:$0xff]  ;;  %v665_v14 = vpack.c.bf16 %v14283_v7, %v14282_v6 }
  0x39   : > { %v585_v10 = vld [vmem:[%s16420_s21 + $0x18] sm:$0xff]  ;;  %v635_v11 = vpack.c.bf16 %v14265_v4, %v14264_v3  ;;  %v14302_v12 = vld [vmem:[%s16420_s21 + $0x1f0] sm:$0xff]  ;;  %v14280_v18 = vld [vmem:[%s16420_s21 + $0x140] sm:$0xff] }
  0x3a   : > { %v14303_v13 = vld [vmem:[%s16420_s21 + $0x1f8] sm:$0xff]  ;;  %v14262_v15 = vld [vmem:[%s16420_s21 + $0xb0] sm:$0xff]  ;;  %v603_v17 = vpack.c.bf16 %v585_v10, %v584_v9  ;;  %v14281_v19 = vld [vmem:[%s16420_s21 + $0x148] sm:$0xff] }
  0x3b   : > { %785 = vrot.lane.b32.xlu1 %v669_v28, %s16250_s25  ;;  %v14263_v16 = vld [vmem:[%s16420_s21 + $0xb8] sm:$0xff]  ;;  %v696_v20 = vpack.c.bf16 %v14303_v13, %v14302_v12  ;;  %v582_v21 = vld [vmem:[%s16420_s21] sm:$0xff]  ;;  %v583_v22 = vld [vmem:[%s16420_s21 + $0x8] sm:$0xff]  ;;  %v664_v26 = vpack.c.bf16 %v14281_v19, %v14280_v18 }
  0x3c   : > { %725 = vrot.lane.b32.xlu0 %v607_v29, %s16250_s25  ;;  %v634_v23 = vpack.c.bf16 %v14263_v16, %v14262_v15  ;;  %v14300_v24 = vld [vmem:[%s16420_s21 + $0x1e0] sm:$0xff]  ;;  %v14301_v25 = vld [vmem:[%s16420_s21 + $0x1e8] sm:$0xff]  ;;  %v602_v29 = vpack.c.bf16 %v583_v22, %v582_v21  ;;  %v14298_v30 = vld [vmem:[%s16420_s21 + $0x1d0] sm:$0xff] }
  0x3d   : > { %v14260_v27 = vld [vmem:[%s16420_s21 + $0xa0] sm:$0xff]  ;;  %v14261_v28 = vld [vmem:[%s16420_s21 + $0xa8] sm:$0xff]  ;;  %v14299_v31 = vld [vmem:[%s16420_s21 + $0x1d8] sm:$0xff]  ;;  %v695_v32 = vpack.c.bf16 %v14301_v25, %v14300_v24 }
  0x3e   : > { %v600_v33 = vld [vmem:[%s16420_s21 + $0x90] sm:$0xff]  ;;  %v14319_v37 = vld [vmem:[%s16420_s21 + $0x278] sm:$0xff]  ;;  %v673_v38 = vpack.c.bf16 %v14299_v31, %v14298_v30  ;;  %v14296_v42 = vld [vmem:[%s16420_s21 + $0x1c0] sm:$0xff] }
  0x3f   : > { %815 = vrot.lane.b32.xlu1 %v700_v34, %s16249_s24  ;;  %v601_v34 = vld [vmem:[%s16420_s21 + $0x98] sm:$0xff]  ;;  %v14318_v36 = vld [vmem:[%s16420_s21 + $0x270] sm:$0xff]  ;;  %v14297_v43 = vld [vmem:[%s16420_s21 + $0x1c8] sm:$0xff] }
  0x40   : > { %755 = vrot.lane.b32.xlu0 %v638_v35, %s16249_s24  ;;  %v633_v35 = vpack.c.bf16 %v14261_v28, %v14260_v27  ;;  %v14278_v39 = vld [vmem:[%s16420_s21 + $0x130] sm:$0xff]  ;;  %v704_v44 = vpack.c.bf16 %v14319_v37, %v14318_v36  ;;  %v598_v45 = vld [vmem:[%s16420_s21 + $0x80] sm:$0xff]  ;;  %v599_v46 = vld [vmem:[%s16420_s21 + $0x88] sm:$0xff]  ;;  %v672_v50 = vpack.c.bf16 %v14297_v43, %v14296_v42 }
  0x41   : > { %v14317_v49 = vld [vmem:[%s16420_s21 + $0x268] sm:$0xff]  ;;  %v610_v53 = vpack.c.bf16 %v599_v46, %v598_v45 }
  0x42   : > { %v14277_v52 = vld [vmem:[%s16420_s21 + $0x128] sm:$0xff] }
  0x43   : > { %783 = vrot.lane.b32.xlu1 %v668_v40, %s16250_s25  ;;  %v14279_v40 = vld [vmem:[%s16420_s21 + $0x138] sm:$0xff] }
  0x44   : > { %723 = vrot.lane.b32.xlu0 %v606_v41, %s16250_s25  ;;  %v611_v41 = vpack.c.bf16 %v601_v34, %v600_v33  ;;  %v642_v47 = vpack.c.bf16 %v14279_v40, %v14278_v39 }
  0x47   : > { %813 = vrot.lane.b32.xlu1 %v699_v48, %s16249_s24  ;;  %v14316_v48 = vld [vmem:[%s16420_s21 + $0x260] sm:$0xff] }
  0x48   : > { %753 = vrot.lane.b32.xlu0 %v637_v51, %s16249_s24  ;;  %v14276_v51 = vld [vmem:[%s16420_s21 + $0x120] sm:$0xff]  ;;  %s21730_s21 = smov 126  }
  0x49   : > { %v641_v55 = vpack.c.bf16 %v14277_v52, %v14276_v51 }
  0x4b   : > { %781 = vrot.lane.b32.xlu1 %v667_v54, %s16250_s25  ;;  %v703_v54 = vpack.c.bf16 %v14317_v49, %v14316_v48 }
  0x4c   : > { %721 = vrot.lane.b32.xlu0 %v605_v57, %s16250_s25 }
  0x4f   : > { %811 = vrot.lane.b32.xlu1 %v698_v60, %s16249_s24 }
  0x50   : > { %751 = vrot.lane.b32.xlu0 %v636_v63, %s16249_s24 }
  0x53   : > { %779 = vrot.lane.b32.xlu1 %v666_v2, %s16250_s25 }
  0x54   : > { %719 = vrot.lane.b32.xlu0 %v604_v5, %s16250_s25 }
  0x57   : > { %809 = vrot.lane.b32.xlu1 %v697_v8, %s16249_s24 }
  0x58   : > { %749 = vrot.lane.b32.xlu0 %v635_v11, %s16249_s24 }
  0x5b   : > { %777 = vrot.lane.b32.xlu1 %v665_v14, %s16250_s25 }
  0x5c   : > { %717 = vrot.lane.b32.xlu0 %v603_v17, %s16250_s25 }
  0x5f   : > { %807 = vrot.lane.b32.xlu1 %v696_v20, %s16249_s24 }
  0x60   : > { %747 = vrot.lane.b32.xlu0 %v634_v23, %s16249_s24 }
  0x63   : > { %775 = vrot.lane.b32.xlu1 %v664_v26, %s16250_s25 }
  0x64   : > { %715 = vrot.lane.b32.xlu0 %v602_v29, %s16250_s25 }
  0x67   : > { %805 = vrot.lane.b32.xlu1 %v695_v32, %s16249_s24 }
  0x68   : > { %745 = vrot.lane.b32.xlu0 %v633_v35, %s16249_s24 }
  0x6b   : > { %793 = vrot.lane.b32.xlu1 %v673_v38, %s16250_s25 }
  0x6c   : > { %733 = vrot.lane.b32.xlu0 %v611_v41, %s16250_s25 }
  0x6f   : > { %823 = vrot.lane.b32.xlu1 %v704_v44, %s16249_s24 }
  0x70   : > { %763 = vrot.lane.b32.xlu0 %v642_v47, %s16249_s24 }
  0x73   : > { %791 = vrot.lane.b32.xlu1 %v672_v50, %s16250_s25 }
  0x74   : > { %731 = vrot.lane.b32.xlu0 %v610_v53, %s16250_s25  ;;  %s21809_s25 = sld [smem:[#allocation43_spill]] }
  0x77   : > { %821 = vrot.lane.b32.xlu1 %v703_v54, %s16249_s24 }
  0x78   : > { %761 = vrot.lane.b32.xlu0 %v641_v55, %s16249_s24  ;;  %s21726_s24 = smov 127  }
  0x9d   : > { %v760_v56 = vpop.permute.xlu1 %759 }
  0x9e   : > { %v730_v57 = vpop.permute.xlu0 %729 }
  0x9f   : > { %v842_v58 = vsel %vm825_vm0, 0, %v730_v57 }
  0xa0   : > { %v855_v59 = vsel %vm847_vm1, %v842_v58, 0 }
  0xa1   : > { %v866_v60 = vsel %vm858_vm2, %v855_v59, 0  ;;  %v820_v61 = vpop.permute.xlu1 %819 }
  0xa2   : > { %v885_v62 = vsel %vm869_vm3, %v866_v60, %v760_v56  ;;  %v790_v63 = vpop.permute.xlu0 %789 }
  0xa3   : > { %v916_v0 = vsel %vm825_vm0, 0, %v790_v63  ;;  %v16548_v1 = vsel %vm890_vm4, %v885_v62, 0 }
  0xa4   : > { %v928_v2 = vsel %vm847_vm1, %v916_v0, 0  ;;  %1025 = vrot.lane.b32.xlu1 %v16548_v1, %s21728_s26 }
  0xa5   : > { %v938_v3 = vsel %vm858_vm2, %v928_v2, 0  ;;  %v788_v4 = vpop.permute.xlu1 %787 }
  0xa6   : > { %v914_v5 = vsel %vm825_vm0, 0, %v788_v4  ;;  %v728_v6 = vpop.permute.xlu0 %727  ;;  %v16556_v7 = vsel %vm869_vm3, %v938_v3, %v820_v61 }
  0xa7   : > { %v927_v8 = vsel %vm847_vm1, %v914_v5, 0  ;;  %v840_v9 = vsel %vm825_vm0, 0, %v728_v6  ;;  %v16562_v10 = vsel %vm890_vm4, %v16556_v7, 0 }
  0xa8   : > { %v937_v11 = vsel %vm858_vm2, %v927_v8, 0  ;;  %v854_v12 = vsel %vm847_vm1, %v840_v9, 0  ;;  %995 = vrot.lane.b32.xlu0 %v16562_v10, %s21728_s26 }
  0xa9   : > { %v865_v13 = vsel %vm858_vm2, %v854_v12, 0  ;;  %v818_v14 = vpop.permute.xlu1 %817 }
  0xaa   : > { %v16570_v15 = vsel %vm869_vm3, %v937_v11, %v818_v14  ;;  %v758_v16 = vpop.permute.xlu0 %757 }
  0xab   : > { %v16574_v17 = vsel %vm890_vm4, %v16570_v15, 0  ;;  %v883_v18 = vsel %vm869_vm3, %v865_v13, %v758_v16 }
  0xac   : > { %v16578_v19 = vsel %vm890_vm4, %v883_v18, 0  ;;  %993 = vrot.lane.b32.xlu0 %v16574_v17, %s21728_s26 }
  0xad   : > { %1023 = vrot.lane.b32.xlu1 %v16578_v19, %s21728_s26  ;;  %v786_v20 = vpop.permute.xlu1 %785 }
  0xae   : > { %v912_v21 = vsel %vm825_vm0, 0, %v786_v20  ;;  %v726_v22 = vpop.permute.xlu0 %725 }
  0xaf   : > { %v926_v23 = vsel %vm847_vm1, %v912_v21, 0  ;;  %v838_v24 = vsel %vm825_vm0, 0, %v726_v22 }
  0xb0   : > { %v936_v25 = vsel %vm858_vm2, %v926_v23, 0  ;;  %v853_v26 = vsel %vm847_vm1, %v838_v24, 0 }
  0xb1   : > { %v864_v27 = vsel %vm858_vm2, %v853_v26, 0  ;;  %v816_v28 = vpop.permute.xlu1 %815 }
  0xb2   : > { %v16591_v29 = vsel %vm869_vm3, %v936_v25, %v816_v28  ;;  %v756_v30 = vpop.permute.xlu0 %755 }
  0xb3   : > { %v16595_v31 = vsel %vm890_vm4, %v16591_v29, 0  ;;  %v881_v32 = vsel %vm869_vm3, %v864_v27, %v756_v30 }
  0xb4   : > { %v16599_v33 = vsel %vm890_vm4, %v881_v32, 0  ;;  %991 = vrot.lane.b32.xlu0 %v16595_v31, %s21728_s26 }
  0xb5   : > { %1021 = vrot.lane.b32.xlu1 %v16599_v33, %s21728_s26  ;;  %v784_v34 = vpop.permute.xlu1 %783 }
  0xb6   : > { %v910_v35 = vsel %vm825_vm0, 0, %v784_v34  ;;  %v724_v36 = vpop.permute.xlu0 %723 }
  0xb7   : > { %v925_v37 = vsel %vm847_vm1, %v910_v35, 0  ;;  %v836_v38 = vsel %vm825_vm0, 0, %v724_v36 }
  0xb8   : > { %v935_v39 = vsel %vm858_vm2, %v925_v37, 0  ;;  %v852_v40 = vsel %vm847_vm1, %v836_v38, 0 }
  0xb9   : > { %v863_v41 = vsel %vm858_vm2, %v852_v40, 0  ;;  %v814_v42 = vpop.permute.xlu1 %813 }
  0xba   : > { %v16612_v43 = vsel %vm869_vm3, %v935_v39, %v814_v42  ;;  %v754_v44 = vpop.permute.xlu0 %753 }
  0xbb   : > { %v16616_v45 = vsel %vm890_vm4, %v16612_v43, 0  ;;  %v879_v46 = vsel %vm869_vm3, %v863_v41, %v754_v44 }
  0xbc   : > { %v16620_v47 = vsel %vm890_vm4, %v879_v46, 0  ;;  %989 = vrot.lane.b32.xlu0 %v16616_v45, %s21728_s26 }
  0xbd   : > { %1019 = vrot.lane.b32.xlu1 %v16620_v47, %s21728_s26  ;;  %v782_v48 = vpop.permute.xlu1 %781 }
  0xbe   : > { %v908_v49 = vsel %vm825_vm0, 0, %v782_v48  ;;  %v722_v50 = vpop.permute.xlu0 %721 }
  0xbf   : > { %v924_v51 = vsel %vm847_vm1, %v908_v49, 0  ;;  %v834_v52 = vsel %vm825_vm0, 0, %v722_v50 }
  0xc0   : > { %v851_v53 = vsel %vm847_vm1, %v834_v52, 0  ;;  %v934_v54 = vsel %vm858_vm2, %v924_v51, 0 }
  0xc1   : > { %v862_v55 = vsel %vm858_vm2, %v851_v53, 0  ;;  %v812_v56 = vpop.permute.xlu1 %811 }
  0xc2   : > { %v752_v57 = vpop.permute.xlu0 %751  ;;  %v948_v58 = vsel %vm869_vm3, %v934_v54, %v812_v56 }
  0xc3   : > { %v877_v59 = vsel %vm869_vm3, %v862_v55, %v752_v57  ;;  %v16635_v60 = vsel %vm890_vm4, %v948_v58, 0  ;;  %15762 = vmatprep.subr.msk.bf16.mxu1 %vm890_vm4, %v948_v58 }
  0xc4   : > { %v16639_v61 = vsel %vm890_vm4, %v877_v59, 0  ;;  %987 = vrot.lane.b32.xlu0 %v16635_v60, %s21728_s26 }
  0xc5   : > { %1017 = vrot.lane.b32.xlu1 %v16639_v61, %s21728_s26  ;;  %2766 = vmatpush1.bf16.msra.mxu1 %v16639_v61  ;;  %v780_v62 = vpop.permute.xlu1 %779 }
  0xc6   : > { %v906_v63 = vsel %vm825_vm0, 0, %v780_v62  ;;  %v720_v0 = vpop.permute.xlu0 %719 }
  0xc7   : > { %v923_v2 = vsel %vm847_vm1, %v906_v63, 0  ;;  %v832_v3 = vsel %vm825_vm0, 0, %v720_v0 }
  0xc8   : > { %v933_v4 = vsel %vm858_vm2, %v923_v2, 0  ;;  %v850_v5 = vsel %vm847_vm1, %v832_v3, 0 }
  0xc9   : > { %v861_v6 = vsel %vm858_vm2, %v850_v5, 0  ;;  %v810_v8 = vpop.permute.xlu1 %809 }
  0xca   : > { %v946_v9 = vsel %vm869_vm3, %v933_v4, %v810_v8  ;;  %v750_v11 = vpop.permute.xlu0 %749 }
  0xcb   : > { %v16654_v12 = vsel %vm890_vm4, %v946_v9, 0  ;;  %v875_v13 = vsel %vm869_vm3, %v861_v6, %v750_v11  ;;  %15763 = vmatprep.subr.msk.bf16.mxu1 %vm890_vm4, %v946_v9 }
  0xcc   : > { %v16659_v14 = vsel %vm890_vm4, %v875_v13, 0  ;;  %985 = vrot.lane.b32.xlu0 %v16654_v12, %s21728_s26 }
  0xcd   : > { %1015 = vrot.lane.b32.xlu1 %v16659_v14, %s21728_s26  ;;  %2768 = vmatpush1.bf16.msra.mxu1 %v16659_v14  ;;  %v778_v16 = vpop.permute.xlu1 %777 }
  0xce   : > { %v904_v18 = vsel %vm825_vm0, 0, %v778_v16  ;;  %v718_v20 = vpop.permute.xlu0 %717 }
  0xcf   : > { %v922_v21 = vsel %vm847_vm1, %v904_v18, 0  ;;  %v830_v22 = vsel %vm825_vm0, 0, %v718_v20 }
  0xd0   : > { %v932_v23 = vsel %vm858_vm2, %v922_v21, 0  ;;  %v849_v24 = vsel %vm847_vm1, %v830_v22, 0 }
  0xd1   : > { %v860_v25 = vsel %vm858_vm2, %v849_v24, 0  ;;  %v808_v26 = vpop.permute.xlu1 %807 }
  0xd2   : > { %v944_v27 = vsel %vm869_vm3, %v932_v23, %v808_v26  ;;  %v748_v28 = vpop.permute.xlu0 %747  ;;  %v15894_v26 = vld [vmem:[%s21807_s4 + $0x4] ss:$28 sps:$4 sm:$0xff]  }
  0xd3   : > { %v16674_v30 = vsel %vm890_vm4, %v944_v27, 0  ;;  %v873_v32 = vsel %vm869_vm3, %v860_v25, %v748_v28  ;;  %15764 = vmatprep.subr.msk.bf16.mxu1 %vm890_vm4, %v944_v27  ;;  %2724 = vmatprep.mubr.bf16.mxu0 %v15894_v26 }
  0xd4   : > { %v16679_v34 = vsel %vm890_vm4, %v873_v32, 0  ;;  %983 = vrot.lane.b32.xlu0 %v16674_v30, %s21728_s26 }
  0xd5   : > { %1013 = vrot.lane.b32.xlu1 %v16679_v34, %s21728_s26  ;;  %2770 = vmatpush1.bf16.msra.mxu1 %v16679_v34  ;;  %v776_v35 = vpop.permute.xlu1 %775 }
  0xd6   : > { %v902_v36 = vsel %vm825_vm0, 0, %v776_v35  ;;  %v716_v37 = vpop.permute.xlu0 %715 }
  0xd7   : > { %v921_v38 = vsel %vm847_vm1, %v902_v36, 0  ;;  %v828_v39 = vsel %vm825_vm0, 0, %v716_v37 }
  0xd8   : > { %v931_v40 = vsel %vm858_vm2, %v921_v38, 0  ;;  %v848_v41 = vsel %vm847_vm1, %v828_v39, 0 }
  0xd9   : > { %v859_v42 = vsel %vm858_vm2, %v848_v41, 0  ;;  %v806_v44 = vpop.permute.xlu1 %805 }
  0xda   : > { %v942_v46 = vsel %vm869_vm3, %v931_v40, %v806_v44  ;;  %v746_v48 = vpop.permute.xlu0 %745 }
  0xdb   : > { %v16694_v49 = vsel %vm890_vm4, %v942_v46, 0  ;;  %v871_v50 = vsel %vm869_vm3, %v859_v42, %v746_v48  ;;  %15765 = vmatprep.subr.msk.bf16.mxu1 %vm890_vm4, %v942_v46  ;;  %v15897_v46 = vld [vmem:[%s21807_s4 + $0xc] ss:$28 sps:$4 sm:$0xff]  }
  0xdc   : > { %v16699_v51 = vsel %vm890_vm4, %v871_v50, 0  ;;  %981 = vrot.lane.b32.xlu0 %v16694_v49, %s21728_s26  ;;  %2797 = vmatprep.mubr.bf16.mxu1 %v15897_v46  ;;  %v1992_v46 = vld [vmem:[%s21808_s5 + $0x8] sm:$0xff] }
  0xdd   : > { %1011 = vrot.lane.b32.xlu1 %v16699_v51, %s21728_s26  ;;  %2772 = vmatpush1.bf16.msra.mxu1 %v16699_v51  ;;  %v794_v52 = vpop.permute.xlu1 %793 }
  0xde   : > { %v734_v53 = vpop.permute.xlu0 %733  ;;  %v920_v55 = vsel %vm825_vm0, 0, %v794_v52 }
  0xdf   : > { %v846_v57 = vsel %vm825_vm0, 0, %v734_v53  ;;  %v930_v58 = vsel %vm847_vm1, %v920_v55, 0 }
  0xe0   : > { %1193 = vrot.lane.b32.xlu0 %v16595_v31, %s21732_s19  ;;  %v857_v59 = vsel %vm847_vm1, %v846_v57, 0  ;;  %v940_v63 = vsel %vm858_vm2, %v930_v58, 0 }
  0xe1   : > { %1213 = vrot.lane.b32.xlu1 %v16599_v33, %s21732_s19  ;;  %v824_v54 = vpop.permute.xlu1 %823  ;;  %v868_v2 = vsel %vm858_vm2, %v857_v59, 0 }
  0xe2   : > { %v764_v56 = vpop.permute.xlu0 %763  ;;  %v16730_v4 = vsel %vm869_vm3, %v940_v63, %v824_v54 }
  0xe3   : > { %v889_v6 = vsel %vm869_vm3, %v868_v2, %v764_v56  ;;  %v16739_v9 = vsel %vm890_vm4, %v16730_v4, 0 }
  0xe4   : > { %1191 = vrot.lane.b32.xlu0 %v16616_v45, %s21732_s19  ;;  %v16745_v13 = vsel %vm890_vm4, %v889_v6, 0 }
  0xe5   : > { %1211 = vrot.lane.b32.xlu1 %v16620_v47, %s21732_s19  ;;  %v792_v62 = vpop.permute.xlu1 %791 }
  0xe6   : > { %v732_v0 = vpop.permute.xlu0 %731  ;;  %v918_v3 = vsel %vm825_vm0, 0, %v792_v62 }
  0xe7   : > { %v844_v5 = vsel %vm825_vm0, 0, %v732_v0  ;;  %v929_v8 = vsel %vm847_vm1, %v918_v3, 0  ;;  %vm3793_vm0 = vcmask 1006592  }
  0xe8   : > { %1189 = vrot.lane.b32.xlu0 %v16635_v60, %s21732_s19  ;;  %v856_v11 = vsel %vm847_vm1, %v844_v5, 0  ;;  %v939_v16 = vsel %vm858_vm2, %v929_v8, 0  ;;  %vm3949_vm1 = vcmask 990208  }
  0xe9   : > { %1209 = vrot.lane.b32.xlu1 %v16639_v61, %s21732_s19  ;;  %v822_v18 = vpop.permute.xlu1 %821  ;;  %v867_v20 = vsel %vm858_vm2, %v856_v11, 0 }
  0xea   : > { %v762_v21 = vpop.permute.xlu0 %761  ;;  %v16754_v22 = vsel %vm869_vm3, %v939_v16, %v822_v18 }
  0xeb   : > { %v887_v23 = vsel %vm869_vm3, %v867_v20, %v762_v21  ;;  %v16761_v24 = vsel %vm890_vm4, %v16754_v22, 0  ;;  %v1998_v21 = vld [vmem:[%s21808_s5 + $0x38] sm:$0xff]  ;;  %vm5736_vm3 = vcmask 48128  }
  0xec   : > { %1187 = vrot.lane.b32.xlu0 %v16654_v12, %s21732_s19  ;;  %v16766_v25 = vsel %vm890_vm4, %v887_v23, 0 }
  0xed   : > { %1207 = vrot.lane.b32.xlu1 %v16659_v14, %s21732_s19 }
  0xf0   : > { %1185 = vrot.lane.b32.xlu0 %v16674_v30, %s21732_s19 }
  0xf1   : > { %1205 = vrot.lane.b32.xlu1 %v16679_v34, %s21732_s19 }
  0xf4   : > { %1201 = vrot.lane.b32.xlu0 %v16739_v9, %s21732_s19 }
  0xf5   : > { %1221 = vrot.lane.b32.xlu1 %v16745_v13, %s21732_s19 }
  0xf8   : > { %1183 = vrot.lane.b32.xlu0 %v16694_v49, %s21732_s19 }
  0xf9   : > { %1203 = vrot.lane.b32.xlu1 %v16699_v51, %s21732_s19 }
  0xfc   : > { %1199 = vrot.lane.b32.xlu0 %v16761_v24, %s21732_s19 }
  0xfd   : > { %1219 = vrot.lane.b32.xlu1 %v16766_v25, %s21732_s19 }
 0x100   : > { %999 = vrot.lane.b32.xlu0 %v16739_v9, %s21728_s26 }
 0x101   : > { %1029 = vrot.lane.b32.xlu1 %v16745_v13, %s21728_s26 }
 0x104   : > { %1197 = vrot.lane.b32.xlu0 %v16562_v10, %s21732_s19 }
 0x105   : > { %1217 = vrot.lane.b32.xlu1 %v16548_v1, %s21732_s19 }
 0x108   : > { %997 = vrot.lane.b32.xlu0 %v16761_v24, %s21728_s26 }
 0x109   : > { %1027 = vrot.lane.b32.xlu1 %v16766_v25, %s21728_s26  ;;  %s21813_s26 = smov 2  }
 0x10c   : > { %1195 = vrot.lane.b32.xlu0 %v16574_v17, %s21732_s19 }
 0x10d   : > { %1215 = vrot.lane.b32.xlu1 %v16578_v19, %s21732_s19  ;;  %s21815_s19 = smov 127  }
 0x110   : > { %1511 = vrot.lane.b32.xlu0 %v16745_v13, %s21726_s24 }
 0x111   : > { %1513 = vrot.lane.b32.xlu1 %v16739_v9, %s21726_s24 }
 0x114   : > { %1479 = vrot.lane.b32.xlu0 %v16679_v34, %s21726_s24 }
 0x115   : > { %1481 = vrot.lane.b32.xlu1 %v16674_v30, %s21726_s24 }
 0x116   : > { %v1026_v27 = vpop.permute.xlu1 %1025 }
 0x118   : > { %1507 = vrot.lane.b32.xlu0 %v16766_v25, %s21726_s24 }
 0x119   : > { %1509 = vrot.lane.b32.xlu1 %v16761_v24, %s21726_s24 }
 0x11a   : > { %v996_v28 = vpop.permute.xlu0 %995 }
 0x11b   : > { %v1039_v32 = vsel %vm1031_vm5, %v1026_v27, %v996_v28  ;;  %v1066_v35 = vsel %vm1031_vm5, %v996_v28, %v1026_v27 }
 0x11c   : > { %2692 = vmatprep.subr.bf16.mxu0 %v1039_v32  ;;  %1475 = vrot.lane.b32.xlu0 %v16699_v51, %s21726_s24  ;;  %v1995_v32 = vld [vmem:[%s21808_s5 + $0x20] sm:$0xff] }
 0x11d   : > { %1477 = vrot.lane.b32.xlu1 %v16694_v49, %s21726_s24  ;;  %2693 = vmatpush1.bf16.msra.mxu0 %v1066_v35 }
 0x11e   : > { %v994_v36 = vpop.permute.xlu0 %993 }
 0x11f   : > { %v1024_v37 = vpop.permute.xlu1 %1023 }
 0x120   : > { %1503 = vrot.lane.b32.xlu0 %v16548_v1, %s21726_s24  ;;  %v1038_v38 = vsel %vm1031_vm5, %v1024_v37, %v994_v36  ;;  %v1063_v39 = vsel %vm1031_vm5, %v994_v36, %v1024_v37 }
 0x121   : > { %1505 = vrot.lane.b32.xlu1 %v16562_v10, %s21726_s24  ;;  %2694 = vmatprep.subr.bf16.mxu0 %v1038_v38  ;;  %v1994_v38 = vld [vmem:[%s21808_s5 + $0x18] sm:$0xff] }
 0x122   : > { %2695 = vmatpush1.bf16.msra.mxu0 %v1063_v39 }
 0x124   : > { %1499 = vrot.lane.b32.xlu0 %v16578_v19, %s21726_s24 }
 0x125   : > { %1501 = vrot.lane.b32.xlu1 %v16574_v17, %s21726_s24 }
 0x126   : > { %v992_v40 = vpop.permute.xlu0 %991 }
 0x127   : > { %v1022_v41 = vpop.permute.xlu1 %1021 }
 0x128   : > { %1495 = vrot.lane.b32.xlu0 %v16599_v33, %s21726_s24  ;;  %v1037_v42 = vsel %vm1031_vm5, %v1022_v41, %v992_v40  ;;  %v1060_v44 = vsel %vm1031_vm5, %v992_v40, %v1022_v41  ;;  %v1993_v40 = vld [vmem:[%s21808_s5 + $0x10] sm:$0xff] }
 0x129   : > { %1497 = vrot.lane.b32.xlu1 %v16595_v31, %s21726_s24  ;;  %2696 = vmatprep.subr.bf16.mxu0 %v1037_v42 }
 0x12a   : > { %2697 = vmatpush1.bf16.msra.mxu0 %v1060_v44 }
 0x12c   : > { %1491 = vrot.lane.b32.xlu0 %v16620_v47, %s21726_s24 }
 0x12d   : > { %1493 = vrot.lane.b32.xlu1 %v16616_v45, %s21726_s24 }
 0x12e   : > { %v990_v48 = vpop.permute.xlu0 %989 }
 0x12f   : > { %v1020_v50 = vpop.permute.xlu1 %1019 }
 0x130   : > { %1487 = vrot.lane.b32.xlu0 %v16639_v61, %s21726_s24  ;;  %v1036_v52 = vsel %vm1031_vm5, %v1020_v50, %v990_v48  ;;  %v1057_v53 = vsel %vm1031_vm5, %v990_v48, %v1020_v50  ;;  %v1991_v50 = vld [vmem:[%s21808_s5] sm:$0xff] }
 0x131   : > { %1489 = vrot.lane.b32.xlu1 %v16635_v60, %s21726_s24  ;;  %2698 = vmatprep.subr.bf16.mxu0 %v1036_v52 }
 0x132   : > { %2699 = vmatpush1.bf16.msra.mxu0 %v1057_v53 }
 0x134   : > { %1483 = vrot.lane.b32.xlu0 %v16659_v14, %s21726_s24 }
 0x135   : > { %1485 = vrot.lane.b32.xlu1 %v16654_v12, %s21726_s24  ;;  %s21814_s24 = smov 126  }
 0x136   : > { %v988_v54 = vpop.permute.xlu0 %987 }
 0x137   : > { %v1018_v55 = vpop.permute.xlu1 %1017 }
 0x138   : > { %1695 = vrot.lane.b32.xlu0 %v16548_v1, %s21730_s21  ;;  %v1035_v56 = vsel %vm1031_vm5, %v1018_v55, %v988_v54  ;;  %v1054_v57 = vsel %vm1031_vm5, %v988_v54, %v1018_v55 }
 0x139   : > { %1697 = vrot.lane.b32.xlu1 %v16562_v10, %s21730_s21  ;;  %2700 = vmatprep.subr.bf16.mxu0 %v1035_v56 }
 0x13a   : > { %2701 = vmatpush1.bf16.msra.mxu0 %v1054_v57 }
 0x13c   : > { %1691 = vrot.lane.b32.xlu0 %v16578_v19, %s21730_s21 }
 0x13d   : > { %1693 = vrot.lane.b32.xlu1 %v16574_v17, %s21730_s21 }
 0x13e   : > { %v986_v58 = vpop.permute.xlu0 %985 }
 0x13f   : > { %v1016_v59 = vpop.permute.xlu1 %1015 }
 0x140   : > { %1687 = vrot.lane.b32.xlu0 %v16599_v33, %s21730_s21  ;;  %v1034_v62 = vsel %vm1031_vm5, %v1016_v59, %v986_v58  ;;  %v1051_v63 = vsel %vm1031_vm5, %v986_v58, %v1016_v59 }
 0x141   : > { %1689 = vrot.lane.b32.xlu1 %v16595_v31, %s21730_s21  ;;  %2702 = vmatprep.subr.bf16.mxu0 %v1034_v62  ;;  %v21753_v31 = vmov 0  }
 0x142   : > { %2703 = vmatpush1.bf16.msra.mxu0 %v1051_v63  ;;  %15891 = vset.pattern.permute.xlu1 %v21753_v31 }
 0x143   : > { %15890 = vset.pattern.permute.xlu0 %v21753_v31 }
 0x144   : > { %1683 = vrot.lane.b32.xlu0 %v16620_v47, %s21730_s21 }
 0x145   : > { %1685 = vrot.lane.b32.xlu1 %v16616_v45, %s21730_s21 }
 0x146   : > { %v984_v10 = vpop.permute.xlu0 %983 }
 0x147   : > { %v1014_v17 = vpop.permute.xlu1 %1013 }
 0x148   : > { %1679 = vrot.lane.b32.xlu0 %v16639_v61, %s21730_s21  ;;  %v1033_v0 = vsel %vm1031_vm5, %v1014_v17, %v984_v10  ;;  %v1048_v2 = vsel %vm1031_vm5, %v984_v10, %v1014_v17 }
 0x149   : > { %1681 = vrot.lane.b32.xlu1 %v16635_v60, %s21730_s21  ;;  %2704 = vmatprep.subr.bf16.mxu0 %v1033_v0 }
 0x14a   : > { %2705 = vmatpush1.bf16.msra.mxu0 %v1048_v2 }
 0x14c   : > { %1675 = vrot.lane.b32.xlu0 %v16659_v14, %s21730_s21 }
 0x14d   : > { %1677 = vrot.lane.b32.xlu1 %v16654_v12, %s21730_s21 }
 0x14e   : > { %v982_v45 = vpop.permute.xlu0 %981 }
 0x14f   : > { %v1012_v61 = vpop.permute.xlu1 %1011 }
 0x150   : > { %1671 = vrot.lane.b32.xlu0 %v16679_v34, %s21730_s21  ;;  %v1032_v60 = vsel %vm1031_vm5, %v1012_v61, %v982_v45  ;;  %v1045_v3 = vsel %vm1031_vm5, %v982_v45, %v1012_v61 }
 0x151   : > { %1673 = vrot.lane.b32.xlu1 %v16674_v30, %s21730_s21  ;;  %2706 = vmatprep.subr.bf16.mxu0 %v1032_v60 }
 0x152   : > { %2707 = vmatpush1.bf16.msra.mxu0 %v1045_v3  ;;  %v1194_v14 = vpop.permute.xlu0 %1193 }
 0x153   : > { %v1214_v5 = vpop.permute.xlu1 %1213 }
 0x154   : > { %1703 = vrot.lane.b32.xlu0 %v16745_v13, %s21730_s21  ;;  %v1229_v12 = vsel %vm1223_vm6, %v1214_v5, %v1194_v14  ;;  %v1252_v6 = vsel %vm1223_vm6, %v1194_v14, %v1214_v5  ;;  %v15892_v5 = vld [vmem:[%s21807_s4] ss:$28 sps:$4 sm:$0xff]  }
 0x155   : > { %1705 = vrot.lane.b32.xlu1 %v16739_v9, %s21730_s21  ;;  %2708 = vmatprep.subr.bf16.mxu0 %v1229_v12 }
 0x156   : > { %2709 = vmatpush2.bf16.msra.mxu0 %v1252_v6  ;;  %v1192_v34 = vpop.permute.xlu0 %1191  ;;  %v15898_v6 = vld [vmem:[%s21807_s4 + $0x3c] ss:$28 sps:$4 sm:$0xff]  }
 0x157   : > { %v1212_v8 = vpop.permute.xlu1 %1211 }
 0x158   : > { %1667 = vrot.lane.b32.xlu0 %v16699_v51, %s21730_s21  ;;  %v1228_v30 = vsel %vm1223_vm6, %v1212_v8, %v1192_v34  ;;  %v1249_v11 = vsel %vm1223_vm6, %v1192_v34, %v1212_v8  ;;  %v1997_v51 = vld [vmem:[%s21808_s5 + $0x30] sm:$0xff] }
 0x159   : > { %1669 = vrot.lane.b32.xlu1 %v16694_v49, %s21730_s21  ;;  %2710 = vmatprep.subr.bf16.mxu0 %v1228_v30 }
 0x15a   : > { %2711 = vmatpush2.bf16.msra.mxu0 %v1249_v11  ;;  %v1190_v16 = vpop.permute.xlu0 %1189 }
 0x15b   : > { %v1210_v18 = vpop.permute.xlu1 %1209 }
 0x15c   : > { %1699 = vrot.lane.b32.xlu0 %v16766_v25, %s21730_s21  ;;  %v1227_v9 = vsel %vm1223_vm6, %v1210_v18, %v1190_v16  ;;  %v1246_v20 = vsel %vm1223_vm6, %v1190_v16, %v1210_v18 }
 0x15d   : > { %1701 = vrot.lane.b32.xlu1 %v16761_v24, %s21730_s21  ;;  %2712 = vmatprep.subr.bf16.mxu0 %v1227_v9  ;;  %v1996_v24 = vld [vmem:[%s21808_s5 + $0x28] sm:$0xff]  ;;  %s21734_s5 = smov 5   ;;  %s21738_s21 = smov 3  }
 0x15e   : > { %2713 = vmatpush2.bf16.msra.mxu0 %v1246_v20  ;;  %v1188_v49 = vpop.permute.xlu0 %1187  ;;  %v15900_v20 = vld [vmem:[%s21807_s4 + $0x38] ss:$28 sps:$4 sm:$0xff]  }
 0x15f   : > { %v1208_v23 = vpop.permute.xlu1 %1207 }
 0x160   : > { %v1226_v26 = vsel %vm1223_vm6, %v1208_v23, %v1188_v49  ;;  %v1243_v27 = vsel %vm1223_vm6, %v1188_v49, %v1208_v23  ;;  %2031 = vperm.xlu0 %15890, %v1997_v51   ;;  %v15904_v49 = vld [vmem:[%s21807_s4 + $0x74] ss:$28 sps:$4 sm:$0xff]  }
 0x161   : > { %2714 = vmatprep.subr.bf16.mxu0 %v1226_v26  ;;  %2036 = vperm.xlu1 %15891, %v1998_v21  }
 0x162   : > { %2715 = vmatpush2.bf16.msra.mxu0 %v1243_v27  ;;  %v1186_v28 = vpop.permute.xlu0 %1185 }
 0x163   : > { %v1206_v35 = vpop.permute.xlu1 %1205 }
 0x164   : > { %v1225_v36 = vsel %vm1223_vm6, %v1206_v35, %v1186_v28  ;;  %v1240_v37 = vsel %vm1223_vm6, %v1186_v28, %v1206_v35  ;;  %2026 = vperm.xlu0 %15890, %v1996_v24   ;;  %v15906_v35 = vld [vmem:[%s21807_s4 + $0x70] ss:$28 sps:$4 sm:$0xff]  }
 0x165   : > { %2716 = vmatprep.subr.bf16.mxu0 %v1225_v36  ;;  %2021 = vperm.xlu1 %15891, %v1995_v32  }
 0x166   : > { %2717 = vmatpush2.bf16.msra.mxu0 %v1240_v37  ;;  %v1202_v39 = vpop.permute.xlu0 %1201  ;;  %v15910_v37 = vld [vmem:[%s21807_s4 + $0xac] ss:$28 sps:$4 sm:$0xff]  }
 0x167   : > { %v1222_v41 = vpop.permute.xlu1 %1221 }
 0x168   : > { %v1233_v42 = vsel %vm1223_vm6, %v1222_v41, %v1202_v39  ;;  %v1264_v44 = vsel %vm1223_vm6, %v1202_v39, %v1222_v41  ;;  %2016 = vperm.xlu0 %15890, %v1994_v38  }
 0x169   : > { %2773 = vmatprep.subr.bf16.mxu1 %v1233_v42  ;;  %2011 = vperm.xlu1 %15891, %v1993_v40  }
 0x16a   : > { %2774 = vmatpush1.bf16.msra.mxu1 %v1264_v44  ;;  %v1184_v48 = vpop.permute.xlu0 %1183 }
 0x16b   : > { %v1204_v52 = vpop.permute.xlu1 %1203 }
 0x16c   : > { %v1224_v53 = vsel %vm1223_vm6, %v1204_v52, %v1184_v48  ;;  %v1237_v54 = vsel %vm1223_vm6, %v1184_v48, %v1204_v52  ;;  %2006 = vperm.xlu0 %15890, %v1992_v46   ;;  %v15912_v48 = vld [vmem:[%s21807_s4 + $0xa8] ss:$28 sps:$4 sm:$0xff]  }
 0x16d   : > { %2718 = vmatprep.subr.bf16.mxu0 %v1224_v53  ;;  %2001 = vperm.xlu1 %15891, %v1991_v50  }
 0x16e   : > { %2719 = vmatpush2.bf16.msra.mxu0 %v1237_v54  ;;  %v1200_v55 = vpop.permute.xlu0 %1199 }
 0x16f   : > { %v1220_v56 = vpop.permute.xlu1 %1219 }
 0x170   : > { %v1232_v57 = vsel %vm1223_vm6, %v1220_v56, %v1200_v55  ;;  %v1261_v58 = vsel %vm1223_vm6, %v1200_v55, %v1220_v56 }
 0x171   : > { %2775 = vmatprep.subr.bf16.mxu1 %v1232_v57 }
 0x172   : > { %2776 = vmatpush1.bf16.msra.mxu1 %v1261_v58  ;;  %v1000_v59 = vpop.permute.xlu0 %999 }
 0x173   : > { %v1030_v62 = vpop.permute.xlu1 %1029 }
 0x174   : > { %v1041_v63 = vsel %vm1031_vm5, %v1030_v62, %v1000_v59  ;;  %v1072_v10 = vsel %vm1031_vm5, %v1000_v59, %v1030_v62 }
 0x175   : > { %2720 = vmatprep.subr.bf16.mxu0 %v1041_v63 }
 0x176   : > { %2721 = vmatpush2.bf16.msra.mxu0 %v1072_v10  ;;  %v1198_v17 = vpop.permute.xlu0 %1197 }
 0x177   : > { %v1218_v0 = vpop.permute.xlu1 %1217 }
 0x178   : > { %v1231_v2 = vsel %vm1223_vm6, %v1218_v0, %v1198_v17  ;;  %v1258_v45 = vsel %vm1223_vm6, %v1198_v17, %v1218_v0  ;;  %v15901_v0 = vld [vmem:[%s21807_s4 + $0x44] ss:$28 sps:$4 sm:$0xff]  }
 0x179   : > { %2777 = vmatprep.subr.bf16.mxu1 %v1231_v2 }
 0x17a   : > { %2778 = vmatpush1.bf16.msra.mxu1 %v1258_v45  ;;  %v998_v61 = vpop.permute.xlu0 %997 }
 0x17b   : > { %v1028_v60 = vpop.permute.xlu1 %1027 }
 0x17c   : > { %v1040_v3 = vsel %vm1031_vm5, %v1028_v60, %v998_v61  ;;  %v1069_v14 = vsel %vm1031_vm5, %v998_v61, %v1028_v60 }
 0x17d   : > { %2722 = vmatprep.subr.bf16.mxu0 %v1040_v3 }
 0x17e   : > { %2723 = vmatpush2.bf16.msra.mxu0 %v1069_v14  ;;  %v1196_v12 = vpop.permute.xlu0 %1195  ;;  %v15903_v14 = vld [vmem:[%s21807_s4 + $0x40] ss:$28 sps:$4 sm:$0xff]  }
 0x17f   : > { %v1216_v34 = vpop.permute.xlu1 %1215 }
 0x180   : > { %v1230_v8 = vsel %vm1223_vm6, %v1216_v34, %v1196_v12  ;;  %v1255_v30 = vsel %vm1223_vm6, %v1196_v12, %v1216_v34  ;;  %v15907_v12 = vld [vmem:[%s21807_s4 + $0x7c] ss:$28 sps:$4 sm:$0xff]  }
 0x181   : > { %2779 = vmatprep.subr.bf16.mxu1 %v1230_v8  ;;  %2725 = vmatmul.mubr.bf16.vlgmr.msra.gmra.mxu0 %v15892_v5 }
 0x182   : > { %2780 = vmatpush1.bf16.msra.mxu1 %v1255_v30  ;;  %v1512_v11 = vpop.permute.xlu0 %1511  ;;  %2734 = vmatprep.mubr.bf16.mxu0 %v15898_v6 }
 0x183   : > { %v1514_v16 = vpop.permute.xlu1 %1513 }
 0x184   : > { %v1556_v18 = vsel %vm1515_vm7, %v1514_v16, %v1512_v11  ;;  %v1525_v9 = vsel %vm1515_vm7, %v1512_v11, %v1514_v16 }
 0x185   : > { %2838 = vmatprep.subr.bf16.mxu0 %v1556_v18 }
 0x186   : > { %2839 = vmatpush1.bf16.msra.mxu0 %v1525_v9  ;;  %v1480_v51 = vpop.permute.xlu0 %1479  ;;  %v15909_v9 = vld [vmem:[%s21807_s4 + $0x78] ss:$28 sps:$4 sm:$0xff]  }
 0x187   : > { %v1482_v21 = vpop.permute.xlu1 %1481 }
 0x188   : > { %v1532_v23 = vsel %vm1515_vm7, %v1482_v21, %v1480_v51  ;;  %v1517_v26 = vsel %vm1515_vm7, %v1480_v51, %v1482_v21  ;;  %v15913_v51 = vld [vmem:[%s21807_s4 + $0xb4] ss:$28 sps:$4 sm:$0xff]  }
 0x189   : > { %2781 = vmatprep.subr.bf16.mxu1 %v1532_v23  ;;  %2735 = vmatmul.mubr.bf16.gmra.mxu0 %v15900_v20 }
 0x18a   : > { %2782 = vmatpush2.bf16.msra.mxu1 %v1517_v26  ;;  %v1508_v27 = vpop.permute.xlu0 %1507  ;;  %2744 = vmatprep.mubr.bf16.mxu0 %v15904_v49 }
 0x18b   : > { %v1510_v24 = vpop.permute.xlu1 %1509 }
 0x18c   : > { %v1553_v28 = vsel %vm1515_vm7, %v1510_v24, %v1508_v27  ;;  %v1524_v32 = vsel %vm1515_vm7, %v1508_v27, %v1510_v24 }
 0x18d   : > { %2840 = vmatprep.subr.bf16.mxu0 %v1553_v28 }
 0x18e   : > { %2841 = vmatpush1.bf16.msra.mxu0 %v1524_v32  ;;  %v1476_v36 = vpop.permute.xlu0 %1475  ;;  %v15915_v32 = vld [vmem:[%s21807_s4 + $0xb0] ss:$28 sps:$4 sm:$0xff]  }
 0x18f   : > { %v1478_v38 = vpop.permute.xlu1 %1477 }
 0x190   : > { %v1529_v39 = vsel %vm1515_vm7, %v1478_v38, %v1476_v36  ;;  %v1516_v40 = vsel %vm1515_vm7, %v1476_v36, %v1478_v38 }
 0x191   : > { %2783 = vmatprep.subr.bf16.mxu1 %v1529_v39  ;;  %2745 = vmatmul.mubr.bf16.gmra.mxu0 %v15906_v35 }
 0x192   : > { %2784 = vmatpush2.bf16.msra.mxu1 %v1516_v40  ;;  %v1504_v41 = vpop.permute.xlu0 %1503  ;;  %2754 = vmatprep.mubr.bf16.mxu0 %v15910_v37 }
 0x193   : > { %v1506_v42 = vpop.permute.xlu1 %1505  ;;  %15766 = vmatprep.subr.msk.bf16.mxu1 %vm890_vm4, %v16730_v4  ;;  %v15918_v4 = vld [vmem:[%s21807_s4 + $0x14] ss:$28 sps:$4 sm:$0xff]  }
 0x194   : > { %v1550_v44 = vsel %vm1515_vm7, %v1506_v42, %v1504_v41  ;;  %v1523_v46 = vsel %vm1515_vm7, %v1504_v41, %v1506_v42 }
 0x195   : > { %2842 = vmatprep.subr.bf16.mxu0 %v1550_v44 }
 0x196   : > { %2786 = vmatpush2.bf16.msra.mxu1 %v16745_v13  ;;  %2843 = vmatpush1.bf16.msra.mxu0 %v1523_v46  ;;  %v1500_v50 = vpop.permute.xlu0 %1499 }
 0x197   : > { %v1502_v52 = vpop.permute.xlu1 %1501  ;;  %15767 = vmatprep.subr.msk.bf16.mxu1 %vm890_vm4, %v16754_v22 }
 0x198   : > { %v1547_v53 = vsel %vm1515_vm7, %v1502_v52, %v1500_v50  ;;  %v1522_v54 = vsel %vm1515_vm7, %v1500_v50, %v1502_v52  ;;  %v15916_v52 = vld [vmem:[%s21807_s4 + $0x10] ss:$28 sps:$4 sm:$0xff]  }
 0x199   : > { %2844 = vmatprep.subr.bf16.mxu0 %v1547_v53  ;;  %2755 = vmatmul.mubr.bf16.gmra.mxu0 %v15912_v48  ;;  %v15920_v53 = vld [vmem:[%s21807_s4 + $0x4c] ss:$28 sps:$4 sm:$0xff]  }
 0x19a   : > { %2788 = vmatpush2.bf16.msra.mxu1 %v16766_v25  ;;  %2845 = vmatpush1.bf16.msra.mxu0 %v1522_v54  ;;  %v1496_v13 = vpop.permute.xlu0 %1495 }
 0x19b   : > { %v1498_v55 = vpop.permute.xlu1 %1497  ;;  %15768 = vmatprep.subr.msk.bf16.mxu1 %vm890_vm4, %v16556_v7  ;;  %2870 = vmatprep.mubr.bf16.mxu0 %v15918_v4 }
 0x19c   : > { %v1544_v22 = vsel %vm1515_vm7, %v1498_v55, %v1496_v13  ;;  %v1521_v56 = vsel %vm1515_vm7, %v1496_v13, %v1498_v55 }
 0x19d   : > { %2846 = vmatprep.subr.bf16.mxu0 %v1544_v22  ;;  %v15919_v22 = vld [vmem:[%s21807_s4 + $0x18] ss:$28 sps:$4 sm:$0xff]  }
 0x19e   : > { %2790 = vmatpush2.bf16.msra.mxu1 %v16548_v1  ;;  %2847 = vmatpush1.bf16.msra.mxu0 %v1521_v56  ;;  %v1492_v57 = vpop.permute.xlu0 %1491  ;;  %v15922_v56 = vld [vmem:[%s21807_s4 + $0x48] ss:$28 sps:$4 sm:$0xff]  }
 0x19f   : > { %v1494_v58 = vpop.permute.xlu1 %1493  ;;  %15769 = vmatprep.subr.msk.bf16.mxu1 %vm890_vm4, %v16570_v15 }
 0x1a0   : > { %v1541_v25 = vsel %vm1515_vm7, %v1494_v58, %v1492_v57  ;;  %v1520_v59 = vsel %vm1515_vm7, %v1492_v57, %v1494_v58  ;;  %v15924_v57 = vld [vmem:[%s21807_s4 + $0x84] ss:$28 sps:$4 sm:$0xff]   ;;  %v15923_v58 = vld [vmem:[%s21807_s4 + $0x50] ss:$28 sps:$4 sm:$0xff]  }
 0x1a1   : > { %2848 = vmatprep.subr.bf16.mxu0 %v1541_v25  ;;  %v15926_v25 = vld [vmem:[%s21807_s4 + $0x80] ss:$28 sps:$4 sm:$0xff]  }
 0x1a2   : > { %2792 = vmatpush2.bf16.msra.mxu1 %v16578_v19  ;;  %2849 = vmatpush1.bf16.msra.mxu0 %v1520_v59  ;;  %v1488_v7 = vpop.permute.xlu0 %1487  ;;  %v15928_v59 = vld [vmem:[%s21807_s4 + $0xbc] ss:$28 sps:$4 sm:$0xff]  }
 0x1a3   : > { %v1490_v62 = vpop.permute.xlu1 %1489  ;;  %15770 = vmatprep.subr.msk.bf16.mxu1 %vm890_vm4, %v16591_v29  ;;  %v15895_v29 = vld [vmem:[%s21807_s4 + $0x8] ss:$28 sps:$4 sm:$0xff]  }
 0x1a4   : > { %v1538_v1 = vsel %vm1515_vm7, %v1490_v62, %v1488_v7  ;;  %v1519_v63 = vsel %vm1515_vm7, %v1488_v7, %v1490_v62  ;;  %v15927_v7 = vld [vmem:[%s21807_s4 + $0x88] ss:$28 sps:$4 sm:$0xff]   ;;  %v15930_v62 = vld [vmem:[%s21807_s4 + $0xb8] ss:$28 sps:$4 sm:$0xff]  }
 0x1a5   : > { %2850 = vmatprep.subr.bf16.mxu0 %v1538_v1  ;;  %v15931_v1 = vld [vmem:[%s21807_s4 + $0xc0] ss:$28 sps:$4 sm:$0xff]   ;;  %s21740_s4 = smov 125  }
 0x1a6   : > { %2794 = vmatpush2.bf16.msra.mxu1 %v16599_v33  ;;  %2851 = vmatpush1.bf16.msra.mxu0 %v1519_v63  ;;  %v1484_v15 = vpop.permute.xlu0 %1483 }
 0x1a7   : > { %v1486_v10 = vpop.permute.xlu1 %1485  ;;  %15771 = vmatprep.subr.msk.bf16.mxu1 %vm890_vm4, %v16612_v43  ;;  %vm5658_vm4 = vcmask 56320  }
 0x1a8   : > { %v1535_v19 = vsel %vm1515_vm7, %v1486_v10, %v1484_v15  ;;  %v1518_v17 = vsel %vm1515_vm7, %v1484_v15, %v1486_v10 }
 0x1a9   : > { %2852 = vmatprep.subr.bf16.mxu0 %v1535_v19 }
 0x1aa   : > { %2796 = vmatpush2.bf16.msra.mxu1 %v16620_v47  ;;  %2853 = vmatpush1.bf16.msra.mxu0 %v1518_v17  ;;  %v1696_v33 = vpop.permute.xlu0 %1695 }
 0x1ab   : > { %v1698_v2 = vpop.permute.xlu1 %1697 }
 0x1ac   : > { %v1742_v43 = vsel %vm1707_vm8, %v1698_v2, %v1696_v33  ;;  %v1715_v45 = vsel %vm1707_vm8, %v1696_v33, %v1698_v2 }
 0x1ad   : > { %2798 = vmatmul.mubr.bf16.vlgmr.msra.gmra.mxu1 %v15895_v29  ;;  %2854 = vmatprep.subr.bf16.mxu0 %v1742_v43 }
 0x1ae   : > { %2855 = vmatpush2.bf16.msra.mxu0 %v1715_v45  ;;  %v1692_v61 = vpop.permute.xlu0 %1691  ;;  %2807 = vmatprep.mubr.bf16.mxu1 %v15901_v0 }
 0x1af   : > { %v1694_v60 = vpop.permute.xlu1 %1693 }
 0x1b0   : > { %v1739_v3 = vsel %vm1707_vm8, %v1694_v60, %v1692_v61  ;;  %v1714_v47 = vsel %vm1707_vm8, %v1692_v61, %v1694_v60 }
 0x1b1   : > { %2856 = vmatprep.subr.bf16.mxu0 %v1739_v3 }
 0x1b2   : > { %2857 = vmatpush2.bf16.msra.mxu0 %v1714_v47  ;;  %v1688_v5 = vpop.permute.xlu0 %1687 }
 0x1b3   : > { %v1690_v6 = vpop.permute.xlu1 %1689 }
 0x1b4   : > { %v1736_v34 = vsel %vm1707_vm8, %v1690_v6, %v1688_v5  ;;  %v1713_v8 = vsel %vm1707_vm8, %v1688_v5, %v1690_v6 }
 0x1b5   : > { %2808 = vmatmul.mubr.bf16.gmra.mxu1 %v15903_v14  ;;  %2858 = vmatprep.subr.bf16.mxu0 %v1736_v34 }
 0x1b6   : > { %2859 = vmatpush2.bf16.msra.mxu0 %v1713_v8  ;;  %v1684_v30 = vpop.permute.xlu0 %1683  ;;  %2817 = vmatprep.mubr.bf16.mxu1 %v15907_v12 }
 0x1b7   : > { %v1686_v11 = vpop.permute.xlu1 %1685 }
 0x1b8   : > { %v1733_v16 = vsel %vm1707_vm8, %v1686_v11, %v1684_v30  ;;  %v1712_v18 = vsel %vm1707_vm8, %v1684_v30, %v1686_v11 }
 0x1b9   : > { %2860 = vmatprep.subr.bf16.mxu0 %v1733_v16 }
 0x1ba   : > { %2861 = vmatpush2.bf16.msra.mxu0 %v1712_v18  ;;  %v1680_v20 = vpop.permute.xlu0 %1679 }
 0x1bb   : > { %v1682_v49 = vpop.permute.xlu1 %1681 }
 0x1bc   : > { %v1730_v21 = vsel %vm1707_vm8, %v1682_v49, %v1680_v20  ;;  %v1711_v23 = vsel %vm1707_vm8, %v1680_v20, %v1682_v49 }
 0x1bd   : > { %2818 = vmatmul.mubr.bf16.gmra.mxu1 %v15909_v9  ;;  %2862 = vmatprep.subr.bf16.mxu0 %v1730_v21 }
 0x1be   : > { %2863 = vmatpush2.bf16.msra.mxu0 %v1711_v23  ;;  %v1676_v26 = vpop.permute.xlu0 %1675  ;;  %2827 = vmatprep.mubr.bf16.mxu1 %v15913_v51 }
 0x1bf   : > { %v1678_v27 = vpop.permute.xlu1 %1677 }
 0x1c0   : > { %v1727_v24 = vsel %vm1707_vm8, %v1678_v27, %v1676_v26  ;;  %v1710_v28 = vsel %vm1707_vm8, %v1676_v26, %v1678_v27 }
 0x1c1   : > { %2864 = vmatprep.subr.bf16.mxu0 %v1727_v24 }
 0x1c2   : > { %2865 = vmatpush2.bf16.msra.mxu0 %v1710_v28  ;;  %v1672_v35 = vpop.permute.xlu0 %1671 }
 0x1c3   : > { %v1674_v36 = vpop.permute.xlu1 %1673 }
 0x1c4   : > { %v1724_v37 = vsel %vm1707_vm8, %v1674_v36, %v1672_v35  ;;  %v1709_v38 = vsel %vm1707_vm8, %v1672_v35, %v1674_v36  ;;  %v3001_v35 = vlaneseq }
 0x1c5   : > { %2828 = vmatmul.mubr.bf16.gmra.mxu1 %v15915_v32  ;;  %2866 = vmatprep.subr.bf16.mxu0 %v1724_v37 }
 0x1c6   : > { %2867 = vmatpush2.bf16.msra.mxu0 %v1709_v38  ;;  %v1704_v39 = vpop.permute.xlu0 %1703  ;;  %2943 = vmatprep.mubr.bf16.mxu1 %v21753_v31 }
 0x1c7   : > { %v1706_v40 = vpop.permute.xlu1 %1705 }
 0x1c8   : > { %v1748_v41 = vsel %vm1707_vm8, %v1706_v40, %v1704_v39  ;;  %v1717_v42 = vsel %vm1707_vm8, %v1704_v39, %v1706_v40 }
 0x1c9   : > { %2923 = vmatprep.subr.bf16.mxu1 %v1748_v41  ;;  %v17140_v41 = vshrl.u32 %v3001_v35, 7 }
 0x1ca   : > { %2924 = vmatpush1.bf16.msra.mxu1 %v1717_v42  ;;  %v1668_v44 = vpop.permute.xlu0 %1667 }
 0x1cb   : > { %v1670_v46 = vpop.permute.xlu1 %1669 }
 0x1cc   : > { %v1721_v48 = vsel %vm1707_vm8, %v1670_v46, %v1668_v44  ;;  %v1708_v50 = vsel %vm1707_vm8, %v1668_v44, %v1670_v46 }
 0x1cd   : > { %2868 = vmatprep.subr.bf16.mxu0 %v1721_v48 }
 0x1ce   : > { %2869 = vmatpush2.bf16.msra.mxu0 %v1708_v50  ;;  %v1700_v4 = vpop.permute.xlu0 %1699 }
 0x1cf   : > { %v1702_v54 = vpop.permute.xlu1 %1701 }
 0x1d0   : > { %v1745_v13 = vsel %vm1707_vm8, %v1702_v54, %v1700_v4  ;;  %v1716_v55 = vsel %vm1707_vm8, %v1700_v4, %v1702_v54 }
 0x1d1   : > { %2871 = vmatmul.mubr.bf16.vlgmr.msra.gmra.mxu0 %v15916_v52  ;;  %2925 = vmatprep.subr.bf16.mxu1 %v1745_v13  ;;  %v21756_v13 = vsub.s32 0, %v17140_v41 }
 0x1d2   : > { %2926 = vmatpush1.bf16.msra.mxu1 %v1716_v55  ;;  %2880 = vmatprep.mubr.bf16.mxu0 %v15920_v53 }
 0x1d5   : > { %14548 = vmatmul.mubr.msk.bf16.vlgmr.msra.gmra.mxu1 %vm2679_vm9, %v15919_v22 }
 0x1d6   : > { %2953 = vmatprep.mubr.bf16.mxu1 %v21753_v31 }
 0x1d9   : > { %2881 = vmatmul.mubr.bf16.gmra.mxu0 %v15922_v56 }
 0x1da   : > { %2890 = vmatprep.mubr.bf16.mxu0 %v15924_v57 }
 0x1db   : > { %v17110_v30 = vpop.permute.xlu0 %2031 }
 0x1dc   : > { %v17102_v12 = vpop.permute.xlu1 %2036 }
 0x1dd   : > { %14549 = vmatmul.mubr.msk.bf16.gmra.mxu1 %vm2679_vm9, %v15923_v58  ;;  %v580_v58 = vld [vmem:[%s21809_s25] sm:$0x3]  ;;  %s21742_s25 = smov 124  }
 0x1de   : > { %2963 = vmatprep.mubr.bf16.mxu1 %v21753_v31 }
 0x1df   : > { %v17124_v49 = vpop.permute.xlu0 %2026 }
 0x1e0   : > { %v17116_v18 = vpop.permute.xlu1 %2021 }
 0x1e1   : > { %2891 = vmatmul.mubr.bf16.gmra.mxu0 %v15926_v25 }
 0x1e2   : > { %2900 = vmatprep.mubr.bf16.mxu0 %v15928_v59 }
 0x1e3   : > { %v2017_v27 = vpop.permute.xlu0 %2016 }
 0x1e4   : > { %v17126_v21 = vpop.permute.xlu1 %2011 }
 0x1e5   : > { %14550 = vmatmul.mubr.msk.bf16.gmra.mxu1 %vm2679_vm9, %v15927_v7  ;;  %v21755_v7 = vsub.s32 1, %v17140_v41 }
 0x1e6   : > { %2973 = vmatprep.mubr.bf16.mxu1 %v21753_v31 }
 0x1e7   : > { %v2007_v39 = vpop.permute.xlu0 %2006 }
 0x1e8   : > { %v2002_v32 = vpop.permute.xlu1 %2001 }
 0x1e9   : > { %2901 = vmatmul.mubr.bf16.gmra.mxu0 %v15930_v62 }
 0x1ed   : > { %14551 = vmatmul.mubr.msk.bf16.gmra.mxu1 %vm2679_vm9, %v15931_v1  ;;  %vm8498_vm9 = vcmask 64512  }
 0x241   : > { %v2726_v63 = vpop.f32.mrf.mxu0 }
 0x242   : > { %v2727_v38 = vadd.f32 %v2726_v63, %v2002_v32 }
 0x243   : > { %v2728_v15 = vpop.f32.mrf.mxu0 }
 0x244   : > { %v2729_v44 = vadd.f32 %v2728_v15, %v2002_v32  ;;  %v17155_v32 = vrot.slane %v580_v58, %v21755_v7 }
 0x245   : > { %v2730_v10 = vpop.f32.mrf.mxu0 }
 0x246   : > { %v2731_v52 = vadd.f32 %v2730_v10, %v2007_v39  ;;  %21811 = vst [vmem:[#allocation15_spill] sm:$0xff] %v17155_v32 }
 0x247   : > { %v2732_v19 = vpop.f32.mrf.mxu0 }
 0x248   : > { %v2733_v55 = vadd.f32 %v2732_v19, %v2007_v39  ;;  %v17151_v19 = vrot.slane %v580_v58, %v21756_v13 }
 0x249   : > { %v17084_v17 = vpop.f32.mrf.mxu0 }
 0x24a   : > { %21810 = vst [vmem:[#allocation14_spill] sm:$0xff] %v17151_v19 }
 0x24b   : > { %v17086_v29 = vpop.f32.mrf.mxu0 }
 0x24d   : > { %v17088_v33 = vpop.f32.mrf.mxu0 }
 0x24e   : > { %v2741_v39 = vadd.f32 %v17088_v33, %v2017_v27 }
 0x24f   : > { %v17090_v43 = vpop.f32.mrf.mxu0 }
 0x251   : > { %v17092_v60 = vpop.f32.mrf.mxu0 }
 0x253   : > { %v17098_v14 = vpop.f32.mrf.mxu0 }
 0x255   : > { %v17106_v34 = vpop.f32.mrf.mxu0 }
 0x257   : > { %v17112_v11 = vpop.f32.mrf.mxu0 }
 0x259   : > { %v17120_v20 = vpop.f32.mrf.mxu0 }
 0x25b   : > { %v17128_v23 = vpop.f32.mrf.mxu0 }
 0x25d   : > { %v17132_v24 = vpop.f32.mrf.mxu0 }
 0x25f   : > { %v17136_v36 = vpop.f32.mrf.mxu0 }
 0x26d   : > { %v2799_v0 = vpop.f32.mrf.mxu1 }
 0x26e   : > { %v2800_v42 = vadd.f32 %v2799_v0, %v2727_v38 }
 0x26f   : > { %v2801_v2 = vpop.f32.mrf.mxu1 }
 0x270   : > { %v2802_v50 = vadd.f32 %v2801_v2, %v2729_v44 }
 0x271   : > { %v2803_v45 = vpop.f32.mrf.mxu1 }
 0x272   : > { %v2804_v22 = vadd.f32 %v2803_v45, %v2731_v52 }
 0x273   : > { %v2805_v61 = vpop.f32.mrf.mxu1 }
 0x274   : > { %v2806_v62 = vadd.f32 %v2805_v61, %v2733_v55 }
 0x275   : > { %v17094_v3 = vpop.f32.mrf.mxu1 }
 0x277   : > { %v17096_v47 = vpop.f32.mrf.mxu1 }
 0x279   : > { %v17100_v5 = vpop.f32.mrf.mxu1 }
 0x27b   : > { %v17104_v6 = vpop.f32.mrf.mxu1 }
 0x27d   : > { %v17108_v8 = vpop.f32.mrf.mxu1 }
 0x27f   : > { %v17114_v16 = vpop.f32.mrf.mxu1 }
 0x281   : > { %v17118_v9 = vpop.f32.mrf.mxu1 }
 0x283   : > { %v17122_v51 = vpop.f32.mrf.mxu1 }
 0x285   : > { %v17130_v26 = vpop.f32.mrf.mxu1 }
 0x287   : > { %v17134_v28 = vpop.f32.mrf.mxu1 }
 0x289   : > { %v17138_v37 = vpop.f32.mrf.mxu1 }
 0x28b   : > { %v17142_v46 = vpop.f32.mrf.mxu1 }
 0x291   : > { %v2872_v40 = vpop.f32.mrf.mxu0 }
 0x292   : > { %v2873_v4 = vadd.f32 %v2872_v40, %v2800_v42 }
 0x293   : > { %v2874_v48 = vpop.f32.mrf.mxu0 }
 0x294   : > { %v2875_v56 = vadd.f32 %v2874_v48, %v2802_v50  ;;  %v2737_v50 = vadd.f32 %v17084_v17, %v17126_v21 }
 0x295   : > { %v2876_v53 = vpop.f32.mrf.mxu0  ;;  %v2945_v54 = vpop.f32.mrf.mxu1 }
 0x296   : > { %v2946_v57 = vadd.f32 %v2945_v54, %v2873_v4  ;;  %v2877_v1 = vadd.f32 %v2876_v53, %v2804_v22  ;;  %v2814_v22 = vadd.f32 %v17100_v5, %v2741_v39  ;;  %v2810_v17 = vadd.f32 %v17094_v3, %v2737_v50 }
 0x297   : > { %v2878_v25 = vpop.f32.mrf.mxu0  ;;  %v2947_v59 = vpop.f32.mrf.mxu1  ;;  %v2739_v5 = vadd.f32 %v17086_v29, %v17126_v21  ;;  %v2753_v39 = vadd.f32 %v17112_v11, %v17124_v49  ;;  %v2761_v11 = vadd.f32 %v17132_v24, %v17102_v12 }
 0x298   : > { %v2948_v63 = vadd.f32 %v2947_v59, %v2875_v56  ;;  %v2984_v0 = vmax.f32 %v2946_v57, 0.0  ;;  %v2879_v2 = vadd.f32 %v2878_v25, %v2806_v62  ;;  %v2743_v59 = vadd.f32 %v17090_v43, %v2017_v27 }
 0x299   : > { %v2882_v15 = vpop.f32.mrf.mxu0  ;;  %v2949_v10 = vpop.f32.mrf.mxu1 }
 0x29a   : > { %v2950_v45 = vadd.f32 %v2949_v10, %v2877_v1  ;;  %v2985_v61 = vmax.f32 %v2948_v63, 0.0  ;;  %v3011_v52 = vmul.f32 %v17151_v19, %v2984_v0  ;;  %v2883_v0 = vadd.f32 %v2882_v15, %v2810_v17 }
 0x29b   : > { %v2884_v35 = vpop.f32.mrf.mxu0  ;;  %v2951_v38 = vpop.f32.mrf.mxu1  ;;  %v2816_v43 = vadd.f32 %v17104_v6, %v2743_v59  ;;  %v2749_v15 = vadd.f32 %v17098_v14, %v17116_v18  ;;  %v2751_v6 = vadd.f32 %v17106_v34, %v17124_v49  ;;  %v2763_v34 = vadd.f32 %v17136_v36, %v17102_v12 }
 0x29c   : > { %v2986_v40 = vmax.f32 %v2950_v45, 0.0  ;;  %v2952_v42 = vadd.f32 %v2951_v38, %v2879_v2  ;;  %v3012_v56 = vmul.f32 %v17155_v32, %v2985_v61  ;;  %v2812_v38 = vadd.f32 %v17096_v47, %v2739_v5 }
 0x29d   : > { %v2886_v44 = vpop.f32.mrf.mxu0  ;;  %v2955_v48 = vpop.f32.mrf.mxu1  ;;  %v2759_v47 = vadd.f32 %v17128_v23, %v17110_v30  ;;  %v2826_v23 = vadd.f32 %v17122_v51, %v2753_v39  ;;  %v2822_v24 = vadd.f32 %v17114_v16, %v2749_v15 }
 0x29e   : > { %v3013_v4 = vmul.f32 %v17151_v19, %v2986_v40  ;;  %v2987_v53 = vmax.f32 %v2952_v42, 0.0  ;;  %v2887_v1 = vadd.f32 %v2886_v44, %v2814_v22  ;;  %v2956_v27 = vadd.f32 %v2955_v48, %v2883_v0 }
 0x29f   : > { %v2888_v54 = vpop.f32.mrf.mxu0  ;;  %v2957_v55 = vpop.f32.mrf.mxu1  ;;  %v2757_v42 = vadd.f32 %v17120_v20, %v17110_v30  ;;  %v2885_v44 = vadd.f32 %v2884_v35, %v2812_v38  ;;  %v2747_v30 = vadd.f32 %v17092_v60, %v17116_v18  ;;  %v2832_v12 = vadd.f32 %v17134_v28, %v2759_v47 }
 0x2a0   : > { %v17164_v33 = vpack.c.bf16 %v3013_v4, %v3011_v52  ;;  %v3014_v57 = vmul.f32 %v17155_v32, %v2987_v53  ;;  %v2889_v61 = vadd.f32 %v2888_v54, %v2816_v43  ;;  %v2988_v50 = vmax.f32 %v2956_v27, 0.0 }
 0x2a1   : > { %v17167_v58 = vpop.f32.mrf.mxu0  ;;  %v2959_v25 = vpop.f32.mrf.mxu1  ;;  %v2958_v49 = vadd.f32 %v2957_v55, %v2885_v44  ;;  %v2824_v53 = vadd.f32 %v17118_v9, %v2751_v6  ;;  %v2830_v54 = vadd.f32 %v17130_v26, %v2757_v42  ;;  %v2834_v22 = vadd.f32 %v17138_v37, %v2761_v11 }
 0x2a2   : > { %v17171_v62 = vpack.c.bf16 %v3014_v57, %v3012_v56  ;;  %3129 = vrot.lane.b32.xlu0 %v17164_v33, %s21736_s20  ;;  %v2960_v2 = vadd.f32 %v2959_v25, %v2887_v1  ;;  %v3015_v60 = vmul.f32 %v17151_v19, %v2988_v50  ;;  %v2836_v56 = vadd.f32 %v17142_v46, %v2763_v34 }
 0x2a3   : > { %v2894_v63 = vpop.f32.mrf.mxu0  ;;  %v2961_v10 = vpop.f32.mrf.mxu1  ;;  %v2989_v16 = vmax.f32 %v2958_v49, 0.0  ;;  %v2820_v37 = vadd.f32 %v17108_v8, %v2747_v30 }
 0x2a4   : > { %3121 = vrot.lane.b32.xlu1 %v17171_v62, %s21736_s20  ;;  %v2990_v40 = vmax.f32 %v2960_v2, 0.0  ;;  %v2962_v52 = vadd.f32 %v2961_v10, %v2889_v61  ;;  %v2895_v28 = vadd.f32 %v2894_v63, %v2822_v24  ;;  %v15934_v24 = vld [vmem:[%s21816_s6 + $0x4] ss:$28 sps:$4 sm:$0xff]  }
 0x2a5   : > { %v2896_v3 = vpop.f32.mrf.mxu0  ;;  %v17179_v45 = vpop.f32.mrf.mxu1  ;;  %v3016_v63 = vmul.f32 %v17155_v32, %v2989_v16  ;;  %5131 = vmatprep.mubr.bf16.mxu1 %v15934_v24 }
 0x2a6   : > { %3051 = vrot.lane.b32.xlu0 %v17164_v33, %s21734_s5  ;;  %v3017_v35 = vmul.f32 %v17151_v19, %v2990_v40  ;;  %v2991_v18 = vmax.f32 %v2962_v52, 0.0  ;;  %v2897_v5 = vadd.f32 %v2896_v3, %v2824_v53 }
 0x2a7   : > { %v2898_v29 = vpop.f32.mrf.mxu0  ;;  %v2967_v21 = vpop.f32.mrf.mxu1 }
 0x2a8   : > { %3039 = vrot.lane.b32.xlu1 %v17171_v62, %s21734_s5  ;;  %v2899_v51 = vadd.f32 %v2898_v29, %v2826_v23  ;;  %v17218_v17 = vpack.c.bf16 %v3017_v35, %v3015_v60  ;;  %v3018_v46 = vmul.f32 %v17155_v32, %v2991_v18  ;;  %v2968_v43 = vadd.f32 %v2967_v21, %v2895_v28 }
 0x2a9   : > { %v2902_v48 = vpop.f32.mrf.mxu0  ;;  %v2969_v14 = vpop.f32.mrf.mxu1  ;;  %v2893_v29 = vadd.f32 %v17167_v58, %v2820_v37 }
 0x2aa   : > { %3361 = vrot.lane.b32.xlu0 %v17164_v33, %s21812_s22  ;;  %v2903_v57 = vadd.f32 %v2902_v48, %v2830_v54  ;;  %v2970_v15 = vadd.f32 %v2969_v14, %v2897_v5  ;;  %v17231_v42 = vpack.c.bf16 %v3018_v46, %v3016_v63  ;;  %v2993_v47 = vmax.f32 %v2968_v43, 0.0 }
 0x2ab   : > { %v2904_v4 = vpop.f32.mrf.mxu0  ;;  %v2971_v20 = vpop.f32.mrf.mxu1  ;;  %v2966_v21 = vadd.f32 %v17179_v45, %v2893_v29 }
 0x2ac   : > { %3353 = vrot.lane.b32.xlu1 %v17171_v62, %s21812_s22  ;;  %v2905_v9 = vadd.f32 %v2904_v4, %v2832_v12  ;;  %v2972_v59 = vadd.f32 %v2971_v20, %v2899_v51  ;;  %v2994_v58 = vmax.f32 %v2970_v15, 0.0  ;;  %v3020_v34 = vmul.f32 %v17155_v32, %v2993_v47  ;;  %v15937_v12 = vld [vmem:[%s21816_s6 + $0xc] ss:$28 sps:$4 sm:$0xff]  }
 0x2ad   : > { %v2906_v36 = vpop.f32.mrf.mxu0  ;;  %v2975_v55 = vpop.f32.mrf.mxu1  ;;  %v2992_v45 = vmax.f32 %v2966_v21, 0.0  ;;  %5244 = vmatprep.mubr.bf16.mxu0 %v15937_v12  ;;  %v4184_v12 = vld [vmem:[%s21817_s7 + $0x28] sm:$0xff] }
 0x2ae   : > { %3285 = vrot.lane.b32.xlu0 %v17164_v33, %s21813_s26  ;;  %v2907_v1 = vadd.f32 %v2906_v36, %v2834_v22  ;;  %v2976_v10 = vadd.f32 %v2975_v55, %v2903_v57  ;;  %v2995_v61 = vmax.f32 %v2972_v59, 0.0  ;;  %v3021_v4 = vmul.f32 %v17151_v19, %v2994_v58 }
 0x2af   : > { %v2908_v25 = vpop.f32.mrf.mxu0  ;;  %v2977_v26 = vpop.f32.mrf.mxu1  ;;  %v3019_v23 = vmul.f32 %v17151_v19, %v2992_v45  ;;  %v4186_v45 = vld [vmem:[%s21817_s7 + $0x38] sm:$0xff] }
 0x2b0   : > { %3277 = vrot.lane.b32.xlu1 %v17171_v62, %s21813_s26  ;;  %v2978_v0 = vadd.f32 %v2977_v26, %v2905_v9  ;;  %v2909_v27 = vadd.f32 %v2908_v25, %v2836_v56  ;;  %v2996_v6 = vmax.f32 %v2976_v10, 0.0  ;;  %v3022_v14 = vmul.f32 %v17155_v32, %v2995_v61 }
 0x2b1   : > { %v2979_v2 = vpop.f32.mrf.mxu1  ;;  %v17260_v35 = vpack.c.bf16 %v3021_v4, %v3019_v23 }
 0x2b2   : > { %v2980_v38 = vadd.f32 %v2979_v2, %v2907_v1  ;;  %3131 = vrot.lane.b32.xlu0 %v17218_v17, %s21736_s20  ;;  %v2997_v8 = vmax.f32 %v2978_v0, 0.0  ;;  %v3023_v52 = vmul.f32 %v17151_v19, %v2996_v6  ;;  %v17250_v30 = vpack.c.bf16 %v3022_v14, %v3020_v34 }
 0x2b3   : > { %v2981_v39 = vpop.f32.mrf.mxu1 }
 0x2b4   : > { %v2998_v3 = vmax.f32 %v2980_v38, 0.0  ;;  %v2982_v40 = vadd.f32 %v2981_v39, %v2909_v27  ;;  %3549 = vrot.lane.b32.xlu1 %v17218_v17, %s21814_s24  ;;  %v3024_v11 = vmul.f32 %v17155_v32, %v2997_v8 }
 0x2b6   : > { %v2999_v44 = vmax.f32 %v2982_v40, 0.0  ;;  %3053 = vrot.lane.b32.xlu0 %v17218_v17, %s21734_s5  ;;  %v3025_v48 = vmul.f32 %v17151_v19, %v2998_v3 }
 0x2b8   : > { %v3026_v50 = vmul.f32 %v17155_v32, %v2999_v44  ;;  %3123 = vrot.lane.b32.xlu1 %v17231_v42, %s21736_s20  ;;  %v17248_v20 = vpack.c.bf16 %v3025_v48, %v3023_v52 }
 0x2ba   : > { %v17243_v49 = vpack.c.bf16 %v3026_v50, %v3024_v11  ;;  %3363 = vrot.lane.b32.xlu0 %v17218_v17, %s21812_s22 }
 0x2bc   : > { %5212 = vmatprep.subr.bf16.mxu0 %v17243_v49  ;;  %3041 = vrot.lane.b32.xlu1 %v17231_v42, %s21734_s5 }
 0x2bd   : > { %5213 = vmatpush1.bf16.msra.mxu0 %v17248_v20 }
 0x2be   : > { %5214 = vmatprep.subr.bf16.mxu0 %v17250_v30  ;;  %3287 = vrot.lane.b32.xlu0 %v17218_v17, %s21813_s26 }
 0x2c0   : > { %3355 = vrot.lane.b32.xlu1 %v17231_v42, %s21812_s22 }
 0x2c1   : > { %5215 = vmatpush1.bf16.msra.mxu0 %v17260_v35 }
 0x2c2   : > { %5216 = vmatprep.subr.bf16.mxu0 %v17231_v42  ;;  %3551 = vrot.lane.b32.xlu0 %v17231_v42, %s21814_s24 }
 0x2c4   : > { %3279 = vrot.lane.b32.xlu1 %v17231_v42, %s21813_s26 }
 0x2c5   : > { %5217 = vmatpush1.bf16.msra.mxu0 %v17218_v17 }
 0x2c6   : > { %5218 = vmatprep.subr.bf16.mxu0 %v17171_v62  ;;  %3133 = vrot.lane.b32.xlu0 %v17260_v35, %s21736_s20 }
 0x2c8   : > { %3553 = vrot.lane.b32.xlu1 %v17260_v35, %s21814_s24 }
 0x2c9   : > { %5219 = vmatpush1.bf16.msra.mxu0 %v17164_v33 }
 0x2ca   : > { %3055 = vrot.lane.b32.xlu0 %v17260_v35, %s21734_s5 }
 0x2cc   : > { %3125 = vrot.lane.b32.xlu1 %v17250_v30, %s21736_s20 }
 0x2ce   : > { %3365 = vrot.lane.b32.xlu0 %v17260_v35, %s21812_s22 }
 0x2d0   : > { %3043 = vrot.lane.b32.xlu1 %v17250_v30, %s21734_s5 }
 0x2d2   : > { %3289 = vrot.lane.b32.xlu0 %v17260_v35, %s21813_s26 }
 0x2d4   : > { %3357 = vrot.lane.b32.xlu1 %v17250_v30, %s21812_s22 }
 0x2d6   : > { %3555 = vrot.lane.b32.xlu0 %v17250_v30, %s21814_s24 }
 0x2d8   : > { %3281 = vrot.lane.b32.xlu1 %v17250_v30, %s21813_s26 }
 0x2da   : > { %3135 = vrot.lane.b32.xlu0 %v17248_v20, %s21736_s20 }
 0x2dc   : > { %3557 = vrot.lane.b32.xlu1 %v17248_v20, %s21814_s24 }
 0x2de   : > { %3057 = vrot.lane.b32.xlu0 %v17248_v20, %s21734_s5 }
 0x2e0   : > { %3127 = vrot.lane.b32.xlu1 %v17243_v49, %s21736_s20  ;;  %s21746_s20 = smov 122  }
 0x2e2   : > { %3367 = vrot.lane.b32.xlu0 %v17248_v20, %s21812_s22 }
 0x2e4   : > { %3545 = vrot.lane.b32.xlu1 %v17164_v33, %s21814_s24 }
 0x2e6   : > { %3291 = vrot.lane.b32.xlu0 %v17248_v20, %s21813_s26 }
 0x2e8   : > { %3481 = vrot.lane.b32.xlu1 %v17248_v20, %s21815_s19 }
 0x2ea   : > { %3547 = vrot.lane.b32.xlu0 %v17171_v62, %s21814_s24 }
 0x2ec   : > { %3203 = vrot.lane.b32.xlu1 %v17250_v30, %s21738_s21 }
 0x2ee   : > { %3213 = vrot.lane.b32.xlu0 %v17248_v20, %s21738_s21 }
 0x2f0   : > { %3045 = vrot.lane.b32.xlu1 %v17243_v49, %s21734_s5  ;;  %s21744_s5 = smov 123  }
 0x2f2   : > { %3211 = vrot.lane.b32.xlu0 %v17260_v35, %s21738_s21 }
 0x2f4   : > { %3359 = vrot.lane.b32.xlu1 %v17243_v49, %s21812_s22 }
 0x2f6   : > { %3479 = vrot.lane.b32.xlu0 %v17250_v30, %s21815_s19 }
 0x2f8   : > { %3477 = vrot.lane.b32.xlu1 %v17260_v35, %s21815_s19 }
 0x2fa   : > { %3209 = vrot.lane.b32.xlu0 %v17218_v17, %s21738_s21 }
 0x2fc   : > { %3201 = vrot.lane.b32.xlu1 %v17231_v42, %s21738_s21 }
 0x2fe   : > { %3475 = vrot.lane.b32.xlu0 %v17231_v42, %s21815_s19 }
 0x300   : > { %3283 = vrot.lane.b32.xlu1 %v17243_v49, %s21813_s26 }
 0x302   : > { %3559 = vrot.lane.b32.xlu0 %v17243_v49, %s21814_s24 }
 0x304   : > { %3473 = vrot.lane.b32.xlu1 %v17218_v17, %s21815_s19 }
 0x306   : > { %3207 = vrot.lane.b32.xlu0 %v17164_v33, %s21738_s21 }
 0x308   : > { %3199 = vrot.lane.b32.xlu1 %v17171_v62, %s21738_s21 }
 0x30a   : > { %3471 = vrot.lane.b32.xlu0 %v17171_v62, %s21815_s19 }
 0x30c   : > { %3469 = vrot.lane.b32.xlu1 %v17164_v33, %s21815_s19 }
 0x30e   : > { %3709 = vrot.lane.b32.xlu0 %v17250_v30, %s21742_s25 }
 0x310   : > { %3205 = vrot.lane.b32.xlu1 %v17243_v49, %s21738_s21  ;;  %s21748_s21 = smov 121  }
 0x312   : > { %3483 = vrot.lane.b32.xlu0 %v17243_v49, %s21815_s19 }
 0x314   : > { %3711 = vrot.lane.b32.xlu1 %v17248_v20, %s21742_s25  ;;  %v17356_v53 = vpop.permute.xlu0 %3129 }
 0x316   : > { %v17358_v54 = vpop.permute.xlu1 %3121  ;;  %3705 = vrot.lane.b32.xlu0 %v17231_v42, %s21742_s25 }
 0x317   : > { %v3138_v11 = vsel %vm3137_vm10, %v17356_v53, %v17358_v54  ;;  %v3145_v34 = vsel %vm3137_vm10, %v17358_v54, %v17356_v53 }
 0x318   : > { %3707 = vrot.lane.b32.xlu1 %v17260_v35, %s21742_s25  ;;  %v17367_v36 = vpop.permute.xlu0 %3051 }
 0x31a   : > { %v17369_v55 = vpop.permute.xlu1 %3039  ;;  %3701 = vrot.lane.b32.xlu0 %v17171_v62, %s21742_s25 }
 0x31c   : > { %3703 = vrot.lane.b32.xlu1 %v17218_v17, %s21742_s25  ;;  %v17375_v22 = vpop.permute.xlu0 %3361 }
 0x31e   : > { %v17377_v60 = vpop.permute.xlu1 %3353  ;;  %3713 = vrot.lane.b32.xlu0 %v17243_v49, %s21742_s25 }
 0x320   : > { %3699 = vrot.lane.b32.xlu1 %v17164_v33, %s21742_s25  ;;  %v17383_v18 = vpop.permute.xlu0 %3285  ;;  %s21869_s25 = smov 124  }
 0x322   : > { %v17385_v51 = vpop.permute.xlu1 %3277  ;;  %3631 = vrot.lane.b32.xlu0 %v17250_v30, %s21740_s4 }
 0x324   : > { %3633 = vrot.lane.b32.xlu1 %v17248_v20, %s21740_s4  ;;  %v17391_v56 = vpop.permute.xlu0 %3131 }
 0x326   : > { %v17393_v16 = vpop.permute.xlu1 %3549  ;;  %3627 = vrot.lane.b32.xlu0 %v17231_v42, %s21740_s4 }
 0x328   : > { %3629 = vrot.lane.b32.xlu1 %v17260_v35, %s21740_s4  ;;  %v17399_v57 = vpop.permute.xlu0 %3053 }
 0x32a   : > { %v17401_v9 = vpop.permute.xlu1 %3123  ;;  %3623 = vrot.lane.b32.xlu0 %v17171_v62, %s21740_s4 }
 0x32b   : > { %v3139_v48 = vsel %vm3137_vm10, %v17391_v56, %v17401_v9 }
 0x32c   : > { %3625 = vrot.lane.b32.xlu1 %v17218_v17, %s21740_s4  ;;  %v17407_v25 = vpop.permute.xlu0 %3363 }
 0x32e   : > { %v17409_v26 = vpop.permute.xlu1 %3041  ;;  %3635 = vrot.lane.b32.xlu0 %v17243_v49, %s21740_s4 }
 0x330   : > { %3621 = vrot.lane.b32.xlu1 %v17164_v33, %s21740_s4  ;;  %v17415_v28 = vpop.permute.xlu0 %3287  ;;  %s21761_s4 = smov 6  }
 0x332   : > { %v17417_v59 = vpop.permute.xlu1 %3355  ;;  %3865 = vrot.lane.b32.xlu0 %v17250_v30, %s21746_s20 }
 0x334   : > { %3867 = vrot.lane.b32.xlu1 %v17248_v20, %s21746_s20  ;;  %v17423_v1 = vpop.permute.xlu0 %3551 }
 0x336   : > { %v17425_v37 = vpop.permute.xlu1 %3279  ;;  %3861 = vrot.lane.b32.xlu0 %v17231_v42, %s21746_s20 }
 0x338   : > { %3863 = vrot.lane.b32.xlu1 %v17260_v35, %s21746_s20  ;;  %v3134_v5 = vpop.permute.xlu0 %3133 }
 0x33a   : > { %v17431_v10 = vpop.permute.xlu1 %3553  ;;  %3857 = vrot.lane.b32.xlu0 %v17171_v62, %s21746_s20 }
 0x33c   : > { %3859 = vrot.lane.b32.xlu1 %v17218_v17, %s21746_s20  ;;  %v17437_v0 = vpop.permute.xlu0 %3055 }
 0x33e   : > { %v3126_v2 = vpop.permute.xlu1 %3125  ;;  %3869 = vrot.lane.b32.xlu0 %v17243_v49, %s21746_s20 }
 0x33f   : > { %v3140_v6 = vsel %vm3137_vm10, %v3134_v5, %v3126_v2  ;;  %v3151_v58 = vsel %vm3137_vm10, %v3126_v2, %v3134_v5  ;;  %v3061_v5 = vsel %vm3059_vm11, %v17399_v57, %v17409_v26  ;;  %v4183_v2 = vld [vmem:[%s21817_s7 + $0x20] sm:$0xff] }
 0x340   : > { %3855 = vrot.lane.b32.xlu1 %v17164_v33, %s21746_s20  ;;  %v17443_v46 = vpop.permute.xlu0 %3365  ;;  %s21859_s20 = smov 5  }
 0x342   : > { %v17445_v43 = vpop.permute.xlu1 %3043  ;;  %3787 = vrot.lane.b32.xlu0 %v17250_v30, %s21744_s5 }
 0x343   : > { %v3062_v23 = vsel %vm3059_vm11, %v17437_v0, %v17445_v43 }
 0x344   : > { %3789 = vrot.lane.b32.xlu1 %v17248_v20, %s21744_s5  ;;  %v17451_v27 = vpop.permute.xlu0 %3289 }
 0x346   : > { %v17453_v38 = vpop.permute.xlu1 %3357  ;;  %3943 = vrot.lane.b32.xlu0 %v17250_v30, %s21748_s21 }
 0x348   : > { %3945 = vrot.lane.b32.xlu1 %v17248_v20, %s21748_s21  ;;  %v17459_v63 = vpop.permute.xlu0 %3555 }
 0x34a   : > { %v17461_v29 = vpop.permute.xlu1 %3281  ;;  %3783 = vrot.lane.b32.xlu0 %v17231_v42, %s21744_s5 }
 0x34c   : > { %3785 = vrot.lane.b32.xlu1 %v17260_v35, %s21744_s5  ;;  %v3136_v15 = vpop.permute.xlu0 %3135 }
 0x34e   : > { %v17467_v39 = vpop.permute.xlu1 %3557  ;;  %3791 = vrot.lane.b32.xlu0 %v17243_v49, %s21744_s5 }
 0x350   : > { %3941 = vrot.lane.b32.xlu1 %v17260_v35, %s21748_s21  ;;  %v3058_v61 = vpop.permute.xlu0 %3057  ;;  %v4193_v35 = vld [vmem:[%s21817_s7 + $0x70] sm:$0xff] }
 0x352   : > { %v3128_v8 = vpop.permute.xlu1 %3127  ;;  %3947 = vrot.lane.b32.xlu0 %v17243_v49, %s21748_s21  ;;  %v4185_v49 = vld [vmem:[%s21817_s7 + $0x30] sm:$0xff] }
 0x353   : > { %v3141_v3 = vsel %vm3137_vm10, %v3136_v15, %v3128_v8  ;;  %v3154_v40 = vsel %vm3137_vm10, %v3128_v8, %v3136_v15  ;;  %v3070_v8 = vsel %vm3059_vm11, %v17409_v26, %v17399_v57  ;;  %v3370_v57 = vsel %vm1223_vm6, %v17407_v25, %v17417_v59  ;;  %v4182_v26 = vld [vmem:[%s21817_s7 + $0x18] sm:$0xff] }
 0x354   : > { %3781 = vrot.lane.b32.xlu1 %v17218_v17, %s21744_s5  ;;  %5099 = vmatprep.subr.bf16.mxu1 %v3141_v3  ;;  %v3368_v21 = vpop.permute.xlu0 %3367  ;;  %v3381_v3 = vsel %vm1223_vm6, %v17453_v38, %v17443_v46 }
 0x355   : > { %5100 = vmatpush1.bf16.msra.mxu1 %v3154_v40  ;;  %v3060_v40 = vsel %vm3059_vm11, %v17367_v36, %v17369_v55 }
 0x356   : > { %v17480_v47 = vpop.permute.xlu1 %3545  ;;  %3939 = vrot.lane.b32.xlu0 %v17231_v42, %s21748_s21  ;;  %5101 = vmatprep.subr.bf16.mxu1 %v3140_v6 }
 0x358   : > { %3937 = vrot.lane.b32.xlu1 %v17218_v17, %s21748_s21  ;;  %v17486_v44 = vpop.permute.xlu0 %3291  ;;  %v3148_v17 = vsel %vm3137_vm10, %v17401_v9, %v17391_v56  ;;  %v3073_v9 = vsel %vm3059_vm11, %v17445_v43, %v17437_v0  ;;  %v4192_v0 = vld [vmem:[%s21817_s7 + $0x68] sm:$0xff] }
 0x359   : > { %5102 = vmatpush1.bf16.msra.mxu1 %v3151_v58  ;;  %v3378_v58 = vsel %vm1223_vm6, %v17417_v59, %v17407_v25  ;;  %v4190_v25 = vld [vmem:[%s21817_s7 + $0x58] sm:$0xff] }
 0x35a   : > { %v17492_v14 = vpop.permute.xlu1 %3481  ;;  %3779 = vrot.lane.b32.xlu0 %v17171_v62, %s21744_s5  ;;  %5103 = vmatprep.subr.bf16.mxu1 %v3139_v48  ;;  %v3369_v48 = vsel %vm1223_vm6, %v17375_v22, %v17377_v60 }
 0x35c   : > { %3777 = vrot.lane.b32.xlu1 %v17164_v33, %s21744_s5  ;;  %v17498_v42 = vpop.permute.xlu0 %3547  ;;  %s21868_s5 = smov 122  }
 0x35d   : > { %5104 = vmatpush1.bf16.msra.mxu1 %v3148_v17  ;;  %v4181_v17 = vld [vmem:[%s21817_s7 + $0x10] sm:$0xff] }
 0x35e   : > { %v17506_v50 = vpop.permute.xlu1 %3203  ;;  %3935 = vrot.lane.b32.xlu0 %v17171_v62, %s21748_s21  ;;  %5105 = vmatprep.subr.bf16.mxu1 %v3138_v11 }
 0x360   : > { %3933 = vrot.lane.b32.xlu1 %v17164_v33, %s21748_s21  ;;  %v17515_v52 = vpop.permute.xlu0 %3213  ;;  %v4194_v33 = vld [vmem:[%s21817_s7 + $0x78] sm:$0xff]  ;;  %s21858_s21 = smov 4  }
 0x361   : > { %5106 = vmatpush1.bf16.msra.mxu1 %v3145_v34  ;;  %v3295_v34 = vsel %vm1031_vm5, %v17451_v27, %v17461_v29 }
 0x362   : > { %v3046_v62 = vpop.permute.xlu1 %3045  ;;  %4232 = vperm.xlu0 %15890, %v4186_v45   ;;  %v3375_v45 = vsel %vm1223_vm6, %v17377_v60, %v17375_v22  ;;  %v4180_v22 = vld [vmem:[%s21817_s7 + $0x8] sm:$0xff] }
 0x363   : > { %v3063_v4 = vsel %vm3059_vm11, %v3058_v61, %v3046_v62  ;;  %v3076_v20 = vsel %vm3059_vm11, %v3046_v62, %v3058_v61  ;;  %v3371_v61 = vsel %vm1223_vm6, %v17443_v46, %v17453_v38  ;;  %v3067_v38 = vsel %vm3059_vm11, %v17369_v55, %v17367_v36 }
 0x364   : > { %4227 = vperm.xlu1 %15891, %v4185_v49   ;;  %5107 = vmatprep.subr.bf16.mxu1 %v3063_v4  ;;  %v17528_v30 = vpop.permute.xlu0 %3211  ;;  %v4189_v49 = vld [vmem:[%s21817_s7 + $0x50] sm:$0xff]  ;;  %v3305_v4 = vsel %vm1031_vm5, %v17461_v29, %v17451_v27  ;;  %v3573_v27 = vsel %vm1707_vm8, %v17459_v63, %v17431_v10  ;;  %v4188_v29 = vld [vmem:[%s21817_s7 + $0x48] sm:$0xff] }
 0x365   : > { %5108 = vmatpush1.bf16.msra.mxu1 %v3076_v20 }
 0x366   : > { %v3360_v24 = vpop.permute.xlu1 %3359  ;;  %4272 = vperm.xlu0 %15890, %v4194_v33   ;;  %5109 = vmatprep.subr.bf16.mxu1 %v3062_v23  ;;  %v3294_v33 = vsel %vm1031_vm5, %v17415_v28, %v17425_v37  ;;  %v4179_v23 = vld [vmem:[%s21817_s7] sm:$0xff] }
 0x367   : > { %v3372_v53 = vsel %vm1223_vm6, %v3368_v21, %v3360_v24  ;;  %v3384_v54 = vsel %vm1223_vm6, %v3360_v24, %v3368_v21  ;;  %v4191_v21 = vld [vmem:[%s21817_s7 + $0x60] sm:$0xff]  ;;  %v3302_v24 = vsel %vm1031_vm5, %v17425_v37, %v17415_v28  ;;  %v3570_v28 = vsel %vm1707_vm8, %v17423_v1, %v17393_v16 }
 0x368   : > { %4267 = vperm.xlu1 %15891, %v4193_v35   ;;  %v17541_v56 = vpop.permute.xlu0 %3479  ;;  %5220 = vmatprep.subr.bf16.mxu0 %v3372_v53  ;;  %v3563_v53 = vsel %vm1707_vm8, %v17431_v10, %v17459_v63  ;;  %v3299_v10 = vsel %vm1031_vm5, %v17385_v51, %v17383_v18  ;;  %v3562_v63 = vsel %vm1707_vm8, %v17393_v16, %v17423_v1 }
 0x369   : > { %5110 = vmatpush1.bf16.msra.mxu1 %v3073_v9  ;;  %5221 = vmatpush1.bf16.msra.mxu0 %v3384_v54  ;;  %v3293_v54 = vsel %vm1031_vm5, %v17383_v18, %v17385_v51  ;;  %v3561_v51 = vsel %vm1707_vm8, %v17480_v47, %v17498_v42  ;;  %v3218_v16 = vsel %vm3215_vm12, %v17528_v30, %v17506_v50 }
 0x36a   : > { %v17552_v15 = vpop.permute.xlu1 %3477  ;;  %4222 = vperm.xlu0 %15890, %v4184_v12   ;;  %5111 = vmatprep.subr.bf16.mxu1 %v3061_v5  ;;  %v4187_v12 = vld [vmem:[%s21817_s7 + $0x40] sm:$0xff]  ;;  %v3567_v5 = vsel %vm1707_vm8, %v17498_v42, %v17480_v47  ;;  %s21839_s7 = sld [smem:[#allocation44_spill]] }
 0x36b   : > { %5222 = vmatprep.subr.bf16.mxu0 %v3371_v61 }
 0x36c   : > { %4217 = vperm.xlu1 %15891, %v4183_v2   ;;  %v17560_v43 = vpop.permute.xlu0 %3209 }
 0x36d   : > { %5112 = vmatpush1.bf16.msra.mxu1 %v3070_v8  ;;  %5223 = vmatpush1.bf16.msra.mxu0 %v3381_v3 }
 0x36e   : > { %v17574_v6 = vpop.permute.xlu1 %3201  ;;  %4262 = vperm.xlu0 %15890, %v4192_v0   ;;  %5113 = vmatprep.subr.bf16.mxu1 %v3060_v40  ;;  %v3497_v40 = vsel %vm1515_vm7, %v17541_v56, %v17552_v15 }
 0x36f   : > { %5224 = vmatprep.subr.bf16.mxu0 %v3370_v57  ;;  %v3217_v42 = vsel %vm3215_vm12, %v17560_v43, %v17574_v6 }
 0x370   : > { %4257 = vperm.xlu1 %15891, %v4191_v21   ;;  %v17582_v46 = vpop.permute.xlu0 %3475 }
 0x371   : > { %5114 = vmatpush1.bf16.msra.mxu1 %v3067_v38  ;;  %5225 = vmatpush1.bf16.msra.mxu0 %v3378_v58 }
 0x372   : > { %v3284_v11 = vpop.permute.xlu1 %3283  ;;  %4212 = vperm.xlu0 %15890, %v4182_v26   ;;  %5226 = vmatprep.subr.bf16.mxu0 %v3369_v48 }
 0x373   : > { %v3296_v36 = vsel %vm1031_vm5, %v17486_v44, %v3284_v11  ;;  %v3308_v55 = vsel %vm1031_vm5, %v3284_v11, %v17486_v44 }
 0x374   : > { %4207 = vperm.xlu1 %15891, %v4181_v17   ;;  %5115 = vmatprep.subr.bf16.mxu1 %v3296_v36  ;;  %v3560_v59 = vpop.permute.xlu0 %3559 }
 0x375   : > { %5116 = vmatpush2.bf16.msra.mxu1 %v3308_v55  ;;  %5227 = vmatpush1.bf16.msra.mxu0 %v3375_v45  ;;  %v3576_v44 = vsel %vm1707_vm8, %v3560_v59, %v17467_v39  ;;  %v3564_v20 = vsel %vm1707_vm8, %v17467_v39, %v3560_v59  ;;  %v15941_v45 = vld [vmem:[%s21816_s6 + $0x44] ss:$28 sps:$4 sm:$0xff]  }
 0x376   : > { %v17614_v62 = vpop.permute.xlu1 %3473  ;;  %4252 = vperm.xlu0 %15890, %v4190_v25   ;;  %5117 = vmatprep.subr.bf16.mxu1 %v3295_v34  ;;  %v15935_v25 = vld [vmem:[%s21816_s6 + $0x8] ss:$28 sps:$4 sm:$0xff]  }
 0x377   : > { %5228 = vmatprep.subr.bf16.mxu0 %v3576_v44  ;;  %v3494_v26 = vsel %vm1515_vm7, %v17582_v46, %v17614_v62 }
 0x378   : > { %4247 = vperm.xlu1 %15891, %v4189_v49   ;;  %v17619_v60 = vpop.permute.xlu0 %3207 }
 0x379   : > { %5118 = vmatpush2.bf16.msra.mxu1 %v3305_v4  ;;  %5229 = vmatpush2.bf16.msra.mxu0 %v3564_v20 }
 0x37a   : > { %v17632_v35 = vpop.permute.xlu1 %3199  ;;  %4202 = vperm.xlu0 %15890, %v4180_v22   ;;  %5119 = vmatprep.subr.bf16.mxu1 %v3294_v33 }
 0x37b   : > { %5230 = vmatprep.subr.bf16.mxu0 %v3573_v27  ;;  %v15947_v27 = vld [vmem:[%s21816_s6 + $0x7c] ss:$28 sps:$4 sm:$0xff]  }
 0x37c   : > { %4197 = vperm.xlu1 %15891, %v4179_v23   ;;  %v17640_v39 = vpop.permute.xlu0 %3471  ;;  %v15943_v23 = vld [vmem:[%s21816_s6 + $0x40] ss:$28 sps:$4 sm:$0xff]  }
 0x37d   : > { %5120 = vmatpush2.bf16.msra.mxu1 %v3302_v24  ;;  %5231 = vmatpush2.bf16.msra.mxu0 %v3563_v53  ;;  %v15946_v53 = vld [vmem:[%s21816_s6 + $0x70] ss:$28 sps:$4 sm:$0xff]  }
 0x37e   : > { %v17654_v9 = vpop.permute.xlu1 %3469  ;;  %4242 = vperm.xlu0 %15890, %v4188_v29   ;;  %5121 = vmatprep.subr.bf16.mxu1 %v3293_v54 }
 0x37f   : > { %5232 = vmatprep.subr.bf16.mxu0 %v3570_v28  ;;  %v3485_v36 = vsel %vm1515_vm7, %v17654_v9, %v17640_v39 }
 0x380   : > { %4237 = vperm.xlu1 %15891, %v4187_v12   ;;  %v17659_v37 = vpop.permute.xlu0 %3709  ;;  %v15950_v12 = vld [vmem:[%s21816_s6 + $0xac] ss:$28 sps:$4 sm:$0xff]  }
 0x381   : > { %5122 = vmatpush2.bf16.msra.mxu1 %v3299_v10  ;;  %5233 = vmatpush2.bf16.msra.mxu0 %v3562_v63  ;;  %v15949_v10 = vld [vmem:[%s21816_s6 + $0x78] ss:$28 sps:$4 sm:$0xff]  }
 0x382   : > { %v3206_v2 = vpop.permute.xlu1 %3205  ;;  %5234 = vmatprep.subr.bf16.mxu0 %v3567_v5  ;;  %v15953_v5 = vld [vmem:[%s21816_s6 + $0xb4] ss:$28 sps:$4 sm:$0xff]  }
 0x383   : > { %v3219_v61 = vsel %vm3215_vm12, %v17515_v52, %v3206_v2  ;;  %v3232_v0 = vsel %vm3215_vm12, %v3206_v2, %v17515_v52  ;;  %v3229_v52 = vsel %vm3215_vm12, %v17506_v50, %v17528_v30  ;;  %v3226_v50 = vsel %vm3215_vm12, %v17574_v6, %v17560_v43 }
 0x384   : > { %5123 = vmatprep.subr.bf16.mxu1 %v3219_v61  ;;  %v3484_v18 = vpop.permute.xlu0 %3483  ;;  %v3216_v30 = vsel %vm3215_vm12, %v17619_v60, %v17632_v35  ;;  %v3223_v43 = vsel %vm3215_vm12, %v17632_v35, %v17619_v60  ;;  %v3491_v6 = vsel %vm1515_vm7, %v17640_v39, %v17654_v9  ;;  %v15944_v60 = vld [vmem:[%s21816_s6 + $0x74] ss:$28 sps:$4 sm:$0xff]  }
 0x385   : > { %5124 = vmatpush2.bf16.msra.mxu1 %v3232_v0  ;;  %5235 = vmatpush2.bf16.msra.mxu0 %v3561_v51  ;;  %v3500_v1 = vsel %vm1515_vm7, %v3484_v18, %v17492_v14  ;;  %v3488_v47 = vsel %vm1515_vm7, %v17492_v14, %v3484_v18  ;;  %v3487_v14 = vsel %vm1515_vm7, %v17552_v15, %v17541_v56  ;;  %v15932_v15 = vld [vmem:[%s21816_s6] ss:$28 sps:$4 sm:$0xff]   ;;  %v15952_v18 = vld [vmem:[%s21816_s6 + $0xa8] ss:$28 sps:$4 sm:$0xff]  }
 0x386   : > { %v3712_v8 = vpop.permute.xlu1 %3711  ;;  %5125 = vmatprep.subr.bf16.mxu1 %v3218_v16  ;;  %5236 = vmatprep.subr.bf16.mxu0 %v3500_v1  ;;  %v3486_v56 = vsel %vm1515_vm7, %v17614_v62, %v17582_v46  ;;  %v15938_v46 = vld [vmem:[%s21816_s6 + $0x3c] ss:$28 sps:$4 sm:$0xff]   ;;  %v15956_v16 = vld [vmem:[%s21816_s6 + $0xe4] ss:$28 sps:$4 sm:$0xff]  }
 0x387   : > { %v15940_v62 = vld [vmem:[%s21816_s6 + $0x38] ss:$28 sps:$4 sm:$0xff]  }
 0x388   : > { %v3706_v3 = vpop.permute.xlu0 %3705 }
 0x389   : > { %5126 = vmatpush2.bf16.msra.mxu1 %v3229_v52  ;;  %5237 = vmatpush2.bf16.msra.mxu0 %v3488_v47  ;;  %v15955_v52 = vld [vmem:[%s21816_s6 + $0xb0] ss:$28 sps:$4 sm:$0xff]  }
 0x38a   : > { %v3708_v21 = vpop.permute.xlu1 %3707  ;;  %5127 = vmatprep.subr.bf16.mxu1 %v3217_v42  ;;  %5238 = vmatprep.subr.bf16.mxu0 %v3497_v40  ;;  %v15959_v42 = vld [vmem:[%s21816_s6 + $0xec] ss:$28 sps:$4 sm:$0xff]  }
 0x38b   : > { %v3729_v59 = vsel %vm3715_vm13, %v17659_v37, %v3708_v21  ;;  %v3718_v49 = vsel %vm3715_vm13, %v3708_v21, %v17659_v37 }
 0x38c   : > { %v3702_v57 = vpop.permute.xlu0 %3701 }
 0x38d   : > { %5128 = vmatpush2.bf16.msra.mxu1 %v3226_v50  ;;  %5239 = vmatpush2.bf16.msra.mxu0 %v3487_v14  ;;  %v15958_v50 = vld [vmem:[%s21816_s6 + $0xe0] ss:$28 sps:$4 sm:$0xff]  }
 0x38e   : > { %v3704_v38 = vpop.permute.xlu1 %3703  ;;  %5129 = vmatprep.subr.bf16.mxu1 %v3216_v30  ;;  %5240 = vmatprep.subr.bf16.mxu0 %v3494_v26  ;;  %v15962_v30 = vld [vmem:[%s21816_s6 + $0x11c] ss:$28 sps:$4 sm:$0xff]  }
 0x38f   : > { %v3726_v22 = vsel %vm3715_vm13, %v3706_v3, %v3704_v38  ;;  %v3717_v33 = vsel %vm3715_vm13, %v3704_v38, %v3706_v3 }
 0x390   : > { %v3714_v58 = vpop.permute.xlu0 %3713 }
 0x391   : > { %5130 = vmatpush2.bf16.msra.mxu1 %v3223_v43  ;;  %5241 = vmatpush2.bf16.msra.mxu0 %v3486_v56  ;;  %v3732_v48 = vsel %vm3715_vm13, %v3714_v58, %v3712_v8  ;;  %v3719_v55 = vsel %vm3715_vm13, %v3712_v8, %v3714_v58  ;;  %v15961_v43 = vld [vmem:[%s21816_s6 + $0xe8] ss:$28 sps:$4 sm:$0xff]  }
 0x392   : > { %v3700_v17 = vpop.permute.xlu1 %3699  ;;  %5242 = vmatprep.subr.bf16.mxu0 %v3491_v6  ;;  %5325 = vmatprep.subr.bf16.mxu1 %v3732_v48 }
 0x393   : > { %v3723_v35 = vsel %vm3715_vm13, %v3702_v57, %v3700_v17  ;;  %v3716_v24 = vsel %vm3715_vm13, %v3700_v17, %v3702_v57 }
 0x394   : > { %5132 = vmatmul.mubr.bf16.vlgmr.msra.gmra.mxu1 %v15932_v15  ;;  %v3632_v11 = vpop.permute.xlu0 %3631  ;;  %v15965_v15 = vld [vmem:[%s21816_s6 + $0x124] ss:$28 sps:$4 sm:$0xff]  }
 0x395   : > { %5243 = vmatpush2.bf16.msra.mxu0 %v3485_v36  ;;  %5326 = vmatpush1.bf16.msra.mxu1 %v3719_v55  ;;  %v15968_v36 = vld [vmem:[%s21816_s6 + $0x154] ss:$28 sps:$4 sm:$0xff]  }
 0x396   : > { %v3634_v34 = vpop.permute.xlu1 %3633  ;;  %5327 = vmatprep.subr.bf16.mxu1 %v3729_v59  ;;  %5141 = vmatprep.mubr.bf16.mxu1 %v15938_v46  ;;  %v15964_v46 = vld [vmem:[%s21816_s6 + $0x118] ss:$28 sps:$4 sm:$0xff]  }
 0x398   : > { %v3628_v44 = vpop.permute.xlu0 %3627  ;;  %5245 = vmatmul.mubr.bf16.vlgmr.msra.gmra.mxu0 %v15935_v25 }
 0x399   : > { %5328 = vmatpush1.bf16.msra.mxu1 %v3718_v49  ;;  %5254 = vmatprep.mubr.bf16.mxu0 %v15941_v45  ;;  %v15967_v45 = vld [vmem:[%s21816_s6 + $0x120] ss:$28 sps:$4 sm:$0xff]  }
 0x39a   : > { %v3630_v4 = vpop.permute.xlu1 %3629  ;;  %5329 = vmatprep.subr.bf16.mxu1 %v3726_v22 }
 0x39b   : > { %v3651_v63 = vsel %vm3637_vm14, %v3632_v11, %v3630_v4  ;;  %v3640_v0 = vsel %vm3637_vm14, %v3630_v4, %v3632_v11 }
 0x39c   : > { %5142 = vmatmul.mubr.bf16.gmra.mxu1 %v15940_v62  ;;  %v3624_v20 = vpop.permute.xlu0 %3623 }
 0x39d   : > { %5330 = vmatpush1.bf16.msra.mxu1 %v3717_v33  ;;  %5151 = vmatprep.mubr.bf16.mxu1 %v15944_v60  ;;  %v15970_v60 = vld [vmem:[%s21816_s6 + $0x150] ss:$28 sps:$4 sm:$0xff]  }
 0x39e   : > { %v3626_v29 = vpop.permute.xlu1 %3625  ;;  %5331 = vmatprep.subr.bf16.mxu1 %v3723_v35 }
 0x39f   : > { %v3648_v51 = vsel %vm3637_vm14, %v3628_v44, %v3626_v29  ;;  %v3639_v3 = vsel %vm3637_vm14, %v3626_v29, %v3628_v44  ;;  %v15971_v44 = vld [vmem:[%s21816_s6 + $0x15c] ss:$28 sps:$4 sm:$0xff]  }
 0x3a0   : > { %v3636_v39 = vpop.permute.xlu0 %3635  ;;  %5255 = vmatmul.mubr.bf16.gmra.mxu0 %v15943_v23 }
 0x3a1   : > { %5332 = vmatpush1.bf16.msra.mxu1 %v3716_v24  ;;  %v3654_v54 = vsel %vm3637_vm14, %v3636_v39, %v3634_v34  ;;  %5264 = vmatprep.mubr.bf16.mxu0 %v15947_v27  ;;  %v3641_v37 = vsel %vm3637_vm14, %v3634_v34, %v3636_v39  ;;  %v15973_v27 = vld [vmem:[%s21816_s6 + $0x158] ss:$28 sps:$4 sm:$0xff]  }
 0x3a2   : > { %v3622_v9 = vpop.permute.xlu1 %3621  ;;  %5333 = vmatprep.subr.bf16.mxu1 %v3654_v54 }
 0x3a3   : > { %v3645_v47 = vsel %vm3637_vm14, %v3624_v20, %v3622_v9  ;;  %v3638_v57 = vsel %vm3637_vm14, %v3622_v9, %v3624_v20  ;;  %v15974_v20 = vld [vmem:[%s21816_s6 + $0x18c] ss:$28 sps:$4 sm:$0xff]  }
 0x3a4   : > { %5152 = vmatmul.mubr.bf16.gmra.mxu1 %v15946_v53  ;;  %v3866_v28 = vpop.permute.xlu0 %3865  ;;  %v15977_v53 = vld [vmem:[%s21816_s6 + $0x194] ss:$28 sps:$4 sm:$0xff]  }
 0x3a5   : > { %5334 = vmatpush1.bf16.msra.mxu1 %v3641_v37  ;;  %5161 = vmatprep.mubr.bf16.mxu1 %v15950_v12  ;;  %v15976_v37 = vld [vmem:[%s21816_s6 + $0x188] ss:$28 sps:$4 sm:$0xff]  }
 0x3a6   : > { %v3868_v2 = vpop.permute.xlu1 %3867  ;;  %5335 = vmatprep.subr.bf16.mxu1 %v3651_v63  ;;  %v15982_v63 = vld [vmem:[%s21816_s6 + $0x14] ss:$28 sps:$4 sm:$0xff]  }
 0x3a8   : > { %v3862_v61 = vpop.permute.xlu0 %3861  ;;  %5265 = vmatmul.mubr.bf16.gmra.mxu0 %v15949_v10 }
 0x3a9   : > { %5336 = vmatpush1.bf16.msra.mxu1 %v3640_v0  ;;  %5274 = vmatprep.mubr.bf16.mxu0 %v15953_v5 }
 0x3aa   : > { %v3864_v1 = vpop.permute.xlu1 %3863  ;;  %5337 = vmatprep.subr.bf16.mxu1 %v3648_v51  ;;  %v15979_v51 = vld [vmem:[%s21816_s6 + $0x190] ss:$28 sps:$4 sm:$0xff]  }
 0x3ab   : > { %v3885_v56 = vsel %vm3871_vm15, %v3866_v28, %v3864_v1  ;;  %v3874_v17 = vsel %vm3871_vm15, %v3864_v1, %v3866_v28 }
 0x3ac   : > { %5162 = vmatmul.mubr.bf16.gmra.mxu1 %v15952_v18  ;;  %v3858_v8 = vpop.permute.xlu0 %3857 }
 0x3ad   : > { %5338 = vmatpush1.bf16.msra.mxu1 %v3639_v3  ;;  %5171 = vmatprep.mubr.bf16.mxu1 %v15956_v16 }
 0x3ae   : > { %v3860_v40 = vpop.permute.xlu1 %3859  ;;  %5339 = vmatprep.subr.bf16.mxu1 %v3645_v47  ;;  %v15984_v47 = vld [vmem:[%s21816_s6 + $0x4c] ss:$28 sps:$4 sm:$0xff]  }
 0x3af   : > { %v3882_v11 = vsel %vm3871_vm15, %v3862_v61, %v3860_v40  ;;  %v3873_v59 = vsel %vm3871_vm15, %v3860_v40, %v3862_v61 }
 0x3b0   : > { %v3870_v21 = vpop.permute.xlu0 %3869  ;;  %5275 = vmatmul.mubr.bf16.gmra.mxu0 %v15955_v52  ;;  %v15980_v52 = vld [vmem:[%s21816_s6 + $0x10] ss:$28 sps:$4 sm:$0xff]  }
 0x3b1   : > { %5340 = vmatpush1.bf16.msra.mxu1 %v3638_v57  ;;  %v3888_v14 = vsel %vm3871_vm15, %v3870_v21, %v3868_v2  ;;  %5284 = vmatprep.mubr.bf16.mxu0 %v15959_v42  ;;  %v3875_v58 = vsel %vm3871_vm15, %v3868_v2, %v3870_v21 }
 0x3b2   : > { %v3856_v26 = vpop.permute.xlu1 %3855  ;;  %5341 = vmatprep.subr.bf16.mxu1 %v3888_v14  ;;  %v15986_v14 = vld [vmem:[%s21816_s6 + $0x48] ss:$28 sps:$4 sm:$0xff]  }
 0x3b3   : > { %v3879_v34 = vsel %vm3871_vm15, %v3858_v8, %v3856_v26  ;;  %v3872_v22 = vsel %vm3871_vm15, %v3856_v26, %v3858_v8  ;;  %v15987_v26 = vld [vmem:[%s21816_s6 + $0x50] ss:$28 sps:$4 sm:$0xff]  }
 0x3b4   : > { %5172 = vmatmul.mubr.bf16.gmra.mxu1 %v15958_v50  ;;  %v3788_v38 = vpop.permute.xlu0 %3787  ;;  %v15983_v50 = vld [vmem:[%s21816_s6 + $0x18] ss:$28 sps:$4 sm:$0xff]  }
 0x3b5   : > { %5342 = vmatpush2.bf16.msra.mxu1 %v3875_v58  ;;  %5181 = vmatprep.mubr.bf16.mxu1 %v15962_v30  ;;  %v15988_v30 = vld [vmem:[%s21816_s6 + $0x84] ss:$28 sps:$4 sm:$0xff]   ;;  %v15992_v58 = vld [vmem:[%s21816_s6 + $0xbc] ss:$28 sps:$4 sm:$0xff]  }
 0x3b6   : > { %v3790_v6 = vpop.permute.xlu1 %3789  ;;  %5343 = vmatprep.subr.bf16.mxu1 %v3885_v56  ;;  %v15994_v56 = vld [vmem:[%s21816_s6 + $0xb8] ss:$28 sps:$4 sm:$0xff]  }
 0x3b8   : > { %v3944_v48 = vpop.permute.xlu0 %3943  ;;  %5285 = vmatmul.mubr.bf16.gmra.mxu0 %v15961_v43  ;;  %v15991_v43 = vld [vmem:[%s21816_s6 + $0x88] ss:$28 sps:$4 sm:$0xff]  }
 0x3b9   : > { %5344 = vmatpush2.bf16.msra.mxu1 %v3874_v17  ;;  %5294 = vmatprep.mubr.bf16.mxu0 %v15965_v15  ;;  %v15996_v15 = vld [vmem:[%s21816_s6 + $0xf4] ss:$28 sps:$4 sm:$0xff]   ;;  %v16000_v17 = vld [vmem:[%s21816_s6 + $0x12c] ss:$28 sps:$4 sm:$0xff]  }
 0x3ba   : > { %v3946_v55 = vpop.permute.xlu1 %3945  ;;  %5345 = vmatprep.subr.bf16.mxu1 %v3882_v11  ;;  %v16002_v11 = vld [vmem:[%s21816_s6 + $0x128] ss:$28 sps:$4 sm:$0xff]  }
 0x3bc   : > { %5182 = vmatmul.mubr.bf16.gmra.mxu1 %v15964_v46  ;;  %v3784_v25 = vpop.permute.xlu0 %3783  ;;  %v15999_v46 = vld [vmem:[%s21816_s6 + $0xf8] ss:$28 sps:$4 sm:$0xff]  }
 0x3bd   : > { %5346 = vmatpush2.bf16.msra.mxu1 %v3873_v59  ;;  %5191 = vmatprep.mubr.bf16.mxu1 %v15968_v36  ;;  %v16004_v36 = vld [vmem:[%s21816_s6 + $0x164] ss:$28 sps:$4 sm:$0xff]   ;;  %v16008_v59 = vld [vmem:[%s21816_s6 + $0x19c] ss:$28 sps:$4 sm:$0xff]  }
 0x3be   : > { %v3786_v49 = vpop.permute.xlu1 %3785  ;;  %5347 = vmatprep.subr.bf16.mxu1 %v3879_v34  ;;  %v16010_v34 = vld [vmem:[%s21816_s6 + $0x198] ss:$28 sps:$4 sm:$0xff]  }
 0x3bf   : > { %v3807_v29 = vsel %vm3793_vm0, %v3788_v38, %v3786_v49  ;;  %v3796_v28 = vsel %vm3793_vm0, %v3786_v49, %v3788_v38  ;;  %v15990_v38 = vld [vmem:[%s21816_s6 + $0x80] ss:$28 sps:$4 sm:$0xff]  }
 0x3c0   : > { %v3792_v62 = vpop.permute.xlu0 %3791  ;;  %5295 = vmatmul.mubr.bf16.gmra.mxu0 %v15967_v45  ;;  %v16007_v45 = vld [vmem:[%s21816_s6 + $0x168] ss:$28 sps:$4 sm:$0xff]  }
 0x3c1   : > { %5348 = vmatpush2.bf16.msra.mxu1 %v3872_v22  ;;  %v3810_v4 = vsel %vm3793_vm0, %v3792_v62, %v3790_v6  ;;  %5304 = vmatprep.mubr.bf16.mxu0 %v15971_v44  ;;  %v3797_v35 = vsel %vm3793_vm0, %v3790_v6, %v3792_v62  ;;  %v15995_v6 = vld [vmem:[%s21816_s6 + $0xc0] ss:$28 sps:$4 sm:$0xff]  }
 0x3c2   : > { %v3942_v33 = vpop.permute.xlu1 %3941  ;;  %5349 = vmatprep.subr.bf16.mxu1 %v3810_v4  ;;  %v16011_v44 = vld [vmem:[%s21816_s6 + $0x1a0] ss:$28 sps:$4 sm:$0xff]  }
 0x3c3   : > { %v3963_v12 = vsel %vm3949_vm1, %v3944_v48, %v3942_v33  ;;  %v3952_v2 = vsel %vm3949_vm1, %v3942_v33, %v3944_v48  ;;  %v15998_v48 = vld [vmem:[%s21816_s6 + $0xf0] ss:$28 sps:$4 sm:$0xff]  }
 0x3c4   : > { %5192 = vmatmul.mubr.bf16.gmra.mxu1 %v15970_v60  ;;  %v3948_v23 = vpop.permute.xlu0 %3947 }
 0x3c5   : > { %5350 = vmatpush2.bf16.msra.mxu1 %v3797_v35  ;;  %v3966_v39 = vsel %vm3949_vm1, %v3948_v23, %v3946_v55  ;;  %v3953_v24 = vsel %vm3949_vm1, %v3946_v55, %v3948_v23  ;;  %5201 = vmatprep.mubr.bf16.mxu1 %v15974_v20  ;;  %v16003_v55 = vld [vmem:[%s21816_s6 + $0x130] ss:$28 sps:$4 sm:$0xff]  }
 0x3c6   : > { %v3782_v54 = vpop.permute.xlu1 %3781  ;;  %5351 = vmatprep.subr.bf16.mxu1 %v3807_v29  ;;  %5446 = vmatprep.subr.bf16.mxu0 %v3966_v39 }
 0x3c7   : > { %5447 = vmatpush1.bf16.msra.mxu0 %v3953_v24  ;;  %v3804_v10 = vsel %vm3793_vm0, %v3784_v25, %v3782_v54  ;;  %v3795_v18 = vsel %vm3793_vm0, %v3782_v54, %v3784_v25  ;;  %v16006_v25 = vld [vmem:[%s21816_s6 + $0x160] ss:$28 sps:$4 sm:$0xff]   ;;  %s21874_s6 = smov 125  }
 0x3c8   : > { %v3940_v9 = vpop.permute.xlu0 %3939  ;;  %5305 = vmatmul.mubr.bf16.gmra.mxu0 %v15973_v27  ;;  %5448 = vmatprep.subr.bf16.mxu0 %v3963_v12 }
 0x3c9   : > { %5352 = vmatpush2.bf16.msra.mxu1 %v3796_v28  ;;  %5314 = vmatprep.mubr.bf16.mxu0 %v15977_v53 }
 0x3ca   : > { %v3938_v5 = vpop.permute.xlu1 %3937  ;;  %5353 = vmatprep.subr.bf16.mxu1 %v3804_v10 }
 0x3cb   : > { %5449 = vmatpush1.bf16.msra.mxu0 %v3952_v2  ;;  %v3960_v61 = vsel %vm3949_vm1, %v3940_v9, %v3938_v5  ;;  %v3951_v1 = vsel %vm3949_vm1, %v3938_v5, %v3940_v9 }
 0x3cc   : > { %5202 = vmatmul.mubr.bf16.gmra.mxu1 %v15976_v37  ;;  %v3780_v0 = vpop.permute.xlu0 %3779  ;;  %5450 = vmatprep.subr.bf16.mxu0 %v3960_v61 }
 0x3cd   : > { %5354 = vmatpush2.bf16.msra.mxu1 %v3795_v18  ;;  %5357 = vmatprep.mubr.bf16.mxu1 %v15982_v63 }
 0x3ce   : > { %v3778_v16 = vpop.permute.xlu1 %3777 }
 0x3cf   : > { %5451 = vmatpush1.bf16.msra.mxu0 %v3951_v1  ;;  %v3801_v8 = vsel %vm3793_vm0, %v3780_v0, %v3778_v16  ;;  %v3794_v3 = vsel %vm3793_vm0, %v3778_v16, %v3780_v0 }
 0x3d0   : > { %5355 = vmatprep.subr.bf16.mxu1 %v3801_v8  ;;  %5315 = vmatmul.mubr.bf16.gmra.mxu0 %v15979_v51  ;;  %v3936_v42 = vpop.permute.xlu0 %3935 }
 0x3d1   : > { %5356 = vmatpush2.bf16.msra.mxu1 %v3794_v3  ;;  %5470 = vmatprep.mubr.bf16.mxu0 %v21753_v31 }
 0x3d2   : > { %v3934_v40 = vpop.permute.xlu1 %3933 }
 0x3d3   : > { %v3957_v21 = vsel %vm3949_vm1, %v3936_v42, %v3934_v40  ;;  %v3950_v57 = vsel %vm3949_vm1, %v3934_v40, %v3936_v42 }
 0x3d4   : > { %5358 = vmatmul.mubr.bf16.vlgmr.msra.gmra.mxu1 %v15980_v52  ;;  %5452 = vmatprep.subr.bf16.mxu0 %v3957_v21 }
 0x3d5   : > { %5453 = vmatpush1.bf16.msra.mxu0 %v3950_v57  ;;  %5367 = vmatprep.mubr.bf16.mxu1 %v15984_v47 }
 0x3d8   : > { %14816 = vmatmul.mubr.msk.bf16.vlgmr.msra.gmra.mxu0 %vm858_vm2, %v15983_v50 }
 0x3d9   : > { %5480 = vmatprep.mubr.bf16.mxu0 %v21753_v31 }
 0x3dc   : > { %5368 = vmatmul.mubr.bf16.gmra.mxu1 %v15986_v14 }
 0x3dd   : > { %5377 = vmatprep.mubr.bf16.mxu1 %v15988_v30  ;;  %v17937_v62 = vpop.permute.xlu0 %4232 }
 0x3df   : > { %v4228_v49 = vpop.permute.xlu1 %4227 }
 0x3e0   : > { %14817 = vmatmul.mubr.msk.bf16.gmra.mxu0 %vm858_vm2, %v15987_v26 }
 0x3e1   : > { %5490 = vmatprep.mubr.bf16.mxu0 %v21753_v31  ;;  %v17941_v60 = vpop.permute.xlu0 %4272 }
 0x3e2   : > { %21818 = vst [vmem:[#allocation16_spill] sm:$0xff] %v17941_v60 }
 0x3e3   : > { %v17939_v22 = vpop.permute.xlu1 %4267 }
 0x3e4   : > { %5378 = vmatmul.mubr.bf16.gmra.mxu1 %v15990_v38 }
 0x3e5   : > { %5387 = vmatprep.mubr.bf16.mxu1 %v15992_v58  ;;  %v17943_v20 = vpop.permute.xlu0 %4222 }
 0x3e6   : > { %21819 = vst [vmem:[#allocation17_spill] sm:$0xff] %v17943_v20 }
 0x3e7   : > { %v4218_v4 = vpop.permute.xlu1 %4217 }
 0x3e8   : > { %14818 = vmatmul.mubr.msk.bf16.gmra.mxu0 %vm858_vm2, %v15991_v43 }
 0x3e9   : > { %5500 = vmatprep.mubr.bf16.mxu0 %v21753_v31  ;;  %v17947_v23 = vpop.permute.xlu0 %4262 }
 0x3ea   : > { %21820 = vst [vmem:[#allocation18_spill] sm:$0xff] %v17947_v23 }
 0x3eb   : > { %v17945_v33 = vpop.permute.xlu1 %4257 }
 0x3ec   : > { %5388 = vmatmul.mubr.bf16.gmra.mxu1 %v15994_v56 }
 0x3ed   : > { %5397 = vmatprep.mubr.bf16.mxu1 %v15996_v15  ;;  %v17949_v27 = vpop.permute.xlu0 %4212 }
 0x3ef   : > { %v4208_v35 = vpop.permute.xlu1 %4207 }
 0x3f0   : > { %14819 = vmatmul.mubr.msk.bf16.gmra.mxu0 %vm858_vm2, %v15995_v6 }
 0x3f1   : > { %5510 = vmatprep.mubr.bf16.mxu0 %v21753_v31  ;;  %v17953_v39 = vpop.permute.xlu0 %4252 }
 0x3f2   : > { %21821 = vst [vmem:[#allocation19_spill] sm:$0xff] %v17953_v39 }
 0x3f3   : > { %v17951_v29 = vpop.permute.xlu1 %4247 }
 0x3f4   : > { %5398 = vmatmul.mubr.bf16.gmra.mxu1 %v15998_v48 }
 0x3f5   : > { %5407 = vmatprep.mubr.bf16.mxu1 %v16000_v17  ;;  %v17955_v37 = vpop.permute.xlu0 %4202 }
 0x3f7   : > { %v4198_v53 = vpop.permute.xlu1 %4197 }
 0x3f8   : > { %14820 = vmatmul.mubr.msk.bf16.gmra.mxu0 %vm858_vm2, %v15999_v46 }
 0x3f9   : > { %5520 = vmatprep.mubr.bf16.mxu0 %v21753_v31 }
 0x3fc   : > { %5408 = vmatmul.mubr.bf16.gmra.mxu1 %v16002_v11 }
 0x3fd   : > { %5417 = vmatprep.mubr.bf16.mxu1 %v16004_v36 }
 0x400   : > { %14821 = vmatmul.mubr.msk.bf16.gmra.mxu0 %vm858_vm2, %v16003_v55 }
 0x401   : > { %5530 = vmatprep.mubr.bf16.mxu0 %v21753_v31 }
 0x404   : > { %5418 = vmatmul.mubr.bf16.gmra.mxu1 %v16006_v25 }
 0x405   : > { %5427 = vmatprep.mubr.bf16.mxu1 %v16008_v59 }
 0x408   : > { %14822 = vmatmul.mubr.msk.bf16.gmra.mxu0 %vm858_vm2, %v16007_v45 }
 0x409   : > { %5540 = vmatprep.mubr.bf16.mxu0 %v21753_v31 }
 0x40c   : > { %5428 = vmatmul.mubr.bf16.gmra.mxu1 %v16010_v34 }
 0x410   : > { %14823 = vmatmul.mubr.msk.bf16.gmra.mxu0 %vm858_vm2, %v16011_v44 }
 0x454   : > { %v5133_v24 = vpop.f32.mrf.mxu1 }
 0x455   : > { %v5134_v12 = vadd.f32 %v5133_v24, %v4198_v53 }
 0x456   : > { %v5135_v54 = vpop.f32.mrf.mxu1 }
 0x457   : > { %v5136_v10 = vadd.f32 %v5135_v54, %v4198_v53 }
 0x458   : > { %v5137_v9 = vpop.f32.mrf.mxu1  ;;  %v5246_v28 = vpop.f32.mrf.mxu0 }
 0x459   : > { %v17957_v63 = vadd.f32 %v5246_v28, %v5134_v12  ;;  %v5138_v61 = vadd.f32 %v5137_v9, %v17955_v37 }
 0x45a   : > { %v17959_v5 = vpop.f32.mrf.mxu1  ;;  %v5248_v2 = vpop.f32.mrf.mxu0 }
 0x45b   : > { %v17962_v0 = vadd.f32 %v5248_v2, %v5136_v10 }
 0x45c   : > { %v5143_v18 = vpop.f32.mrf.mxu1  ;;  %v5250_v51 = vpop.f32.mrf.mxu0 }
 0x45d   : > { %v17964_v16 = vadd.f32 %v5250_v51, %v5138_v61  ;;  %v5144_v3 = vadd.f32 %v5143_v18, %v4208_v35  ;;  %v4238_v18 = vpop.permute.xlu1 %4237 }
 0x45e   : > { %v5145_v1 = vpop.f32.mrf.mxu1  ;;  %v17966_v8 = vpop.f32.mrf.mxu0 }
 0x45f   : > { %v5146_v42 = vadd.f32 %v5145_v1, %v4208_v35 }
 0x460   : > { %v5147_v52 = vpop.f32.mrf.mxu1  ;;  %v5256_v47 = vpop.f32.mrf.mxu0 }
 0x461   : > { %v17968_v40 = vadd.f32 %v5256_v47, %v5144_v3  ;;  %v5148_v50 = vadd.f32 %v5147_v52, %v17949_v27 }
 0x462   : > { %v17970_v21 = vpop.f32.mrf.mxu1  ;;  %v5258_v57 = vpop.f32.mrf.mxu0 }
 0x463   : > { %v17973_v14 = vadd.f32 %v5258_v57, %v5146_v42 }
 0x464   : > { %v5153_v30 = vpop.f32.mrf.mxu1  ;;  %v5260_v26 = vpop.f32.mrf.mxu0 }
 0x465   : > { %v17975_v38 = vadd.f32 %v5260_v26, %v5148_v50  ;;  %v5154_v56 = vadd.f32 %v5153_v30, %v4218_v4 }
 0x466   : > { %v5155_v58 = vpop.f32.mrf.mxu1  ;;  %v17977_v43 = vpop.f32.mrf.mxu0 }
 0x467   : > { %21822 = vst [vmem:[#allocation20_spill] sm:$0xff] %v17977_v43  ;;  %v5156_v48 = vadd.f32 %v5155_v58, %v4218_v4 }
 0x468   : > { %v5157_v15 = vpop.f32.mrf.mxu1  ;;  %v5266_v6 = vpop.f32.mrf.mxu0 }
 0x469   : > { %v17979_v17 = vadd.f32 %v5266_v6, %v5154_v56  ;;  %v5158_v36 = vadd.f32 %v5157_v15, %v17943_v20 }
 0x46a   : > { %v17981_v46 = vpop.f32.mrf.mxu1  ;;  %v5268_v11 = vpop.f32.mrf.mxu0 }
 0x46b   : > { %21823 = vst [vmem:[#allocation21_spill] sm:$0xff] %v17981_v46  ;;  %v17984_v55 = vadd.f32 %v5268_v11, %v5156_v48 }
 0x46c   : > { %v5163_v25 = vpop.f32.mrf.mxu1  ;;  %v5270_v59 = vpop.f32.mrf.mxu0 }
 0x46d   : > { %v17986_v45 = vadd.f32 %v5270_v59, %v5158_v36  ;;  %v5164_v35 = vadd.f32 %v5163_v25, %v4228_v49 }
 0x46e   : > { %v5165_v34 = vpop.f32.mrf.mxu1  ;;  %v17988_v44 = vpop.f32.mrf.mxu0 }
 0x46f   : > { %21824 = vst [vmem:[#allocation22_spill] sm:$0xff] %v17988_v44  ;;  %v5166_v4 = vadd.f32 %v5165_v34, %v4228_v49 }
 0x470   : > { %v5167_v24 = vpop.f32.mrf.mxu1  ;;  %v5276_v53 = vpop.f32.mrf.mxu0 }
 0x471   : > { %v17990_v54 = vadd.f32 %v5276_v53, %v5164_v35  ;;  %v5168_v28 = vadd.f32 %v5167_v24, %v17937_v62 }
 0x472   : > { %v17992_v12 = vpop.f32.mrf.mxu1  ;;  %v5278_v9 = vpop.f32.mrf.mxu0 }
 0x473   : > { %v17995_v10 = vadd.f32 %v5278_v9, %v5166_v4 }
 0x474   : > { %v5173_v2 = vpop.f32.mrf.mxu1  ;;  %v5280_v61 = vpop.f32.mrf.mxu0 }
 0x475   : > { %v17997_v51 = vadd.f32 %v5280_v61, %v5168_v28  ;;  %v5174_v52 = vadd.f32 %v5173_v2, %v4238_v18 }
 0x476   : > { %v5175_v1 = vpop.f32.mrf.mxu1  ;;  %v17999_v3 = vpop.f32.mrf.mxu0 }
 0x477   : > { %21825 = vst [vmem:[#allocation23_spill] sm:$0xff] %v17999_v3  ;;  %v5176_v42 = vadd.f32 %v5175_v1, %v4238_v18 }
 0x478   : > { %v18001_v47 = vpop.f32.mrf.mxu1  ;;  %v5286_v49 = vpop.f32.mrf.mxu0 }
 0x479   : > { %v18003_v57 = vadd.f32 %v5286_v49, %v5174_v52 }
 0x47a   : > { %v18005_v50 = vpop.f32.mrf.mxu1  ;;  %v5288_v30 = vpop.f32.mrf.mxu0 }
 0x47b   : > { %v18007_v26 = vadd.f32 %v5288_v30, %v5176_v42 }
 0x47c   : > { %v5183_v58 = vpop.f32.mrf.mxu1  ;;  %v18009_v56 = vpop.f32.mrf.mxu0 }
 0x47d   : > { %v5184_v48 = vadd.f32 %v5183_v58, %v17951_v29 }
 0x47e   : > { %v5185_v15 = vpop.f32.mrf.mxu1  ;;  %v18011_v6 = vpop.f32.mrf.mxu0 }
 0x47f   : > { %v5186_v25 = vadd.f32 %v5185_v15, %v17951_v29 }
 0x480   : > { %v5187_v11 = vpop.f32.mrf.mxu1  ;;  %v5296_v36 = vpop.f32.mrf.mxu0 }
 0x481   : > { %v18015_v59 = vadd.f32 %v5296_v36, %v5184_v48  ;;  %v5188_v24 = vadd.f32 %v5187_v11, %v17953_v39  ;;  %v4243_v39 = vpop.permute.xlu0 %4242 }
 0x482   : > { %v18017_v34 = vpop.f32.mrf.mxu1  ;;  %v5298_v35 = vpop.f32.mrf.mxu0 }
 0x483   : > { %21826 = vst [vmem:[#allocation24_spill] sm:$0xff] %v18017_v34  ;;  %v18020_v53 = vadd.f32 %v5298_v35, %v5186_v25 }
 0x484   : > { %v5193_v4 = vpop.f32.mrf.mxu1  ;;  %v5300_v9 = vpop.f32.mrf.mxu0 }
 0x485   : > { %v18022_v28 = vadd.f32 %v5300_v9, %v5188_v24  ;;  %v5194_v18 = vadd.f32 %v5193_v4, %v17945_v33 }
 0x486   : > { %v5195_v2 = vpop.f32.mrf.mxu1  ;;  %v18024_v61 = vpop.f32.mrf.mxu0 }
 0x487   : > { %21827 = vst [vmem:[#allocation25_spill] sm:$0xff] %v18024_v61  ;;  %v5196_v52 = vadd.f32 %v5195_v2, %v17945_v33 }
 0x488   : > { %v5197_v1 = vpop.f32.mrf.mxu1  ;;  %v5306_v29 = vpop.f32.mrf.mxu0 }
 0x489   : > { %v18028_v49 = vadd.f32 %v5306_v29, %v5194_v18  ;;  %v5198_v58 = vadd.f32 %v5197_v1, %v17947_v23 }
 0x48a   : > { %v18030_v42 = vpop.f32.mrf.mxu1  ;;  %v5308_v30 = vpop.f32.mrf.mxu0 }
 0x48b   : > { %21828 = vst [vmem:[#allocation26_spill] sm:$0xff] %v18030_v42  ;;  %v18033_v15 = vadd.f32 %v5308_v30, %v5196_v52 }
 0x48c   : > { %v5203_v48 = vpop.f32.mrf.mxu1  ;;  %v5310_v11 = vpop.f32.mrf.mxu0 }
 0x48d   : > { %v18035_v36 = vadd.f32 %v5310_v11, %v5198_v58  ;;  %v5204_v24 = vadd.f32 %v5203_v48, %v17939_v22 }
 0x48e   : > { %v5205_v25 = vpop.f32.mrf.mxu1  ;;  %v18037_v35 = vpop.f32.mrf.mxu0 }
 0x48f   : > { %21829 = vst [vmem:[#allocation27_spill] sm:$0xff] %v18037_v35  ;;  %v5206_v9 = vadd.f32 %v5205_v25, %v17939_v22 }
 0x490   : > { %v5207_v4 = vpop.f32.mrf.mxu1  ;;  %v5316_v33 = vpop.f32.mrf.mxu0 }
 0x491   : > { %v18041_v2 = vadd.f32 %v5316_v33, %v5204_v24  ;;  %v5208_v29 = vadd.f32 %v5207_v4, %v17941_v60 }
 0x492   : > { %v18043_v18 = vpop.f32.mrf.mxu1  ;;  %v5318_v1 = vpop.f32.mrf.mxu0 }
 0x493   : > { %21830 = vst [vmem:[#allocation28_spill] sm:$0xff] %v18041_v2  ;;  %21831 = vst [vmem:[#allocation29_spill] sm:$0xff] %v18043_v18  ;;  %v18046_v52 = vadd.f32 %v5318_v1, %v5206_v9 }
 0x494   : > { %v5320_v30 = vpop.f32.mrf.mxu0  ;;  %v5359_v58 = vpop.f32.mrf.mxu1 }
 0x495   : > { %21832 = vst [vmem:[#allocation30_spill] sm:$0xff] %v18046_v52  ;;  %v18048_v11 = vadd.f32 %v5320_v30, %v5208_v29 }
 0x496   : > { %v18050_v31 = vpop.f32.mrf.mxu0  ;;  %v5361_v48 = vpop.f32.mrf.mxu1 }
 0x497   : > { %21833 = vst [vmem:[#allocation31_spill] sm:$0xff] %v18048_v11  ;;  %21834 = vst [vmem:[#allocation32_spill] sm:$0xff] %v18050_v31 }
 0x498   : > { %v5363_v7 = vpop.f32.mrf.mxu1  ;;  %v5472_v13 = vpop.f32.mrf.mxu0 }
 0x49a   : > { %v18052_v35 = vpop.f32.mrf.mxu1  ;;  %v5474_v22 = vpop.f32.mrf.mxu0 }
 0x49c   : > { %v18054_v25 = vpop.f32.mrf.mxu1  ;;  %v5476_v24 = vpop.f32.mrf.mxu0 }
 0x49e   : > { %v18056_v33 = vpop.f32.mrf.mxu1  ;;  %v18058_v4 = vpop.f32.mrf.mxu0 }
 0x4a0   : > { %v18060_v9 = vpop.f32.mrf.mxu1  ;;  %v18062_v1 = vpop.f32.mrf.mxu0 }
 0x4a2   : > { %v18064_v29 = vpop.f32.mrf.mxu1  ;;  %v18066_v30 = vpop.f32.mrf.mxu0 }
 0x4a3   : > { %21835 = vst [vmem:[#allocation33_spill] sm:$0xff] %v18064_v29 }
 0x4a4   : > { %v5379_v42 = vpop.f32.mrf.mxu1  ;;  %v18068_v23 = vpop.f32.mrf.mxu0 }
 0x4a5   : > { %v5380_v44 = vadd.f32 %v5379_v42, %v17979_v17 }
 0x4a6   : > { %v5381_v46 = vpop.f32.mrf.mxu1  ;;  %v18071_v20 = vpop.f32.mrf.mxu0 }
 0x4a7   : > { %21836 = vst [vmem:[#allocation34_spill] sm:$0xff] %v18071_v20  ;;  %v5382_v11 = vadd.f32 %v5381_v46, %v17984_v55  ;;  %v581_v46 = vld [vmem:[%s21839_s7] sm:$0x3]  ;;  %s16268_s7 = smov 10  }
 0x4a8   : > { %v5383_v31 = vpop.f32.mrf.mxu1  ;;  %v5492_v52 = vpop.f32.mrf.mxu0 }
 0x4a9   : > { %v5384_v18 = vadd.f32 %v5383_v31, %v17986_v45  ;;  %v18075_v60 = vadd.f32 %v5492_v52, %v5380_v44  ;;  %v21841_v52 = vsub.s32 0, %v17140_v41 }
 0x4aa   : > { %v18077_v2 = vpop.f32.mrf.mxu1  ;;  %v5494_v29 = vpop.f32.mrf.mxu0 }
 0x4ab   : > { %21837 = vst [vmem:[#allocation35_spill] sm:$0xff] %v18077_v2  ;;  %v18079_v61 = vadd.f32 %v5494_v29, %v5382_v11  ;;  %v18092_v11 = vrot.slane %v581_v46, %v21841_v52  ;;  %v21842_v2 = vsub.s32 1, %v17140_v41  ;;  %v5178_v41 = vadd.f32 %v18001_v47, %v4243_v39 }
 0x4ac   : > { %v5389_v3 = vpop.f32.mrf.mxu1  ;;  %v5496_v43 = vpop.f32.mrf.mxu0 }
 0x4ad   : > { %v5390_v17 = vadd.f32 %v5389_v3, %v17990_v54  ;;  %v18082_v42 = vadd.f32 %v5496_v43, %v5384_v18  ;;  %v5360_v18 = vadd.f32 %v5359_v58, %v17957_v63  ;;  %v5140_v63 = vadd.f32 %v17959_v5, %v17955_v37 }
 0x4ae   : > { %v5391_v55 = vpop.f32.mrf.mxu1  ;;  %v18087_v20 = vpop.f32.mrf.mxu0 }
 0x4af   : > { %21838 = vst [vmem:[#allocation36_spill] sm:$0xff] %v18082_v42  ;;  %21840 = vst [vmem:[#allocation37_spill] sm:$0xff] %v18087_v20  ;;  %v5392_v31 = vadd.f32 %v5391_v55, %v17995_v10  ;;  %v18100_v42 = vrot.slane %v581_v46, %v21842_v2  ;;  %v5362_v20 = vadd.f32 %v5361_v48, %v17962_v0 }
 0x4b0   : > { %v5393_v45 = vpop.f32.mrf.mxu1  ;;  %v5502_v44 = vpop.f32.mrf.mxu0 }
 0x4b1   : > { %v5394_v29 = vadd.f32 %v5393_v45, %v17997_v51  ;;  %v5503_v54 = vadd.f32 %v5502_v44, %v5390_v17  ;;  %v5473_v51 = vadd.f32 %v5472_v13, %v5360_v18  ;;  %v5475_v2 = vadd.f32 %v5474_v22, %v5362_v20 }
 0x4b2   : > { %v18095_v43 = vpop.f32.mrf.mxu1  ;;  %v5504_v3 = vpop.f32.mrf.mxu0  ;;  %v5253_v13 = vadd.f32 %v17966_v8, %v5140_v63  ;;  %v5180_v22 = vadd.f32 %v18005_v50, %v4243_v39  ;;  %v5370_v8 = vadd.f32 %v18054_v25, %v17968_v40 }
 0x4b3   : > { %v18103_v10 = vmul.f32 %v18092_v11, %v5503_v54  ;;  %v5505_v55 = vadd.f32 %v5504_v3, %v5392_v31  ;;  %v5364_v31 = vadd.f32 %v5363_v7, %v17964_v16  ;;  %v5562_v37 = vmul.f32 %v18092_v11, %v5473_v51 }
 0x4b4   : > { %v5399_v52 = vpop.f32.mrf.mxu1  ;;  %v5506_v34 = vpop.f32.mrf.mxu0  ;;  %v5366_v7 = vadd.f32 %v18052_v35, %v5253_v13  ;;  %v5563_v16 = vmul.f32 %v18100_v42, %v5475_v2 }
 0x4b5   : > { %v18107_v17 = vmul.f32 %v18100_v42, %v5505_v55  ;;  %v5507_v45 = vadd.f32 %v5506_v34, %v5394_v29  ;;  %v5400_v0 = vadd.f32 %v5399_v52, %v18003_v57  ;;  %v5291_v34 = vadd.f32 %v18009_v56, %v5178_v41 }
 0x4b6   : > { %v5401_v58 = vpop.f32.mrf.mxu1  ;;  %v18112_v46 = vpop.f32.mrf.mxu0  ;;  %v5477_v5 = vadd.f32 %v5476_v24, %v5364_v31  ;;  %v5293_v55 = vadd.f32 %v18011_v6, %v5180_v22  ;;  %v5479_v24 = vadd.f32 %v18058_v4, %v5366_v7  ;;  %v5483_v52 = vadd.f32 %v18062_v1, %v5370_v8 }
 0x4b7   : > { %v18117_v48 = vmul.f32 %v18092_v11, %v5507_v45  ;;  %v5402_v20 = vadd.f32 %v5401_v58, %v18007_v26  ;;  %v5372_v26 = vadd.f32 %v18056_v33, %v17973_v14  ;;  %v5374_v33 = vadd.f32 %v18060_v9, %v17975_v38 }
 0x4b8   : > { %v5403_v44 = vpop.f32.mrf.mxu1  ;;  %v5512_v29 = vpop.f32.mrf.mxu0  ;;  %v5564_v35 = vmul.f32 %v18092_v11, %v5477_v5  ;;  %v5565_v14 = vmul.f32 %v18100_v42, %v5479_v24  ;;  %v5566_v1 = vmul.f32 %v18092_v11, %v5483_v52 }
 0x4b9   : > { %v5513_v47 = vadd.f32 %v5512_v29, %v5400_v0  ;;  %v5404_v56 = vadd.f32 %v5403_v44, %v5291_v34  ;;  %v5485_v40 = vadd.f32 %v18066_v30, %v5372_v26  ;;  %v5487_v29 = vadd.f32 %v18068_v23, %v5374_v33 }
 0x4ba   : > { %v5405_v57 = vpop.f32.mrf.mxu1  ;;  %v5514_v54 = vpop.f32.mrf.mxu0 }
 0x4bb   : > { %v5578_v3 = vadd.f32 %v5562_v37, %v5513_v47  ;;  %v5515_v18 = vadd.f32 %v5514_v54, %v5402_v20  ;;  %v5406_v25 = vadd.f32 %v5405_v57, %v5293_v55  ;;  %v5567_v44 = vmul.f32 %v18100_v42, %v5485_v40 }
 0x4bc   : > { %v5409_v39 = vpop.f32.mrf.mxu1  ;;  %v5516_v50 = vpop.f32.mrf.mxu0  ;;  %v5568_v23 = vmul.f32 %v18092_v11, %v5487_v29 }
 0x4bd   : > { %v5579_v51 = vadd.f32 %v5563_v16, %v5515_v18  ;;  %v5517_v45 = vadd.f32 %v5516_v50, %v5404_v56  ;;  %v5594_v2 = vmax.f32 %v5578_v3, 0.0  ;;  %v5410_v6 = vadd.f32 %v5409_v39, %v18015_v59 }
 0x4be   : > { %v5411_v63 = vpop.f32.mrf.mxu1  ;;  %v5518_v41 = vpop.f32.mrf.mxu0 }
 0x4bf   : > { %v5580_v58 = vadd.f32 %v5564_v35, %v5517_v45  ;;  %v5519_v4 = vadd.f32 %v5518_v41, %v5406_v25  ;;  %v5412_v30 = vadd.f32 %v5411_v63, %v18020_v53  ;;  %v5595_v59 = vmax.f32 %v5579_v51, 0.0 }
 0x4c0   : > { %v5413_v31 = vpop.f32.mrf.mxu1  ;;  %v5522_v0 = vpop.f32.mrf.mxu0  ;;  %v5610_v38 = vmul.f32 %v5594_v2, %v17151_v19  ;;  %v5570_v51 = vmul.f32 %v18092_v11, %v18075_v60  ;;  %v5571_v41 = vmul.f32 %v18100_v42, %v18079_v61  ;;  %v5150_v60 = vadd.f32 %v17970_v21, %v17949_v27  ;;  %v21843_v61 = vld [vmem:[#allocation19_spill] sm:$0xff] }
 0x4c1   : > { %v5596_v13 = vmax.f32 %v5580_v58, 0.0  ;;  %v5523_v34 = vadd.f32 %v5522_v0, %v5410_v6  ;;  %v5581_v37 = vadd.f32 %v5565_v14, %v5519_v4  ;;  %v5414_v16 = vadd.f32 %v5413_v31, %v18022_v28  ;;  %v21844_v0 = vld [vmem:[#allocation24_spill] sm:$0xff] }
 0x4c2   : > { %v18143_v5 = vpop.f32.mrf.mxu1  ;;  %v5524_v20 = vpop.f32.mrf.mxu0  ;;  %v5611_v56 = vmul.f32 %v5595_v59, %v17155_v32  ;;  %v5170_v31 = vadd.f32 %v17992_v12, %v17937_v62  ;;  %v21847_v62 = vld [vmem:[#allocation23_spill] sm:$0xff] }
 0x4c3   : > { %v5612_v9 = vmul.f32 %v5596_v13, %v17151_v19  ;;  %v5582_v47 = vadd.f32 %v5566_v1, %v5523_v34  ;;  %v5525_v22 = vadd.f32 %v5524_v20, %v5412_v30  ;;  %v5597_v7 = vmax.f32 %v5581_v37, 0.0  ;;  %v21845_v30 = vld [vmem:[#allocation20_spill] sm:$0xff]  ;;  %v21848_v37 = vld [vmem:[#allocation25_spill] sm:$0xff] }
 0x4c4   : > { %v5419_v53 = vpop.f32.mrf.mxu1  ;;  %v5526_v57 = vpop.f32.mrf.mxu0  ;;  %v5190_v1 = vadd.f32 %v21844_v0, %v21843_v61  ;;  %v5263_v34 = vadd.f32 %v21845_v30, %v5150_v60  ;;  %v5283_v12 = vadd.f32 %v21847_v62, %v5170_v31 }
 0x4c5   : > { %v18148_v54 = vpack.c.bf16 %v5612_v9, %v5610_v38  ;;  %v18150_v8 = vadd.f32 %v5567_v44, %v5525_v22  ;;  %v5613_v3 = vmul.f32 %v5597_v7, %v17155_v32  ;;  %v5527_v18 = vadd.f32 %v5526_v57, %v5414_v16  ;;  %v21846_v44 = vld [vmem:[#allocation36_spill] sm:$0xff]  ;;  %v21852_v7 = vld [vmem:[#allocation33_spill] sm:$0xff] }
 0x4c6   : > { %v5421_v55 = vpop.f32.mrf.mxu1  ;;  %v5528_v26 = vpop.f32.mrf.mxu0  ;;  %v5420_v24 = vadd.f32 %v5419_v53, %v18028_v49  ;;  %v5598_v39 = vmax.f32 %v5582_v47, 0.0  ;;  %v5572_v27 = vmul.f32 %v18092_v11, %v21846_v44  ;;  %v5303_v20 = vadd.f32 %v21848_v37, %v5190_v1  ;;  %v21849_v38 = vld [vmem:[#allocation28_spill] sm:$0xff]  ;;  %v21851_v47 = vld [vmem:[#allocation29_spill] sm:$0xff] }
 0x4c7   : > { %5728 = vrot.lane.b32.xlu0 %v18148_v54, %s21761_s4  ;;  %v18158_v28 = vpack.c.bf16 %v5613_v3, %v5611_v56  ;;  %v5584_v50 = vadd.f32 %v5568_v23, %v5527_v18  ;;  %v5422_v45 = vadd.f32 %v5421_v55, %v18033_v15  ;;  %v21850_v11 = vld [vmem:[#allocation16_spill] sm:$0xff]  ;;  %v5376_v16 = vadd.f32 %v21852_v7, %v5263_v34  ;;  %v21853_v18 = vld [vmem:[#allocation30_spill] sm:$0xff] }
 0x4c8   : > { %v5423_v35 = vpop.f32.mrf.mxu1  ;;  %v5532_v52 = vpop.f32.mrf.mxu0  ;;  %v5614_v15 = vmul.f32 %v5598_v39, %v17151_v19  ;;  %v5210_v22 = vadd.f32 %v21851_v47, %v21850_v11  ;;  %v5396_v3 = vadd.f32 %v18095_v43, %v5283_v12  ;;  %v21854_v39 = vld [vmem:[#allocation32_spill] sm:$0xff] }
 0x4c9   : > { %v5533_v40 = vadd.f32 %v5532_v52, %v5420_v24  ;;  %v5600_v25 = vmax.f32 %v5584_v50, 0.0  ;;  %5720 = vrot.lane.b32.xlu1 %v18158_v28, %s21761_s4  ;;  %v5424_v14 = vadd.f32 %v5423_v35, %v18035_v36  ;;  %v21855_v35 = vld [vmem:[#allocation34_spill] sm:$0xff] }
 0x4ca   : > { %v18165_v49 = vpop.f32.mrf.mxu1  ;;  %v5534_v63 = vpop.f32.mrf.mxu0  ;;  %v5323_v50 = vadd.f32 %v21854_v39, %v5210_v22  ;;  %v5489_v52 = vadd.f32 %v21855_v35, %v5376_v16  ;;  %v21861_v22 = vld [vmem:[#allocation21_spill] sm:$0xff]  ;;  %v21862_v16 = vld [vmem:[#allocation22_spill] sm:$0xff] }
 0x4cb   : > { %v5586_v2 = vadd.f32 %v5570_v51, %v5533_v40  ;;  %v5535_v6 = vadd.f32 %v5534_v63, %v5422_v45  ;;  %6034 = vrot.lane.b32.xlu0 %v18148_v54, %s21813_s26  ;;  %v5616_v58 = vmul.f32 %v5600_v25, %v17151_v19  ;;  %v5416_v51 = vadd.f32 %v18143_v5, %v5303_v20  ;;  %v21867_v39 = vld [vmem:[#allocation37_spill] sm:$0xff] }
 0x4cc   : > { %v5429_v33 = vpop.f32.mrf.mxu1  ;;  %v5536_v4 = vpop.f32.mrf.mxu0  ;;  %v5509_v63 = vadd.f32 %v18112_v46, %v5396_v3  ;;  %v5569_v46 = vmul.f32 %v18100_v42, %v5489_v52  ;;  %v5599_v20 = vmax.f32 %v18150_v8, 0.0  ;;  %v21860_v8 = vld [vmem:[#allocation17_spill] sm:$0xff]  ;;  %v21865_v3 = vld [vmem:[#allocation27_spill] sm:$0xff] }
 0x4cd   : > { %v18180_v13 = vadd.f32 %v5571_v41, %v5535_v6  ;;  %v18185_v21 = vpack.c.bf16 %v5616_v58, %v5614_v15  ;;  %v5537_v29 = vadd.f32 %v5536_v4, %v5424_v14  ;;  %6026 = vrot.lane.b32.xlu1 %v18158_v28, %s21813_s26  ;;  %v5430_v9 = vadd.f32 %v5429_v33, %v21849_v38  ;;  %v21856_v41 = vld [vmem:[#allocation31_spill] sm:$0xff] }
 0x4ce   : > { %v5431_v36 = vpop.f32.mrf.mxu1  ;;  %v18189_v59 = vpop.f32.mrf.mxu0  ;;  %v5602_v53 = vmax.f32 %v5586_v2, 0.0  ;;  %v5529_v60 = vadd.f32 %v5528_v26, %v5416_v51  ;;  %v5577_v61 = vmul.f32 %v18100_v42, %v5509_v63  ;;  %v5615_v11 = vmul.f32 %v5599_v20, %v17155_v32 }
 0x4cf   : > { %5650 = vrot.lane.b32.xlu0 %v18148_v54, %s21763_s29  ;;  %v5588_v57 = vadd.f32 %v5572_v27, %v5537_v29  ;;  %v5432_v55 = vadd.f32 %v5431_v36, %v21853_v18  ;;  %v5160_v7 = vadd.f32 %v21861_v22, %v21860_v8 }
 0x4d0   : > { %v5433_v23 = vpop.f32.mrf.mxu1  ;;  %v5542_v56 = vpop.f32.mrf.mxu0  ;;  %v5618_v15 = vmul.f32 %v5602_v53, %v17151_v19  ;;  %v5585_v30 = vadd.f32 %v5569_v46, %v5529_v60 }
 0x4d1   : > { %v5543_v24 = vadd.f32 %v5542_v56, %v5430_v9  ;;  %v5604_v45 = vmax.f32 %v5588_v57, 0.0  ;;  %5638 = vrot.lane.b32.xlu1 %v18158_v28, %s21763_s29  ;;  %v5434_v2 = vadd.f32 %v5433_v23, %v21856_v41  ;;  %v5273_v53 = vadd.f32 %v21862_v16, %v5160_v7  ;;  %v21863_v57 = vld [vmem:[#allocation18_spill] sm:$0xff] }
 0x4d2   : > { %v5435_v40 = vpop.f32.mrf.mxu1  ;;  %v5544_v25 = vpop.f32.mrf.mxu0  ;;  %v21864_v23 = vld [vmem:[#allocation26_spill] sm:$0xff] }
 0x4d3   : > { %v5590_v43 = vadd.f32 %v18103_v10, %v5543_v24  ;;  %v5545_v6 = vadd.f32 %v5544_v25, %v5432_v55  ;;  %5958 = vrot.lane.b32.xlu0 %v18148_v54, %s21857_s1  ;;  %v5620_v5 = vmul.f32 %v5604_v45, %v17151_v19  ;;  %v5436_v14 = vadd.f32 %v5435_v40, %v5323_v50  ;;  %v21866_v55 = vld [vmem:[#allocation35_spill] sm:$0xff] }
 0x4d4   : > { %v5546_v58 = vpop.f32.mrf.mxu0  ;;  %v5200_v56 = vadd.f32 %v21864_v23, %v21863_v57  ;;  %v5386_v24 = vadd.f32 %v21866_v55, %v5273_v53  ;;  %v5603_v40 = vmax.f32 %v18180_v13, 0.0 }
 0x4d5   : > { %v5591_v33 = vadd.f32 %v18107_v17, %v5545_v6  ;;  %v5547_v4 = vadd.f32 %v5546_v58, %v5434_v2  ;;  %v18215_v31 = vpack.c.bf16 %v5620_v5, %v5618_v15  ;;  %5950 = vrot.lane.b32.xlu1 %v18158_v28, %s21857_s1  ;;  %v5606_v26 = vmax.f32 %v5590_v43, 0.0 }
 0x4d6   : > { %v5548_v10 = vpop.f32.mrf.mxu0  ;;  %v5313_v18 = vadd.f32 %v21865_v3, %v5200_v56  ;;  %v5499_v50 = vadd.f32 %v21867_v39, %v5386_v24 }
 0x4d7   : > { %v5592_v0 = vadd.f32 %v18117_v48, %v5547_v4  ;;  %v5549_v1 = vadd.f32 %v5548_v10, %v5436_v14  ;;  %5882 = vrot.lane.b32.xlu0 %v18148_v54, %s21858_s21  ;;  %v5607_v17 = vmax.f32 %v5591_v33, 0.0  ;;  %v5622_v27 = vmul.f32 %v5606_v26, %v17151_v19  ;;  %v18418_v26 = vld [vmem:[%s21715_s8 + $0x20] sm:$0xff] }
 0x4d8   : > { %v5601_v48 = vmax.f32 %v5585_v30, 0.0  ;;  %v5426_v35 = vadd.f32 %v18165_v49, %v5313_v18  ;;  %v5573_v51 = vmul.f32 %v18100_v42, %v5499_v50 }
 0x4d9   : > { %v5608_v34 = vmax.f32 %v5592_v0, 0.0  ;;  %v5593_v44 = vadd.f32 %v5577_v61, %v5549_v1  ;;  %5874 = vrot.lane.b32.xlu1 %v18158_v28, %s21858_s21  ;;  %v5623_v62 = vmul.f32 %v5607_v17, %v17155_v32  ;;  %v18413_v61 = vld [vmem:[%s21715_s8] sm:$0xff] }
 0x4da   : > { %v5617_v9 = vmul.f32 %v5601_v48, %v17155_v32  ;;  %v5539_v52 = vadd.f32 %v18189_v59, %v5426_v35  ;;  %v5619_v59 = vmul.f32 %v5603_v40, %v17155_v32  ;;  %v14945_v30 = vcombine.high %v18413_v61, %v18418_v26 }
 0x4db   : > { %v5624_v29 = vmul.f32 %v5608_v34, %v17151_v19  ;;  %v5609_v36 = vmax.f32 %v5593_v44, 0.0  ;;  %5806 = vrot.lane.b32.xlu0 %v18148_v54, %s21859_s20  ;;  %v18435_v34 = vld [vmem:[%s21715_s8 + $0x8] sm:$0xff] }
 0x4dc   : > { %v18246_v47 = vpack.c.bf16 %v5617_v9, %v5615_v11  ;;  %v5589_v45 = vadd.f32 %v5573_v51, %v5539_v52  ;;  %7998 = vmatprep.mubr.bf16.mxu1 %v14945_v30  ;;  %21870 = vst [vmem:[#allocation19_spill] sm:$0xff] %v18435_v34  ;;  %v18440_v44 = vld [vmem:[%s21715_s8 + $0x28] sm:$0xff] }
 0x4dd   : > { %v18230_v12 = vpack.c.bf16 %v5624_v29, %v5622_v27  ;;  %v5625_v37 = vmul.f32 %v5609_v36, %v17155_v32  ;;  %5798 = vrot.lane.b32.xlu1 %v18158_v28, %s21859_s20  ;;  %21871 = vst [vmem:[#allocation24_spill] sm:$0xff] %v18440_v44  ;;  %v14947_v36 = vcombine.high %v18435_v34, %v18440_v44 }
 0x4de   : > { %v5605_v49 = vmax.f32 %v5589_v45, 0.0 }
 0x4df   : > { %v18236_v38 = vpack.c.bf16 %v5625_v37, %v5623_v62  ;;  %6110 = vrot.lane.b32.xlu0 %v18148_v54, %s21812_s22  ;;  %8111 = vmatprep.mubr.bf16.mxu0 %v14947_v36 }
 0x4e0   : > { %v5621_v42 = vmul.f32 %v5605_v49, %v17155_v32 }
 0x4e1   : > { %6102 = vrot.lane.b32.xlu1 %v18158_v28, %s21812_s22 }
 0x4e2   : > { %v18294_v25 = vpack.c.bf16 %v5621_v42, %v5619_v59 }
 0x4e3   : > { %5730 = vrot.lane.b32.xlu0 %v18185_v21, %s21761_s4 }
 0x4e5   : > { %5722 = vrot.lane.b32.xlu1 %v18246_v47, %s21761_s4 }
 0x4e7   : > { %6036 = vrot.lane.b32.xlu0 %v18185_v21, %s21813_s26 }
 0x4e9   : > { %6028 = vrot.lane.b32.xlu1 %v18246_v47, %s21813_s26 }
 0x4eb   : > { %5652 = vrot.lane.b32.xlu0 %v18185_v21, %s21763_s29 }
 0x4ed   : > { %5640 = vrot.lane.b32.xlu1 %v18246_v47, %s21763_s29 }
 0x4ef   : > { %5960 = vrot.lane.b32.xlu0 %v18185_v21, %s21857_s1 }
 0x4f1   : > { %5952 = vrot.lane.b32.xlu1 %v18246_v47, %s21857_s1 }
 0x4f3   : > { %5884 = vrot.lane.b32.xlu0 %v18185_v21, %s21858_s21 }
 0x4f5   : > { %5876 = vrot.lane.b32.xlu1 %v18246_v47, %s21858_s21 }
 0x4f7   : > { %5808 = vrot.lane.b32.xlu0 %v18185_v21, %s21859_s20 }
 0x4f9   : > { %5800 = vrot.lane.b32.xlu1 %v18246_v47, %s21859_s20 }
 0x4fb   : > { %6112 = vrot.lane.b32.xlu0 %v18185_v21, %s21812_s22 }
 0x4fd   : > { %6104 = vrot.lane.b32.xlu1 %v18246_v47, %s21812_s22 }
 0x4ff   : > { %5732 = vrot.lane.b32.xlu0 %v18215_v31, %s21761_s4 }
 0x501   : > { %6302 = vrot.lane.b32.xlu1 %v18215_v31, %s21814_s24 }
 0x503   : > { %6038 = vrot.lane.b32.xlu0 %v18215_v31, %s21813_s26 }
 0x505   : > { %5724 = vrot.lane.b32.xlu1 %v18294_v25, %s21761_s4 }
 0x507   : > { %5654 = vrot.lane.b32.xlu0 %v18215_v31, %s21763_s29 }
 0x509   : > { %6030 = vrot.lane.b32.xlu1 %v18294_v25, %s21813_s26 }
 0x50b   : > { %5962 = vrot.lane.b32.xlu0 %v18215_v31, %s21857_s1 }
 0x50d   : > { %5642 = vrot.lane.b32.xlu1 %v18294_v25, %s21763_s29 }
 0x50f   : > { %5886 = vrot.lane.b32.xlu0 %v18215_v31, %s21858_s21 }
 0x511   : > { %5954 = vrot.lane.b32.xlu1 %v18294_v25, %s21857_s1 }
 0x513   : > { %5810 = vrot.lane.b32.xlu0 %v18215_v31, %s21859_s20 }
 0x515   : > { %5878 = vrot.lane.b32.xlu1 %v18294_v25, %s21858_s21 }
 0x517   : > { %6114 = vrot.lane.b32.xlu0 %v18215_v31, %s21812_s22 }
 0x519   : > { %5802 = vrot.lane.b32.xlu1 %v18294_v25, %s21859_s20 }
 0x51b   : > { %6304 = vrot.lane.b32.xlu0 %v18294_v25, %s21814_s24 }
 0x51d   : > { %6106 = vrot.lane.b32.xlu1 %v18294_v25, %s21812_s22 }
 0x51f   : > { %5734 = vrot.lane.b32.xlu0 %v18230_v12, %s21761_s4 }
 0x521   : > { %6306 = vrot.lane.b32.xlu1 %v18230_v12, %s21814_s24 }
 0x523   : > { %6040 = vrot.lane.b32.xlu0 %v18230_v12, %s21813_s26 }
 0x525   : > { %5726 = vrot.lane.b32.xlu1 %v18236_v38, %s21761_s4  ;;  %s21872_s4 = smov 123  }
 0x527   : > { %5656 = vrot.lane.b32.xlu0 %v18230_v12, %s21763_s29 }
 0x529   : > { %6032 = vrot.lane.b32.xlu1 %v18236_v38, %s21813_s26 }
 0x52b   : > { %5964 = vrot.lane.b32.xlu0 %v18230_v12, %s21857_s1 }
 0x52d   : > { %6298 = vrot.lane.b32.xlu1 %v18185_v21, %s21814_s24 }
 0x52f   : > { %5888 = vrot.lane.b32.xlu0 %v18230_v12, %s21858_s21 }
 0x531   : > { %6294 = vrot.lane.b32.xlu1 %v18148_v54, %s21814_s24 }
 0x533   : > { %5812 = vrot.lane.b32.xlu0 %v18230_v12, %s21859_s20 }
 0x535   : > { %5644 = vrot.lane.b32.xlu1 %v18236_v38, %s21763_s29  ;;  %s21875_s29 = smov 121  }
 0x537   : > { %6116 = vrot.lane.b32.xlu0 %v18230_v12, %s21812_s22 }
 0x539   : > { %v18348_v13 = vpop.permute.xlu0 %5728  ;;  %5956 = vrot.lane.b32.xlu1 %v18236_v38, %s21857_s1 }
 0x53b   : > { %6300 = vrot.lane.b32.xlu0 %v18246_v47, %s21814_s24  ;;  %v18354_v63 = vpop.permute.xlu1 %5720 }
 0x53d   : > { %v18356_v41 = vpop.permute.xlu0 %6034  ;;  %6230 = vrot.lane.b32.xlu1 %v18230_v12, %s21815_s19 }
 0x53f   : > { %6296 = vrot.lane.b32.xlu0 %v18158_v28, %s21814_s24  ;;  %v18362_v2 = vpop.permute.xlu1 %6026 }
 0x541   : > { %v18364_v43 = vpop.permute.xlu0 %5650  ;;  %6610 = vrot.lane.b32.xlu1 %v18230_v12, %s21868_s5 }
 0x543   : > { %6228 = vrot.lane.b32.xlu0 %v18294_v25, %s21815_s19  ;;  %v18370_v6 = vpop.permute.xlu1 %5638 }
 0x545   : > { %v18372_v60 = vpop.permute.xlu0 %5958  ;;  %5880 = vrot.lane.b32.xlu1 %v18236_v38, %s21858_s21 }
 0x547   : > { %6608 = vrot.lane.b32.xlu0 %v18294_v25, %s21868_s5  ;;  %v18378_v15 = vpop.permute.xlu1 %5950 }
 0x549   : > { %v18380_v5 = vpop.permute.xlu0 %5882  ;;  %6226 = vrot.lane.b32.xlu1 %v18215_v31, %s21815_s19 }
 0x54b   : > { %6224 = vrot.lane.b32.xlu0 %v18246_v47, %s21815_s19  ;;  %v18386_v58 = vpop.permute.xlu1 %5874 }
 0x54d   : > { %v18388_v14 = vpop.permute.xlu0 %5806  ;;  %6606 = vrot.lane.b32.xlu1 %v18215_v31, %s21868_s5 }
 0x54f   : > { %6604 = vrot.lane.b32.xlu0 %v18246_v47, %s21868_s5  ;;  %v18394_v33 = vpop.permute.xlu1 %5798 }
 0x551   : > { %v18396_v4 = vpop.permute.xlu0 %6110  ;;  %6222 = vrot.lane.b32.xlu1 %v18185_v21, %s21815_s19 }
 0x553   : > { %6220 = vrot.lane.b32.xlu0 %v18158_v28, %s21815_s19  ;;  %v18402_v46 = vpop.permute.xlu1 %6102 }
 0x555   : > { %v18404_v10 = vpop.permute.xlu0 %5730  ;;  %5804 = vrot.lane.b32.xlu1 %v18236_v38, %s21859_s20 }
 0x557   : > { %6600 = vrot.lane.b32.xlu0 %v18158_v28, %s21868_s5  ;;  %v18420_v0 = vpop.permute.xlu1 %5722 }
 0x559   : > { %v18426_v17 = vpop.permute.xlu0 %6036  ;;  %6108 = vrot.lane.b32.xlu1 %v18236_v38, %s21812_s22 }
 0x55b   : > { %6456 = vrot.lane.b32.xlu0 %v18294_v25, %s21869_s25  ;;  %v18442_v27 = vpop.permute.xlu1 %6028 }
 0x55d   : > { %v18448_v48 = vpop.permute.xlu0 %5652  ;;  %6602 = vrot.lane.b32.xlu1 %v18185_v21, %s21868_s5 }
 0x55f   : > { %6532 = vrot.lane.b32.xlu0 %v18294_v25, %s21872_s4  ;;  %v18454_v62 = vpop.permute.xlu1 %5640 }
 0x561   : > { %v18456_v37 = vpop.permute.xlu0 %5960  ;;  %6218 = vrot.lane.b32.xlu1 %v18148_v54, %s21815_s19 }
 0x563   : > { %6308 = vrot.lane.b32.xlu0 %v18236_v38, %s21814_s24  ;;  %v18462_v20 = vpop.permute.xlu1 %5952 }
 0x565   : > { %v18464_v9 = vpop.permute.xlu0 %5884  ;;  %6598 = vrot.lane.b32.xlu1 %v18148_v54, %s21868_s5 }
 0x567   : > { %6452 = vrot.lane.b32.xlu0 %v18246_v47, %s21869_s25  ;;  %v18470_v11 = vpop.permute.xlu1 %5876 }
 0x569   : > { %v18472_v8 = vpop.permute.xlu0 %5808  ;;  %6458 = vrot.lane.b32.xlu1 %v18230_v12, %s21869_s25 }
 0x56b   : > { %6528 = vrot.lane.b32.xlu0 %v18246_v47, %s21872_s4  ;;  %v18478_v22 = vpop.permute.xlu1 %5800 }
 0x56d   : > { %v18480_v7 = vpop.permute.xlu0 %6112  ;;  %6534 = vrot.lane.b32.xlu1 %v18230_v12, %s21872_s4 }
 0x56f   : > { %6448 = vrot.lane.b32.xlu0 %v18158_v28, %s21869_s25  ;;  %v18486_v16 = vpop.permute.xlu1 %6104 }
 0x571   : > { %v5733_v53 = vpop.permute.xlu0 %5732  ;;  %6454 = vrot.lane.b32.xlu1 %v18215_v31, %s21869_s25 }
 0x573   : > { %6232 = vrot.lane.b32.xlu0 %v18236_v38, %s21815_s19  ;;  %v18492_v57 = vpop.permute.xlu1 %6302 }
 0x574   : > { %21873 = vst [vmem:[#allocation20_spill] sm:$0xff] %v18492_v57 }
 0x575   : > { %v18494_v23 = vpop.permute.xlu0 %6038  ;;  %6530 = vrot.lane.b32.xlu1 %v18215_v31, %s21872_s4 }
 0x577   : > { %6612 = vrot.lane.b32.xlu0 %v18236_v38, %s21868_s5  ;;  %v5725_v56 = vpop.permute.xlu1 %5724 }
 0x578   : > { %v5739_v19 = vsel %vm5736_vm3, %v5733_v53, %v5725_v56 }
 0x579   : > { %v18500_v3 = vpop.permute.xlu0 %5654  ;;  %6450 = vrot.lane.b32.xlu1 %v18185_v21, %s21869_s25 }
 0x57b   : > { %6524 = vrot.lane.b32.xlu0 %v18158_v28, %s21872_s4  ;;  %v6031_v18 = vpop.permute.xlu1 %6030 }
 0x57d   : > { %v18506_v55 = vpop.permute.xlu0 %5962  ;;  %6526 = vrot.lane.b32.xlu1 %v18185_v21, %s21872_s4 }
 0x57f   : > { %6380 = vrot.lane.b32.xlu0 %v18294_v25, %s21874_s6  ;;  %v18512_v24 = vpop.permute.xlu1 %5642 }
 0x581   : > { %v18514_v39 = vpop.permute.xlu0 %5886  ;;  %6446 = vrot.lane.b32.xlu1 %v18148_v54, %s21869_s25 }
 0x583   : > { %6460 = vrot.lane.b32.xlu0 %v18236_v38, %s21869_s25  ;;  %v18520_v50 = vpop.permute.xlu1 %5954 }
 0x585   : > { %v18522_v35 = vpop.permute.xlu0 %5810  ;;  %6522 = vrot.lane.b32.xlu1 %v18148_v54, %s21872_s4 }
 0x587   : > { %6536 = vrot.lane.b32.xlu0 %v18236_v38, %s21872_s4  ;;  %v18528_v52 = vpop.permute.xlu1 %5878 }
 0x589   : > { %v18530_v51 = vpop.permute.xlu0 %6114  ;;  %6382 = vrot.lane.b32.xlu1 %v18230_v12, %s21874_s6 }
 0x58b   : > { %6684 = vrot.lane.b32.xlu0 %v18294_v25, %s21875_s29  ;;  %v18536_v45 = vpop.permute.xlu1 %5802 }
 0x58d   : > { %v18538_v49 = vpop.permute.xlu0 %6304  ;;  %6686 = vrot.lane.b32.xlu1 %v18230_v12, %s21875_s29 }
 0x58e   : > { %21876 = vst [vmem:[#allocation36_spill] sm:$0xff] %v18538_v49 }
 0x58f   : > { %6376 = vrot.lane.b32.xlu0 %v18246_v47, %s21874_s6  ;;  %v18544_v40 = vpop.permute.xlu1 %6106 }
 0x591   : > { %v5735_v42 = vpop.permute.xlu0 %5734  ;;  %6378 = vrot.lane.b32.xlu1 %v18215_v31, %s21874_s6 }
 0x593   : > { %6384 = vrot.lane.b32.xlu0 %v18236_v38, %s21874_s6  ;;  %v18550_v59 = vpop.permute.xlu1 %6306 }
 0x595   : > { %v6041_v30 = vpop.permute.xlu0 %6040  ;;  %6682 = vrot.lane.b32.xlu1 %v18215_v31, %s21875_s29 }
 0x597   : > { %6688 = vrot.lane.b32.xlu0 %v18236_v38, %s21875_s29  ;;  %v5727_v36 = vpop.permute.xlu1 %5726 }
 0x598   : > { %v5740_v29 = vsel %vm5736_vm3, %v5735_v42, %v5727_v36  ;;  %v5753_v32 = vsel %vm5736_vm3, %v5727_v36, %v5735_v42  ;;  %v5750_v42 = vsel %vm5736_vm3, %v5725_v56, %v5733_v53  ;;  %v6054_v53 = vsel %vm1031_vm5, %v6031_v18, %v18494_v23 }
 0x599   : > { %v5657_v1 = vpop.permute.xlu0 %5656  ;;  %6374 = vrot.lane.b32.xlu1 %v18185_v21, %s21874_s6  ;;  %7966 = vmatprep.subr.bf16.mxu1 %v5740_v29  ;;  %v6042_v36 = vsel %vm1031_vm5, %v18356_v41, %v18362_v2 }
 0x59a   : > { %7967 = vmatpush1.bf16.msra.mxu1 %v5753_v32  ;;  %v5738_v32 = vsel %vm5736_vm3, %v18404_v10, %v18420_v0 }
 0x59b   : > { %6680 = vrot.lane.b32.xlu0 %v18246_v47, %s21875_s29  ;;  %v6033_v44 = vpop.permute.xlu1 %6032  ;;  %7968 = vmatprep.subr.bf16.mxu1 %v5739_v19  ;;  %v6044_v19 = vsel %vm1031_vm5, %v18494_v23, %v6031_v18  ;;  %v5744_v23 = vsel %vm5736_vm3, %v18354_v63, %v18348_v13  ;;  %v6051_v18 = vsel %vm1031_vm5, %v18442_v27, %v18426_v17 }
 0x59c   : > { %v6045_v34 = vsel %vm1031_vm5, %v6041_v30, %v6033_v44  ;;  %v6057_v57 = vsel %vm1031_vm5, %v6033_v44, %v6041_v30  ;;  %v6043_v30 = vsel %vm1031_vm5, %v18426_v17, %v18442_v27  ;;  %v6949_v27 = vld [vmem:[%s21877_s9 + $0x78] sm:$0xff] }
 0x59d   : > { %v5965_v49 = vpop.permute.xlu0 %5964  ;;  %6678 = vrot.lane.b32.xlu1 %v18185_v21, %s21875_s29  ;;  %8079 = vmatprep.subr.bf16.mxu0 %v6045_v34  ;;  %v5747_v34 = vsel %vm5736_vm3, %v18420_v0, %v18404_v10  ;;  %v6941_v0 = vld [vmem:[%s21877_s9 + $0x38] sm:$0xff] }
 0x59e   : > { %7969 = vmatpush1.bf16.msra.mxu1 %v5750_v42  ;;  %8080 = vmatpush1.bf16.msra.mxu0 %v6057_v57  ;;  %v5737_v57 = vsel %vm5736_vm3, %v18348_v13, %v18354_v63  ;;  %v6940_v42 = vld [vmem:[%s21877_s9 + $0x30] sm:$0xff] }
 0x59f   : > { %v18571_v29 = vpop.permute.xlu1 %6298  ;;  %6372 = vrot.lane.b32.xlu0 %v18158_v28, %s21874_s6  ;;  %7970 = vmatprep.subr.bf16.mxu1 %v5738_v32 }
 0x5a0   : > { %8081 = vmatprep.subr.bf16.mxu0 %v6044_v19  ;;  %v6048_v19 = vsel %vm1031_vm5, %v18362_v2, %v18356_v41  ;;  %v6939_v41 = vld [vmem:[%s21877_s9 + $0x28] sm:$0xff]  ;;  %v5672_v2 = vsel %vm5658_vm4, %v18512_v24, %v18500_v3 }
 0x5a1   : > { %v18577_v44 = vpop.permute.xlu0 %5888  ;;  %6370 = vrot.lane.b32.xlu1 %v18148_v54, %s21874_s6 }
 0x5a2   : > { %7971 = vmatpush1.bf16.msra.mxu1 %v5747_v34  ;;  %8082 = vmatpush1.bf16.msra.mxu0 %v6054_v53  ;;  %v5661_v34 = vsel %vm5658_vm4, %v18500_v3, %v18512_v24  ;;  %v6947_v24 = vld [vmem:[%s21877_s9 + $0x68] sm:$0xff] }
 0x5a3   : > { %v18589_v56 = vpop.permute.xlu1 %6294  ;;  %6676 = vrot.lane.b32.xlu0 %v18158_v28, %s21875_s29  ;;  %7972 = vmatprep.subr.bf16.mxu1 %v5737_v57 }
 0x5a4   : > { %8083 = vmatprep.subr.bf16.mxu0 %v6043_v30 }
 0x5a5   : > { %v18596_v10 = vpop.permute.xlu0 %5812  ;;  %6674 = vrot.lane.b32.xlu1 %v18148_v54, %s21875_s29 }
 0x5a6   : > { %7973 = vmatpush1.bf16.msra.mxu1 %v5744_v23  ;;  %8084 = vmatpush1.bf16.msra.mxu0 %v6051_v18  ;;  %v5660_v23 = vsel %vm5658_vm4, %v18448_v48, %v18454_v62 }
 0x5a7   : > { %v5645_v32 = vpop.permute.xlu1 %5644  ;;  %6987 = vperm.xlu0 %15890, %v6941_v0   ;;  %8085 = vmatprep.subr.bf16.mxu0 %v6042_v36  ;;  %v5968_v36 = vsel %vm3215_vm12, %v18506_v55, %v18520_v50 }
 0x5a8   : > { %v5662_v13 = vsel %vm5658_vm4, %v5657_v1, %v5645_v32  ;;  %v5675_v17 = vsel %vm5658_vm4, %v5645_v32, %v5657_v1  ;;  %v6948_v1 = vld [vmem:[%s21877_s9 + $0x70] sm:$0xff]  ;;  %v5978_v32 = vsel %vm3215_vm12, %v18520_v50, %v18506_v55  ;;  %v6937_v55 = vld [vmem:[%s21877_s9 + $0x18] sm:$0xff]  ;;  %v5666_v50 = vsel %vm5658_vm4, %v18370_v6, %v18364_v43 }
 0x5a9   : > { %v18616_v63 = vpop.permute.xlu0 %6116  ;;  %6982 = vperm.xlu1 %15891, %v6940_v42   ;;  %7974 = vmatprep.subr.bf16.mxu1 %v5662_v13  ;;  %v5669_v42 = vsel %vm5658_vm4, %v18454_v62, %v18448_v48  ;;  %v5659_v13 = vsel %vm5658_vm4, %v18364_v43, %v18370_v6  ;;  %v5967_v48 = vsel %vm3215_vm12, %v18456_v37, %v18462_v20 }
 0x5aa   : > { %7975 = vmatpush1.bf16.msra.mxu1 %v5675_v17  ;;  %8086 = vmatpush1.bf16.msra.mxu0 %v6048_v19  ;;  %v6946_v17 = vld [vmem:[%s21877_s9 + $0x60] sm:$0xff]  ;;  %v5975_v19 = vsel %vm3215_vm12, %v18462_v20, %v18456_v37  ;;  %v6945_v20 = vld [vmem:[%s21877_s9 + $0x58] sm:$0xff] }
 0x5ab   : > { %v5957_v53 = vpop.permute.xlu1 %5956  ;;  %7027 = vperm.xlu0 %15890, %v6949_v27   ;;  %7976 = vmatprep.subr.bf16.mxu1 %v5661_v34  ;;  %v5966_v34 = vsel %vm3215_vm12, %v18372_v60, %v18378_v15 }
 0x5ac   : > { %v5969_v57 = vsel %vm3215_vm12, %v5965_v49, %v5957_v53  ;;  %v5981_v0 = vsel %vm3215_vm12, %v5957_v53, %v5965_v49  ;;  %v6938_v49 = vld [vmem:[%s21877_s9 + $0x20] sm:$0xff] }
 0x5ad   : > { %v18632_v30 = vpop.permute.xlu0 %6300  ;;  %7022 = vperm.xlu1 %15891, %v6948_v1   ;;  %8087 = vmatprep.subr.bf16.mxu0 %v5969_v57  ;;  %v6936_v1 = vld [vmem:[%s21877_s9 + $0x10] sm:$0xff]  ;;  %v5972_v57 = vsel %vm3215_vm12, %v18378_v15, %v18372_v60  ;;  %v6935_v60 = vld [vmem:[%s21877_s9 + $0x8] sm:$0xff]  ;;  %v5902_v15 = vsel %vm3137_vm10, %v18528_v52, %v18514_v39 }
 0x5ae   : > { %7977 = vmatpush1.bf16.msra.mxu1 %v5672_v2  ;;  %8088 = vmatpush1.bf16.msra.mxu0 %v5981_v0  ;;  %v5892_v0 = vsel %vm3137_vm10, %v18514_v39, %v18528_v52  ;;  %v5899_v39 = vsel %vm3137_vm10, %v18470_v11, %v18464_v9  ;;  %v5890_v52 = vsel %vm3137_vm10, %v18380_v5, %v18386_v58 }
 0x5af   : > { %v18647_v18 = vpop.permute.xlu1 %6230  ;;  %6977 = vperm.xlu0 %15890, %v6939_v41   ;;  %7978 = vmatprep.subr.bf16.mxu1 %v5660_v23  ;;  %v5891_v23 = vsel %vm3137_vm10, %v18464_v9, %v18470_v11 }
 0x5b0   : > { %8089 = vmatprep.subr.bf16.mxu0 %v5968_v36 }
 0x5b1   : > { %v18652_v3 = vpop.permute.xlu0 %6296  ;;  %6972 = vperm.xlu1 %15891, %v6938_v49  }
 0x5b2   : > { %7979 = vmatpush1.bf16.msra.mxu1 %v5669_v42  ;;  %8090 = vmatpush1.bf16.msra.mxu0 %v5978_v32 }
 0x5b3   : > { %v18669_v27 = vpop.permute.xlu1 %6610  ;;  %7017 = vperm.xlu0 %15890, %v6947_v24   ;;  %7980 = vmatprep.subr.bf16.mxu1 %v5659_v13 }
 0x5b4   : > { %8091 = vmatprep.subr.bf16.mxu0 %v5967_v48 }
 0x5b5   : > { %v18674_v62 = vpop.permute.xlu0 %6228  ;;  %7012 = vperm.xlu1 %15891, %v6946_v17   ;;  %v6120_v17 = vsel %vm1223_vm6, %v18530_v51, %v18544_v40 }
 0x5b6   : > { %7981 = vmatpush1.bf16.msra.mxu1 %v5666_v50  ;;  %8092 = vmatpush1.bf16.msra.mxu0 %v5975_v19  ;;  %v6119_v50 = vsel %vm1223_vm6, %v18480_v7, %v18486_v16 }
 0x5b7   : > { %v5881_v53 = vpop.permute.xlu1 %5880  ;;  %6967 = vperm.xlu0 %15890, %v6937_v55   ;;  %8093 = vmatprep.subr.bf16.mxu0 %v5966_v34  ;;  %v5814_v55 = vsel %vm3059_vm11, %v18388_v14, %v18394_v33 }
 0x5b8   : > { %v5893_v43 = vsel %vm3137_vm10, %v18577_v44, %v5881_v53  ;;  %v5905_v37 = vsel %vm3137_vm10, %v5881_v53, %v18577_v44  ;;  %v6944_v44 = vld [vmem:[%s21877_s9 + $0x50] sm:$0xff]  ;;  %v6118_v53 = vsel %vm1223_vm6, %v18396_v4, %v18402_v46 }
 0x5b9   : > { %v18693_v6 = vpop.permute.xlu0 %6608  ;;  %6962 = vperm.xlu1 %15891, %v6936_v1   ;;  %7982 = vmatprep.subr.bf16.mxu1 %v5893_v43 }
 0x5ba   : > { %7983 = vmatpush2.bf16.msra.mxu1 %v5905_v37  ;;  %8094 = vmatpush1.bf16.msra.mxu0 %v5972_v57 }
 0x5bb   : > { %v18709_v41 = vpop.permute.xlu1 %6226  ;;  %7007 = vperm.xlu0 %15890, %v6945_v20   ;;  %7984 = vmatprep.subr.bf16.mxu1 %v5892_v0  ;;  %v6124_v20 = vsel %vm1223_vm6, %v18402_v46, %v18396_v4  ;;  %v21879_v0 = vld [vmem:[#allocation20_spill] sm:$0xff]  ;;  %v6890_v4 = vld [vmem:[%s21715_s8 + $0xa0] sm:$0xff] }
 0x5bc   : > { %8095 = vmatprep.subr.bf16.mxu0 %v18236_v38  ;;  %v6934_v38 = vld [vmem:[%s21877_s9] sm:$0xff] }
 0x5bd   : > { %v18712_v2 = vpop.permute.xlu0 %6224  ;;  %7002 = vperm.xlu1 %15891, %v6944_v44   ;;  %v21880_v44 = vld [vmem:[#allocation36_spill] sm:$0xff] }
 0x5be   : > { %7985 = vmatpush2.bf16.msra.mxu1 %v5902_v15  ;;  %8096 = vmatpush2.bf16.msra.mxu0 %v18230_v12  ;;  %v6943_v12 = vld [vmem:[%s21877_s9 + $0x48] sm:$0xff] }
 0x5bf   : > { %v18727_v49 = vpop.permute.xlu1 %6606  ;;  %6957 = vperm.xlu0 %15890, %v6935_v60   ;;  %7986 = vmatprep.subr.bf16.mxu1 %v5891_v23  ;;  %v6322_v60 = vsel %vm1707_vm8, %v21880_v44, %v21879_v0 }
 0x5c0   : > { %8097 = vmatprep.subr.bf16.mxu0 %v18294_v25  ;;  %v6942_v25 = vld [vmem:[%s21877_s9 + $0x40] sm:$0xff]  ;;  %s21912_s9 = smov 7  }
 0x5c1   : > { %v18730_v36 = vpop.permute.xlu0 %6604  ;;  %6952 = vperm.xlu1 %15891, %v6934_v38  }
 0x5c2   : > { %7987 = vmatpush2.bf16.msra.mxu1 %v5899_v39  ;;  %8098 = vmatpush2.bf16.msra.mxu0 %v18215_v31  ;;  %v5896_v31 = vsel %vm3137_vm10, %v18386_v58, %v18380_v5  ;;  %v5816_v5 = vsel %vm3059_vm11, %v18522_v35, %v18536_v45 }
 0x5c3   : > { %v18745_v24 = vpop.permute.xlu1 %6222  ;;  %6997 = vperm.xlu0 %15890, %v6943_v12   ;;  %7988 = vmatprep.subr.bf16.mxu1 %v5890_v52  ;;  %v6312_v12 = vsel %vm1707_vm8, %v21879_v0, %v21880_v44  ;;  %v6319_v52 = vsel %vm1707_vm8, %v18632_v30, %v18571_v29  ;;  %v6616_v0 = vsel %vm3871_vm15, %v18727_v49, %v18693_v6 }
 0x5c4   : > { %8099 = vmatprep.subr.bf16.mxu0 %v18246_v47 }
 0x5c5   : > { %v18748_v42 = vpop.permute.xlu0 %6220  ;;  %6992 = vperm.xlu1 %15891, %v6942_v25  }
 0x5c6   : > { %7989 = vmatpush2.bf16.msra.mxu1 %v5896_v31  ;;  %8100 = vmatpush2.bf16.msra.mxu0 %v18185_v21 }
 0x5c7   : > { %v5805_v9 = vpop.permute.xlu1 %5804  ;;  %8101 = vmatprep.subr.bf16.mxu0 %v18158_v28 }
 0x5c8   : > { %v5817_v11 = vsel %vm3059_vm11, %v18596_v10, %v5805_v9  ;;  %v5829_v47 = vsel %vm3059_vm11, %v5805_v9, %v18596_v10  ;;  %v5826_v10 = vsel %vm3059_vm11, %v18536_v45, %v18522_v35  ;;  %v5823_v35 = vsel %vm3059_vm11, %v18478_v22, %v18472_v8  ;;  %v6887_v9 = vld [vmem:[%s21715_s8 + $0x88] sm:$0xff] }
 0x5c9   : > { %v18757_v32 = vpop.permute.xlu0 %6600  ;;  %7990 = vmatprep.subr.bf16.mxu1 %v5817_v11  ;;  %v6130_v45 = vsel %vm1223_vm6, %v18544_v40, %v18530_v51  ;;  %v5820_v51 = vsel %vm3059_vm11, %v18394_v33, %v18388_v14  ;;  %v6127_v40 = vsel %vm1223_vm6, %v18486_v16, %v18480_v7  ;;  %v6879_v14 = vld [vmem:[%s21715_s8 + $0x48] sm:$0xff]  ;;  %v21878_v16 = vcombine.low %v18413_v61, %v18418_v26  ;;  %v6886_v61 = vld [vmem:[%s21715_s8 + $0x80] sm:$0xff]  ;;  %v21881_v26 = vld [vmem:[#allocation19_spill] sm:$0xff] }
 0x5ca   : > { %7991 = vmatpush2.bf16.msra.mxu1 %v5829_v47  ;;  %8102 = vmatpush2.bf16.msra.mxu0 %v18148_v54  ;;  %v5815_v54 = vsel %vm3059_vm11, %v18472_v8, %v18478_v22  ;;  %v6878_v8 = vld [vmem:[%s21715_s8 + $0x40] sm:$0xff]  ;;  %v6883_v33 = vld [vmem:[%s21715_s8 + $0x68] sm:$0xff]  ;;  %v14961_v25 = vcombine.high %v6886_v61, %v6890_v4 }
 0x5cb   : > { %v6109_v21 = vpop.permute.xlu1 %6108  ;;  %7992 = vmatprep.subr.bf16.mxu1 %v5816_v5  ;;  %v6882_v22 = vld [vmem:[%s21715_s8 + $0x60] sm:$0xff]  ;;  %v14955_v15 = vcombine.high %v6879_v14, %v6883_v33  ;;  %v6891_v11 = vld [vmem:[%s21715_s8 + $0xa8] sm:$0xff]  ;;  %v6311_v5 = vsel %vm1707_vm8, %v18571_v29, %v18632_v30  ;;  %v14960_v30 = vcombine.low %v6886_v61, %v6890_v4 }
 0x5cc   : > { %v6121_v28 = vsel %vm1223_vm6, %v18616_v63, %v6109_v21  ;;  %v6133_v13 = vsel %vm1223_vm6, %v6109_v21, %v18616_v63  ;;  %v14953_v37 = vcombine.high %v6878_v8, %v6882_v22  ;;  %v14952_v39 = vcombine.low %v6878_v8, %v6882_v22 }
 0x5cd   : > { %v18767_v58 = vpop.permute.xlu0 %6456  ;;  %8103 = vmatprep.subr.bf16.mxu0 %v6121_v28  ;;  %v14954_v21 = vcombine.low %v6879_v14, %v6883_v33  ;;  %v6316_v28 = vsel %vm1707_vm8, %v18652_v3, %v18589_v56  ;;  %v6906_v14 = vld [vmem:[%s21715_s8 + $0x120] sm:$0xff] }
 0x5ce   : > { %7993 = vmatpush2.bf16.msra.mxu1 %v5826_v10  ;;  %8104 = vmatpush2.bf16.msra.mxu0 %v6133_v13  ;;  %v14963_v13 = vcombine.high %v6887_v9, %v6891_v11 }
 0x5cf   : > { %v18780_v48 = vpop.permute.xlu1 %6602  ;;  %7994 = vmatprep.subr.bf16.mxu1 %v5815_v54  ;;  %8105 = vmatprep.subr.bf16.mxu0 %v6120_v17  ;;  %v6310_v17 = vsel %vm1707_vm8, %v18589_v56, %v18652_v3  ;;  %v6895_v56 = vld [vmem:[%s21715_s8 + $0xc8] sm:$0xff] }
 0x5d0   : > { %v6899_v3 = vld [vmem:[%s21715_s8 + $0xe8] sm:$0xff] }
 0x5d1   : > { %v18782_v63 = vpop.permute.xlu0 %6532  ;;  %v14970_v61 = vcombine.low %v6895_v56, %v6899_v3 }
 0x5d2   : > { %7995 = vmatpush2.bf16.msra.mxu1 %v5823_v35  ;;  %8106 = vmatpush2.bf16.msra.mxu0 %v6130_v45  ;;  %v6894_v35 = vld [vmem:[%s21715_s8 + $0xc0] sm:$0xff] }
 0x5d3   : > { %v18796_v19 = vpop.permute.xlu1 %6218  ;;  %7996 = vmatprep.subr.bf16.mxu1 %v5814_v55  ;;  %8107 = vmatprep.subr.bf16.mxu0 %v6119_v50  ;;  %v6898_v45 = vld [vmem:[%s21715_s8 + $0xe0] sm:$0xff] }
 0x5d4   : > { %v6240_v4 = vsel %vm1515_vm7, %v18748_v42, %v18796_v19 }
 0x5d5   : > { %v6309_v34 = vpop.permute.xlu0 %6308 }
 0x5d6   : > { %v6325_v1 = vsel %vm1707_vm8, %v6309_v34, %v18550_v59  ;;  %7997 = vmatpush2.bf16.msra.mxu1 %v5820_v51  ;;  %8108 = vmatpush2.bf16.msra.mxu0 %v6127_v40  ;;  %v6313_v57 = vsel %vm1707_vm8, %v18550_v59, %v6309_v34  ;;  %v21882_v59 = vld [vmem:[#allocation24_spill] sm:$0xff]  ;;  %v14969_v34 = vcombine.high %v6894_v35, %v6898_v45 }
 0x5d7   : > { %v18815_v43 = vpop.permute.xlu1 %6598  ;;  %8109 = vmatprep.subr.bf16.mxu0 %v6118_v53  ;;  %8192 = vmatprep.subr.bf16.mxu1 %v6325_v1  ;;  %v21883_v38 = vcombine.low %v21881_v26, %v21882_v59  ;;  %v14962_v40 = vcombine.low %v6887_v9, %v6891_v11  ;;  %v6246_v1 = vsel %vm1515_vm7, %v18674_v62, %v18709_v41 }
 0x5d8   : > { %v14971_v53 = vcombine.high %v6895_v56, %v6899_v3  ;;  %v6615_v26 = vsel %vm3871_vm15, %v18780_v48, %v18730_v36 }
 0x5d9   : > { %v18823_v7 = vpop.permute.xlu0 %6452  ;;  %7999 = vmatmul.mubr.bf16.vlgmr.msra.gmra.mxu1 %v21878_v16  ;;  %v6236_v16 = vsel %vm1515_vm7, %v18709_v41, %v18674_v62  ;;  %v6623_v62 = vsel %vm3871_vm15, %v18730_v36, %v18780_v48  ;;  %v6903_v41 = vld [vmem:[%s21715_s8 + $0x108] sm:$0xff] }
 0x5da   : > { %8110 = vmatpush2.bf16.msra.mxu0 %v6124_v20  ;;  %8193 = vmatpush1.bf16.msra.mxu1 %v6313_v57  ;;  %v14968_v20 = vcombine.low %v6894_v35, %v6898_v45  ;;  %v6243_v57 = vsel %vm1515_vm7, %v18712_v2, %v18745_v24 }
 0x5db   : > { %v18836_v23 = vpop.permute.xlu1 %6458  ;;  %8194 = vmatprep.subr.bf16.mxu1 %v6322_v60  ;;  %8008 = vmatprep.mubr.bf16.mxu1 %v14953_v37 }
 0x5dd   : > { %v18844_v46 = vpop.permute.xlu0 %6528  ;;  %8112 = vmatmul.mubr.bf16.vlgmr.msra.gmra.mxu0 %v21883_v38 }
 0x5de   : > { %8195 = vmatpush1.bf16.msra.mxu1 %v6312_v12  ;;  %8121 = vmatprep.mubr.bf16.mxu0 %v14955_v15  ;;  %v6907_v15 = vld [vmem:[%s21715_s8 + $0x128] sm:$0xff]  ;;  %v6234_v12 = vsel %vm1515_vm7, %v18796_v19, %v18748_v42 }
 0x5df   : > { %v18855_v31 = vpop.permute.xlu1 %6534  ;;  %8196 = vmatprep.subr.bf16.mxu1 %v6319_v52  ;;  %v14979_v59 = vcombine.high %v6903_v41, %v6907_v15  ;;  %v6914_v52 = vld [vmem:[%s21715_s8 + $0x160] sm:$0xff]  ;;  %v6911_v42 = vld [vmem:[%s21715_s8 + $0x148] sm:$0xff] }
 0x5e0   : > { %v6915_v19 = vld [vmem:[%s21715_s8 + $0x168] sm:$0xff] }
 0x5e1   : > { %v18863_v47 = vpop.permute.xlu0 %6448  ;;  %8009 = vmatmul.mubr.bf16.gmra.mxu1 %v14952_v39  ;;  %v6910_v39 = vld [vmem:[%s21715_s8 + $0x140] sm:$0xff] }
 0x5e2   : > { %8197 = vmatpush1.bf16.msra.mxu1 %v6311_v5  ;;  %8018 = vmatprep.mubr.bf16.mxu1 %v14961_v25  ;;  %v6614_v25 = vsel %vm3871_vm15, %v18815_v43, %v18757_v32  ;;  %v14985_v5 = vcombine.high %v6910_v39, %v6914_v52  ;;  %v14984_v45 = vcombine.low %v6910_v39, %v6914_v52 }
 0x5e3   : > { %v18871_v10 = vpop.permute.xlu1 %6454  ;;  %8198 = vmatprep.subr.bf16.mxu1 %v6316_v28 }
 0x5e4   : > { %v6464_v35 = vsel %vm3715_vm13, %v18871_v10, %v18767_v58 }
 0x5e5   : > { %v6233_v54 = vpop.permute.xlu0 %6232  ;;  %8122 = vmatmul.mubr.bf16.gmra.mxu0 %v14954_v21 }
 0x5e6   : > { %v6249_v29 = vsel %vm1515_vm7, %v6233_v54, %v18647_v18  ;;  %8199 = vmatpush1.bf16.msra.mxu1 %v6310_v17  ;;  %8131 = vmatprep.mubr.bf16.mxu0 %v14963_v13  ;;  %v6237_v8 = vsel %vm1515_vm7, %v18647_v18, %v6233_v54  ;;  %v6626_v18 = vsel %vm3871_vm15, %v18693_v6, %v18727_v49 }
 0x5e7   : > { %v18884_v55 = vpop.permute.xlu1 %6530  ;;  %8200 = vmatprep.subr.bf16.mxu1 %v6249_v29  ;;  %v6235_v49 = vsel %vm1515_vm7, %v18745_v24, %v18712_v2  ;;  %v6620_v2 = vsel %vm3871_vm15, %v18757_v32, %v18815_v43  ;;  %v14978_v43 = vcombine.low %v6903_v41, %v6907_v15  ;;  %v6474_v13 = vsel %vm3715_vm13, %v18767_v58, %v18871_v10  ;;  %v6918_v29 = vld [vmem:[%s21715_s8 + $0x180] sm:$0xff]  ;;  %v6919_v58 = vld [vmem:[%s21715_s8 + $0x188] sm:$0xff] }
 0x5e8   : > { %v14987_v54 = vcombine.high %v6911_v42, %v6915_v19  ;;  %v6540_v3 = vsel %vm3793_vm0, %v18884_v55, %v18782_v63  ;;  %v6923_v10 = vld [vmem:[%s21715_s8 + $0x1a8] sm:$0xff] }
 0x5e9   : > { %v6613_v50 = vpop.permute.xlu0 %6612  ;;  %8019 = vmatmul.mubr.bf16.gmra.mxu1 %v14960_v30 }
 0x5ea   : > { %v6629_v22 = vsel %vm3871_vm15, %v6613_v50, %v18669_v27  ;;  %v6617_v51 = vsel %vm3871_vm15, %v18669_v27, %v6613_v50  ;;  %8201 = vmatpush1.bf16.msra.mxu1 %v6237_v8  ;;  %v6902_v27 = vld [vmem:[%s21715_s8 + $0x100] sm:$0xff]  ;;  %8028 = vmatprep.mubr.bf16.mxu1 %v14969_v34 }
 0x5eb   : > { %8305 = vmatprep.subr.bf16.mxu0 %v6629_v22  ;;  %v18901_v37 = vpop.permute.xlu1 %6450  ;;  %8202 = vmatprep.subr.bf16.mxu1 %v6246_v1  ;;  %v14977_v44 = vcombine.high %v6902_v27, %v6906_v14  ;;  %v14976_v48 = vcombine.low %v6902_v27, %v6906_v14  ;;  %v14995_v1 = vcombine.high %v6919_v58, %v6923_v10 }
 0x5ec   : > { %8306 = vmatpush1.bf16.msra.mxu0 %v6617_v51  ;;  %v6471_v56 = vsel %vm3715_vm13, %v18823_v7, %v18901_v37 }
 0x5ed   : > { %8307 = vmatprep.subr.bf16.mxu0 %v6626_v18  ;;  %v18912_v33 = vpop.permute.xlu0 %6524  ;;  %8132 = vmatmul.mubr.bf16.gmra.mxu0 %v14962_v40 }
 0x5ee   : > { %8203 = vmatpush1.bf16.msra.mxu1 %v6236_v16  ;;  %8141 = vmatprep.mubr.bf16.mxu0 %v14971_v53  ;;  %v6930_v16 = vld [vmem:[%s21715_s8 + $0x1e0] sm:$0xff] }
 0x5ef   : > { %v18923_v60 = vpop.permute.xlu1 %6526  ;;  %8204 = vmatprep.subr.bf16.mxu1 %v6243_v57 }
 0x5f0   : > { %8308 = vmatpush1.bf16.msra.mxu0 %v6616_v0  ;;  %v6547_v8 = vsel %vm3793_vm0, %v18844_v46, %v18923_v60  ;;  %v6539_v40 = vsel %vm3793_vm0, %v18923_v60, %v18844_v46  ;;  %v6926_v46 = vld [vmem:[%s21715_s8 + $0x1c0] sm:$0xff]  ;;  %v6931_v0 = vld [vmem:[%s21715_s8 + $0x1e8] sm:$0xff] }
 0x5f1   : > { %8309 = vmatprep.subr.bf16.mxu0 %v6623_v62  ;;  %v18934_v6 = vpop.permute.xlu0 %6380  ;;  %8029 = vmatmul.mubr.bf16.gmra.mxu1 %v14968_v20  ;;  %v15001_v60 = vcombine.high %v6926_v46, %v6930_v16 }
 0x5f2   : > { %8205 = vmatpush1.bf16.msra.mxu1 %v6235_v49  ;;  %8038 = vmatprep.mubr.bf16.mxu1 %v14977_v44 }
 0x5f3   : > { %v18945_v38 = vpop.permute.xlu1 %6446  ;;  %8206 = vmatprep.subr.bf16.mxu1 %v6240_v4 }
 0x5f4   : > { %8310 = vmatpush1.bf16.msra.mxu0 %v6615_v26  ;;  %v6468_v51 = vsel %vm3715_vm13, %v18863_v47, %v18945_v38 }
 0x5f5   : > { %8311 = vmatprep.subr.bf16.mxu0 %v6620_v2  ;;  %v6461_v24 = vpop.permute.xlu0 %6460  ;;  %8142 = vmatmul.mubr.bf16.gmra.mxu0 %v14970_v61 }
 0x5f6   : > { %v6477_v36 = vsel %vm3715_vm13, %v6461_v24, %v18836_v23  ;;  %8207 = vmatpush1.bf16.msra.mxu1 %v6234_v12  ;;  %8151 = vmatprep.mubr.bf16.mxu0 %v14979_v59  ;;  %v6465_v21 = vsel %vm3715_vm13, %v18836_v23, %v6461_v24  ;;  %v6550_v23 = vsel %vm3793_vm0, %v18782_v63, %v18884_v55  ;;  %v6872_v59 = vld [vmem:[%s21715_s8 + $0x10] sm:$0xff] }
 0x5f7   : > { %v18964_v9 = vpop.permute.xlu1 %6522  ;;  %8208 = vmatprep.subr.bf16.mxu1 %v6477_v36  ;;  %v6463_v63 = vsel %vm3715_vm13, %v18901_v37, %v18823_v7  ;;  %v14986_v55 = vcombine.low %v6911_v42, %v6915_v19  ;;  %v6462_v37 = vsel %vm3715_vm13, %v18945_v38, %v18863_v47  ;;  %v6927_v47 = vld [vmem:[%s21715_s8 + $0x1c8] sm:$0xff]  ;;  %v6876_v38 = vld [vmem:[%s21715_s8 + $0x30] sm:$0xff]  ;;  %v15000_v12 = vcombine.low %v6926_v46, %v6930_v16 }
 0x5f8   : > { %8312 = vmatpush1.bf16.msra.mxu0 %v6614_v25  ;;  %v6544_v18 = vsel %vm3793_vm0, %v18912_v33, %v18964_v9  ;;  %v6538_v20 = vsel %vm3793_vm0, %v18964_v9, %v18912_v33  ;;  %v14994_v33 = vcombine.low %v6919_v58, %v6923_v10  ;;  %v15003_v61 = vcombine.high %v6927_v47, %v6931_v0  ;;  %v6873_v25 = vld [vmem:[%s21715_s8 + $0x18] sm:$0xff]  ;;  %v6904_v46 = vld [vmem:[%s21715_s8 + $0x110] sm:$0xff] }
 0x5f9   : > { %v6537_v11 = vpop.permute.xlu0 %6536  ;;  %8039 = vmatmul.mubr.bf16.gmra.mxu1 %v14976_v48  ;;  %v14949_v39 = vcombine.high %v6872_v59, %v6876_v38  ;;  %v6908_v16 = vld [vmem:[%s21715_s8 + $0x130] sm:$0xff] }
 0x5fa   : > { %v6553_v32 = vsel %vm3793_vm0, %v6537_v11, %v18855_v31  ;;  %v6541_v28 = vsel %vm3793_vm0, %v18855_v31, %v6537_v11  ;;  %8209 = vmatpush2.bf16.msra.mxu1 %v6465_v21  ;;  %v6922_v31 = vld [vmem:[%s21715_s8 + $0x1a0] sm:$0xff]  ;;  %8048 = vmatprep.mubr.bf16.mxu1 %v14985_v5  ;;  %v15002_v11 = vcombine.low %v6927_v47, %v6931_v0  ;;  %v6905_v47 = vld [vmem:[%s21715_s8 + $0x118] sm:$0xff] }
 0x5fb   : > { %8313 = vmatprep.subr.bf16.mxu0 %v6553_v32  ;;  %v6383_v17 = vpop.permute.xlu1 %6382  ;;  %8210 = vmatprep.subr.bf16.mxu1 %v6474_v13  ;;  %v14993_v50 = vcombine.high %v6918_v29, %v6922_v31  ;;  %v14992_v14 = vcombine.low %v6918_v29, %v6922_v31  ;;  %v6909_v0 = vld [vmem:[%s21715_s8 + $0x138] sm:$0xff] }
 0x5fc   : > { %8314 = vmatpush1.bf16.msra.mxu0 %v6541_v28  ;;  %v6884_v28 = vld [vmem:[%s21715_s8 + $0x70] sm:$0xff] }
 0x5fd   : > { %8315 = vmatprep.subr.bf16.mxu0 %v6550_v23  ;;  %v18990_v30 = vpop.permute.xlu0 %6684  ;;  %8152 = vmatmul.mubr.bf16.gmra.mxu0 %v14978_v43  ;;  %v6880_v43 = vld [vmem:[%s21715_s8 + $0x50] sm:$0xff] }
 0x5fe   : > { %8211 = vmatpush2.bf16.msra.mxu1 %v6464_v35  ;;  %8161 = vmatprep.mubr.bf16.mxu0 %v14987_v54  ;;  %v14957_v23 = vcombine.high %v6880_v43, %v6884_v28  ;;  %v6885_v35 = vld [vmem:[%s21715_s8 + $0x78] sm:$0xff]  ;;  %v14956_v58 = vcombine.low %v6880_v43, %v6884_v28 }
 0x5ff   : > { %v6687_v34 = vpop.permute.xlu1 %6686  ;;  %8212 = vmatprep.subr.bf16.mxu1 %v6471_v56 }
 0x600   : > { %8316 = vmatpush1.bf16.msra.mxu0 %v6540_v3 }
 0x601   : > { %8317 = vmatprep.subr.bf16.mxu0 %v6547_v8  ;;  %v19010_v22 = vpop.permute.xlu0 %6376  ;;  %8049 = vmatmul.mubr.bf16.gmra.mxu1 %v14984_v45  ;;  %v6892_v8 = vld [vmem:[%s21715_s8 + $0xb0] sm:$0xff] }
 0x602   : > { %8213 = vmatpush2.bf16.msra.mxu1 %v6463_v63  ;;  %8058 = vmatprep.mubr.bf16.mxu1 %v14993_v50  ;;  %v6893_v63 = vld [vmem:[%s21715_s8 + $0xb8] sm:$0xff] }
 0x603   : > { %v6379_v53 = vpop.permute.xlu1 %6378  ;;  %8214 = vmatprep.subr.bf16.mxu1 %v6468_v51 }
 0x604   : > { %8318 = vmatpush1.bf16.msra.mxu0 %v6539_v40  ;;  %v6398_v49 = vsel %vm3637_vm14, %v18934_v6, %v6379_v53  ;;  %v6388_v24 = vsel %vm3637_vm14, %v6379_v53, %v18934_v6  ;;  %v6877_v6 = vld [vmem:[%s21715_s8 + $0x38] sm:$0xff]  ;;  %v6896_v40 = vld [vmem:[%s21715_s8 + $0xd0] sm:$0xff] }
 0x605   : > { %8319 = vmatprep.subr.bf16.mxu0 %v6544_v18  ;;  %v6385_v7 = vpop.permute.xlu0 %6384  ;;  %8162 = vmatmul.mubr.bf16.gmra.mxu0 %v14986_v55  ;;  %v14951_v21 = vcombine.high %v6873_v25, %v6877_v6  ;;  %v14950_v3 = vcombine.low %v6873_v25, %v6877_v6  ;;  %v6932_v25 = vld [vmem:[%s21715_s8 + $0x1f0] sm:$0xff] }
 0x606   : > { %v6401_v27 = vsel %vm3637_vm14, %v6385_v7, %v6383_v17  ;;  %8215 = vmatpush2.bf16.msra.mxu1 %v6462_v37  ;;  %8171 = vmatprep.mubr.bf16.mxu0 %v14995_v1  ;;  %v6389_v62 = vsel %vm3637_vm14, %v6383_v17, %v6385_v7  ;;  %v14948_v17 = vcombine.low %v6872_v59, %v6876_v38  ;;  %v6900_v1 = vld [vmem:[%s21715_s8 + $0xf0] sm:$0xff]  ;;  %v6897_v7 = vld [vmem:[%s21715_s8 + $0xd8] sm:$0xff] }
 0x607   : > { %v6683_v57 = vpop.permute.xlu1 %6682  ;;  %8216 = vmatprep.subr.bf16.mxu1 %v6401_v27  ;;  %v14973_v18 = vcombine.high %v6896_v40, %v6900_v1  ;;  %v6901_v37 = vld [vmem:[%s21715_s8 + $0xf8] sm:$0xff]  ;;  %v6920_v59 = vld [vmem:[%s21715_s8 + $0x190] sm:$0xff] }
 0x608   : > { %8320 = vmatpush1.bf16.msra.mxu0 %v6538_v20  ;;  %v6702_v26 = vsel %vm3949_vm1, %v18990_v30, %v6683_v57  ;;  %v6692_v48 = vsel %vm3949_vm1, %v6683_v57, %v18990_v30  ;;  %v6881_v30 = vld [vmem:[%s21715_s8 + $0x58] sm:$0xff]  ;;  %v14972_v20 = vcombine.low %v6896_v40, %v6900_v1  ;;  %v14981_v57 = vcombine.high %v6904_v46, %v6908_v16  ;;  %v6924_v38 = vld [vmem:[%s21715_s8 + $0x1b0] sm:$0xff] }
 0x609   : > { %v6689_v44 = vpop.permute.xlu0 %6688  ;;  %8059 = vmatmul.mubr.bf16.gmra.mxu1 %v14992_v14  ;;  %v14959_v50 = vcombine.high %v6881_v30, %v6885_v35  ;;  %v14958_v55 = vcombine.low %v6881_v30, %v6885_v35  ;;  %v14975_v14 = vcombine.high %v6897_v7, %v6901_v37  ;;  %v14996_v6 = vcombine.low %v6920_v59, %v6924_v38 }
 0x60a   : > { %v6705_v41 = vsel %vm3949_vm1, %v6689_v44, %v6687_v34  ;;  %v6693_v15 = vsel %vm3949_vm1, %v6687_v34, %v6689_v44  ;;  %8217 = vmatpush2.bf16.msra.mxu1 %v6389_v62  ;;  %8068 = vmatprep.mubr.bf16.mxu1 %v15001_v60  ;;  %v6888_v34 = vld [vmem:[%s21715_s8 + $0x90] sm:$0xff]  ;;  %v14974_v44 = vcombine.low %v6897_v7, %v6901_v37 }
 0x60b   : > { %8329 = vmatprep.subr.bf16.mxu0 %v6705_v41  ;;  %v6375_v4 = vpop.permute.xlu1 %6374  ;;  %8218 = vmatprep.subr.bf16.mxu1 %v6398_v49  ;;  %v14965_v10 = vcombine.high %v6888_v34, %v6892_v8  ;;  %v14964_v53 = vcombine.low %v6888_v34, %v6892_v8  ;;  %v14983_v60 = vcombine.high %v6905_v47, %v6909_v0  ;;  %v6912_v62 = vld [vmem:[%s21715_s8 + $0x150] sm:$0xff]  ;;  %v6913_v49 = vld [vmem:[%s21715_s8 + $0x158] sm:$0xff] }
 0x60c   : > { %8330 = vmatpush2.bf16.msra.mxu0 %v6693_v15  ;;  %v6395_v36 = vsel %vm3637_vm14, %v19010_v22, %v6375_v4  ;;  %v6387_v19 = vsel %vm3637_vm14, %v6375_v4, %v19010_v22  ;;  %v6889_v22 = vld [vmem:[%s21715_s8 + $0x98] sm:$0xff]  ;;  %v6916_v41 = vld [vmem:[%s21715_s8 + $0x170] sm:$0xff]  ;;  %v14982_v4 = vcombine.low %v6905_v47, %v6909_v0 }
 0x60d   : > { %8331 = vmatprep.subr.bf16.mxu0 %v6702_v26  ;;  %v6681_v2 = vpop.permute.xlu0 %6680  ;;  %8172 = vmatmul.mubr.bf16.gmra.mxu0 %v14994_v33  ;;  %v14967_v51 = vcombine.high %v6889_v22, %v6893_v63  ;;  %v14966_v27 = vcombine.low %v6889_v22, %v6893_v63  ;;  %v14980_v33 = vcombine.low %v6904_v46, %v6908_v16 }
 0x60e   : > { %8219 = vmatpush2.bf16.msra.mxu1 %v6388_v24  ;;  %8181 = vmatprep.mubr.bf16.mxu0 %v15003_v61  ;;  %v14989_v15 = vcombine.high %v6912_v62, %v6916_v41  ;;  %v6917_v61 = vld [vmem:[%s21715_s8 + $0x178] sm:$0xff]  ;;  %v14997_v24 = vcombine.high %v6920_v59, %v6924_v38 }
 0x60f   : > { %v6679_v52 = vpop.permute.xlu1 %6678  ;;  %8220 = vmatprep.subr.bf16.mxu1 %v6395_v36  ;;  %v14991_v26 = vcombine.high %v6913_v49, %v6917_v61  ;;  %v6925_v36 = vld [vmem:[%s21715_s8 + $0x1b8] sm:$0xff] }
 0x610   : > { %8332 = vmatpush2.bf16.msra.mxu0 %v6692_v48  ;;  %v6699_v9 = vsel %vm3949_vm1, %v6681_v2, %v6679_v52  ;;  %v6691_v5 = vsel %vm3949_vm1, %v6679_v52, %v6681_v2  ;;  %v14988_v2 = vcombine.low %v6912_v62, %v6916_v41  ;;  %v14990_v48 = vcombine.low %v6913_v49, %v6917_v61  ;;  %v6928_v52 = vld [vmem:[%s21715_s8 + $0x1d0] sm:$0xff] }
 0x611   : > { %8069 = vmatmul.mubr.bf16.gmra.mxu1 %v15000_v12  ;;  %8333 = vmatprep.subr.bf16.mxu0 %v6699_v9  ;;  %v6373_v42 = vpop.permute.xlu0 %6372  ;;  %v6921_v12 = vld [vmem:[%s21715_s8 + $0x198] sm:$0xff]  ;;  %v15005_v9 = vcombine.high %v6928_v52, %v6932_v25 }
 0x612   : > { %8221 = vmatpush2.bf16.msra.mxu1 %v6387_v19  ;;  %8224 = vmatprep.mubr.bf16.mxu1 %v14949_v39  ;;  %v14999_v39 = vcombine.high %v6921_v12, %v6925_v36  ;;  %v6933_v19 = vld [vmem:[%s21715_s8 + $0x1f8] sm:$0xff] }
 0x613   : > { %v6371_v32 = vpop.permute.xlu1 %6370 }
 0x614   : > { %8334 = vmatpush2.bf16.msra.mxu0 %v6691_v5  ;;  %v6392_v13 = vsel %vm3637_vm14, %v6373_v42, %v6371_v32  ;;  %v6386_v54 = vsel %vm3637_vm14, %v6371_v32, %v6373_v42  ;;  %v6929_v42 = vld [vmem:[%s21715_s8 + $0x1d8] sm:$0xff] }
 0x615   : > { %8182 = vmatmul.mubr.bf16.gmra.mxu0 %v15002_v11  ;;  %8222 = vmatprep.subr.bf16.mxu1 %v6392_v13  ;;  %v6677_v29 = vpop.permute.xlu0 %6676  ;;  %v14998_v11 = vcombine.low %v6921_v12, %v6925_v36  ;;  %v15007_v5 = vcombine.high %v6929_v42, %v6933_v19  ;;  %v15006_v32 = vcombine.low %v6929_v42, %v6933_v19 }
 0x616   : > { %8223 = vmatpush2.bf16.msra.mxu1 %v6386_v54  ;;  %15128 = vmatprep.mubr.msk.bf16.mxu0 %vm858_vm2, %v14951_v21  ;;  %v15004_v21 = vcombine.low %v6928_v52, %v6932_v25 }
 0x617   : > { %v6675_v31 = vpop.permute.xlu1 %6674 }
 0x618   : > { %v6696_v45 = vsel %vm3949_vm1, %v6677_v29, %v6675_v31  ;;  %v6690_v56 = vsel %vm3949_vm1, %v6675_v31, %v6677_v29 }
 0x619   : > { %8225 = vmatmul.mubr.bf16.vlgmr.msra.gmra.mxu1 %v14948_v17  ;;  %8335 = vmatprep.subr.bf16.mxu0 %v6696_v45 }
 0x61a   : > { %8336 = vmatpush2.bf16.msra.mxu0 %v6690_v56  ;;  %8234 = vmatprep.mubr.bf16.mxu1 %v14957_v23 }
 0x61d   : > { %8338 = vmatmul.mubr.bf16.vlgmr.msra.gmra.mxu0 %v14950_v3 }
 0x61e   : > { %15129 = vmatprep.mubr.msk.bf16.mxu0 %vm858_vm2, %v14959_v50 }
 0x621   : > { %8235 = vmatmul.mubr.bf16.gmra.mxu1 %v14956_v58 }
 0x622   : > { %8244 = vmatprep.mubr.bf16.mxu1 %v14965_v10  ;;  %v19168_v28 = vpop.permute.xlu0 %6987 }
 0x623   : > { %21884 = vst [vmem:[#allocation23_spill] sm:$0xff] %v19168_v28 }
 0x624   : > { %v6983_v43 = vpop.permute.xlu1 %6982 }
 0x625   : > { %8348 = vmatmul.mubr.bf16.gmra.mxu0 %v14958_v55 }
 0x626   : > { %15130 = vmatprep.mubr.msk.bf16.mxu0 %vm858_vm2, %v14967_v51  ;;  %v19172_v54 = vpop.permute.xlu0 %7027 }
 0x627   : > { %21885 = vst [vmem:[#allocation25_spill] sm:$0xff] %v19172_v54 }
 0x628   : > { %v19170_v13 = vpop.permute.xlu1 %7022 }
 0x629   : > { %8245 = vmatmul.mubr.bf16.gmra.mxu1 %v14964_v53 }
 0x62a   : > { %8254 = vmatprep.mubr.bf16.mxu1 %v14973_v18  ;;  %v19174_v23 = vpop.permute.xlu0 %6977 }
 0x62b   : > { %21886 = vst [vmem:[#allocation28_spill] sm:$0xff] %v19174_v23 }
 0x62c   : > { %v6973_v17 = vpop.permute.xlu1 %6972 }
 0x62d   : > { %8358 = vmatmul.mubr.bf16.gmra.mxu0 %v14966_v27 }
 0x62e   : > { %15131 = vmatprep.mubr.msk.bf16.mxu0 %vm858_vm2, %v14975_v14  ;;  %v19178_v31 = vpop.permute.xlu0 %7017 }
 0x62f   : > { %21887 = vst [vmem:[#allocation16_spill] sm:$0xff] %v19178_v31 }
 0x630   : > { %v19176_v29 = vpop.permute.xlu1 %7012 }
 0x631   : > { %8255 = vmatmul.mubr.bf16.gmra.mxu1 %v14972_v20 }
 0x632   : > { %8264 = vmatprep.mubr.bf16.mxu1 %v14981_v57  ;;  %v19180_v35 = vpop.permute.xlu0 %6967 }
 0x634   : > { %v6963_v30 = vpop.permute.xlu1 %6962 }
 0x635   : > { %8368 = vmatmul.mubr.bf16.gmra.mxu0 %v14974_v44 }
 0x636   : > { %15132 = vmatprep.mubr.msk.bf16.mxu0 %vm858_vm2, %v14983_v60  ;;  %v19184_v56 = vpop.permute.xlu0 %7007 }
 0x638   : > { %v19182_v45 = vpop.permute.xlu1 %7002 }
 0x639   : > { %8265 = vmatmul.mubr.bf16.gmra.mxu1 %v14980_v33 }
 0x63a   : > { %8274 = vmatprep.mubr.bf16.mxu1 %v14989_v15  ;;  %v19186_v22 = vpop.permute.xlu0 %6957 }
 0x63c   : > { %v6953_v50 = vpop.permute.xlu1 %6952 }
 0x63d   : > { %8378 = vmatmul.mubr.bf16.gmra.mxu0 %v14982_v4 }
 0x63e   : > { %15133 = vmatprep.mubr.msk.bf16.mxu0 %vm858_vm2, %v14991_v26 }
 0x641   : > { %8275 = vmatmul.mubr.bf16.gmra.mxu1 %v14988_v2 }
 0x642   : > { %8284 = vmatprep.mubr.bf16.mxu1 %v14997_v24 }
 0x645   : > { %8388 = vmatmul.mubr.bf16.gmra.mxu0 %v14990_v48 }
 0x646   : > { %15134 = vmatprep.mubr.msk.bf16.mxu0 %vm858_vm2, %v14999_v39 }
 0x649   : > { %8285 = vmatmul.mubr.bf16.gmra.mxu1 %v14996_v6 }
 0x64a   : > { %8294 = vmatprep.mubr.bf16.mxu1 %v15005_v9 }
 0x64d   : > { %8398 = vmatmul.mubr.bf16.gmra.mxu0 %v14998_v11 }
 0x64e   : > { %15135 = vmatprep.mubr.msk.bf16.mxu0 %vm858_vm2, %v15007_v5 }
 0x651   : > { %8295 = vmatmul.mubr.bf16.gmra.mxu1 %v15004_v21 }
 0x655   : > { %8408 = vmatmul.mubr.bf16.gmra.mxu0 %v15006_v32 }
 0x699   : > { %v8000_v3 = vpop.f32.mrf.mxu1 }
 0x69a   : > { %v8001_v8 = vadd.f32 %v8000_v3, %v6953_v50 }
 0x69b   : > { %v8002_v34 = vpop.f32.mrf.mxu1 }
 0x69c   : > { %v8003_v63 = vadd.f32 %v8002_v34, %v6953_v50 }
 0x69d   : > { %v8004_v58 = vpop.f32.mrf.mxu1  ;;  %v8113_v10 = vpop.f32.mrf.mxu0 }
 0x69e   : > { %v19188_v55 = vadd.f32 %v8113_v10, %v8001_v8  ;;  %v8005_v1 = vadd.f32 %v8004_v58, %v19186_v22  ;;  %v6993_v8 = vpop.permute.xlu1 %6992 }
 0x69f   : > { %v19190_v51 = vpop.f32.mrf.mxu1  ;;  %v8115_v40 = vpop.f32.mrf.mxu0 }
 0x6a0   : > { %v19193_v53 = vadd.f32 %v8115_v40, %v8003_v63 }
 0x6a1   : > { %v8010_v18 = vpop.f32.mrf.mxu1  ;;  %v8117_v7 = vpop.f32.mrf.mxu0 }
 0x6a2   : > { %v19195_v37 = vadd.f32 %v8117_v7, %v8005_v1  ;;  %v8011_v46 = vadd.f32 %v8010_v18, %v6963_v30 }
 0x6a3   : > { %v8012_v27 = vpop.f32.mrf.mxu1  ;;  %v19197_v14 = vpop.f32.mrf.mxu0 }
 0x6a4   : > { %v8013_v57 = vadd.f32 %v8012_v27, %v6963_v30 }
 0x6a5   : > { %v8014_v16 = vpop.f32.mrf.mxu1  ;;  %v8123_v20 = vpop.f32.mrf.mxu0 }
 0x6a6   : > { %v19199_v47 = vadd.f32 %v8123_v20, %v8011_v46  ;;  %v8015_v60 = vadd.f32 %v8014_v16, %v19180_v35 }
 0x6a7   : > { %v19201_v0 = vpop.f32.mrf.mxu1  ;;  %v8125_v44 = vpop.f32.mrf.mxu0 }
 0x6a8   : > { %v19204_v62 = vadd.f32 %v8125_v44, %v8013_v57 }
 0x6a9   : > { %v8020_v41 = vpop.f32.mrf.mxu1  ;;  %v8127_v33 = vpop.f32.mrf.mxu0 }
 0x6aa   : > { %v19206_v15 = vadd.f32 %v8127_v33, %v8015_v60  ;;  %v8021_v4 = vadd.f32 %v8020_v41, %v6973_v17 }
 0x6ab   : > { %v8022_v49 = vpop.f32.mrf.mxu1  ;;  %v19208_v61 = vpop.f32.mrf.mxu0 }
 0x6ac   : > { %v8023_v38 = vadd.f32 %v8022_v49, %v6973_v17 }
 0x6ad   : > { %v8024_v26 = vpop.f32.mrf.mxu1  ;;  %v8133_v59 = vpop.f32.mrf.mxu0 }
 0x6ae   : > { %v19210_v2 = vadd.f32 %v8133_v59, %v8021_v4  ;;  %v8025_v36 = vadd.f32 %v8024_v26, %v19174_v23 }
 0x6af   : > { %v19212_v24 = vpop.f32.mrf.mxu1  ;;  %v8135_v12 = vpop.f32.mrf.mxu0 }
 0x6b0   : > { %21888 = vst [vmem:[#allocation29_spill] sm:$0xff] %v19212_v24  ;;  %v19215_v48 = vadd.f32 %v8135_v12, %v8023_v38 }
 0x6b1   : > { %v8030_v39 = vpop.f32.mrf.mxu1  ;;  %v8137_v52 = vpop.f32.mrf.mxu0 }
 0x6b2   : > { %v19217_v25 = vadd.f32 %v8137_v52, %v8025_v36  ;;  %v8031_v42 = vadd.f32 %v8030_v39, %v6983_v43 }
 0x6b3   : > { %v8032_v6 = vpop.f32.mrf.mxu1  ;;  %v19219_v9 = vpop.f32.mrf.mxu0 }
 0x6b4   : > { %21889 = vst [vmem:[#allocation33_spill] sm:$0xff] %v19217_v25  ;;  %21890 = vst [vmem:[#allocation30_spill] sm:$0xff] %v19219_v9  ;;  %v8033_v5 = vadd.f32 %v8032_v6, %v6983_v43 }
 0x6b5   : > { %v8034_v19 = vpop.f32.mrf.mxu1  ;;  %v8143_v11 = vpop.f32.mrf.mxu0 }
 0x6b6   : > { %v19221_v21 = vadd.f32 %v8143_v11, %v8031_v42  ;;  %v8035_v30 = vadd.f32 %v8034_v19, %v19168_v28 }
 0x6b7   : > { %v19223_v32 = vpop.f32.mrf.mxu1  ;;  %v8145_v17 = vpop.f32.mrf.mxu0 }
 0x6b8   : > { %21891 = vst [vmem:[#allocation32_spill] sm:$0xff] %v19223_v32  ;;  %v19226_v3 = vadd.f32 %v8145_v17, %v8033_v5 }
 0x6b9   : > { %v8040_v50 = vpop.f32.mrf.mxu1  ;;  %v8147_v34 = vpop.f32.mrf.mxu0 }
 0x6ba   : > { %v19228_v58 = vadd.f32 %v8147_v34, %v8035_v30  ;;  %v8041_v40 = vadd.f32 %v8040_v50, %v6993_v8 }
 0x6bb   : > { %v8042_v10 = vpop.f32.mrf.mxu1  ;;  %v19230_v63 = vpop.f32.mrf.mxu0 }
 0x6bc   : > { %21892 = vst [vmem:[#allocation34_spill] sm:$0xff] %v19230_v63  ;;  %v8043_v18 = vadd.f32 %v8042_v10, %v6993_v8 }
 0x6bd   : > { %v19232_v1 = vpop.f32.mrf.mxu1  ;;  %v8153_v43 = vpop.f32.mrf.mxu0 }
 0x6be   : > { %v19234_v7 = vadd.f32 %v8153_v43, %v8041_v40 }
 0x6bf   : > { %v19236_v27 = vpop.f32.mrf.mxu1  ;;  %v8155_v46 = vpop.f32.mrf.mxu0 }
 0x6c0   : > { %v19238_v16 = vadd.f32 %v8155_v46, %v8043_v18 }
 0x6c1   : > { %v8050_v20 = vpop.f32.mrf.mxu1  ;;  %v19240_v57 = vpop.f32.mrf.mxu0 }
 0x6c2   : > { %v8051_v41 = vadd.f32 %v8050_v20, %v19182_v45 }
 0x6c3   : > { %v8052_v44 = vpop.f32.mrf.mxu1  ;;  %v19242_v60 = vpop.f32.mrf.mxu0 }
 0x6c4   : > { %v8053_v4 = vadd.f32 %v8052_v44, %v19182_v45 }
 0x6c5   : > { %v8054_v33 = vpop.f32.mrf.mxu1  ;;  %v8163_v49 = vpop.f32.mrf.mxu0 }
 0x6c6   : > { %v19246_v26 = vadd.f32 %v8163_v49, %v8051_v41  ;;  %v8055_v12 = vadd.f32 %v8054_v33, %v19184_v56 }
 0x6c7   : > { %v19248_v59 = vpop.f32.mrf.mxu1  ;;  %v8165_v38 = vpop.f32.mrf.mxu0 }
 0x6c8   : > { %v19251_v36 = vadd.f32 %v8165_v38, %v8053_v4 }
 0x6c9   : > { %v8060_v39 = vpop.f32.mrf.mxu1  ;;  %v8167_v52 = vpop.f32.mrf.mxu0 }
 0x6ca   : > { %v19253_v6 = vadd.f32 %v8167_v52, %v8055_v12  ;;  %v8061_v11 = vadd.f32 %v8060_v39, %v19176_v29 }
 0x6cb   : > { %v8062_v42 = vpop.f32.mrf.mxu1  ;;  %v19255_v19 = vpop.f32.mrf.mxu0 }
 0x6cc   : > { %v8063_v17 = vadd.f32 %v8062_v42, %v19176_v29 }
 0x6cd   : > { %v8064_v5 = vpop.f32.mrf.mxu1  ;;  %v8173_v45 = vpop.f32.mrf.mxu0 }
 0x6ce   : > { %v19259_v30 = vadd.f32 %v8173_v45, %v8061_v11  ;;  %v8065_v8 = vadd.f32 %v8064_v5, %v19178_v31 }
 0x6cf   : > { %v19261_v50 = vpop.f32.mrf.mxu1  ;;  %v8175_v34 = vpop.f32.mrf.mxu0 }
 0x6d0   : > { %21893 = vst [vmem:[#allocation31_spill] sm:$0xff] %v19261_v50  ;;  %v19264_v10 = vadd.f32 %v8175_v34, %v8063_v17 }
 0x6d1   : > { %v8070_v40 = vpop.f32.mrf.mxu1  ;;  %v8177_v43 = vpop.f32.mrf.mxu0 }
 0x6d2   : > { %v19266_v18 = vadd.f32 %v8177_v43, %v8065_v8  ;;  %v8071_v44 = vadd.f32 %v8070_v40, %v19170_v13 }
 0x6d3   : > { %v8072_v46 = vpop.f32.mrf.mxu1  ;;  %v19268_v20 = vpop.f32.mrf.mxu0 }
 0x6d4   : > { %21894 = vst [vmem:[#allocation17_spill] sm:$0xff] %v19266_v18  ;;  %21895 = vst [vmem:[#allocation21_spill] sm:$0xff] %v19268_v20  ;;  %v8073_v33 = vadd.f32 %v8072_v46, %v19170_v13 }
 0x6d5   : > { %v8074_v41 = vpop.f32.mrf.mxu1  ;;  %v8183_v29 = vpop.f32.mrf.mxu0 }
 0x6d6   : > { %v19272_v49 = vadd.f32 %v8183_v29, %v8071_v44  ;;  %v8075_v12 = vadd.f32 %v8074_v41, %v19172_v54 }
 0x6d7   : > { %v19274_v4 = vpop.f32.mrf.mxu1  ;;  %v8185_v38 = vpop.f32.mrf.mxu0 }
 0x6d8   : > { %21896 = vst [vmem:[#allocation22_spill] sm:$0xff] %v19272_v49  ;;  %21897 = vst [vmem:[#allocation18_spill] sm:$0xff] %v19274_v4  ;;  %v19277_v39 = vadd.f32 %v8185_v38, %v8073_v33 }
 0x6d9   : > { %v8187_v52 = vpop.f32.mrf.mxu0  ;;  %v8226_v42 = vpop.f32.mrf.mxu1 }
 0x6da   : > { %21898 = vst [vmem:[#allocation26_spill] sm:$0xff] %v19277_v39  ;;  %v19279_v11 = vadd.f32 %v8187_v52, %v8075_v12 }
 0x6db   : > { %v19281_v5 = vpop.f32.mrf.mxu0  ;;  %v8228_v45 = vpop.f32.mrf.mxu1 }
 0x6dc   : > { %21899 = vst [vmem:[#allocation27_spill] sm:$0xff] %v19279_v11  ;;  %21900 = vst [vmem:[#allocation35_spill] sm:$0xff] %v19281_v5 }
 0x6dd   : > { %v8230_v17 = vpop.f32.mrf.mxu1  ;;  %v8339_v34 = vpop.f32.mrf.mxu0 }
 0x6df   : > { %v19283_v8 = vpop.f32.mrf.mxu1  ;;  %v8341_v13 = vpop.f32.mrf.mxu0 }
 0x6e1   : > { %v19285_v40 = vpop.f32.mrf.mxu1  ;;  %v8343_v43 = vpop.f32.mrf.mxu0 }
 0x6e3   : > { %v19287_v46 = vpop.f32.mrf.mxu1  ;;  %v19289_v44 = vpop.f32.mrf.mxu0 }
 0x6e5   : > { %v19291_v41 = vpop.f32.mrf.mxu1  ;;  %v19293_v29 = vpop.f32.mrf.mxu0 }
 0x6e7   : > { %v19295_v33 = vpop.f32.mrf.mxu1  ;;  %v19297_v38 = vpop.f32.mrf.mxu0 }
 0x6e9   : > { %v19299_v12 = vpop.f32.mrf.mxu1  ;;  %v19301_v52 = vpop.f32.mrf.mxu0 }
 0x6eb   : > { %v19303_v63 = vpop.f32.mrf.mxu1  ;;  %v19305_v5 = vpop.f32.mrf.mxu0 }
 0x6ec   : > { %21901 = vst [vmem:[#allocation37_spill] sm:$0xff] %v19305_v5  ;;  %v6998_v5 = vpop.permute.xlu0 %6997 }
 0x6ed   : > { %v19307_v32 = vpop.f32.mrf.mxu1  ;;  %v19309_v28 = vpop.f32.mrf.mxu0 }
 0x6ee   : > { %21902 = vst [vmem:[#allocation20_spill] sm:$0xff] %v19307_v32 }
 0x6ef   : > { %v19311_v4 = vpop.f32.mrf.mxu1  ;;  %v19313_v54 = vpop.f32.mrf.mxu0 }
 0x6f0   : > { %21903 = vst [vmem:[#allocation36_spill] sm:$0xff] %v19311_v4  ;;  %21904 = vst [vmem:[#allocation19_spill] sm:$0xff] %v19313_v54 }
 0x6f1   : > { %v8256_v9 = vpop.f32.mrf.mxu1  ;;  %v19315_v20 = vpop.f32.mrf.mxu0 }
 0x6f2   : > { %21905 = vst [vmem:[#allocation24_spill] sm:$0xff] %v19315_v20  ;;  %v8257_v24 = vadd.f32 %v8256_v9, %v19221_v21  ;;  %v8045_v21 = vadd.f32 %v19232_v1, %v6998_v5  ;;  %v8007_v1 = vadd.f32 %v19190_v51, %v19186_v22  ;;  %v8017_v22 = vadd.f32 %v19201_v0, %v19180_v35 }
 0x6f3   : > { %v8258_v23 = vpop.f32.mrf.mxu1  ;;  %v19318_v50 = vpop.f32.mrf.mxu0 }
 0x6f4   : > { %21906 = vst [vmem:[#allocation38_spill] sm:$0xff] %v19318_v50  ;;  %v8259_v31 = vadd.f32 %v8258_v23, %v19226_v3  ;;  %v8227_v3 = vadd.f32 %v8226_v42, %v19188_v55 }
 0x6f5   : > { %v8260_v11 = vpop.f32.mrf.mxu1  ;;  %v8369_v39 = vpop.f32.mrf.mxu0 }
 0x6f6   : > { %v8261_v49 = vadd.f32 %v8260_v11, %v19228_v58  ;;  %v19322_v18 = vadd.f32 %v8369_v39, %v8257_v24  ;;  %v8158_v58 = vadd.f32 %v19240_v57, %v8045_v21 }
 0x6f7   : > { %v19324_v32 = vpop.f32.mrf.mxu1  ;;  %v8371_v4 = vpop.f32.mrf.mxu0 }
 0x6f8   : > { %21907 = vst [vmem:[#allocation39_spill] sm:$0xff] %v19324_v32  ;;  %v19326_v54 = vadd.f32 %v8371_v4, %v8259_v31  ;;  %v8229_v31 = vadd.f32 %v8228_v45, %v19193_v53  ;;  %v8340_v4 = vadd.f32 %v8339_v34, %v8227_v3 }
 0x6f9   : > { %v8266_v25 = vpop.f32.mrf.mxu1  ;;  %v8373_v20 = vpop.f32.mrf.mxu0 }
 0x6fa   : > { %v19328_v9 = vadd.f32 %v8373_v20, %v8261_v49  ;;  %v8267_v24 = vadd.f32 %v8266_v25, %v19234_v7  ;;  %v8047_v49 = vadd.f32 %v19236_v27, %v6998_v5  ;;  %v8342_v25 = vadd.f32 %v8341_v13, %v8229_v31 }
 0x6fb   : > { %v8268_v50 = vpop.f32.mrf.mxu1  ;;  %v19331_v23 = vpop.f32.mrf.mxu0  ;;  %v8057_v13 = vadd.f32 %v19248_v59, %v19184_v56 }
 0x6fc   : > { %21908 = vst [vmem:[#allocation40_spill] sm:$0xff] %v19328_v9  ;;  %21909 = vst [vmem:[#allocation41_spill] sm:$0xff] %v19331_v23  ;;  %v8269_v32 = vadd.f32 %v8268_v50, %v19238_v16  ;;  %v8231_v23 = vadd.f32 %v8230_v17, %v19195_v37  ;;  %v8120_v9 = vadd.f32 %v19197_v14, %v8007_v1 }
 0x6fd   : > { %v8270_v39 = vpop.f32.mrf.mxu1  ;;  %v8379_v11 = vpop.f32.mrf.mxu0  ;;  %v8160_v53 = vadd.f32 %v19242_v60, %v8047_v49 }
 0x6fe   : > { %v8380_v20 = vadd.f32 %v8379_v11, %v8267_v24  ;;  %v8271_v7 = vadd.f32 %v8270_v39, %v8158_v58  ;;  %v8344_v50 = vadd.f32 %v8343_v43, %v8231_v23  ;;  %v8233_v51 = vadd.f32 %v19283_v8, %v8120_v9 }
 0x6ff   : > { %v8272_v55 = vpop.f32.mrf.mxu1  ;;  %v8381_v42 = vpop.f32.mrf.mxu0  ;;  %v8239_v43 = vadd.f32 %v19287_v46, %v19204_v62  ;;  %v21910_v46 = vld [vmem:[#allocation14_spill] sm:$0xff] }
 0x700   : > { %v8418_v57 = vadd.f32 %v8380_v20, %v8340_v4  ;;  %v8382_v21 = vadd.f32 %v8381_v42, %v8269_v32  ;;  %v8273_v37 = vadd.f32 %v8272_v55, %v8160_v53  ;;  %v8237_v32 = vadd.f32 %v19285_v40, %v19199_v47  ;;  %v21911_v42 = vld [vmem:[#allocation15_spill] sm:$0xff] }
 0x701   : > { %v8276_v45 = vpop.f32.mrf.mxu1  ;;  %v8383_v16 = vpop.f32.mrf.mxu0  ;;  %v8346_v35 = vadd.f32 %v19289_v44, %v8233_v51  ;;  %v8352_v58 = vadd.f32 %v19297_v38, %v8239_v43  ;;  %v8249_v51 = vadd.f32 %v19303_v63, %v19215_v48 }
 0x702   : > { %v8419_v34 = vadd.f32 %v8382_v21, %v8342_v25  ;;  %v8384_v3 = vadd.f32 %v8383_v16, %v8271_v7  ;;  %v8434_v17 = vmax.f32 %v8418_v57, 0.0  ;;  %v8277_v14 = vadd.f32 %v8276_v45, %v19246_v26 }
 0x703   : > { %v8278_v27 = vpop.f32.mrf.mxu1  ;;  %v8385_v5 = vpop.f32.mrf.mxu0  ;;  %v8350_v23 = vadd.f32 %v19293_v29, %v8237_v32  ;;  %v8241_v26 = vadd.f32 %v19291_v41, %v19206_v15  ;;  %v8170_v29 = vadd.f32 %v19255_v19, %v8057_v13  ;;  %v8130_v15 = vadd.f32 %v19208_v61, %v8017_v22  ;;  %v21916_v13 = vld [vmem:[#allocation19_spill] sm:$0xff] }
 0x704   : > { %v8420_v60 = vadd.f32 %v8384_v3, %v8344_v50  ;;  %v8386_v0 = vadd.f32 %v8385_v5, %v8273_v37  ;;  %v8279_v47 = vadd.f32 %v8278_v27, %v19251_v36  ;;  %v8435_v56 = vmax.f32 %v8419_v34, 0.0 }
 0x705   : > { %v8280_v8 = vpop.f32.mrf.mxu1  ;;  %v8389_v9 = vpop.f32.mrf.mxu0  ;;  %v8450_v44 = vmul.f32 %v8434_v17, %v21910_v46  ;;  %v8354_v41 = vadd.f32 %v19301_v52, %v8241_v26  ;;  %v8247_v45 = vadd.f32 %v19299_v12, %v19210_v2  ;;  %v21913_v12 = vld [vmem:[#allocation37_spill] sm:$0xff]  ;;  %v8362_v43 = vadd.f32 %v21916_v13, %v8249_v51  ;;  %v21929_v13 = vld [vmem:[#allocation30_spill] sm:$0xff] }
 0x706   : > { %v8436_v24 = vmax.f32 %v8420_v60, 0.0  ;;  %v8390_v40 = vadd.f32 %v8389_v9, %v8277_v14  ;;  %v8421_v59 = vadd.f32 %v8386_v0, %v8346_v35  ;;  %v8281_v36 = vadd.f32 %v8280_v8, %v19253_v6  ;;  %v21914_v17 = vld [vmem:[#allocation33_spill] sm:$0xff]  ;;  %v21915_v14 = vld [vmem:[#allocation20_spill] sm:$0xff] }
 0x707   : > { %v8282_v39 = vpop.f32.mrf.mxu1  ;;  %v8391_v62 = vpop.f32.mrf.mxu0  ;;  %v8451_v25 = vmul.f32 %v8435_v56, %v21911_v42  ;;  %v8243_v6 = vadd.f32 %v19295_v33, %v8130_v15  ;;  %v8360_v33 = vadd.f32 %v19309_v28, %v8247_v45  ;;  %v8251_v60 = vadd.f32 %v21915_v14, %v21914_v17  ;;  %v21917_v0 = vld [vmem:[#allocation17_spill] sm:$0xff] }
 0x708   : > { %v8452_v11 = vmul.f32 %v8436_v24, %v21910_v46  ;;  %v8422_v31 = vadd.f32 %v8390_v40, %v8350_v23  ;;  %v8392_v4 = vadd.f32 %v8391_v62, %v8279_v47  ;;  %v8437_v20 = vmax.f32 %v8421_v59, 0.0  ;;  %v21918_v47 = vld [vmem:[#allocation24_spill] sm:$0xff]  ;;  %v21928_v17 = vld [vmem:[#allocation21_spill] sm:$0xff] }
 0x709   : > { %v8286_v1 = vpop.f32.mrf.mxu1  ;;  %v8393_v49 = vpop.f32.mrf.mxu0  ;;  %v8283_v57 = vadd.f32 %v8282_v39, %v8170_v29  ;;  %v8364_v40 = vadd.f32 %v21918_v47, %v8251_v60  ;;  %v21919_v39 = vld [vmem:[#allocation22_spill] sm:$0xff] }
 0x70a   : > { %v19366_v38 = vpack.c.bf16 %v8452_v11, %v8450_v44  ;;  %v19368_v55 = vadd.f32 %v8392_v4, %v8352_v58  ;;  %v8453_v7 = vmul.f32 %v8437_v20, %v21911_v42  ;;  %v8394_v21 = vadd.f32 %v8393_v49, %v8281_v36  ;;  %v21920_v20 = vld [vmem:[#allocation26_spill] sm:$0xff] }
 0x70b   : > { %v8288_v19 = vpop.f32.mrf.mxu1  ;;  %v8395_v53 = vpop.f32.mrf.mxu0  ;;  %v8287_v61 = vadd.f32 %v8286_v1, %v19259_v30  ;;  %v8438_v16 = vmax.f32 %v8422_v31, 0.0  ;;  %v8356_v30 = vadd.f32 %v21913_v12, %v8243_v6 }
 0x70c   : > { %8568 = vrot.lane.b32.xlu0 %v19366_v38, %s21912_s9  ;;  %v19378_v52 = vpack.c.bf16 %v8453_v7, %v8451_v25  ;;  %v8424_v50 = vadd.f32 %v8394_v21, %v8354_v41  ;;  %v8396_v34 = vadd.f32 %v8395_v53, %v8283_v57  ;;  %v8289_v37 = vadd.f32 %v8288_v19, %v19264_v10  ;;  %v21921_v25 = vld [vmem:[#allocation27_spill] sm:$0xff] }
 0x70d   : > { %v8290_v3 = vpop.f32.mrf.mxu1  ;;  %v8399_v22 = vpop.f32.mrf.mxu0  ;;  %v8454_v28 = vmul.f32 %v8438_v16, %v21910_v46  ;;  %v8439_v49 = vmax.f32 %v19368_v55, 0.0 }
 0x70e   : > { %v8400_v2 = vadd.f32 %v8399_v22, %v8287_v61  ;;  %v8440_v27 = vmax.f32 %v8424_v50, 0.0  ;;  %8560 = vrot.lane.b32.xlu1 %v19378_v52, %s21912_s9  ;;  %v8425_v10 = vadd.f32 %v8396_v34, %v8356_v30  ;;  %v8291_v8 = vadd.f32 %v8290_v3, %v21917_v0  ;;  %v21923_v34 = vld [vmem:[#allocation40_spill] sm:$0xff] }
 0x70f   : > { %v8292_v5 = vpop.f32.mrf.mxu1  ;;  %v8401_v32 = vpop.f32.mrf.mxu0  ;;  %v8455_v16 = vmul.f32 %v8439_v49, %v21911_v42  ;;  %v21926_v30 = vld [vmem:[#allocation28_spill] sm:$0xff] }
 0x710   : > { %v8426_v35 = vadd.f32 %v8400_v2, %v8360_v33  ;;  %v8402_v48 = vadd.f32 %v8401_v32, %v8289_v37  ;;  %8490 = vrot.lane.b32.xlu0 %v19366_v38, %s16266_s18  ;;  %v8456_v63 = vmul.f32 %v8440_v27, %v21910_v46  ;;  %v8441_v44 = vmax.f32 %v8425_v10, 0.0  ;;  %v21924_v33 = vld [vmem:[#allocation16_spill] sm:$0xff]  ;;  %v21927_v27 = vld [vmem:[#allocation29_spill] sm:$0xff]  ;;  %v21931_v10 = vld [vmem:[#allocation38_spill] sm:$0xff] }
 0x711   : > { %v8296_v9 = vpop.f32.mrf.mxu1  ;;  %v8403_v23 = vpop.f32.mrf.mxu0  ;;  %v8027_v32 = vadd.f32 %v21927_v27, %v21926_v30 }
 0x712   : > { %v19395_v24 = vadd.f32 %v8402_v48, %v8362_v43  ;;  %v19398_v26 = vpack.c.bf16 %v8456_v63, %v8454_v28  ;;  %v8404_v58 = vadd.f32 %v8403_v23, %v8291_v8  ;;  %8478 = vrot.lane.b32.xlu1 %v19378_v52, %s16266_s18  ;;  %v8297_v62 = vadd.f32 %v8296_v9, %v21919_v39  ;;  %v21930_v48 = vld [vmem:[#allocation36_spill] sm:$0xff]  ;;  %v21934_v39 = vld [vmem:[#allocation23_spill] sm:$0xff] }
 0x713   : > { %v8298_v56 = vpop.f32.mrf.mxu1  ;;  %v8405_v59 = vpop.f32.mrf.mxu0  ;;  %v8442_v11 = vmax.f32 %v8426_v35, 0.0  ;;  %v8457_v19 = vmul.f32 %v8441_v44, %v21911_v42  ;;  %v8140_v43 = vadd.f32 %v21929_v13, %v8027_v32 }
 0x714   : > { %8720 = vrot.lane.b32.xlu0 %v19366_v38, %s21859_s20  ;;  %v8428_v31 = vadd.f32 %v8404_v58, %v8364_v40  ;;  %v8299_v36 = vadd.f32 %v8298_v56, %v21920_v20  ;;  %v8443_v9 = vmax.f32 %v19395_v24, 0.0  ;;  %v21932_v58 = vld [vmem:[#allocation25_spill] sm:$0xff]  ;;  %v21933_v24 = vld [vmem:[#allocation18_spill] sm:$0xff] }
 0x715   : > { %v8300_v4 = vpop.f32.mrf.mxu1  ;;  %v8409_v29 = vpop.f32.mrf.mxu0  ;;  %v8458_v53 = vmul.f32 %v8442_v11, %v21910_v46  ;;  %v19427_v22 = vpack.c.bf16 %v8457_v19, %v8455_v16  ;;  %v8253_v28 = vadd.f32 %v21930_v48, %v8140_v43  ;;  %v8077_v56 = vadd.f32 %v21933_v24, %v21932_v58  ;;  %v21936_v11 = vld [vmem:[#allocation35_spill] sm:$0xff] }
 0x716   : > { %v8410_v1 = vadd.f32 %v8409_v29, %v8297_v62  ;;  %v8444_v15 = vmax.f32 %v8428_v31, 0.0  ;;  %8712 = vrot.lane.b32.xlu1 %v19378_v52, %s21859_s20  ;;  %v8301_v7 = vadd.f32 %v8300_v4, %v21921_v25  ;;  %v8459_v47 = vmul.f32 %v8443_v9, %v21911_v42  ;;  %v21935_v62 = vld [vmem:[#allocation32_spill] sm:$0xff]  ;;  %v21937_v29 = vld [vmem:[#allocation34_spill] sm:$0xff] }
 0x717   : > { %v8411_v41 = vpop.f32.mrf.mxu0  ;;  %v8366_v0 = vadd.f32 %v21931_v10, %v8253_v28  ;;  %v8037_v44 = vadd.f32 %v21935_v62, %v21934_v39  ;;  %v8190_v31 = vadd.f32 %v21936_v11, %v8077_v56  ;;  %v16038_v56 = vld [vmem:[%s21717_s10 + $0xc] ss:$36 sps:$4 sm:$0xff]  }
 0x718   : > { %v8430_v57 = vadd.f32 %v8410_v1, %v19322_v18  ;;  %v8412_v21 = vadd.f32 %v8411_v41, %v8299_v36  ;;  %8644 = vrot.lane.b32.xlu0 %v19366_v38, %s21922_s0  ;;  %v8460_v6 = vmul.f32 %v8444_v15, %v21910_v46  ;;  %v21938_v1 = vld [vmem:[#allocation39_spill] sm:$0xff]  ;;  %v21939_v41 = vld [vmem:[#allocation41_spill] sm:$0xff]  ;;  %11263 = vmatprep.mubr.bf16.mxu0 %v16038_v56 }
 0x719   : > { %v8413_v55 = vpop.f32.mrf.mxu0  ;;  %v8150_v20 = vadd.f32 %v21937_v29, %v8037_v44 }
 0x71a   : > { %v19417_v45 = vadd.f32 %v8412_v21, %v19326_v54  ;;  %v8414_v61 = vadd.f32 %v8413_v55, %v8301_v7  ;;  %v19420_v50 = vpack.c.bf16 %v8460_v6, %v8458_v53  ;;  %8636 = vrot.lane.b32.xlu1 %v19378_v52, %s21922_s0  ;;  %v8446_v18 = vmax.f32 %v8430_v57, 0.0  ;;  %v21925_v54 = vld [vmem:[#allocation31_spill] sm:$0xff] }
 0x71b   : > { %v8067_v37 = vadd.f32 %v21925_v54, %v21924_v33  ;;  %v8415_v4 = vpop.f32.mrf.mxu0  ;;  %v8263_v49 = vadd.f32 %v21938_v1, %v8150_v20 }
 0x71c   : > { %v8432_v3 = vadd.f32 %v8414_v61, %v21923_v34  ;;  %8570 = vrot.lane.b32.xlu0 %v19398_v26, %s21912_s9  ;;  %v8462_v2 = vmul.f32 %v8446_v18, %v21910_v46  ;;  %v8447_v21 = vmax.f32 %v19417_v45, 0.0  ;;  %v16014_v61 = vld [vmem:[%s21717_s10 + $0x4] ss:$36 sps:$4 sm:$0xff]  }
 0x71d   : > { %v8180_v14 = vadd.f32 %v21928_v17, %v8067_v37  ;;  %v8376_v25 = vadd.f32 %v21939_v41, %v8263_v49  ;;  %11150 = vmatprep.mubr.bf16.mxu1 %v16014_v61 }
 0x71e   : > { %v8448_v51 = vmax.f32 %v8432_v3, 0.0  ;;  %8562 = vrot.lane.b32.xlu1 %v19427_v22, %s21912_s9  ;;  %v8463_v53 = vmul.f32 %v8447_v21, %v21911_v42 }
 0x71f   : > { %v8293_v35 = vadd.f32 %v8292_v5, %v8180_v14 }
 0x720   : > { %v8464_v12 = vmul.f32 %v8448_v51, %v21910_v46  ;;  %8492 = vrot.lane.b32.xlu0 %v19398_v26, %s16266_s18 }
 0x721   : > { %v8406_v63 = vadd.f32 %v8405_v59, %v8293_v35  ;;  %v8302_v59 = vpop.f32.mrf.mxu1 }
 0x722   : > { %v19440_v60 = vpack.c.bf16 %v8464_v12, %v8462_v2  ;;  %8480 = vrot.lane.b32.xlu1 %v19427_v22, %s16266_s18  ;;  %v8303_v36 = vadd.f32 %v8302_v59, %v8190_v31 }
 0x723   : > { %v8429_v8 = vadd.f32 %v8406_v63, %v8366_v0 }
 0x724   : > { %8722 = vrot.lane.b32.xlu0 %v19398_v26, %s21859_s20  ;;  %v8416_v15 = vadd.f32 %v8415_v4, %v8303_v36 }
 0x725   : > { %v8445_v5 = vmax.f32 %v8429_v8, 0.0 }
 0x726   : > { %8714 = vrot.lane.b32.xlu1 %v19427_v22, %s21859_s20  ;;  %v8433_v7 = vadd.f32 %v8416_v15, %v8376_v25 }
 0x727   : > { %v8461_v23 = vmul.f32 %v8445_v5, %v21911_v42 }
 0x728   : > { %8646 = vrot.lane.b32.xlu0 %v19398_v26, %s21922_s0  ;;  %v8449_v57 = vmax.f32 %v8433_v7, 0.0 }
 0x729   : > { %v19468_v40 = vpack.c.bf16 %v8461_v23, %v8459_v47 }
 0x72a   : > { %8638 = vrot.lane.b32.xlu1 %v19427_v22, %s21922_s0  ;;  %v8465_v19 = vmul.f32 %v8449_v57, %v21911_v42 }
 0x72c   : > { %8874 = vrot.lane.b32.xlu0 %v19398_v26, %s21857_s1  ;;  %v19505_v6 = vpack.c.bf16 %v8465_v19, %v8463_v53 }
 0x72e   : > { %8866 = vrot.lane.b32.xlu1 %v19427_v22, %s21857_s1 }
 0x730   : > { %8572 = vrot.lane.b32.xlu0 %v19420_v50, %s21912_s9 }
 0x732   : > { %9140 = vrot.lane.b32.xlu1 %v19420_v50, %s21815_s19 }
 0x734   : > { %8494 = vrot.lane.b32.xlu0 %v19420_v50, %s16266_s18 }
 0x736   : > { %8564 = vrot.lane.b32.xlu1 %v19468_v40, %s21912_s9 }
 0x738   : > { %8724 = vrot.lane.b32.xlu0 %v19420_v50, %s21859_s20 }
 0x73a   : > { %8482 = vrot.lane.b32.xlu1 %v19468_v40, %s16266_s18 }
 0x73c   : > { %8648 = vrot.lane.b32.xlu0 %v19420_v50, %s21922_s0 }
 0x73e   : > { %8716 = vrot.lane.b32.xlu1 %v19468_v40, %s21859_s20 }
 0x740   : > { %8876 = vrot.lane.b32.xlu0 %v19420_v50, %s21857_s1 }
 0x742   : > { %8640 = vrot.lane.b32.xlu1 %v19468_v40, %s21922_s0 }
 0x744   : > { %9142 = vrot.lane.b32.xlu0 %v19468_v40, %s21815_s19 }
 0x746   : > { %8868 = vrot.lane.b32.xlu1 %v19468_v40, %s21857_s1 }
 0x748   : > { %8574 = vrot.lane.b32.xlu0 %v19440_v60, %s21912_s9 }
 0x74a   : > { %9144 = vrot.lane.b32.xlu1 %v19440_v60, %s21815_s19 }
 0x74c   : > { %8496 = vrot.lane.b32.xlu0 %v19440_v60, %s16266_s18 }
 0x74e   : > { %8566 = vrot.lane.b32.xlu1 %v19505_v6, %s21912_s9 }
 0x750   : > { %8726 = vrot.lane.b32.xlu0 %v19440_v60, %s21859_s20 }
 0x752   : > { %9136 = vrot.lane.b32.xlu1 %v19398_v26, %s21815_s19 }
 0x754   : > { %8650 = vrot.lane.b32.xlu0 %v19440_v60, %s21922_s0 }
 0x756   : > { %8864 = vrot.lane.b32.xlu1 %v19378_v52, %s21857_s1 }
 0x758   : > { %8878 = vrot.lane.b32.xlu0 %v19440_v60, %s21857_s1 }
 0x75a   : > { %9132 = vrot.lane.b32.xlu1 %v19366_v38, %s21815_s19 }
 0x75c   : > { %9138 = vrot.lane.b32.xlu0 %v19427_v22, %s21815_s19 }
 0x75e   : > { %8484 = vrot.lane.b32.xlu1 %v19505_v6, %s16266_s18 }
 0x760   : > { %8872 = vrot.lane.b32.xlu0 %v19366_v38, %s21857_s1 }
 0x762   : > { %8792 = vrot.lane.b32.xlu1 %v19468_v40, %s21858_s21 }
 0x764   : > { %9134 = vrot.lane.b32.xlu0 %v19378_v52, %s21815_s19 }
 0x766   : > { %8790 = vrot.lane.b32.xlu1 %v19427_v22, %s21858_s21 }
 0x768   : > { %8802 = vrot.lane.b32.xlu0 %v19440_v60, %s21858_s21 }
 0x76a   : > { %8788 = vrot.lane.b32.xlu1 %v19378_v52, %s21858_s21 }
 0x76c   : > { %8800 = vrot.lane.b32.xlu0 %v19420_v50, %s21858_s21 }
 0x76e   : > { %8718 = vrot.lane.b32.xlu1 %v19505_v6, %s21859_s20  ;;  %s569_s20 = sand.u32 1, %s16239_s28  }
 0x76f   : > { %s14257_s2 = sshll.u32 %s569_s20, 2 }
 0x770   : > { %8798 = vrot.lane.b32.xlu0 %v19398_v26, %s21858_s21 }
 0x772   : > { %9296 = vrot.lane.b32.xlu1 %v19440_v60, %s21874_s6 }
 0x774   : > { %8796 = vrot.lane.b32.xlu0 %v19366_v38, %s21858_s21 }
 0x776   : > { %9020 = vrot.lane.b32.xlu1 %v19468_v40, %s21812_s22 }
 0x778   : > { %9030 = vrot.lane.b32.xlu0 %v19440_v60, %s21812_s22 }
 0x77a   : > { %9292 = vrot.lane.b32.xlu1 %v19420_v50, %s21874_s6 }
 0x77c   : > { %9028 = vrot.lane.b32.xlu0 %v19420_v50, %s21812_s22 }
 0x77e   : > { %v19555_v55 = vpop.permute.xlu0 %8568  ;;  %8642 = vrot.lane.b32.xlu1 %v19505_v6, %s21922_s0 }
 0x780   : > { %9294 = vrot.lane.b32.xlu0 %v19468_v40, %s21874_s6  ;;  %v19561_v45 = vpop.permute.xlu1 %8560 }
 0x781   : > { %v8576_v41 = vsel %vm5658_vm4, %v19555_v55, %v19561_v45  ;;  %v8582_v57 = vsel %vm5658_vm4, %v19561_v45, %v19555_v55 }
 0x782   : > { %v19566_v16 = vpop.permute.xlu0 %8490  ;;  %9018 = vrot.lane.b32.xlu1 %v19427_v22, %s21812_s22 }
 0x784   : > { %9026 = vrot.lane.b32.xlu0 %v19398_v26, %s21812_s22  ;;  %v19572_v18 = vpop.permute.xlu1 %8478 }
 0x786   : > { %v19574_v34 = vpop.permute.xlu0 %8720  ;;  %9288 = vrot.lane.b32.xlu1 %v19398_v26, %s21874_s6 }
 0x788   : > { %9290 = vrot.lane.b32.xlu0 %v19427_v22, %s21874_s6  ;;  %v19580_v3 = vpop.permute.xlu1 %8712 }
 0x78a   : > { %v19582_v51 = vpop.permute.xlu0 %8644  ;;  %8870 = vrot.lane.b32.xlu1 %v19505_v6, %s21857_s1  ;;  %s16267_s1 = smov 120  }
 0x78c   : > { %9146 = vrot.lane.b32.xlu0 %v19505_v6, %s21815_s19  ;;  %v19588_v33 = vpop.permute.xlu1 %8636  ;;  %s571_s19 = scalar_lea.vmem [#allocation3], %s14257_s2 }
 0x78e   : > { %v19590_v54 = vpop.permute.xlu0 %8570  ;;  %9016 = vrot.lane.b32.xlu1 %v19378_v52, %s21812_s22 }
 0x790   : > { %9024 = vrot.lane.b32.xlu0 %v19366_v38, %s21812_s22  ;;  %v19596_v37 = vpop.permute.xlu1 %8562 }
 0x791   : > { %v8577_v36 = vsel %vm5658_vm4, %v19590_v54, %v19596_v37  ;;  %v8585_v15 = vsel %vm5658_vm4, %v19596_v37, %v19590_v54 }
 0x792   : > { %v19598_v2 = vpop.permute.xlu0 %8492  ;;  %9284 = vrot.lane.b32.xlu1 %v19366_v38, %s21874_s6 }
 0x794   : > { %9286 = vrot.lane.b32.xlu0 %v19378_v52, %s21874_s6  ;;  %v19604_v12 = vpop.permute.xlu1 %8480 }
 0x796   : > { %v19606_v30 = vpop.permute.xlu0 %8722  ;;  %9220 = vrot.lane.b32.xlu1 %v19440_v60, %s21814_s24 }
 0x798   : > { %8954 = vrot.lane.b32.xlu0 %v19440_v60, %s21813_s26  ;;  %v19612_v27 = vpop.permute.xlu1 %8714 }
 0x79a   : > { %v19614_v32 = vpop.permute.xlu0 %8646  ;;  %8794 = vrot.lane.b32.xlu1 %v19505_v6, %s21858_s21 }
 0x79c   : > { %8952 = vrot.lane.b32.xlu0 %v19420_v50, %s21813_s26  ;;  %v19620_v17 = vpop.permute.xlu1 %8638 }
 0x79e   : > { %v19622_v14 = vpop.permute.xlu0 %8874  ;;  %8944 = vrot.lane.b32.xlu1 %v19468_v40, %s21813_s26 }
 0x7a0   : > { %9218 = vrot.lane.b32.xlu0 %v19468_v40, %s21814_s24  ;;  %v19628_v13 = vpop.permute.xlu1 %8866 }
 0x7a2   : > { %v8573_v43 = vpop.permute.xlu0 %8572  ;;  %9216 = vrot.lane.b32.xlu1 %v19420_v50, %s21814_s24 }
 0x7a4   : > { %8950 = vrot.lane.b32.xlu0 %v19398_v26, %s21813_s26  ;;  %v19634_v35 = vpop.permute.xlu1 %9140 }
 0x7a6   : > { %v19636_v48 = vpop.permute.xlu0 %8494  ;;  %8942 = vrot.lane.b32.xlu1 %v19427_v22, %s21813_s26 }
 0x7a8   : > { %9214 = vrot.lane.b32.xlu0 %v19427_v22, %s21814_s24  ;;  %v8565_v28 = vpop.permute.xlu1 %8564 }
 0x7a9   : > { %v8578_v31 = vsel %vm5658_vm4, %v8573_v43, %v8565_v28  ;;  %v8588_v20 = vsel %vm5658_vm4, %v8565_v28, %v8573_v43  ;;  %v8500_v43 = vsel %vm8498_vm9, %v19598_v2, %v19604_v12 }
 0x7aa   : > { %v19642_v63 = vpop.permute.xlu0 %8724  ;;  %9022 = vrot.lane.b32.xlu1 %v19505_v6, %s21812_s22 }
 0x7ac   : > { %9298 = vrot.lane.b32.xlu0 %v19505_v6, %s21874_s6  ;;  %v19648_v10 = vpop.permute.xlu1 %8482 }
 0x7ad   : > { %v8501_v55 = vsel %vm8498_vm9, %v19636_v48, %v19648_v10  ;;  %v8512_v37 = vsel %vm8498_vm9, %v19648_v10, %v19636_v48  ;;  %v8509_v48 = vsel %vm8498_vm9, %v19604_v12, %v19598_v2  ;;  %v8499_v10 = vsel %vm8498_vm9, %v19566_v16, %v19572_v18 }
 0x7ae   : > { %v19650_v0 = vpop.permute.xlu0 %8648  ;;  %9212 = vrot.lane.b32.xlu1 %v19398_v26, %s21814_s24  ;;  %v8506_v2 = vsel %vm8498_vm9, %v19572_v18, %v19566_v16 }
 0x7b0   : > { %8948 = vrot.lane.b32.xlu0 %v19366_v38, %s21813_s26  ;;  %v19656_v8 = vpop.permute.xlu1 %8716 }
 0x7b1   : > { %v8730_v16 = vsel %vm3059_vm11, %v19642_v63, %v19656_v8 }
 0x7b2   : > { %v19658_v5 = vpop.permute.xlu0 %8876  ;;  %8940 = vrot.lane.b32.xlu1 %v19378_v52, %s21813_s26 }
 0x7b4   : > { %9210 = vrot.lane.b32.xlu0 %v19378_v52, %s21814_s24  ;;  %v19664_v9 = vpop.permute.xlu1 %8640 }
 0x7b6   : > { %v19666_v23 = vpop.permute.xlu0 %9142  ;;  %9208 = vrot.lane.b32.xlu1 %v19366_v38, %s21814_s24 }
 0x7b8   : > { %9446 = vrot.lane.b32.xlu0 %v19468_v40, %s21872_s4  ;;  %v19672_v47 = vpop.permute.xlu1 %8868 }
 0x7ba   : > { %v8575_v58 = vpop.permute.xlu0 %8574  ;;  %8946 = vrot.lane.b32.xlu1 %v19505_v6, %s21813_s26 }
 0x7bc   : > { %9222 = vrot.lane.b32.xlu0 %v19505_v6, %s21814_s24  ;;  %v19678_v24 = vpop.permute.xlu1 %9144 }
 0x7be   : > { %v8497_v59 = vpop.permute.xlu0 %8496  ;;  %9448 = vrot.lane.b32.xlu1 %v19440_v60, %s21872_s4 }
 0x7c0   : > { %9442 = vrot.lane.b32.xlu0 %v19427_v22, %s21872_s4  ;;  %v8567_v39 = vpop.permute.xlu1 %8566 }
 0x7c1   : > { %v8579_v62 = vsel %vm5658_vm4, %v8575_v58, %v8567_v39  ;;  %v8591_v11 = vsel %vm5658_vm4, %v8567_v39, %v8575_v58 }
 0x7c2   : > { %v19688_v44 = vpop.permute.xlu0 %8726  ;;  %9444 = vrot.lane.b32.xlu1 %v19420_v50, %s21872_s4  ;;  %11118 = vmatprep.subr.bf16.mxu1 %v8579_v62 }
 0x7c3   : > { %11119 = vmatpush1.bf16.msra.mxu1 %v8591_v11 }
 0x7c4   : > { %9438 = vrot.lane.b32.xlu0 %v19378_v52, %s21872_s4  ;;  %v19696_v4 = vpop.permute.xlu1 %9136  ;;  %11120 = vmatprep.subr.bf16.mxu1 %v8578_v31 }
 0x7c6   : > { %v19698_v29 = vpop.permute.xlu0 %8650  ;;  %9440 = vrot.lane.b32.xlu1 %v19398_v26, %s21872_s4 }
 0x7c7   : > { %11121 = vmatpush1.bf16.msra.mxu1 %v8588_v20  ;;  %v8729_v20 = vsel %vm3059_vm11, %v19606_v30, %v19612_v27 }
 0x7c8   : > { %9450 = vrot.lane.b32.xlu0 %v19505_v6, %s21872_s4  ;;  %v19708_v1 = vpop.permute.xlu1 %8864  ;;  %11122 = vmatprep.subr.bf16.mxu1 %v8577_v36 }
 0x7ca   : > { %v19710_v49 = vpop.permute.xlu0 %8878  ;;  %9436 = vrot.lane.b32.xlu1 %v19366_v38, %s21872_s4  ;;  %s14194_s4 = sshll.u32 %s571_s19, 4  ;;  %s14195_s4 = int_to_ptr.vmem [resolvable:$true] %s14194_s4 }
 0x7cb   : > { %11123 = vmatpush1.bf16.msra.mxu1 %v8585_v15 }
 0x7cc   : > { %9370 = vrot.lane.b32.xlu0 %v19468_v40, %s21869_s25  ;;  %v19722_v25 = vpop.permute.xlu1 %9132  ;;  %11124 = vmatprep.subr.bf16.mxu1 %v8576_v41 }
 0x7ce   : > { %v19724_v7 = vpop.permute.xlu0 %9138  ;;  %9372 = vrot.lane.b32.xlu1 %v19440_v60, %s21869_s25 }
 0x7cf   : > { %11125 = vmatpush1.bf16.msra.mxu1 %v8582_v57 }
 0x7d0   : > { %9366 = vrot.lane.b32.xlu0 %v19427_v22, %s21869_s25  ;;  %v8485_v21 = vpop.permute.xlu1 %8484 }
 0x7d1   : > { %v8502_v19 = vsel %vm8498_vm9, %v8497_v59, %v8485_v21  ;;  %v8515_v61 = vsel %vm8498_vm9, %v8485_v21, %v8497_v59 }
 0x7d2   : > { %v19734_v53 = vpop.permute.xlu0 %8872  ;;  %9368 = vrot.lane.b32.xlu1 %v19420_v50, %s21869_s25  ;;  %11126 = vmatprep.subr.bf16.mxu1 %v8502_v19 }
 0x7d3   : > { %11127 = vmatpush1.bf16.msra.mxu1 %v8515_v61 }
 0x7d4   : > { %9362 = vrot.lane.b32.xlu0 %v19378_v52, %s21869_s25  ;;  %v19744_v45 = vpop.permute.xlu1 %8792  ;;  %11128 = vmatprep.subr.bf16.mxu1 %v8501_v55 }
 0x7d6   : > { %v19746_v54 = vpop.permute.xlu0 %9134  ;;  %9364 = vrot.lane.b32.xlu1 %v19398_v26, %s21869_s25 }
 0x7d7   : > { %11129 = vmatpush1.bf16.msra.mxu1 %v8512_v37  ;;  %v8653_v37 = vsel %vm5736_vm3, %v19614_v32, %v19620_v17 }
 0x7d8   : > { %9374 = vrot.lane.b32.xlu0 %v19505_v6, %s21869_s25  ;;  %v19758_v28 = vpop.permute.xlu1 %8790  ;;  %11130 = vmatprep.subr.bf16.mxu1 %v8500_v43 }
 0x7da   : > { %v19760_v58 = vpop.permute.xlu0 %8802  ;;  %9360 = vrot.lane.b32.xlu1 %v19366_v38, %s21869_s25 }
 0x7db   : > { %11131 = vmatpush1.bf16.msra.mxu1 %v8509_v48 }
 0x7dc   : > { %9598 = vrot.lane.b32.xlu0 %v19468_v40, %s21875_s29  ;;  %v19772_v56 = vpop.permute.xlu1 %8788  ;;  %11132 = vmatprep.subr.bf16.mxu1 %v8499_v10 }
 0x7de   : > { %v19774_v59 = vpop.permute.xlu0 %8800  ;;  %9600 = vrot.lane.b32.xlu1 %v19440_v60, %s21875_s29 }
 0x7df   : > { %11133 = vmatpush1.bf16.msra.mxu1 %v8506_v2 }
 0x7e0   : > { %9594 = vrot.lane.b32.xlu0 %v19427_v22, %s21875_s29  ;;  %v8719_v12 = vpop.permute.xlu1 %8718 }
 0x7e1   : > { %v8731_v39 = vsel %vm3059_vm11, %v19688_v44, %v8719_v12  ;;  %v8743_v11 = vsel %vm3059_vm11, %v8719_v12, %v19688_v44  ;;  %v8740_v44 = vsel %vm3059_vm11, %v19656_v8, %v19642_v63  ;;  %v8737_v63 = vsel %vm3059_vm11, %v19612_v27, %v19606_v30 }
 0x7e2   : > { %v19785_v62 = vpop.permute.xlu0 %8798  ;;  %9596 = vrot.lane.b32.xlu1 %v19420_v50, %s21875_s29  ;;  %11134 = vmatprep.subr.bf16.mxu1 %v8731_v39  ;;  %v8728_v8 = vsel %vm3059_vm11, %v19574_v34, %v19580_v3  ;;  %v8734_v30 = vsel %vm3059_vm11, %v19580_v3, %v19574_v34  ;;  %v8654_v34 = vsel %vm5736_vm3, %v19650_v0, %v19664_v9 }
 0x7e3   : > { %11135 = vmatpush2.bf16.msra.mxu1 %v8743_v11  ;;  %v16012_v11 = vld [vmem:[%s21717_s10] ss:$36 sps:$4 sm:$0xff]  }
 0x7e4   : > { %9590 = vrot.lane.b32.xlu0 %v19378_v52, %s21875_s29  ;;  %v19796_v18 = vpop.permute.xlu1 %9296  ;;  %11136 = vmatprep.subr.bf16.mxu1 %v8730_v16 }
 0x7e6   : > { %v19798_v31 = vpop.permute.xlu0 %8796  ;;  %9592 = vrot.lane.b32.xlu1 %v19398_v26, %s21875_s29 }
 0x7e7   : > { %11137 = vmatpush2.bf16.msra.mxu1 %v8740_v44  ;;  %v8892_v44 = vsel %vm3215_vm12, %v19672_v47, %v19658_v5 }
 0x7e8   : > { %9602 = vrot.lane.b32.xlu0 %v19505_v6, %s21875_s29  ;;  %v19810_v36 = vpop.permute.xlu1 %9020  ;;  %11138 = vmatprep.subr.bf16.mxu1 %v8729_v20 }
 0x7ea   : > { %v19812_v15 = vpop.permute.xlu0 %9030  ;;  %9588 = vrot.lane.b32.xlu1 %v19366_v38, %s21875_s29 }
 0x7eb   : > { %11139 = vmatpush2.bf16.msra.mxu1 %v8737_v63  ;;  %v8881_v63 = vsel %vm3215_vm12, %v19622_v14, %v19628_v13 }
 0x7ec   : > { %9522 = vrot.lane.b32.xlu0 %v19468_v40, %s21868_s5  ;;  %v19824_v41 = vpop.permute.xlu1 %9292  ;;  %11140 = vmatprep.subr.bf16.mxu1 %v8728_v8 }
 0x7ee   : > { %v19826_v57 = vpop.permute.xlu0 %9028  ;;  %9524 = vrot.lane.b32.xlu1 %v19440_v60, %s21868_s5 }
 0x7ef   : > { %11141 = vmatpush2.bf16.msra.mxu1 %v8734_v30  ;;  %v9160_v30 = vsel %vm1515_vm7, %v19666_v23, %v19634_v35 }
 0x7f0   : > { %9674 = vrot.lane.b32.xlu0 %v19468_v40, %s16267_s1  ;;  %v8643_v27 = vpop.permute.xlu1 %8642 }
 0x7f1   : > { %v8655_v21 = vsel %vm5736_vm3, %v19698_v29, %v8643_v27  ;;  %v8667_v61 = vsel %vm5736_vm3, %v8643_v27, %v19698_v29  ;;  %v8664_v29 = vsel %vm5736_vm3, %v19664_v9, %v19650_v0  ;;  %v8661_v0 = vsel %vm5736_vm3, %v19620_v17, %v19614_v32  ;;  %v16015_v27 = vld [vmem:[%s21717_s10 + $0x48] ss:$36 sps:$4 sm:$0xff]  }
 0x7f2   : > { %v19837_v19 = vpop.permute.xlu0 %9294  ;;  %9676 = vrot.lane.b32.xlu1 %v19440_v60, %s16267_s1  ;;  %11142 = vmatprep.subr.bf16.mxu1 %v8655_v21  ;;  %v8652_v9 = vsel %vm5736_vm3, %v19582_v51, %v19588_v33  ;;  %v8658_v32 = vsel %vm5736_vm3, %v19588_v33, %v19582_v51  ;;  %v16017_v33 = vld [vmem:[%s21717_s10 + $0x4c] ss:$36 sps:$4 sm:$0xff]   ;;  %v8880_v21 = vsel %vm3215_vm12, %v19734_v53, %v19708_v1 }
 0x7f3   : > { %11143 = vmatpush2.bf16.msra.mxu1 %v8667_v61 }
 0x7f4   : > { %9518 = vrot.lane.b32.xlu0 %v19427_v22, %s21868_s5  ;;  %v19848_v3 = vpop.permute.xlu1 %9018  ;;  %11144 = vmatprep.subr.bf16.mxu1 %v8654_v34  ;;  %v8886_v34 = vsel %vm3215_vm12, %v19708_v1, %v19734_v53 }
 0x7f6   : > { %v19850_v55 = vpop.permute.xlu0 %9026  ;;  %9520 = vrot.lane.b32.xlu1 %v19420_v50, %s21868_s5 }
 0x7f7   : > { %11145 = vmatpush2.bf16.msra.mxu1 %v8664_v29  ;;  %v9149_v29 = vsel %vm1515_vm7, %v19696_v4, %v19724_v7 }
 0x7f8   : > { %9526 = vrot.lane.b32.xlu0 %v19505_v6, %s21868_s5  ;;  %v19862_v43 = vpop.permute.xlu1 %9288  ;;  %11146 = vmatprep.subr.bf16.mxu1 %v8653_v37  ;;  %v9154_v37 = vsel %vm1515_vm7, %v19746_v54, %v19722_v25 }
 0x7fa   : > { %v19864_v48 = vpop.permute.xlu0 %9290  ;;  %9672 = vrot.lane.b32.xlu1 %v19420_v50, %s16267_s1 }
 0x7fb   : > { %11147 = vmatpush2.bf16.msra.mxu1 %v8661_v0  ;;  %v9964_v0 = vld [vmem:[%s21718_s11 + $0x30] sm:$0xff] }
 0x7fc   : > { %9678 = vrot.lane.b32.xlu0 %v19505_v6, %s16267_s1  ;;  %v8871_v10 = vpop.permute.xlu1 %8870  ;;  %11148 = vmatprep.subr.bf16.mxu1 %v8652_v9 }
 0x7fd   : > { %v8883_v2 = vsel %vm3215_vm12, %v19710_v49, %v8871_v10  ;;  %v8895_v39 = vsel %vm3215_vm12, %v8871_v10, %v19710_v49  ;;  %v8882_v49 = vsel %vm3215_vm12, %v19658_v5, %v19672_v47  ;;  %v8889_v47 = vsel %vm3215_vm12, %v19628_v13, %v19622_v14 }
 0x7fe   : > { %v9147_v12 = vpop.permute.xlu0 %9146  ;;  %9516 = vrot.lane.b32.xlu1 %v19398_v26, %s21868_s5  ;;  %11231 = vmatprep.subr.bf16.mxu0 %v8883_v2  ;;  %v9157_v14 = vsel %vm1515_vm7, %v19724_v7, %v19696_v4  ;;  %v9973_v7 = vld [vmem:[%s21718_s11 + $0x78] sm:$0xff]  ;;  %v9148_v10 = vsel %vm1515_vm7, %v19722_v25, %v19746_v54  ;;  %v16018_v2 = vld [vmem:[%s21717_s10 + $0x90] ss:$36 sps:$4 sm:$0xff]   ;;  %v9963_v54 = vld [vmem:[%s21718_s11 + $0x28] sm:$0xff] }
 0x7ff   : > { %v9163_v17 = vsel %vm1515_vm7, %v9147_v12, %v19678_v24  ;;  %11149 = vmatpush2.bf16.msra.mxu1 %v8658_v32  ;;  %11232 = vmatpush1.bf16.msra.mxu0 %v8895_v39  ;;  %v9151_v20 = vsel %vm1515_vm7, %v19678_v24, %v9147_v12  ;;  %v9150_v24 = vsel %vm1515_vm7, %v19634_v35, %v19666_v23  ;;  %v9965_v35 = vld [vmem:[%s21718_s11 + $0x38] sm:$0xff]  ;;  %v9972_v12 = vld [vmem:[%s21718_s11 + $0x70] sm:$0xff]  ;;  %vm11763_vm7 = vcmask 80896  }
 0x800   : > { %v19893_v16 = vpop.permute.xlu1 %9016  ;;  %9670 = vrot.lane.b32.xlu0 %v19427_v22, %s16267_s1  ;;  %11233 = vmatprep.subr.bf16.mxu0 %v8882_v49  ;;  %v16020_v23 = vld [vmem:[%s21717_s10 + $0x94] ss:$36 sps:$4 sm:$0xff]   ;;  %v16023_v32 = vld [vmem:[%s21717_s10 + $0xdc] ss:$36 sps:$4 sm:$0xff]  }
 0x801   : > { %11344 = vmatprep.subr.bf16.mxu1 %v9163_v17  ;;  %v8816_v17 = vsel %vm3137_vm10, %v19744_v45, %v19774_v59 }
 0x802   : > { %v19897_v51 = vpop.permute.xlu0 %9024  ;;  %9668 = vrot.lane.b32.xlu1 %v19398_v26, %s16267_s1  ;;  %11151 = vmatmul.mubr.bf16.vlgmr.msra.gmra.mxu1 %v16012_v11  ;;  %v9962_v11 = vld [vmem:[%s21718_s11 + $0x20] sm:$0xff] }
 0x803   : > { %11234 = vmatpush1.bf16.msra.mxu0 %v8892_v44  ;;  %11345 = vmatpush1.bf16.msra.mxu1 %v9151_v20  ;;  %v9970_v44 = vld [vmem:[%s21718_s11 + $0x60] sm:$0xff] }
 0x804   : > { %v19912_v8 = vpop.permute.xlu1 %9284  ;;  %9514 = vrot.lane.b32.xlu0 %v19378_v52, %s21868_s5  ;;  %11235 = vmatprep.subr.bf16.mxu0 %v8881_v63  ;;  %v8810_v63 = vsel %vm3137_vm10, %v19772_v56, %v19798_v31 }
 0x805   : > { %11346 = vmatprep.subr.bf16.mxu1 %v9160_v30  ;;  %11160 = vmatprep.mubr.bf16.mxu1 %v16017_v33 }
 0x806   : > { %v19919_v5 = vpop.permute.xlu0 %9286  ;;  %9512 = vrot.lane.b32.xlu1 %v19366_v38, %s21868_s5 }
 0x807   : > { %11236 = vmatpush1.bf16.msra.mxu0 %v8889_v47  ;;  %11347 = vmatpush1.bf16.msra.mxu1 %v9150_v24 }
 0x808   : > { %v19935_v61 = vpop.permute.xlu1 %9220  ;;  %9666 = vrot.lane.b32.xlu0 %v19378_v52, %s16267_s1  ;;  %11237 = vmatprep.subr.bf16.mxu0 %v8880_v21 }
 0x809   : > { %11348 = vmatprep.subr.bf16.mxu1 %v9157_v14 }
 0x80a   : > { %v19942_v13 = vpop.permute.xlu0 %8954  ;;  %9664 = vrot.lane.b32.xlu1 %v19366_v38, %s16267_s1  ;;  %11161 = vmatmul.mubr.bf16.gmra.mxu1 %v16015_v27 }
 0x80b   : > { %11238 = vmatpush1.bf16.msra.mxu0 %v8886_v34  ;;  %11349 = vmatpush1.bf16.msra.mxu1 %v9149_v29  ;;  %v9033_v29 = vsel %vm1223_vm6, %v19850_v55, %v19848_v3 }
 0x80c   : > { %v8795_v9 = vpop.permute.xlu1 %8794  ;;  %10011 = vperm.xlu0 %15890, %v9965_v35   ;;  %11350 = vmatprep.subr.bf16.mxu1 %v9154_v37  ;;  %v9959_v35 = vld [vmem:[%s21718_s11 + $0x8] sm:$0xff]  ;;  %v9958_v37 = vld [vmem:[%s21718_s11] sm:$0xff] }
 0x80d   : > { %v8807_v1 = vsel %vm3137_vm10, %v19760_v58, %v8795_v9  ;;  %v8819_v4 = vsel %vm3137_vm10, %v8795_v9, %v19760_v58  ;;  %11170 = vmatprep.mubr.bf16.mxu1 %v16020_v23  ;;  %v8806_v58 = vsel %vm3137_vm10, %v19774_v59, %v19744_v45  ;;  %v8813_v45 = vsel %vm3137_vm10, %v19758_v28, %v19785_v62  ;;  %v16021_v59 = vld [vmem:[%s21717_s10 + $0xd8] ss:$36 sps:$4 sm:$0xff]  }
 0x80e   : > { %v19966_v53 = vpop.permute.xlu0 %8952  ;;  %10006 = vperm.xlu1 %15891, %v9964_v0   ;;  %11239 = vmatprep.subr.bf16.mxu0 %v8807_v1  ;;  %v9044_v23 = vsel %vm1223_vm6, %v19810_v36, %v19826_v57  ;;  %v9041_v9 = vsel %vm1223_vm6, %v19848_v3, %v19850_v55  ;;  %v9302_v1 = vsel %vm3637_vm14, %v19824_v41, %v19837_v19 }
 0x80f   : > { %11240 = vmatpush1.bf16.msra.mxu0 %v8819_v4  ;;  %11351 = vmatpush1.bf16.msra.mxu1 %v9148_v10  ;;  %v16027_v4 = vld [vmem:[%s21717_s10 + $0x168] ss:$36 sps:$4 sm:$0xff]   ;;  %v9966_v10 = vld [vmem:[%s21718_s11 + $0x40] sm:$0xff]  ;;  %v9038_v55 = vsel %vm1223_vm6, %v19893_v16, %v19897_v51 }
 0x810   : > { %v19985_v39 = vpop.permute.xlu1 %8944  ;;  %10051 = vperm.xlu0 %15890, %v9973_v7   ;;  %11241 = vmatprep.subr.bf16.mxu0 %v8806_v58  ;;  %v9032_v7 = vsel %vm1223_vm6, %v19897_v51, %v19893_v16  ;;  %v9301_v58 = vsel %vm3637_vm14, %v19862_v43, %v19864_v48  ;;  %v16030_v51 = vld [vmem:[%s21717_s10 + $0x1b0] ss:$36 sps:$4 sm:$0xff]  }
 0x811   : > { %11352 = vmatprep.subr.bf16.mxu1 %v19505_v6  ;;  %v8805_v6 = vsel %vm3137_vm10, %v19785_v62, %v19758_v28  ;;  %v16026_v62 = vld [vmem:[%s21717_s10 + $0x124] ss:$36 sps:$4 sm:$0xff]  }
 0x812   : > { %v19988_v25 = vpop.permute.xlu0 %9218  ;;  %10046 = vperm.xlu1 %15891, %v9972_v12   ;;  %11171 = vmatmul.mubr.bf16.gmra.mxu1 %v16018_v2  ;;  %v9306_v12 = vsel %vm3637_vm14, %v19919_v5, %v19912_v8 }
 0x813   : > { %11242 = vmatpush1.bf16.msra.mxu0 %v8816_v17  ;;  %11353 = vmatpush1.bf16.msra.mxu1 %v19440_v60  ;;  %v9971_v60 = vld [vmem:[%s21718_s11 + $0x68] sm:$0xff] }
 0x814   : > { %v20006_v49 = vpop.permute.xlu1 %9216  ;;  %10001 = vperm.xlu0 %15890, %v9963_v54   ;;  %11243 = vmatprep.subr.bf16.mxu0 %v8805_v6  ;;  %v8958_v6 = vsel %vm1031_vm5, %v19966_v53, %v19985_v39 }
 0x815   : > { %11354 = vmatprep.subr.bf16.mxu1 %v19468_v40  ;;  %11180 = vmatprep.mubr.bf16.mxu1 %v16023_v32  ;;  %v8804_v40 = vsel %vm3137_vm10, %v19798_v31, %v19772_v56  ;;  %v9969_v56 = vld [vmem:[%s21718_s11 + $0x58] sm:$0xff]  ;;  %v9034_v31 = vsel %vm1223_vm6, %v19826_v57, %v19810_v36  ;;  %v9312_v36 = vsel %vm3637_vm14, %v19837_v19, %v19824_v41  ;;  %v9967_v57 = vld [vmem:[%s21718_s11 + $0x48] sm:$0xff] }
 0x816   : > { %v20009_v33 = vpop.permute.xlu0 %8950  ;;  %9996 = vperm.xlu1 %15891, %v9962_v11   ;;  %v9309_v41 = vsel %vm3637_vm14, %v19864_v48, %v19862_v43  ;;  %v16032_v19 = vld [vmem:[%s21717_s10 + $0x1b4] ss:$36 sps:$4 sm:$0xff]   ;;  %v9300_v43 = vsel %vm3637_vm14, %v19912_v8, %v19919_v5  ;;  %v16035_v8 = vld [vmem:[%s21717_s10 + $0x1fc] ss:$36 sps:$4 sm:$0xff]   ;;  %v8968_v5 = vsel %vm1031_vm5, %v19985_v39, %v19966_v53 }
 0x817   : > { %11244 = vmatpush1.bf16.msra.mxu0 %v8813_v45  ;;  %11355 = vmatpush1.bf16.msra.mxu1 %v19420_v50  ;;  %v9961_v50 = vld [vmem:[%s21718_s11 + $0x18] sm:$0xff] }
 0x818   : > { %v20027_v20 = vpop.permute.xlu1 %8942  ;;  %10041 = vperm.xlu0 %15890, %v9971_v60   ;;  %11245 = vmatprep.subr.bf16.mxu0 %v8804_v40  ;;  %v16033_v39 = vld [vmem:[%s21717_s10 + $0x1f8] ss:$36 sps:$4 sm:$0xff]  }
 0x819   : > { %11356 = vmatprep.subr.bf16.mxu1 %v19427_v22  ;;  %v9960_v22 = vld [vmem:[%s21718_s11 + $0x10] sm:$0xff]  ;;  %v8957_v45 = vsel %vm1031_vm5, %v20009_v33, %v20027_v20  ;;  %v8965_v53 = vsel %vm1031_vm5, %v20027_v20, %v20009_v33 }
 0x81a   : > { %v20030_v28 = vpop.permute.xlu0 %9214  ;;  %10036 = vperm.xlu1 %15891, %v9970_v44   ;;  %11181 = vmatmul.mubr.bf16.gmra.mxu1 %v16021_v59  ;;  %v9236_v59 = vsel %vm1707_vm8, %v19988_v25, %v20006_v49 }
 0x81b   : > { %11246 = vmatpush1.bf16.msra.mxu0 %v8810_v63  ;;  %11357 = vmatpush1.bf16.msra.mxu1 %v19398_v26 }
 0x81c   : > { %v9023_v30 = vpop.permute.xlu1 %9022  ;;  %9991 = vperm.xlu0 %15890, %v9961_v50   ;;  %11358 = vmatprep.subr.bf16.mxu1 %v19378_v52  ;;  %v16024_v52 = vld [vmem:[%s21717_s10 + $0x120] ss:$36 sps:$4 sm:$0xff]  }
 0x81d   : > { %v9035_v47 = vsel %vm1223_vm6, %v19812_v15, %v9023_v30  ;;  %v9047_v27 = vsel %vm1223_vm6, %v9023_v30, %v19812_v15  ;;  %11190 = vmatprep.mubr.bf16.mxu1 %v16026_v62  ;;  %v9968_v15 = vld [vmem:[%s21718_s11 + $0x50] sm:$0xff]  ;;  %v16036_v30 = vld [vmem:[%s21717_s10 + $0x8] ss:$36 sps:$4 sm:$0xff]   ;;  %vm9680_vm6 = vcmask 982016  }
 0x81e   : > { %v9299_v24 = vpop.permute.xlu0 %9298  ;;  %9986 = vperm.xlu1 %15891, %v9960_v22   ;;  %11247 = vmatprep.subr.bf16.mxu0 %v9035_v47 }
 0x81f   : > { %v9315_v26 = vsel %vm3637_vm14, %v9299_v24, %v19796_v18  ;;  %11248 = vmatpush2.bf16.msra.mxu0 %v9047_v27  ;;  %11359 = vmatpush1.bf16.msra.mxu1 %v19366_v38  ;;  %v16029_v38 = vld [vmem:[%s21717_s10 + $0x16c] ss:$36 sps:$4 sm:$0xff]   ;;  %v9303_v34 = vsel %vm3637_vm14, %v19796_v18, %v9299_v24  ;;  %v16044_v27 = vld [vmem:[%s21717_s10 + $0x54] ss:$36 sps:$4 sm:$0xff]  }
 0x820   : > { %v20065_v21 = vpop.permute.xlu1 %9212  ;;  %10031 = vperm.xlu0 %15890, %v9969_v56   ;;  %11249 = vmatprep.subr.bf16.mxu0 %v9034_v31 }
 0x821   : > { %11360 = vmatprep.subr.bf16.mxu1 %v9315_v26  ;;  %v9233_v62 = vsel %vm1707_vm8, %v20030_v28, %v20065_v21  ;;  %v9225_v20 = vsel %vm1707_vm8, %v20065_v21, %v20030_v28 }
 0x822   : > { %v20067_v14 = vpop.permute.xlu0 %8948  ;;  %10026 = vperm.xlu1 %15891, %v9968_v15   ;;  %11191 = vmatmul.mubr.bf16.gmra.mxu1 %v16024_v52  ;;  %v16039_v52 = vld [vmem:[%s21717_s10 + $0x10] ss:$36 sps:$4 sm:$0xff]   ;;  %v16047_v15 = vld [vmem:[%s21717_s10 + $0x5c] ss:$36 sps:$4 sm:$0xff]  }
 0x823   : > { %11250 = vmatpush2.bf16.msra.mxu0 %v9044_v23  ;;  %11361 = vmatpush2.bf16.msra.mxu1 %v9303_v34  ;;  %v16050_v34 = vld [vmem:[%s21717_s10 + $0x9c] ss:$36 sps:$4 sm:$0xff]  }
 0x824   : > { %v20086_v0 = vpop.permute.xlu1 %8940  ;;  %9981 = vperm.xlu0 %15890, %v9959_v35   ;;  %11251 = vmatprep.subr.bf16.mxu0 %v9033_v29 }
 0x825   : > { %11362 = vmatprep.subr.bf16.mxu1 %v9312_v36  ;;  %11200 = vmatprep.mubr.bf16.mxu1 %v16029_v38  ;;  %v8956_v50 = vsel %vm1031_vm5, %v20067_v14, %v20086_v0  ;;  %v16042_v38 = vld [vmem:[%s21717_s10 + $0x50] ss:$36 sps:$4 sm:$0xff]   ;;  %v16045_v36 = vld [vmem:[%s21717_s10 + $0x58] ss:$36 sps:$4 sm:$0xff]  }
 0x826   : > { %v20091_v18 = vpop.permute.xlu0 %9210  ;;  %9976 = vperm.xlu1 %15891, %v9958_v37  }
 0x827   : > { %11252 = vmatpush2.bf16.msra.mxu0 %v9041_v9  ;;  %11363 = vmatpush2.bf16.msra.mxu1 %v9302_v1 }
 0x828   : > { %v20111_v2 = vpop.permute.xlu1 %9208  ;;  %10021 = vperm.xlu0 %15890, %v9967_v57   ;;  %11253 = vmatprep.subr.bf16.mxu0 %v9032_v7  ;;  %v16053_v57 = vld [vmem:[%s21717_s10 + $0xa4] ss:$36 sps:$4 sm:$0xff]  }
 0x829   : > { %11364 = vmatprep.subr.bf16.mxu1 %v9309_v41  ;;  %v9230_v47 = vsel %vm1707_vm8, %v20091_v18, %v20111_v2  ;;  %v9224_v56 = vsel %vm1707_vm8, %v20111_v2, %v20091_v18  ;;  %v16056_v2 = vld [vmem:[%s21717_s10 + $0xe4] ss:$36 sps:$4 sm:$0xff]  }
 0x82a   : > { %v20119_v3 = vpop.permute.xlu0 %9446  ;;  %10016 = vperm.xlu1 %15891, %v9966_v10   ;;  %11201 = vmatmul.mubr.bf16.gmra.mxu1 %v16027_v4  ;;  %v16048_v10 = vld [vmem:[%s21717_s10 + $0x98] ss:$36 sps:$4 sm:$0xff]  }
 0x82b   : > { %11254 = vmatpush2.bf16.msra.mxu0 %v9038_v55  ;;  %11365 = vmatpush2.bf16.msra.mxu1 %v9301_v58  ;;  %v16051_v55 = vld [vmem:[%s21717_s10 + $0xa0] ss:$36 sps:$4 sm:$0xff]  }
 0x82c   : > { %v8947_v54 = vpop.permute.xlu1 %8946  ;;  %11366 = vmatprep.subr.bf16.mxu1 %v9306_v12  ;;  %11210 = vmatprep.mubr.bf16.mxu1 %v16032_v19  ;;  %v16059_v12 = vld [vmem:[%s21717_s10 + $0xec] ss:$36 sps:$4 sm:$0xff]  }
 0x82d   : > { %v8959_v32 = vsel %vm1031_vm5, %v19942_v13, %v8947_v54  ;;  %v8971_v16 = vsel %vm1031_vm5, %v8947_v54, %v19942_v13 }
 0x82e   : > { %v9223_v17 = vpop.permute.xlu0 %9222  ;;  %11255 = vmatprep.subr.bf16.mxu0 %v8959_v32 }
 0x82f   : > { %v9239_v48 = vsel %vm1707_vm8, %v9223_v17, %v19935_v61  ;;  %11256 = vmatpush2.bf16.msra.mxu0 %v8971_v16  ;;  %11367 = vmatpush2.bf16.msra.mxu1 %v9300_v43  ;;  %v9227_v60 = vsel %vm1707_vm8, %v19935_v61, %v9223_v17  ;;  %v9226_v61 = vsel %vm1707_vm8, %v20006_v49, %v19988_v25  ;;  %v16041_v25 = vld [vmem:[%s21717_s10 + $0x14] ss:$36 sps:$4 sm:$0xff]   ;;  %v16054_v16 = vld [vmem:[%s21717_s10 + $0xe0] ss:$36 sps:$4 sm:$0xff]  }
 0x830   : > { %v9449_v11 = vpop.permute.xlu1 %9448  ;;  %11257 = vmatprep.subr.bf16.mxu0 %v8958_v6  ;;  %11368 = vmatprep.subr.bf16.mxu1 %v9239_v48  ;;  %v8962_v49 = vsel %vm1031_vm5, %v20086_v0, %v20067_v14  ;;  %v16062_v48 = vld [vmem:[%s21717_s10 + $0x12c] ss:$36 sps:$4 sm:$0xff]  }
 0x832   : > { %v20145_v13 = vpop.permute.xlu0 %9442  ;;  %11211 = vmatmul.mubr.bf16.gmra.mxu1 %v16030_v51 }
 0x833   : > { %11258 = vmatpush2.bf16.msra.mxu0 %v8968_v5  ;;  %11369 = vmatpush2.bf16.msra.mxu1 %v9227_v60  ;;  %v16065_v5 = vld [vmem:[%s21717_s10 + $0x134] ss:$36 sps:$4 sm:$0xff]  }
 0x834   : > { %v9445_v40 = vpop.permute.xlu1 %9444  ;;  %11259 = vmatprep.subr.bf16.mxu0 %v8957_v45  ;;  %11370 = vmatprep.subr.bf16.mxu1 %v9236_v59 }
 0x835   : > { %11220 = vmatprep.mubr.bf16.mxu1 %v16035_v8  ;;  %v9464_v31 = vsel %vm3793_vm0, %v20119_v3, %v9445_v40  ;;  %v9454_v35 = vsel %vm3793_vm0, %v9445_v40, %v20119_v3 }
 0x836   : > { %v9439_v44 = vpop.permute.xlu0 %9438 }
 0x837   : > { %11260 = vmatpush2.bf16.msra.mxu0 %v8965_v53  ;;  %11371 = vmatpush2.bf16.msra.mxu1 %v9226_v61  ;;  %v16068_v53 = vld [vmem:[%s21717_s10 + $0x174] ss:$36 sps:$4 sm:$0xff]  }
 0x838   : > { %v9441_v63 = vpop.permute.xlu1 %9440  ;;  %11261 = vmatprep.subr.bf16.mxu0 %v8956_v50  ;;  %11372 = vmatprep.subr.bf16.mxu1 %v9233_v62  ;;  %v16063_v62 = vld [vmem:[%s21717_s10 + $0x130] ss:$36 sps:$4 sm:$0xff]  }
 0x839   : > { %v9461_v23 = vsel %vm3793_vm0, %v20145_v13, %v9441_v63  ;;  %v9453_v0 = vsel %vm3793_vm0, %v9441_v63, %v20145_v13  ;;  %v16057_v13 = vld [vmem:[%s21717_s10 + $0xe8] ss:$36 sps:$4 sm:$0xff]  }
 0x83a   : > { %v9451_v33 = vpop.permute.xlu0 %9450  ;;  %11221 = vmatmul.mubr.bf16.gmra.mxu1 %v16033_v39 }
 0x83b   : > { %v9467_v22 = vsel %vm3793_vm0, %v9451_v33, %v9449_v11  ;;  %11262 = vmatpush2.bf16.msra.mxu0 %v8962_v49  ;;  %11373 = vmatpush2.bf16.msra.mxu1 %v9225_v20  ;;  %v9455_v26 = vsel %vm3793_vm0, %v9449_v11, %v9451_v33  ;;  %v16071_v33 = vld [vmem:[%s21717_s10 + $0x17c] ss:$36 sps:$4 sm:$0xff]  }
 0x83c   : > { %v9437_v24 = vpop.permute.xlu1 %9436  ;;  %11374 = vmatprep.subr.bf16.mxu1 %v9230_v47  ;;  %11457 = vmatprep.subr.bf16.mxu0 %v9467_v22  ;;  %v16066_v22 = vld [vmem:[%s21717_s10 + $0x170] ss:$36 sps:$4 sm:$0xff]   ;;  %v16074_v47 = vld [vmem:[%s21717_s10 + $0x1bc] ss:$36 sps:$4 sm:$0xff]  }
 0x83d   : > { %11376 = vmatprep.mubr.bf16.mxu1 %v16041_v25  ;;  %v9458_v18 = vsel %vm3793_vm0, %v9439_v44, %v9437_v24  ;;  %v9452_v4 = vsel %vm3793_vm0, %v9437_v24, %v9439_v44  ;;  %v16060_v44 = vld [vmem:[%s21717_s10 + $0x128] ss:$36 sps:$4 sm:$0xff]  }
 0x83e   : > { %v9371_v28 = vpop.permute.xlu0 %9370  ;;  %11264 = vmatmul.mubr.bf16.vlgmr.msra.gmra.mxu0 %v16036_v30 }
 0x83f   : > { %11375 = vmatpush2.bf16.msra.mxu1 %v9224_v56  ;;  %11458 = vmatpush1.bf16.msra.mxu0 %v9455_v26  ;;  %v16069_v56 = vld [vmem:[%s21717_s10 + $0x178] ss:$36 sps:$4 sm:$0xff]  }
 0x840   : > { %v9373_v21 = vpop.permute.xlu1 %9372  ;;  %11459 = vmatprep.subr.bf16.mxu0 %v9464_v31  ;;  %11273 = vmatprep.mubr.bf16.mxu0 %v16044_v27 }
 0x842   : > { %v9367_v14 = vpop.permute.xlu0 %9366  ;;  %11377 = vmatmul.mubr.bf16.vlgmr.msra.gmra.mxu1 %v16039_v52  ;;  %v16077_v52 = vld [vmem:[%s21717_s10 + $0x1c4] ss:$36 sps:$4 sm:$0xff]  }
 0x843   : > { %11460 = vmatpush1.bf16.msra.mxu0 %v9454_v35  ;;  %11386 = vmatprep.mubr.bf16.mxu1 %v16047_v15  ;;  %v16072_v35 = vld [vmem:[%s21717_s10 + $0x1b8] ss:$36 sps:$4 sm:$0xff]  }
 0x844   : > { %v9369_v29 = vpop.permute.xlu1 %9368  ;;  %11461 = vmatprep.subr.bf16.mxu0 %v9461_v23 }
 0x845   : > { %v9388_v58 = vsel %vm3715_vm13, %v9371_v28, %v9369_v29  ;;  %v9378_v17 = vsel %vm3715_vm13, %v9369_v29, %v9371_v28 }
 0x846   : > { %v9363_v37 = vpop.permute.xlu0 %9362  ;;  %11274 = vmatmul.mubr.bf16.gmra.mxu0 %v16042_v38 }
 0x847   : > { %11462 = vmatpush1.bf16.msra.mxu0 %v9453_v0  ;;  %11283 = vmatprep.mubr.bf16.mxu0 %v16050_v34  ;;  %v16080_v34 = vld [vmem:[%s21717_s10 + $0x204] ss:$36 sps:$4 sm:$0xff]  }
 0x848   : > { %v9365_v9 = vpop.permute.xlu1 %9364  ;;  %11463 = vmatprep.subr.bf16.mxu0 %v9458_v18  ;;  %v16075_v0 = vld [vmem:[%s21717_s10 + $0x1c0] ss:$36 sps:$4 sm:$0xff]  }
 0x849   : > { %v9385_v43 = vsel %vm3715_vm13, %v9367_v14, %v9365_v9  ;;  %v9377_v11 = vsel %vm3715_vm13, %v9365_v9, %v9367_v14 }
 0x84a   : > { %v9375_v1 = vpop.permute.xlu0 %9374  ;;  %11387 = vmatmul.mubr.bf16.gmra.mxu1 %v16045_v36 }
 0x84b   : > { %v9391_v7 = vsel %vm3715_vm13, %v9375_v1, %v9373_v21  ;;  %11464 = vmatpush1.bf16.msra.mxu0 %v9452_v4  ;;  %11396 = vmatprep.mubr.bf16.mxu1 %v16053_v57  ;;  %v9379_v3 = vsel %vm3715_vm13, %v9373_v21, %v9375_v1  ;;  %v16083_v57 = vld [vmem:[%s21717_s10 + $0x20c] ss:$36 sps:$4 sm:$0xff]  }
 0x84c   : > { %v9361_v41 = vpop.permute.xlu1 %9360  ;;  %11465 = vmatprep.subr.bf16.mxu0 %v9391_v7 }
 0x84d   : > { %v9382_v8 = vsel %vm3715_vm13, %v9363_v37, %v9361_v41  ;;  %v9376_v59 = vsel %vm3715_vm13, %v9361_v41, %v9363_v37 }
 0x84e   : > { %v9599_v19 = vpop.permute.xlu0 %9598  ;;  %11284 = vmatmul.mubr.bf16.gmra.mxu0 %v16048_v10  ;;  %v16078_v10 = vld [vmem:[%s21717_s10 + $0x200] ss:$36 sps:$4 sm:$0xff]  }
 0x84f   : > { %11466 = vmatpush1.bf16.msra.mxu0 %v9379_v3  ;;  %11293 = vmatprep.mubr.bf16.mxu0 %v16056_v2 }
 0x850   : > { %v9601_v54 = vpop.permute.xlu1 %9600  ;;  %11467 = vmatprep.subr.bf16.mxu0 %v9388_v58 }
 0x852   : > { %v9595_v32 = vpop.permute.xlu0 %9594  ;;  %11397 = vmatmul.mubr.bf16.gmra.mxu1 %v16051_v55 }
 0x853   : > { %11468 = vmatpush1.bf16.msra.mxu0 %v9378_v17  ;;  %11406 = vmatprep.mubr.bf16.mxu1 %v16059_v12 }
 0x854   : > { %v9597_v51 = vpop.permute.xlu1 %9596  ;;  %11469 = vmatprep.subr.bf16.mxu0 %v9385_v43 }
 0x855   : > { %v9616_v63 = vsel %vm3949_vm1, %v9599_v19, %v9597_v51  ;;  %v9606_v20 = vsel %vm3949_vm1, %v9597_v51, %v9599_v19  ;;  %v16086_v19 = vld [vmem:[%s21717_s10 + $0x1c] ss:$36 sps:$4 sm:$0xff]   ;;  %v21940_v51 = vmov 0  }
 0x856   : > { %v9591_v6 = vpop.permute.xlu0 %9590  ;;  %11294 = vmatmul.mubr.bf16.gmra.mxu0 %v16054_v16 }
 0x857   : > { %11470 = vmatpush1.bf16.msra.mxu0 %v9377_v11  ;;  %11303 = vmatprep.mubr.bf16.mxu0 %v16062_v48  ;;  %v16084_v48 = vld [vmem:[%s21717_s10 + $0x18] ss:$36 sps:$4 sm:$0xff]  }
 0x858   : > { %v9593_v60 = vpop.permute.xlu1 %9592  ;;  %11471 = vmatprep.subr.bf16.mxu0 %v9382_v8 }
 0x859   : > { %v9613_v30 = vsel %vm3949_vm1, %v9595_v32, %v9593_v60  ;;  %v9605_v28 = vsel %vm3949_vm1, %v9593_v60, %v9595_v32  ;;  %v16087_v60 = vld [vmem:[%s21717_s10 + $0x20] ss:$36 sps:$4 sm:$0xff]  }
 0x85a   : > { %v9603_v45 = vpop.permute.xlu0 %9602  ;;  %11407 = vmatmul.mubr.bf16.gmra.mxu1 %v16057_v13 }
 0x85b   : > { %v9619_v40 = vsel %vm3949_vm1, %v9603_v45, %v9601_v54  ;;  %11472 = vmatpush1.bf16.msra.mxu0 %v9376_v59  ;;  %11416 = vmatprep.mubr.bf16.mxu1 %v16065_v5  ;;  %v9607_v50 = vsel %vm3949_vm1, %v9601_v54, %v9603_v45  ;;  %v16081_v54 = vld [vmem:[%s21717_s10 + $0x208] ss:$36 sps:$4 sm:$0xff]   ;;  %v16088_v45 = vld [vmem:[%s21717_s10 + $0x60] ss:$36 sps:$4 sm:$0xff]  }
 0x85c   : > { %v9589_v61 = vpop.permute.xlu1 %9588  ;;  %11473 = vmatprep.subr.bf16.mxu0 %v9619_v40  ;;  %v16094_v59 = vld [vmem:[%s21717_s10 + $0xac] ss:$36 sps:$4 sm:$0xff]  }
 0x85d   : > { %v9610_v26 = vsel %vm3949_vm1, %v9591_v6, %v9589_v61  ;;  %v9604_v21 = vsel %vm3949_vm1, %v9589_v61, %v9591_v6  ;;  %v16090_v6 = vld [vmem:[%s21717_s10 + $0x64] ss:$36 sps:$4 sm:$0xff]   ;;  %v16095_v61 = vld [vmem:[%s21717_s10 + $0xb0] ss:$36 sps:$4 sm:$0xff]  }
 0x85e   : > { %v9523_v39 = vpop.permute.xlu0 %9522  ;;  %11304 = vmatmul.mubr.bf16.gmra.mxu0 %v16060_v44  ;;  %v16091_v40 = vld [vmem:[%s21717_s10 + $0x68] ss:$36 sps:$4 sm:$0xff]  }
 0x85f   : > { %11474 = vmatpush2.bf16.msra.mxu0 %v9607_v50  ;;  %11313 = vmatprep.mubr.bf16.mxu0 %v16068_v53  ;;  %v16092_v44 = vld [vmem:[%s21717_s10 + $0xa8] ss:$36 sps:$4 sm:$0xff]   ;;  %v16098_v53 = vld [vmem:[%s21717_s10 + $0xf4] ss:$36 sps:$4 sm:$0xff]   ;;  %v16102_v50 = vld [vmem:[%s21717_s10 + $0x13c] ss:$36 sps:$4 sm:$0xff]  }
 0x860   : > { %v9525_v25 = vpop.permute.xlu1 %9524  ;;  %11475 = vmatprep.subr.bf16.mxu0 %v9616_v63  ;;  %v16100_v63 = vld [vmem:[%s21717_s10 + $0x138] ss:$36 sps:$4 sm:$0xff]  }
 0x862   : > { %v9675_v49 = vpop.permute.xlu0 %9674  ;;  %11417 = vmatmul.mubr.bf16.gmra.mxu1 %v16063_v62  ;;  %v16099_v62 = vld [vmem:[%s21717_s10 + $0xf8] ss:$36 sps:$4 sm:$0xff]  }
 0x863   : > { %11476 = vmatpush2.bf16.msra.mxu0 %v9606_v20  ;;  %11426 = vmatprep.mubr.bf16.mxu1 %v16071_v33  ;;  %v16106_v33 = vld [vmem:[%s21717_s10 + $0x184] ss:$36 sps:$4 sm:$0xff]   ;;  %v16110_v20 = vld [vmem:[%s21717_s10 + $0x1cc] ss:$36 sps:$4 sm:$0xff]  }
 0x864   : > { %v9677_v24 = vpop.permute.xlu1 %9676  ;;  %11477 = vmatprep.subr.bf16.mxu0 %v9613_v30  ;;  %v16108_v30 = vld [vmem:[%s21717_s10 + $0x1c8] ss:$36 sps:$4 sm:$0xff]  }
 0x866   : > { %v9519_v27 = vpop.permute.xlu0 %9518  ;;  %11314 = vmatmul.mubr.bf16.gmra.mxu0 %v16066_v22  ;;  %v16107_v22 = vld [vmem:[%s21717_s10 + $0x188] ss:$36 sps:$4 sm:$0xff]  }
 0x867   : > { %11478 = vmatpush2.bf16.msra.mxu0 %v9605_v28  ;;  %11323 = vmatprep.mubr.bf16.mxu0 %v16074_v47  ;;  %v16114_v47 = vld [vmem:[%s21717_s10 + $0x214] ss:$36 sps:$4 sm:$0xff]  }
 0x868   : > { %v9521_v31 = vpop.permute.xlu1 %9520  ;;  %11479 = vmatprep.subr.bf16.mxu0 %v9610_v26  ;;  %v16115_v28 = vld [vmem:[%s21717_s10 + $0x218] ss:$36 sps:$4 sm:$0xff]  }
 0x869   : > { %v9540_v18 = vsel %vm3871_vm15, %v9523_v39, %v9521_v31  ;;  %v9530_v7 = vsel %vm3871_vm15, %v9521_v31, %v9523_v39  ;;  %v16096_v39 = vld [vmem:[%s21717_s10 + $0xf0] ss:$36 sps:$4 sm:$0xff]  }
 0x86a   : > { %v9527_v15 = vpop.permute.xlu0 %9526  ;;  %11427 = vmatmul.mubr.bf16.gmra.mxu1 %v16069_v56 }
 0x86b   : > { %v9543_v14 = vsel %vm3871_vm15, %v9527_v15, %v9525_v25  ;;  %11480 = vmatpush2.bf16.msra.mxu0 %v9604_v21  ;;  %11436 = vmatprep.mubr.bf16.mxu1 %v16077_v52  ;;  %v9531_v29 = vsel %vm3871_vm15, %v9525_v25, %v9527_v15  ;;  %v16103_v25 = vld [vmem:[%s21717_s10 + $0x140] ss:$36 sps:$4 sm:$0xff]  }
 0x86c   : > { %v9673_v38 = vpop.permute.xlu1 %9672  ;;  %11481 = vmatprep.subr.bf16.mxu0 %v9543_v14 }
 0x86d   : > { %v9694_v1 = vsel %vm9680_vm6, %v9675_v49, %v9673_v38  ;;  %v9683_v41 = vsel %vm9680_vm6, %v9673_v38, %v9675_v49  ;;  %v16104_v49 = vld [vmem:[%s21717_s10 + $0x180] ss:$36 sps:$4 sm:$0xff]  }
 0x86e   : > { %v9679_v23 = vpop.permute.xlu0 %9678  ;;  %11324 = vmatmul.mubr.bf16.gmra.mxu0 %v16072_v35 }
 0x86f   : > { %v9697_v37 = vsel %vm9680_vm6, %v9679_v23, %v9677_v24  ;;  %v9684_v36 = vsel %vm9680_vm6, %v9677_v24, %v9679_v23  ;;  %11482 = vmatpush2.bf16.msra.mxu0 %v9531_v29  ;;  %11333 = vmatprep.mubr.bf16.mxu0 %v16080_v34  ;;  %v16111_v24 = vld [vmem:[%s21717_s10 + $0x1d0] ss:$36 sps:$4 sm:$0xff]  }
 0x870   : > { %11578 = vmatprep.subr.bf16.mxu1 %v9697_v37  ;;  %v9517_v9 = vpop.permute.xlu1 %9516  ;;  %11483 = vmatprep.subr.bf16.mxu0 %v9540_v18 }
 0x871   : > { %11579 = vmatpush1.bf16.msra.mxu1 %v9684_v36  ;;  %v9537_v2 = vsel %vm3871_vm15, %v9519_v27, %v9517_v9  ;;  %v9529_v12 = vsel %vm3871_vm15, %v9517_v9, %v9519_v27  ;;  %v16112_v27 = vld [vmem:[%s21717_s10 + $0x210] ss:$36 sps:$4 sm:$0xff]  }
 0x872   : > { %11580 = vmatprep.subr.bf16.mxu1 %v9694_v1  ;;  %11437 = vmatmul.mubr.bf16.gmra.mxu1 %v16075_v0  ;;  %v9671_v4 = vpop.permute.xlu0 %9670 }
 0x873   : > { %11484 = vmatpush2.bf16.msra.mxu0 %v9530_v7  ;;  %11446 = vmatprep.mubr.bf16.mxu1 %v16083_v57 }
 0x874   : > { %v9669_v3 = vpop.permute.xlu1 %9668  ;;  %11485 = vmatprep.subr.bf16.mxu0 %v9537_v2 }
 0x875   : > { %11581 = vmatpush1.bf16.msra.mxu1 %v9683_v41  ;;  %v9691_v55 = vsel %vm9680_vm6, %v9671_v4, %v9669_v3  ;;  %v9682_v32 = vsel %vm9680_vm6, %v9669_v3, %v9671_v4 }
 0x876   : > { %11334 = vmatmul.mubr.bf16.gmra.mxu0 %v16078_v10  ;;  %11582 = vmatprep.subr.bf16.mxu1 %v9691_v55  ;;  %v9515_v58 = vpop.permute.xlu0 %9514 }
 0x877   : > { %11486 = vmatpush2.bf16.msra.mxu0 %v9529_v12  ;;  %11489 = vmatprep.mubr.bf16.mxu0 %v16086_v19 }
 0x878   : > { %v9513_v17 = vpop.permute.xlu1 %9512 }
 0x879   : > { %11583 = vmatpush1.bf16.msra.mxu1 %v9682_v32  ;;  %v9534_v16 = vsel %vm3871_vm15, %v9515_v58, %v9513_v17  ;;  %v9528_v43 = vsel %vm3871_vm15, %v9513_v17, %v9515_v58 }
 0x87a   : > { %11447 = vmatmul.mubr.bf16.gmra.mxu1 %v16081_v54  ;;  %11487 = vmatprep.subr.bf16.mxu0 %v9534_v16  ;;  %v9667_v11 = vpop.permute.xlu0 %9666 }
 0x87b   : > { %11488 = vmatpush2.bf16.msra.mxu0 %v9528_v43  ;;  %11602 = vmatprep.mubr.bf16.mxu1 %v21940_v51 }
 0x87c   : > { %v9665_v13 = vpop.permute.xlu1 %9664 }
 0x87d   : > { %v9688_v8 = vsel %vm9680_vm6, %v9667_v11, %v9665_v13  ;;  %v9681_v5 = vsel %vm9680_vm6, %v9665_v13, %v9667_v11 }
 0x87e   : > { %11490 = vmatmul.mubr.bf16.vlgmr.msra.gmra.mxu0 %v16084_v48  ;;  %11584 = vmatprep.subr.bf16.mxu1 %v9688_v8 }
 0x87f   : > { %11585 = vmatpush1.bf16.msra.mxu1 %v9681_v5  ;;  %11499 = vmatprep.mubr.bf16.mxu0 %v16090_v6 }
 0x882   : > { %15480 = vmatmul.mubr.msk.bf16.vlgmr.msra.gmra.mxu1 %vm858_vm2, %v16087_v60 }
 0x883   : > { %11612 = vmatprep.mubr.bf16.mxu1 %v21940_v51 }
 0x886   : > { %11500 = vmatmul.mubr.bf16.gmra.mxu0 %v16088_v45 }
 0x887   : > { %11509 = vmatprep.mubr.bf16.mxu0 %v16094_v59  ;;  %v20431_v36 = vpop.permute.xlu0 %10011 }
 0x889   : > { %v20425_v29 = vpop.permute.xlu1 %10006 }
 0x88a   : > { %15481 = vmatmul.mubr.msk.bf16.gmra.mxu1 %vm858_vm2, %v16091_v40 }
 0x88b   : > { %11622 = vmatprep.mubr.bf16.mxu1 %v21940_v51  ;;  %v20441_v4 = vpop.permute.xlu0 %10051 }
 0x88d   : > { %v20435_v57 = vpop.permute.xlu1 %10046 }
 0x88e   : > { %11510 = vmatmul.mubr.bf16.gmra.mxu0 %v16092_v44 }
 0x88f   : > { %11519 = vmatprep.mubr.bf16.mxu0 %v16098_v53  ;;  %v20451_v19 = vpop.permute.xlu0 %10001 }
 0x891   : > { %v20445_v10 = vpop.permute.xlu1 %9996 }
 0x892   : > { %15482 = vmatmul.mubr.msk.bf16.gmra.mxu1 %vm858_vm2, %v16095_v61 }
 0x893   : > { %11632 = vmatprep.mubr.bf16.mxu1 %v21940_v51  ;;  %v20461_v54 = vpop.permute.xlu0 %10041 }
 0x895   : > { %v20455_v55 = vpop.permute.xlu1 %10036 }
 0x896   : > { %11520 = vmatmul.mubr.bf16.gmra.mxu0 %v16096_v39 }
 0x897   : > { %11529 = vmatprep.mubr.bf16.mxu0 %v16102_v50  ;;  %v9992_v48 = vpop.permute.xlu0 %9991 }
 0x899   : > { %v9987_v17 = vpop.permute.xlu1 %9986 }
 0x89a   : > { %15483 = vmatmul.mubr.msk.bf16.gmra.mxu1 %vm858_vm2, %v16099_v62 }
 0x89b   : > { %11642 = vmatprep.mubr.bf16.mxu1 %v21940_v51  ;;  %v20477_v5 = vpop.permute.xlu0 %10031 }
 0x89d   : > { %v20471_v11 = vpop.permute.xlu1 %10026 }
 0x89e   : > { %11530 = vmatmul.mubr.bf16.gmra.mxu0 %v16100_v63 }
 0x89f   : > { %11539 = vmatprep.mubr.bf16.mxu0 %v16106_v33  ;;  %v9982_v61 = vpop.permute.xlu0 %9981 }
 0x8a1   : > { %v9977_v45 = vpop.permute.xlu1 %9976 }
 0x8a2   : > { %15484 = vmatmul.mubr.msk.bf16.gmra.mxu1 %vm858_vm2, %v16103_v25 }
 0x8a3   : > { %11652 = vmatprep.mubr.bf16.mxu1 %v21940_v51 }
 0x8a6   : > { %11540 = vmatmul.mubr.bf16.gmra.mxu0 %v16104_v49 }
 0x8a7   : > { %11549 = vmatprep.mubr.bf16.mxu0 %v16110_v20 }
 0x8aa   : > { %15485 = vmatmul.mubr.msk.bf16.gmra.mxu1 %vm858_vm2, %v16107_v22 }
 0x8ab   : > { %11662 = vmatprep.mubr.bf16.mxu1 %v21940_v51 }
 0x8ae   : > { %11550 = vmatmul.mubr.bf16.gmra.mxu0 %v16108_v30 }
 0x8af   : > { %11559 = vmatprep.mubr.bf16.mxu0 %v16114_v47 }
 0x8b2   : > { %15486 = vmatmul.mubr.msk.bf16.gmra.mxu1 %vm858_vm2, %v16111_v24 }
 0x8b3   : > { %11672 = vmatprep.mubr.bf16.mxu1 %v21940_v51 }
 0x8b6   : > { %11560 = vmatmul.mubr.bf16.gmra.mxu0 %v16112_v27 }
 0x8ba   : > { %15487 = vmatmul.mubr.msk.bf16.gmra.mxu1 %vm858_vm2, %v16115_v28 }
 0x8c2   : > { %v11152_v56 = vpop.f32.mrf.mxu1 }
 0x8c3   : > { %v11153_v40 = vadd.f32 %v11152_v56, %v9977_v45 }
 0x8c4   : > { %v11154_v26 = vpop.f32.mrf.mxu1 }
 0x8c5   : > { %v11155_v63 = vadd.f32 %v11154_v26, %v9977_v45 }
 0x8c6   : > { %v11156_v52 = vpop.f32.mrf.mxu1 }
 0x8c7   : > { %v11157_v33 = vadd.f32 %v11156_v52, %v9982_v61 }
 0x8c8   : > { %v11158_v31 = vpop.f32.mrf.mxu1 }
 0x8c9   : > { %v11159_v27 = vadd.f32 %v11158_v31, %v9982_v61 }
 0x8ca   : > { %v11162_v15 = vpop.f32.mrf.mxu1 }
 0x8cb   : > { %v11163_v28 = vadd.f32 %v11162_v15, %v9987_v17 }
 0x8cc   : > { %v20413_v21 = vpop.f32.mrf.mxu1 }
 0x8cd   : > { %v11165_v45 = vadd.f32 %v20413_v21, %v9987_v17 }
 0x8ce   : > { %v20415_v14 = vpop.f32.mrf.mxu1 }
 0x8d0   : > { %v20417_v35 = vpop.f32.mrf.mxu1 }
 0x8d2   : > { %v20419_v38 = vpop.f32.mrf.mxu1 }
 0x8d4   : > { %v20421_v23 = vpop.f32.mrf.mxu1 }
 0x8d6   : > { %v20423_v34 = vpop.f32.mrf.mxu1 }
 0x8d8   : > { %v20427_v37 = vpop.f32.mrf.mxu1 }
 0x8da   : > { %v20429_v0 = vpop.f32.mrf.mxu1 }
 0x8dc   : > { %v20433_v18 = vpop.f32.mrf.mxu1 }
 0x8de   : > { %v20437_v9 = vpop.f32.mrf.mxu1 }
 0x8e0   : > { %v20439_v1 = vpop.f32.mrf.mxu1 }
 0x8e2   : > { %v20443_v7 = vpop.f32.mrf.mxu1 }
 0x8e4   : > { %v20447_v2 = vpop.f32.mrf.mxu1 }
 0x8e6   : > { %v20449_v41 = vpop.f32.mrf.mxu1 }
 0x8e8   : > { %v20453_v3 = vpop.f32.mrf.mxu1 }
 0x8ea   : > { %v20457_v58 = vpop.f32.mrf.mxu1 }
 0x8ec   : > { %v20459_v12 = vpop.f32.mrf.mxu1 }
 0x8ee   : > { %v20463_v32 = vpop.f32.mrf.mxu1 }
 0x8f0   : > { %v20465_v16 = vpop.f32.mrf.mxu1 }
 0x8f2   : > { %v20467_v43 = vpop.f32.mrf.mxu1 }
 0x8f4   : > { %v20469_v6 = vpop.f32.mrf.mxu1 }
 0x8f6   : > { %v20473_v13 = vpop.f32.mrf.mxu1 }
 0x8f8   : > { %v20475_v8 = vpop.f32.mrf.mxu1 }
 0x8fa   : > { %v20479_v60 = vpop.f32.mrf.mxu1 }
 0x8fc   : > { %v20481_v59 = vpop.f32.mrf.mxu1 }
 0x8fe   : > { %v20483_v44 = vpop.f32.mrf.mxu1  ;;  %v11265_v53 = vpop.f32.mrf.mxu0 }
 0x8ff   : > { %v11266_v39 = vadd.f32 %v11265_v53, %v11153_v40 }
 0x900   : > { %v20485_v50 = vpop.f32.mrf.mxu1  ;;  %v11267_v62 = vpop.f32.mrf.mxu0 }
 0x901   : > { %v11268_v20 = vadd.f32 %v11267_v62, %v11155_v63  ;;  %v11167_v62 = vadd.f32 %v20415_v14, %v9992_v48  ;;  %v11175_v14 = vadd.f32 %v20421_v23, %v20445_v10  ;;  %v11179_v23 = vadd.f32 %v20427_v37, %v20451_v19 }
 0x902   : > { %v11269_v25 = vpop.f32.mrf.mxu0  ;;  %v11378_v49 = vpop.f32.mrf.mxu1 }
 0x903   : > { %v11270_v22 = vadd.f32 %v11269_v25, %v11157_v33  ;;  %v20487_v30 = vadd.f32 %v11378_v49, %v11266_v39 }
 0x904   : > { %v11271_v47 = vpop.f32.mrf.mxu0  ;;  %v11380_v24 = vpop.f32.mrf.mxu1 }
 0x905   : > { %v20489_v56 = vadd.f32 %v11380_v24, %v11268_v20  ;;  %v11272_v40 = vadd.f32 %v11271_v47, %v11159_v27 }
 0x906   : > { %v11275_v51 = vpop.f32.mrf.mxu0  ;;  %v11382_v42 = vpop.f32.mrf.mxu1 }
 0x907   : > { %v11276_v53 = vadd.f32 %v11275_v51, %v11163_v28  ;;  %v20491_v46 = vadd.f32 %v11382_v42, %v11270_v22  ;;  %v11169_v51 = vadd.f32 %v20417_v35, %v9992_v48  ;;  %v11173_v42 = vadd.f32 %v20419_v38, %v20445_v10 }
 0x908   : > { %v11277_v26 = vpop.f32.mrf.mxu0  ;;  %v11384_v52 = vpop.f32.mrf.mxu1  ;;  %v11183_v10 = vadd.f32 %v20429_v0, %v20425_v29 }
 0x909   : > { %v20495_v39 = vadd.f32 %v11384_v52, %v11272_v40  ;;  %v11278_v31 = vadd.f32 %v11277_v26, %v11165_v45  ;;  %v11177_v40 = vadd.f32 %v20423_v34, %v20451_v19 }
 0x90a   : > { %v11279_v63 = vpop.f32.mrf.mxu0  ;;  %v11388_v33 = vpop.f32.mrf.mxu1 }
 0x90b   : > { %v11280_v15 = vadd.f32 %v11279_v63, %v11167_v62  ;;  %v20497_v61 = vadd.f32 %v11388_v33, %v11276_v53 }
 0x90c   : > { %v11281_v25 = vpop.f32.mrf.mxu0  ;;  %v11390_v49 = vpop.f32.mrf.mxu1 }
 0x90d   : > { %v20502_v20 = vadd.f32 %v11390_v49, %v11278_v31  ;;  %v11282_v22 = vadd.f32 %v11281_v25, %v11169_v51  ;;  %v11185_v31 = vadd.f32 %v20433_v18, %v20425_v29  ;;  %v11189_v18 = vadd.f32 %v20439_v1, %v20431_v36 }
 0x90e   : > { %v11285_v21 = vpop.f32.mrf.mxu0  ;;  %v11392_v17 = vpop.f32.mrf.mxu1 }
 0x90f   : > { %v11286_v47 = vadd.f32 %v11285_v21, %v11173_v42  ;;  %v20506_v24 = vadd.f32 %v11392_v17, %v11280_v15  ;;  %v11187_v21 = vadd.f32 %v20437_v9, %v20431_v36 }
 0x910   : > { %v11287_v27 = vpop.f32.mrf.mxu0  ;;  %v11394_v28 = vpop.f32.mrf.mxu1 }
 0x911   : > { %v11288_v35 = vadd.f32 %v11287_v27, %v11175_v14  ;;  %v20510_v48 = vadd.f32 %v11394_v28, %v11282_v22  ;;  %v10017_v14 = vpop.permute.xlu1 %10016 }
 0x912   : > { %v11289_v38 = vpop.f32.mrf.mxu0  ;;  %v11398_v53 = vpop.f32.mrf.mxu1  ;;  %v11193_v28 = vadd.f32 %v20443_v7, %v10017_v14 }
 0x913   : > { %v11290_v26 = vadd.f32 %v11289_v38, %v11177_v40  ;;  %v20512_v52 = vadd.f32 %v11398_v53, %v11286_v47  ;;  %v11195_v38 = vadd.f32 %v20447_v2, %v10017_v14  ;;  %v11203_v2 = vadd.f32 %v20457_v58, %v20471_v11 }
 0x914   : > { %v11291_v45 = vpop.f32.mrf.mxu0  ;;  %v11400_v62 = vpop.f32.mrf.mxu1 }
 0x915   : > { %v20518_v63 = vadd.f32 %v11400_v62, %v11288_v35  ;;  %v11292_v15 = vadd.f32 %v11291_v45, %v11179_v23 }
 0x916   : > { %v11295_v33 = vpop.f32.mrf.mxu0  ;;  %v11402_v34 = vpop.f32.mrf.mxu1 }
 0x917   : > { %v11296_v25 = vadd.f32 %v11295_v33, %v11183_v10  ;;  %v20522_v49 = vadd.f32 %v11402_v34, %v11290_v26 }
 0x918   : > { %v11297_v51 = vpop.f32.mrf.mxu0  ;;  %v11404_v42 = vpop.f32.mrf.mxu1 }
 0x919   : > { %21941 = vst [vmem:[#allocation37_spill] sm:$0xff] %v20522_v49  ;;  %v11298_v37 = vadd.f32 %v11297_v51, %v11185_v31  ;;  %v20526_v19 = vadd.f32 %v11404_v42, %v11292_v15  ;;  %v11205_v42 = vadd.f32 %v20459_v12, %v20471_v11  ;;  %v11213_v12 = vadd.f32 %v20467_v43, %v20455_v55 }
 0x91a   : > { %v11299_v0 = vpop.f32.mrf.mxu0  ;;  %v11408_v17 = vpop.f32.mrf.mxu1 }
 0x91b   : > { %21942 = vst [vmem:[#allocation33_spill] sm:$0xff] %v20526_v19  ;;  %v11300_v22 = vadd.f32 %v11299_v0, %v11187_v21  ;;  %v20528_v47 = vadd.f32 %v11408_v17, %v11296_v25  ;;  %v11207_v17 = vadd.f32 %v20463_v32, %v20477_v5  ;;  %v11215_v32 = vadd.f32 %v20469_v6, %v20455_v55 }
 0x91c   : > { %v11301_v27 = vpop.f32.mrf.mxu0  ;;  %v11410_v29 = vpop.f32.mrf.mxu1  ;;  %v11219_v55 = vadd.f32 %v20475_v8, %v20461_v54  ;;  %v11223_v6 = vadd.f32 %v20479_v60, %v20435_v57 }
 0x91d   : > { %21943 = vst [vmem:[#allocation20_spill] sm:$0xff] %v20528_v47  ;;  %v20533_v40 = vadd.f32 %v11410_v29, %v11298_v37  ;;  %v11302_v53 = vadd.f32 %v11301_v27, %v11189_v18 }
 0x91e   : > { %v11305_v35 = vpop.f32.mrf.mxu0  ;;  %v11412_v9 = vpop.f32.mrf.mxu1 }
 0x91f   : > { %21944 = vst [vmem:[#allocation19_spill] sm:$0xff] %v20533_v40  ;;  %v11306_v26 = vadd.f32 %v11305_v35, %v11193_v28  ;;  %v20536_v45 = vadd.f32 %v11412_v9, %v11300_v22  ;;  %v11209_v35 = vadd.f32 %v20465_v16, %v20477_v5 }
 0x920   : > { %v11307_v62 = vpop.f32.mrf.mxu0  ;;  %v11414_v23 = vpop.f32.mrf.mxu1 }
 0x921   : > { %21945 = vst [vmem:[#allocation17_spill] sm:$0xff] %v20536_v45  ;;  %v11308_v10 = vadd.f32 %v11307_v62, %v11195_v38  ;;  %v20538_v33 = vadd.f32 %v11414_v23, %v11302_v53 }
 0x922   : > { %v20540_v34 = vpop.f32.mrf.mxu0  ;;  %v11418_v36 = vpop.f32.mrf.mxu1 }
 0x923   : > { %21946 = vst [vmem:[#allocation24_spill] sm:$0xff] %v20538_v33  ;;  %v20542_v1 = vadd.f32 %v11418_v36, %v11306_v26  ;;  %v11217_v36 = vadd.f32 %v20473_v13, %v20461_v54 }
 0x924   : > { %v20544_v7 = vpop.f32.mrf.mxu0  ;;  %v11420_v31 = vpop.f32.mrf.mxu1 }
 0x925   : > { %v20548_v15 = vadd.f32 %v11420_v31, %v11308_v10 }
 0x926   : > { %v11315_v25 = vpop.f32.mrf.mxu0  ;;  %v20550_v51 = vpop.f32.mrf.mxu1 }
 0x927   : > { %v11316_v21 = vadd.f32 %v11315_v25, %v11203_v2 }
 0x928   : > { %v11317_v37 = vpop.f32.mrf.mxu0  ;;  %v20554_v0 = vpop.f32.mrf.mxu1 }
 0x929   : > { %v11318_v14 = vadd.f32 %v11317_v37, %v11205_v42 }
 0x92a   : > { %v11319_v22 = vpop.f32.mrf.mxu0  ;;  %v11428_v27 = vpop.f32.mrf.mxu1 }
 0x92b   : > { %v11320_v29 = vadd.f32 %v11319_v22, %v11207_v17  ;;  %v20558_v58 = vadd.f32 %v11428_v27, %v11316_v21 }
 0x92c   : > { %v11321_v18 = vpop.f32.mrf.mxu0  ;;  %v11430_v28 = vpop.f32.mrf.mxu1 }
 0x92d   : > { %v20564_v11 = vadd.f32 %v11430_v28, %v11318_v14  ;;  %v11322_v53 = vadd.f32 %v11321_v18, %v11209_v35  ;;  %v11225_v14 = vadd.f32 %v20481_v59, %v20435_v57 }
 0x92e   : > { %v11325_v9 = vpop.f32.mrf.mxu0  ;;  %v11432_v38 = vpop.f32.mrf.mxu1 }
 0x92f   : > { %v11326_v26 = vadd.f32 %v11325_v9, %v11213_v12  ;;  %v20568_v62 = vadd.f32 %v11432_v38, %v11320_v29 }
 0x930   : > { %v11327_v23 = vpop.f32.mrf.mxu0  ;;  %v11434_v10 = vpop.f32.mrf.mxu1 }
 0x931   : > { %v11328_v16 = vadd.f32 %v11327_v23, %v11215_v32  ;;  %v20572_v5 = vadd.f32 %v11434_v10, %v11322_v53 }
 0x932   : > { %v11329_v43 = vpop.f32.mrf.mxu0  ;;  %v11438_v31 = vpop.f32.mrf.mxu1 }
 0x933   : > { %v11330_v2 = vadd.f32 %v11329_v43, %v11217_v36  ;;  %v20574_v25 = vadd.f32 %v11438_v31, %v11326_v26 }
 0x934   : > { %v11331_v42 = vpop.f32.mrf.mxu0  ;;  %v11440_v21 = vpop.f32.mrf.mxu1 }
 0x935   : > { %v20580_v37 = vadd.f32 %v11440_v21, %v11328_v16  ;;  %v11332_v22 = vadd.f32 %v11331_v42, %v11219_v55 }
 0x936   : > { %v11335_v17 = vpop.f32.mrf.mxu0  ;;  %v11442_v13 = vpop.f32.mrf.mxu1 }
 0x937   : > { %v11336_v27 = vadd.f32 %v11335_v17, %v11223_v6  ;;  %v20584_v29 = vadd.f32 %v11442_v13, %v11330_v2 }
 0x938   : > { %v11337_v18 = vpop.f32.mrf.mxu0  ;;  %v11444_v28 = vpop.f32.mrf.mxu1 }
 0x939   : > { %21947 = vst [vmem:[#allocation22_spill] sm:$0xff] %v20584_v29  ;;  %v11338_v35 = vadd.f32 %v11337_v18, %v11225_v14  ;;  %v20586_v12 = vadd.f32 %v11444_v28, %v11332_v22 }
 0x93a   : > { %v20588_v54 = vpop.f32.mrf.mxu0  ;;  %v11448_v8 = vpop.f32.mrf.mxu1 }
 0x93b   : > { %21948 = vst [vmem:[#allocation26_spill] sm:$0xff] %v20586_v12  ;;  %v20590_v60 = vadd.f32 %v11448_v8, %v11336_v27  ;;  %v10022_v12 = vpop.permute.xlu0 %10021 }
 0x93c   : > { %v20592_v9 = vpop.f32.mrf.mxu0  ;;  %v11450_v38 = vpop.f32.mrf.mxu1 }
 0x93d   : > { %21949 = vst [vmem:[#allocation27_spill] sm:$0xff] %v20590_v60  ;;  %v20594_v32 = vadd.f32 %v11450_v38, %v11338_v35 }
 0x93e   : > { %v20596_v57 = vpop.f32.mrf.mxu1  ;;  %v11491_v59 = vpop.f32.mrf.mxu0 }
 0x93f   : > { %21950 = vst [vmem:[#allocation40_spill] sm:$0xff] %v20594_v32  ;;  %21951 = vst [vmem:[#allocation16_spill] sm:$0xff] %v20596_v57 }
 0x940   : > { %v20598_v53 = vpop.f32.mrf.mxu1  ;;  %v11493_v26 = vpop.f32.mrf.mxu0 }
 0x941   : > { %21952 = vst [vmem:[#allocation31_spill] sm:$0xff] %v20598_v53 }
 0x942   : > { %v11495_v23 = vpop.f32.mrf.mxu0  ;;  %v11604_v10 = vpop.f32.mrf.mxu1 }
 0x944   : > { %v11497_v36 = vpop.f32.mrf.mxu0  ;;  %v11606_v16 = vpop.f32.mrf.mxu1 }
 0x946   : > { %v11501_v43 = vpop.f32.mrf.mxu0  ;;  %v11608_v31 = vpop.f32.mrf.mxu1 }
 0x948   : > { %v20600_v2 = vpop.f32.mrf.mxu0  ;;  %v20602_v42 = vpop.f32.mrf.mxu1 }
 0x94a   : > { %v20604_v21 = vpop.f32.mrf.mxu0  ;;  %v20606_v55 = vpop.f32.mrf.mxu1 }
 0x94c   : > { %v20608_v6 = vpop.f32.mrf.mxu0  ;;  %v20610_v17 = vpop.f32.mrf.mxu1 }
 0x94e   : > { %v20612_v13 = vpop.f32.mrf.mxu0  ;;  %v20614_v14 = vpop.f32.mrf.mxu1 }
 0x950   : > { %v20616_v22 = vpop.f32.mrf.mxu0  ;;  %v20618_v27 = vpop.f32.mrf.mxu1 }
 0x952   : > { %v20620_v18 = vpop.f32.mrf.mxu0  ;;  %v20622_v28 = vpop.f32.mrf.mxu1 }
 0x953   : > { %21953 = vst [vmem:[#allocation28_spill] sm:$0xff] %v20620_v18 }
 0x954   : > { %v20624_v35 = vpop.f32.mrf.mxu0  ;;  %v20626_v8 = vpop.f32.mrf.mxu1 }
 0x955   : > { %21954 = vst [vmem:[#allocation29_spill] sm:$0xff] %v20624_v35  ;;  %21955 = vst [vmem:[#allocation21_spill] sm:$0xff] %v20626_v8  ;;  %v11197_v35 = vadd.f32 %v20449_v41, %v10022_v12  ;;  %v11494_v41 = vadd.f32 %v11493_v26, %v20489_v56 }
 0x956   : > { %v20628_v38 = vpop.f32.mrf.mxu0  ;;  %v20630_v33 = vpop.f32.mrf.mxu1 }
 0x957   : > { %21956 = vst [vmem:[#allocation30_spill] sm:$0xff] %v20628_v38  ;;  %21957 = vst [vmem:[#allocation36_spill] sm:$0xff] %v20630_v33  ;;  %v11310_v38 = vadd.f32 %v20540_v34, %v11197_v35  ;;  %v11496_v35 = vadd.f32 %v11495_v23, %v20491_v46 }
 0x958   : > { %v20632_v45 = vpop.f32.mrf.mxu0  ;;  %v20634_v32 = vpop.f32.mrf.mxu1 }
 0x959   : > { %21958 = vst [vmem:[#allocation38_spill] sm:$0xff] %v20632_v45  ;;  %21959 = vst [vmem:[#allocation25_spill] sm:$0xff] %v20634_v32  ;;  %v11492_v32 = vadd.f32 %v11491_v59, %v20487_v30  ;;  %v11607_v59 = vadd.f32 %v11606_v16, %v11494_v41  ;;  %v11609_v57 = vadd.f32 %v11608_v31, %v11496_v35 }
 0x95a   : > { %v20636_v40 = vpop.f32.mrf.mxu0  ;;  %v20638_v60 = vpop.f32.mrf.mxu1 }
 0x95b   : > { %21960 = vst [vmem:[#allocation18_spill] sm:$0xff] %v20636_v40  ;;  %21961 = vst [vmem:[#allocation23_spill] sm:$0xff] %v20638_v60  ;;  %v11199_v60 = vadd.f32 %v20453_v3, %v10022_v12  ;;  %v11605_v49 = vadd.f32 %v11604_v10, %v11492_v32 }
 0x95c   : > { %v20640_v47 = vpop.f32.mrf.mxu0  ;;  %v20642_v53 = vpop.f32.mrf.mxu1 }
 0x95d   : > { %21962 = vst [vmem:[#allocation32_spill] sm:$0xff] %v20640_v47  ;;  %21963 = vst [vmem:[#allocation35_spill] sm:$0xff] %v20642_v53  ;;  %v11423_v47 = vadd.f32 %v20550_v51, %v11310_v38  ;;  %v11312_v34 = vadd.f32 %v20544_v7, %v11199_v60  ;;  %v11502_v60 = vadd.f32 %v11501_v43, %v20497_v61 }
 0x95e   : > { %v11531_v19 = vpop.f32.mrf.mxu0  ;;  %v20645_v29 = vpop.f32.mrf.mxu1 }
 0x95f   : > { %21964 = vst [vmem:[#allocation34_spill] sm:$0xff] %v20645_v29  ;;  %v11532_v40 = vadd.f32 %v11531_v19, %v20542_v1  ;;  %v11425_v51 = vadd.f32 %v20554_v0, %v11312_v34  ;;  %v11229_v0 = vadd.f32 %v20485_v50, %v20441_v4  ;;  %v11512_v34 = vadd.f32 %v20612_v13, %v20512_v52 }
 0x960   : > { %v11533_v33 = vpop.f32.mrf.mxu0  ;;  %v20648_v45 = vpop.f32.mrf.mxu1 }
 0x961   : > { %21965 = vst [vmem:[#allocation39_spill] sm:$0xff] %v20648_v45  ;;  %v11534_v29 = vadd.f32 %v11533_v33, %v20548_v15  ;;  %v11498_v33 = vadd.f32 %v11497_v36, %v20495_v39 }
 0x962   : > { %v11535_v53 = vpop.f32.mrf.mxu0  ;;  %v11644_v18 = vpop.f32.mrf.mxu1 }
 0x963   : > { %v11645_v8 = vadd.f32 %v11644_v18, %v11532_v40  ;;  %v11536_v19 = vadd.f32 %v11535_v53, %v11423_v47  ;;  %v11227_v40 = vadd.f32 %v20483_v44, %v20441_v4  ;;  %v11504_v53 = vadd.f32 %v20600_v2, %v20502_v20  ;;  %v21966_v20 = vld [vmem:[#allocation14_spill] sm:$0xff] }
 0x964   : > { %v11537_v45 = vpop.f32.mrf.mxu0  ;;  %v11646_v30 = vpop.f32.mrf.mxu1  ;;  %v11611_v26 = vadd.f32 %v20602_v42, %v11498_v33 }
 0x965   : > { %v11683_v1 = vadd.f32 %v11645_v8, %v11605_v49  ;;  %v11647_v3 = vadd.f32 %v11646_v30, %v11534_v29  ;;  %v11538_v7 = vadd.f32 %v11537_v45, %v11425_v51  ;;  %v11615_v45 = vadd.f32 %v20606_v55, %v11502_v60  ;;  %v21969_v60 = vld [vmem:[#allocation21_spill] sm:$0xff] }
 0x966   : > { %v11541_v12 = vpop.f32.mrf.mxu0  ;;  %v11648_v38 = vpop.f32.mrf.mxu1  ;;  %v11506_v55 = vadd.f32 %v20604_v21, %v20506_v24 }
 0x967   : > { %v11684_v56 = vadd.f32 %v11647_v3, %v11607_v59  ;;  %v11649_v32 = vadd.f32 %v11648_v38, %v11536_v19  ;;  %v11699_v47 = vmax.f32 %v11683_v1, 0.0  ;;  %v11542_v49 = vadd.f32 %v11541_v12, %v20558_v58  ;;  %v21967_v1 = vld [vmem:[#allocation15_spill] sm:$0xff] }
 0x968   : > { %v11543_v46 = vpop.f32.mrf.mxu0  ;;  %v11650_v15 = vpop.f32.mrf.mxu1  ;;  %v11340_v58 = vadd.f32 %v20588_v54, %v11227_v40  ;;  %v11619_v19 = vadd.f32 %v20614_v14, %v11506_v55 }
 0x969   : > { %v11685_v29 = vadd.f32 %v11649_v32, %v11609_v57  ;;  %v11651_v44 = vadd.f32 %v11650_v15, %v11538_v7  ;;  %v11544_v61 = vadd.f32 %v11543_v46, %v20564_v11  ;;  %v11617_v57 = vadd.f32 %v20610_v17, %v11504_v53 }
 0x96a   : > { %v11545_v23 = vpop.f32.mrf.mxu0  ;;  %v11654_v39 = vpop.f32.mrf.mxu1  ;;  %v11700_v16 = vmax.f32 %v11684_v56, 0.0  ;;  %v11715_v31 = vmul.f32 %v11699_v47, %v21966_v20  ;;  %v11508_v11 = vadd.f32 %v20608_v6, %v20510_v48 }
 0x96b   : > { %v11701_v10 = vmax.f32 %v11685_v29, 0.0  ;;  %v11655_v36 = vadd.f32 %v11654_v39, %v11542_v49  ;;  %v11686_v4 = vadd.f32 %v11651_v44, %v11611_v26  ;;  %v11546_v54 = vadd.f32 %v11545_v23, %v20568_v62  ;;  %v21971_v26 = vld [vmem:[#allocation28_spill] sm:$0xff]  ;;  %v21972_v23 = vld [vmem:[#allocation22_spill] sm:$0xff] }
 0x96c   : > { %v11547_v50 = vpop.f32.mrf.mxu0  ;;  %v11656_v43 = vpop.f32.mrf.mxu1  ;;  %v11716_v24 = vmul.f32 %v11700_v16, %v21967_v1  ;;  %v11514_v62 = vadd.f32 %v20616_v22, %v20518_v63  ;;  %v11621_v51 = vadd.f32 %v20618_v27, %v11508_v11  ;;  %v11342_v27 = vadd.f32 %v20592_v9, %v11229_v0 }
 0x96d   : > { %v11717_v2 = vmul.f32 %v11701_v10, %v21966_v20  ;;  %v11687_v42 = vadd.f32 %v11655_v36, %v11615_v45  ;;  %v11657_v18 = vadd.f32 %v11656_v43, %v11544_v61  ;;  %v11702_v8 = vmax.f32 %v11686_v4, 0.0  ;;  %v21973_v61 = vld [vmem:[#allocation33_spill] sm:$0xff] }
 0x96e   : > { %v11551_v17 = vpop.f32.mrf.mxu0  ;;  %v11658_v41 = vpop.f32.mrf.mxu1  ;;  %v11548_v30 = vadd.f32 %v11547_v50, %v20572_v5  ;;  %v11625_v5 = vadd.f32 %v20622_v28, %v11512_v34  ;;  %v11627_v47 = vadd.f32 %v21969_v60, %v11514_v62  ;;  %v21974_v36 = vld [vmem:[#allocation29_spill] sm:$0xff]  ;;  %v21975_v50 = vld [vmem:[#allocation36_spill] sm:$0xff]  ;;  %v21988_v60 = vld [vmem:[#allocation35_spill] sm:$0xff] }
 0x96f   : > { %v20682_v35 = vpack.c.bf16 %v11717_v2, %v11715_v31  ;;  %v11688_v59 = vadd.f32 %v11657_v18, %v11617_v57  ;;  %v11718_v21 = vmul.f32 %v11702_v8, %v21967_v1  ;;  %v11659_v48 = vadd.f32 %v11658_v41, %v11546_v54  ;;  %v21976_v2 = vld [vmem:[#allocation26_spill] sm:$0xff]  ;;  %v21977_v8 = vld [vmem:[#allocation31_spill] sm:$0xff] }
 0x970   : > { %v11553_v6 = vpop.f32.mrf.mxu0  ;;  %v11660_v3 = vpop.f32.mrf.mxu1  ;;  %v11552_v52 = vadd.f32 %v11551_v17, %v20574_v25  ;;  %v11703_v12 = vmax.f32 %v11687_v42, 0.0  ;;  %v21968_v25 = vld [vmem:[#allocation16_spill] sm:$0xff]  ;;  %v11455_v54 = vadd.f32 %v21977_v8, %v11342_v27  ;;  %v21979_v41 = vld [vmem:[#allocation30_spill] sm:$0xff] }
 0x971   : > { %v11661_v13 = vadd.f32 %v11660_v3, %v11548_v30  ;;  %11833 = vrot.lane.b32.xlu0 %v20682_v35, %s16266_s18  ;;  %v20695_v14 = vpack.c.bf16 %v11718_v21, %v11716_v24  ;;  %v11689_v38 = vadd.f32 %v11659_v48, %v11619_v19  ;;  %v11704_v40 = vmax.f32 %v11688_v59, 0.0  ;;  %v21978_v17 = vld [vmem:[#allocation20_spill] sm:$0xff]  ;;  %v21980_v59 = vld [vmem:[#allocation27_spill] sm:$0xff]  ;;  %v21981_v24 = vld [vmem:[#allocation25_spill] sm:$0xff] }
 0x972   : > { %v11555_v56 = vpop.f32.mrf.mxu0  ;;  %v11664_v32 = vpop.f32.mrf.mxu1  ;;  %v11554_v33 = vadd.f32 %v11553_v6, %v20580_v37  ;;  %v11453_v7 = vadd.f32 %v21968_v25, %v11340_v58  ;;  %v21970_v37 = vld [vmem:[#allocation37_spill] sm:$0xff]  ;;  %v11719_v0 = vmul.f32 %v11703_v12, %v21966_v20  ;;  %v11518_v58 = vadd.f32 %v21974_v36, %v21973_v61  ;;  %v21984_v12 = vld [vmem:[#allocation23_spill] sm:$0xff] }
 0x973   : > { %v11690_v63 = vadd.f32 %v11661_v13, %v11621_v51  ;;  %v11665_v22 = vadd.f32 %v11664_v32, %v11552_v52  ;;  %v11705_v46 = vmax.f32 %v11689_v38, 0.0  ;;  %11825 = vrot.lane.b32.xlu1 %v20695_v14, %s16266_s18  ;;  %v11516_v9 = vadd.f32 %v21971_v26, %v21970_v37  ;;  %v21982_v52 = vld [vmem:[#allocation19_spill] sm:$0xff]  ;;  %v21983_v13 = vld [vmem:[#allocation38_spill] sm:$0xff]  ;;  %v21989_v37 = vld [vmem:[#allocation24_spill] sm:$0xff] }
 0x974   : > { %v11557_v28 = vpop.f32.mrf.mxu0  ;;  %v11666_v15 = vpop.f32.mrf.mxu1  ;;  %v11556_v39 = vadd.f32 %v11555_v56, %v21972_v23  ;;  %v11720_v57 = vmul.f32 %v11704_v40, %v21967_v1  ;;  %v11522_v34 = vadd.f32 %v21979_v41, %v21978_v17  ;;  %v11631_v21 = vadd.f32 %v21981_v24, %v11518_v58  ;;  %v21985_v56 = vld [vmem:[#allocation40_spill] sm:$0xff] }
 0x975   : > { %v11706_v49 = vmax.f32 %v11690_v63, 0.0  ;;  %v11691_v29 = vadd.f32 %v11665_v22, %v11625_v5  ;;  %v11667_v53 = vadd.f32 %v11666_v15, %v11554_v33  ;;  %11755 = vrot.lane.b32.xlu0 %v20682_v35, %s16268_s7  ;;  %v11721_v44 = vmul.f32 %v11705_v46, %v21966_v20  ;;  %v21986_v33 = vld [vmem:[#allocation17_spill] sm:$0xff]  ;;  %v21987_v63 = vld [vmem:[#allocation18_spill] sm:$0xff]  ;;  %v21990_v26 = vld [vmem:[#allocation32_spill] sm:$0xff] }
 0x976   : > { %v11561_v45 = vpop.f32.mrf.mxu0  ;;  %v11668_v10 = vpop.f32.mrf.mxu1  ;;  %v11629_v43 = vadd.f32 %v21975_v50, %v11516_v9  ;;  %v11558_v42 = vadd.f32 %v11557_v28, %v21976_v2  ;;  %v11524_v5 = vadd.f32 %v21983_v13, %v21982_v52  ;;  %v11635_v38 = vadd.f32 %v21984_v12, %v11522_v34  ;;  %v21992_v50 = vld [vmem:[#allocation39_spill] sm:$0xff] }
 0x977   : > { %v11722_v16 = vmul.f32 %v11706_v49, %v21967_v1  ;;  %v11692_v4 = vadd.f32 %v11667_v53, %v11627_v47  ;;  %v20715_v31 = vpack.c.bf16 %v11721_v44, %v11719_v0  ;;  %v11669_v18 = vadd.f32 %v11668_v10, %v11556_v39  ;;  %11743 = vrot.lane.b32.xlu1 %v20695_v14, %s16268_s7 }
 0x978   : > { %v11563_v55 = vpop.f32.mrf.mxu0  ;;  %v11670_v11 = vpop.f32.mrf.mxu1  ;;  %v11562_v19 = vadd.f32 %v11561_v45, %v21980_v59  ;;  %v11707_v48 = vmax.f32 %v11691_v29, 0.0  ;;  %v11526_v22 = vadd.f32 %v21987_v63, %v21986_v33  ;;  %v11637_v47 = vadd.f32 %v21988_v60, %v11524_v5  ;;  %v21991_v45 = vld [vmem:[#allocation34_spill] sm:$0xff] }
 0x979   : > { %v20723_v30 = vpack.c.bf16 %v11722_v16, %v11720_v57  ;;  %11985 = vrot.lane.b32.xlu0 %v20682_v35, %s21858_s21  ;;  %v11693_v6 = vadd.f32 %v11669_v18, %v11629_v43  ;;  %v11671_v3 = vadd.f32 %v11670_v11, %v11558_v42  ;;  %v11564_v32 = vadd.f32 %v11563_v55, %v21985_v56 }
 0x97a   : > { %v11565_v62 = vpop.f32.mrf.mxu0  ;;  %v11674_v51 = vpop.f32.mrf.mxu1  ;;  %v11708_v27 = vmax.f32 %v11692_v4, 0.0  ;;  %v11528_v9 = vadd.f32 %v21990_v26, %v21989_v37  ;;  %v11723_v0 = vmul.f32 %v11707_v48, %v21966_v20  ;;  %v11639_v10 = vadd.f32 %v21991_v45, %v11526_v22  ;;  %v16118_v48 = vld [vmem:[%s21719_s12 + $0x4] ss:$24 sps:$4 sm:$0xff]   ;;  %v12685_v26 = vld [vmem:[%s21720_s13 + $0x50] sm:$0xff] }
 0x97b   : > { %v11675_v40 = vadd.f32 %v11674_v51, %v11562_v19  ;;  %v11709_v25 = vmax.f32 %v11693_v6, 0.0  ;;  %v11694_v46 = vadd.f32 %v11671_v3, %v11631_v21  ;;  %11977 = vrot.lane.b32.xlu1 %v20695_v14, %s21858_s21  ;;  %v11566_v49 = vadd.f32 %v11565_v62, %v11453_v7  ;;  %13411 = vmatprep.mubr.bf16.mxu0 %v16118_v48  ;;  %v12686_v37 = vld [vmem:[%s21720_s13 + $0x58] sm:$0xff] }
 0x97c   : > { %v11567_v28 = vpop.f32.mrf.mxu0  ;;  %v11676_v15 = vpop.f32.mrf.mxu1  ;;  %v11724_v7 = vmul.f32 %v11708_v27, %v21967_v1  ;;  %v11641_v43 = vadd.f32 %v21992_v50, %v11528_v9  ;;  %v12679_v50 = vld [vmem:[%s21720_s13 + $0x20] sm:$0xff] }
 0x97d   : > { %v11695_v29 = vadd.f32 %v11675_v40, %v11635_v38  ;;  %v11677_v53 = vadd.f32 %v11676_v15, %v11564_v32  ;;  %11909 = vrot.lane.b32.xlu0 %v20682_v35, %s21922_s0  ;;  %v11725_v44 = vmul.f32 %v11709_v25, %v21966_v20  ;;  %v11710_v23 = vmax.f32 %v11694_v46, 0.0  ;;  %v16136_v25 = vld [vmem:[%s21719_s12 + $0xc] ss:$24 sps:$4 sm:$0xff]  }
 0x97e   : > { %v11678_v39 = vpop.f32.mrf.mxu1  ;;  %v11568_v61 = vadd.f32 %v11567_v28, %v11455_v54  ;;  %13504 = vmatprep.mubr.bf16.mxu1 %v16136_v25 }
 0x97f   : > { %v11696_v36 = vadd.f32 %v11677_v53, %v11637_v47  ;;  %v11679_v58 = vadd.f32 %v11678_v39, %v11566_v49  ;;  %v20746_v57 = vpack.c.bf16 %v11725_v44, %v11723_v0  ;;  %v11726_v16 = vmul.f32 %v11710_v23, %v21967_v1  ;;  %11901 = vrot.lane.b32.xlu1 %v20695_v14, %s21922_s0  ;;  %v12683_v44 = vld [vmem:[%s21720_s13 + $0x40] sm:$0xff] }
 0x980   : > { %v11680_v4 = vpop.f32.mrf.mxu1  ;;  %v11711_v2 = vmax.f32 %v11695_v29, 0.0 }
 0x981   : > { %v11697_v42 = vadd.f32 %v11679_v58, %v11639_v10  ;;  %v11681_v18 = vadd.f32 %v11680_v4, %v11568_v61  ;;  %11835 = vrot.lane.b32.xlu0 %v20715_v31, %s16266_s18  ;;  %v20754_v55 = vpack.c.bf16 %v11726_v16, %v11724_v7  ;;  %v11712_v11 = vmax.f32 %v11696_v36, 0.0  ;;  %v12681_v36 = vld [vmem:[%s21720_s13 + $0x30] sm:$0xff]  ;;  %v12680_v7 = vld [vmem:[%s21720_s13 + $0x28] sm:$0xff] }
 0x982   : > { %v11727_v17 = vmul.f32 %v11711_v2, %v21966_v20  ;;  %v12678_v2 = vld [vmem:[%s21720_s13 + $0x18] sm:$0xff] }
 0x983   : > { %v11713_v8 = vmax.f32 %v11697_v42, 0.0  ;;  %v11698_v54 = vadd.f32 %v11681_v18, %v11641_v43  ;;  %11827 = vrot.lane.b32.xlu1 %v20723_v30, %s16266_s18  ;;  %v11728_v59 = vmul.f32 %v11712_v11, %v21967_v1  ;;  %v12677_v11 = vld [vmem:[%s21720_s13 + $0x10] sm:$0xff] }
 0x985   : > { %v11729_v41 = vmul.f32 %v11713_v8, %v21966_v20  ;;  %v11714_v34 = vmax.f32 %v11698_v54, 0.0  ;;  %11757 = vrot.lane.b32.xlu0 %v20715_v31, %s16268_s7  ;;  %v12676_v54 = vld [vmem:[%s21720_s13 + $0x8] sm:$0xff] }
 0x987   : > { %v20763_v19 = vpack.c.bf16 %v11729_v41, %v11727_v17  ;;  %v11730_v24 = vmul.f32 %v11714_v34, %v21967_v1  ;;  %11745 = vrot.lane.b32.xlu1 %v20723_v30, %s16268_s7  ;;  %v12675_v34 = vld [vmem:[%s21720_s13] sm:$0xff] }
 0x989   : > { %v20768_v21 = vpack.c.bf16 %v11730_v24, %v11728_v59  ;;  %11987 = vrot.lane.b32.xlu0 %v20715_v31, %s21858_s21 }
 0x98b   : > { %13472 = vmatprep.subr.bf16.mxu1 %v20768_v21  ;;  %11979 = vrot.lane.b32.xlu1 %v20723_v30, %s21858_s21 }
 0x98c   : > { %13473 = vmatpush1.bf16.msra.mxu1 %v20763_v19 }
 0x98d   : > { %13474 = vmatprep.subr.bf16.mxu1 %v20754_v55  ;;  %11911 = vrot.lane.b32.xlu0 %v20715_v31, %s21922_s0 }
 0x98f   : > { %11903 = vrot.lane.b32.xlu1 %v20723_v30, %s21922_s0 }
 0x990   : > { %13475 = vmatpush1.bf16.msra.mxu1 %v20746_v57 }
 0x991   : > { %13476 = vmatprep.subr.bf16.mxu1 %v20723_v30  ;;  %11837 = vrot.lane.b32.xlu0 %v20746_v57, %s16266_s18 }
 0x993   : > { %11829 = vrot.lane.b32.xlu1 %v20754_v55, %s16266_s18 }
 0x994   : > { %13477 = vmatpush1.bf16.msra.mxu1 %v20715_v31 }
 0x995   : > { %13478 = vmatprep.subr.bf16.mxu1 %v20695_v14  ;;  %11759 = vrot.lane.b32.xlu0 %v20746_v57, %s16268_s7 }
 0x997   : > { %11747 = vrot.lane.b32.xlu1 %v20754_v55, %s16268_s7 }
 0x998   : > { %13479 = vmatpush1.bf16.msra.mxu1 %v20682_v35 }
 0x999   : > { %11989 = vrot.lane.b32.xlu0 %v20746_v57, %s21858_s21 }
 0x99b   : > { %11981 = vrot.lane.b32.xlu1 %v20754_v55, %s21858_s21 }
 0x99d   : > { %11913 = vrot.lane.b32.xlu0 %v20746_v57, %s21922_s0 }
 0x99f   : > { %11905 = vrot.lane.b32.xlu1 %v20754_v55, %s21922_s0 }
 0x9a1   : > { %11839 = vrot.lane.b32.xlu0 %v20763_v19, %s16266_s18 }
 0x9a3   : > { %11831 = vrot.lane.b32.xlu1 %v20768_v21, %s16266_s18  ;;  %s14181_s18 = scalar_lea.sflag [#allocation4], %s569_s20 }
 0x9a5   : > { %11761 = vrot.lane.b32.xlu0 %v20763_v19, %s16268_s7 }
 0x9a7   : > { %12409 = vrot.lane.b32.xlu1 %v20763_v19, %s16267_s1 }
 0x9a9   : > { %11991 = vrot.lane.b32.xlu0 %v20763_v19, %s21858_s21 }
 0x9ab   : > { %12057 = vrot.lane.b32.xlu1 %v20754_v55, %s21813_s26 }
 0x9ad   : > { %11915 = vrot.lane.b32.xlu0 %v20763_v19, %s21922_s0 }
 0x9af   : > { %12405 = vrot.lane.b32.xlu1 %v20746_v57, %s16267_s1 }
 0x9b1   : > { %12067 = vrot.lane.b32.xlu0 %v20763_v19, %s21813_s26 }
 0x9b3   : > { %11749 = vrot.lane.b32.xlu1 %v20768_v21, %s16268_s7  ;;  %s21997_s7 = smov %s21996_s30 }
 0x9b5   : > { %12065 = vrot.lane.b32.xlu0 %v20746_v57, %s21813_s26 }
 0x9b7   : > { %12055 = vrot.lane.b32.xlu1 %v20723_v30, %s21813_s26 }
 0x9b9   : > { %12407 = vrot.lane.b32.xlu0 %v20754_v55, %s16267_s1 }
 0x9bb   : > { %12401 = vrot.lane.b32.xlu1 %v20715_v31, %s16267_s1 }
 0x9bd   : > { %12063 = vrot.lane.b32.xlu0 %v20715_v31, %s21813_s26 }
 0x9bf   : > { %12053 = vrot.lane.b32.xlu1 %v20695_v14, %s21813_s26 }
 0x9c1   : > { %12403 = vrot.lane.b32.xlu0 %v20723_v30, %s16267_s1 }
 0x9c3   : > { %11983 = vrot.lane.b32.xlu1 %v20768_v21, %s21858_s21 }
 0x9c5   : > { %12061 = vrot.lane.b32.xlu0 %v20682_v35, %s21813_s26 }
 0x9c7   : > { %12397 = vrot.lane.b32.xlu1 %v20682_v35, %s16267_s1 }
 0x9c9   : > { %12399 = vrot.lane.b32.xlu0 %v20695_v14, %s16267_s1 }
 0x9cb   : > { %12257 = vrot.lane.b32.xlu1 %v20763_v19, %s21869_s25 }
 0x9cd   : > { %12255 = vrot.lane.b32.xlu0 %v20754_v55, %s21869_s25 }
 0x9cf   : > { %12333 = vrot.lane.b32.xlu1 %v20763_v19, %s21868_s5 }
 0x9d1   : > { %12331 = vrot.lane.b32.xlu0 %v20754_v55, %s21868_s5 }
 0x9d3   : > { %11907 = vrot.lane.b32.xlu1 %v20768_v21, %s21922_s0 }
 0x9d5   : > { %12251 = vrot.lane.b32.xlu0 %v20723_v30, %s21869_s25 }
 0x9d7   : > { %12253 = vrot.lane.b32.xlu1 %v20746_v57, %s21869_s25 }
 0x9d9   : > { %12327 = vrot.lane.b32.xlu0 %v20723_v30, %s21868_s5 }
 0x9db   : > { %12329 = vrot.lane.b32.xlu1 %v20746_v57, %s21868_s5 }
 0x9dd   : > { %12247 = vrot.lane.b32.xlu0 %v20695_v14, %s21869_s25 }
 0x9df   : > { %12059 = vrot.lane.b32.xlu1 %v20768_v21, %s21813_s26  ;;  %s16269_s26 = smov 118  }
 0x9e1   : > { %12411 = vrot.lane.b32.xlu0 %v20768_v21, %s16267_s1 }
 0x9e3   : > { %v20871_v6 = vpop.permute.xlu0 %11833  ;;  %12249 = vrot.lane.b32.xlu1 %v20715_v31, %s21869_s25 }
 0x9e5   : > { %12323 = vrot.lane.b32.xlu0 %v20695_v14, %s21868_s5  ;;  %v20877_v3 = vpop.permute.xlu1 %11825 }
 0x9e6   : > { %v11847_v41 = vsel %vm8498_vm9, %v20877_v3, %v20871_v6 }
 0x9e7   : > { %v20879_v62 = vpop.permute.xlu0 %11755  ;;  %12325 = vrot.lane.b32.xlu1 %v20715_v31, %s21868_s5 }
 0x9e9   : > { %12179 = vrot.lane.b32.xlu0 %v20754_v55, %s21814_s24  ;;  %v20885_v51 = vpop.permute.xlu1 %11743 }
 0x9eb   : > { %v20887_v52 = vpop.permute.xlu0 %11985  ;;  %12245 = vrot.lane.b32.xlu1 %v20682_v35, %s21869_s25 }
 0x9ed   : > { %12259 = vrot.lane.b32.xlu0 %v20768_v21, %s21869_s25  ;;  %v20893_v13 = vpop.permute.xlu1 %11977 }
 0x9ef   : > { %v20895_v5 = vpop.permute.xlu0 %11909  ;;  %12321 = vrot.lane.b32.xlu1 %v20682_v35, %s21868_s5 }
 0x9f1   : > { %12335 = vrot.lane.b32.xlu0 %v20768_v21, %s21868_s5  ;;  %v20901_v12 = vpop.permute.xlu1 %11901  ;;  %s16272_s5 = smov [#allocation3]  }
 0x9f2   : > { %s16191_s25 = sshll.u32 %s16272_s5, 4  ;;  %s16192_s25 = int_to_ptr.vmem [resolvable:$false] %s16191_s25 }
 0x9f3   : > { %v20903_v38 = vpop.permute.xlu0 %11835  ;;  %12181 = vrot.lane.b32.xlu1 %v20763_v19, %s21814_s24  ;;  %s16193_s0 = scalar_lea.vmem %s16192_s25, 128  ;;  %p16194_p0 = scmp.lt.s32.totalorder %s14195_s4, %s16192_s25 }
 0x9f5   : > { %12483 = vrot.lane.b32.xlu0 %v20754_v55, %s16269_s26  ;;  %v20909_v56 = vpop.permute.xlu1 %11827  ;;  %v11841_v55 = vsel %vm8498_vm9, %v20871_v6, %v20877_v3  ;;  %v13741_v3 = vld [vmem:[%s21722_s15 + $0x58] sm:$0xff] }
 0x9f6   : > { %v11842_v4 = vsel %vm8498_vm9, %v20903_v38, %v20909_v56  ;;  %v11850_v18 = vsel %vm8498_vm9, %v20909_v56, %v20903_v38  ;;  %v13738_v56 = vld [vmem:[%s21722_s15 + $0x40] sm:$0xff] }
 0x9f7   : > { %v20911_v32 = vpop.permute.xlu0 %11757  ;;  %12485 = vrot.lane.b32.xlu1 %v20763_v19, %s16269_s26  ;;  %v13740_v19 = vld [vmem:[%s21722_s15 + $0x50] sm:$0xff] }
 0x9f9   : > { %12175 = vrot.lane.b32.xlu0 %v20723_v30, %s21814_s24  ;;  %v20917_v40 = vpop.permute.xlu1 %11745 }
 0x9fb   : > { %v20919_v33 = vpop.permute.xlu0 %11987  ;;  %12177 = vrot.lane.b32.xlu1 %v20746_v57, %s21814_s24 }
 0x9fd   : > { %12183 = vrot.lane.b32.xlu0 %v20768_v21, %s21814_s24  ;;  %v20925_v63 = vpop.permute.xlu1 %11979 }
 0x9fe   : > { %v20930_v22 = vsel %vm3137_vm10, %v20925_v63, %v20919_v33 }
 0x9ff   : > { %v11912_v27 = vpop.permute.xlu0 %11911  ;;  %12481 = vrot.lane.b32.xlu1 %v20746_v57, %s16269_s26 }
 0xa01   : > { %12487 = vrot.lane.b32.xlu0 %v20768_v21, %s16269_s26  ;;  %v11904_v46 = vpop.permute.xlu1 %11903 }
 0xa02   : > { %v20940_v28 = vsel %vm5736_vm3, %v11904_v46, %v11912_v27  ;;  %v20943_v60 = vsel %vm5736_vm3, %v11912_v27, %v11904_v46  ;;  %v11765_v46 = vsel %vm11763_vm7, %v20911_v32, %v20917_v40 }
 0xa03   : > { %v11838_v15 = vpop.permute.xlu0 %11837  ;;  %12173 = vrot.lane.b32.xlu1 %v20715_v31, %s21814_s24 }
 0xa05   : > { %12479 = vrot.lane.b32.xlu0 %v20723_v30, %s16269_s26  ;;  %v11830_v47 = vpop.permute.xlu1 %11829 }
 0xa06   : > { %v11843_v61 = vsel %vm8498_vm9, %v11838_v15, %v11830_v47  ;;  %v11853_v16 = vsel %vm8498_vm9, %v11830_v47, %v11838_v15  ;;  %v13739_v15 = vld [vmem:[%s21722_s15 + $0x48] sm:$0xff] }
 0xa07   : > { %v20949_v49 = vpop.permute.xlu0 %11759  ;;  %12477 = vrot.lane.b32.xlu1 %v20715_v31, %s16269_s26 }
 0xa09   : > { %12171 = vrot.lane.b32.xlu0 %v20695_v14, %s21814_s24  ;;  %v20955_v29 = vpop.permute.xlu1 %11747 }
 0xa0a   : > { %v11766_v6 = vsel %vm11763_vm7, %v20949_v49, %v20955_v29  ;;  %v11777_v25 = vsel %vm11763_vm7, %v20955_v29, %v20949_v49  ;;  %v11774_v49 = vsel %vm11763_vm7, %v20917_v40, %v20911_v32  ;;  %v11764_v29 = vsel %vm11763_vm7, %v20879_v62, %v20885_v51  ;;  %v13735_v40 = vld [vmem:[%s21722_s15 + $0x28] sm:$0xff] }
 0xa0b   : > { %v20957_v53 = vpop.permute.xlu0 %11989  ;;  %12169 = vrot.lane.b32.xlu1 %v20682_v35, %s21814_s24  ;;  %v11771_v32 = vsel %vm11763_vm7, %v20885_v51, %v20879_v62  ;;  %v13733_v51 = vld [vmem:[%s21722_s15 + $0x18] sm:$0xff]  ;;  %s21994_s24 = sld [smem:[#allocation9_spill]] }
 0xa0d   : > { %12475 = vrot.lane.b32.xlu0 %v20695_v14, %s16269_s26  ;;  %v20963_v30 = vpop.permute.xlu1 %11981  ;;  %v12684_v14 = vld [vmem:[%s21720_s13 + $0x48] sm:$0xff] }
 0xa0e   : > { %v11995_v62 = vsel %vm3137_vm10, %v20957_v53, %v20963_v30 }
 0xa0f   : > { %v20968_v31 = vpop.permute.xlu0 %11913  ;;  %12473 = vrot.lane.b32.xlu1 %v20682_v35, %s16269_s26  ;;  %v12682_v35 = vld [vmem:[%s21720_s13 + $0x38] sm:$0xff]  ;;  %s16187_s26 = scalar_lea.vmem %s14195_s4, 64 }
 0xa10   : > { %p16188_p11 = scmp.ne.s32.totalorder %s14195_s4, %s16187_s26  ;;  %p16195_p1 = scmp.lt.s32.totalorder %s16193_s0, %s16187_s26 }
 0xa11   : > { %12744 = vperm.xlu0 %15890, %v12686_v37   ;;  %v20975_v9 = vpop.permute.xlu1 %11905  ;;  %v13736_v37 = vld [vmem:[%s21722_s15 + $0x30] sm:$0xff]  ;;  %s15727_s22 = sshll.u32 %s21994_s24, 6 }
 0xa12   : > { %s14192_s21 = scalar_lea.hbm %s21996_s30, %s15727_s22  ;;  %p16189_p12 = pnand %p16188_p11, %p16406_p5 }
 0xa13   : > { %v11840_v0 = vpop.permute.xlu0 %11839  ;;  %12739 = vperm.xlu1 %15891, %v12685_v26   ;;  %p16196_p2 = por %p16195_p1, %p16194_p0 }
 0xa14   : > { %p16190_p13 = pneg %p16189_p12 }
 0xa15   : > { %12734 = vperm.xlu0 %15890, %v12684_v14   ;;  %v11832_v23 = vpop.permute.xlu1 %11831  ;;  %v13737_v14 = vld [vmem:[%s21722_s15 + $0x38] sm:$0xff] }
 0xa16   : > { %v11856_v39 = vsel %vm8498_vm9, %v11832_v23, %v11840_v0  ;;  %v11844_v45 = vsel %vm8498_vm9, %v11840_v0, %v11832_v23  ;;  %p16197_p3 = pnand %p16196_p2, %p16190_p13 }
 0xa17   : > { %v11762_v10 = vpop.permute.xlu0 %11761  ;;  %12729 = vperm.xlu1 %15891, %v12683_v44   ;;  %13379 = vmatprep.subr.bf16.mxu0 %v11844_v45  ;;  %v13734_v44 = vld [vmem:[%s21722_s15 + $0x20] sm:$0xff] }
 0xa18   : > { %13380 = vmatpush1.bf16.msra.mxu0 %v11856_v39  ;;  %v13732_v39 = vld [vmem:[%s21722_s15 + $0x10] sm:$0xff] }
 0xa19   : > { %12724 = vperm.xlu0 %15890, %v12682_v35   ;;  %v20992_v58 = vpop.permute.xlu1 %12409  ;;  %13381 = vmatprep.subr.bf16.mxu0 %v11843_v61 }
 0xa1b   : > { %v20997_v57 = vpop.permute.xlu0 %11991  ;;  %12719 = vperm.xlu1 %15891, %v12681_v36  }
 0xa1c   : > { %13382 = vmatpush1.bf16.msra.mxu0 %v11853_v16  ;;  %v12005_v16 = vsel %vm3137_vm10, %v20963_v30, %v20957_v53  ;;  %v11993_v53 = vsel %vm3137_vm10, %v20887_v52, %v20893_v13 }
 0xa1d   : > { %12714 = vperm.xlu0 %15890, %v12680_v7   ;;  %v21006_v43 = vpop.permute.xlu1 %12057  ;;  %13383 = vmatprep.subr.bf16.mxu0 %v11842_v4  ;;  %v13730_v7 = vld [vmem:[%s21722_s15] sm:$0xff]  ;;  %v11994_v4 = vsel %vm3137_vm10, %v20919_v33, %v20925_v63  ;;  %v11999_v63 = vsel %vm3137_vm10, %v20893_v13, %v20887_v52  ;;  %v11929_v13 = vsel %vm5736_vm3, %v20975_v9, %v20968_v31 }
 0xa1f   : > { %v21011_v42 = vpop.permute.xlu0 %11915  ;;  %12709 = vperm.xlu1 %15891, %v12679_v50   ;;  %v13731_v50 = vld [vmem:[%s21722_s15 + $0x8] sm:$0xff] }
 0xa20   : > { %13384 = vmatpush1.bf16.msra.mxu0 %v11850_v18 }
 0xa21   : > { %12704 = vperm.xlu0 %15890, %v12678_v2   ;;  %v21022_v8 = vpop.permute.xlu1 %12405  ;;  %13385 = vmatprep.subr.bf16.mxu0 %v11841_v55 }
 0xa23   : > { %v21027_v17 = vpop.permute.xlu0 %12067  ;;  %12699 = vperm.xlu1 %15891, %v12677_v11  }
 0xa24   : > { %13386 = vmatpush1.bf16.msra.mxu0 %v11847_v41  ;;  %v11919_v41 = vsel %vm5736_vm3, %v20968_v31, %v20975_v9  ;;  %v16116_v9 = vld [vmem:[%s21719_s12] ss:$24 sps:$4 sm:$0xff]  }
 0xa25   : > { %12694 = vperm.xlu0 %15890, %v12676_v54   ;;  %v11750_v59 = vpop.permute.xlu1 %11749 }
 0xa26   : > { %v11780_v24 = vsel %vm11763_vm7, %v11750_v59, %v11762_v10  ;;  %v11767_v21 = vsel %vm11763_vm7, %v11762_v10, %v11750_v59 }
 0xa27   : > { %v21040_v48 = vpop.permute.xlu0 %12065  ;;  %12689 = vperm.xlu1 %15891, %v12675_v34   ;;  %13387 = vmatprep.subr.bf16.mxu0 %v11767_v21 }
 0xa28   : > { %13388 = vmatpush1.bf16.msra.mxu0 %v11780_v24 }
 0xa29   : > { %13794 = vperm.xlu0 %15890, %v13740_v19   ;;  %v21048_v38 = vpop.permute.xlu1 %12055  ;;  %13389 = vmatprep.subr.bf16.mxu0 %v11766_v6  ;;  %v11917_v19 = vsel %vm5736_vm3, %v20895_v5, %v20901_v12 }
 0xa2b   : > { %v21053_v27 = vpop.permute.xlu0 %12407  ;;  %13799 = vperm.xlu1 %15891, %v13741_v3   ;;  %v12071_v3 = vsel %vm1031_vm5, %v21040_v48, %v21006_v43 }
 0xa2c   : > { %13390 = vmatpush1.bf16.msra.mxu0 %v11777_v25 }
 0xa2d   : > { %13784 = vperm.xlu0 %15890, %v13738_v56   ;;  %v21064_v47 = vpop.permute.xlu1 %12401  ;;  %13391 = vmatprep.subr.bf16.mxu0 %v11765_v46 }
 0xa2f   : > { %v21069_v26 = vpop.permute.xlu0 %12063  ;;  %13789 = vperm.xlu1 %15891, %v13739_v15   ;;  %v12425_v15 = vsel %vm9680_vm6, %v21053_v27, %v21022_v8 }
 0xa30   : > { %13392 = vmatpush1.bf16.msra.mxu0 %v11774_v49  ;;  %v12070_v46 = vsel %vm1031_vm5, %v21069_v26, %v21048_v38 }
 0xa31   : > { %13774 = vperm.xlu0 %15890, %v13736_v37   ;;  %v21080_v0 = vpop.permute.xlu1 %12053  ;;  %13393 = vmatprep.subr.bf16.mxu0 %v11764_v29 }
 0xa33   : > { %v21085_v23 = vpop.permute.xlu0 %12403  ;;  %13779 = vperm.xlu1 %15891, %v13737_v14  }
 0xa34   : > { %13394 = vmatpush1.bf16.msra.mxu0 %v11771_v32  ;;  %v12422_v14 = vsel %vm9680_vm6, %v21085_v23, %v21064_v47 }
 0xa35   : > { %13764 = vperm.xlu0 %15890, %v13734_v44   ;;  %v11984_v35 = vpop.permute.xlu1 %11983 }
 0xa36   : > { %v12008_v45 = vsel %vm3137_vm10, %v11984_v35, %v20997_v57  ;;  %v11996_v10 = vsel %vm3137_vm10, %v20997_v57, %v11984_v35  ;;  %vm14165_vm10 = vcmask 1043456  }
 0xa37   : > { %v21100_v61 = vpop.permute.xlu0 %12061  ;;  %13769 = vperm.xlu1 %15891, %v13735_v40   ;;  %13395 = vmatprep.subr.bf16.mxu0 %v11996_v10 }
 0xa38   : > { %13396 = vmatpush2.bf16.msra.mxu0 %v12008_v45  ;;  %v12069_v29 = vsel %vm1031_vm5, %v21100_v61, %v21080_v0  ;;  %v16122_v45 = vld [vmem:[%s21719_s12 + $0x60] ss:$24 sps:$4 sm:$0xff]  }
 0xa39   : > { %13754 = vperm.xlu0 %15890, %v13732_v39   ;;  %v21108_v36 = vpop.permute.xlu1 %12397  ;;  %13397 = vmatprep.subr.bf16.mxu0 %v11995_v62 }
 0xa3b   : > { %v21113_v57 = vpop.permute.xlu0 %12399  ;;  %13759 = vperm.xlu1 %15891, %v13733_v51   ;;  %v16127_v51 = vld [vmem:[%s21719_s12 + $0x94] ss:$24 sps:$4 sm:$0xff]  }
 0xa3c   : > { %13398 = vmatpush2.bf16.msra.mxu0 %v12005_v16  ;;  %v12419_v40 = vsel %vm9680_vm6, %v21113_v57, %v21108_v36 }
 0xa3d   : > { %13744 = vperm.xlu0 %15890, %v13730_v7   ;;  %v21124_v2 = vpop.permute.xlu1 %12257  ;;  %13399 = vmatprep.subr.bf16.mxu0 %v11994_v4 }
 0xa3f   : > { %v21126_v18 = vpop.permute.xlu0 %12255  ;;  %13749 = vperm.xlu1 %15891, %v13731_v50  }
 0xa40   : > { %13400 = vmatpush2.bf16.msra.mxu0 %v20930_v22 }
 0xa41   : > { %v21132_v30 = vpop.permute.xlu1 %12333  ;;  %13401 = vmatprep.subr.bf16.mxu0 %v11993_v53  ;;  %v16125_v53 = vld [vmem:[%s21719_s12 + $0x90] ss:$24 sps:$4 sm:$0xff]  }
 0xa43   : > { %v21134_v33 = vpop.permute.xlu0 %12331 }
 0xa44   : > { %13402 = vmatpush2.bf16.msra.mxu0 %v11999_v63 }
 0xa45   : > { %v11908_v55 = vpop.permute.xlu1 %11907 }
 0xa46   : > { %v11932_v11 = vsel %vm5736_vm3, %v11908_v55, %v21011_v42  ;;  %v11920_v22 = vsel %vm5736_vm3, %v21011_v42, %v11908_v55 }
 0xa47   : > { %v21143_v54 = vpop.permute.xlu0 %12251  ;;  %13403 = vmatprep.subr.bf16.mxu0 %v11920_v22 }
 0xa48   : > { %13404 = vmatpush2.bf16.msra.mxu0 %v11932_v11  ;;  %v16130_v11 = vld [vmem:[%s21719_s12 + $0xc4] ss:$24 sps:$4 sm:$0xff]  }
 0xa49   : > { %v21148_v34 = vpop.permute.xlu1 %12253  ;;  %13405 = vmatprep.subr.bf16.mxu0 %v11919_v41 }
 0xa4a   : > { %v12273_v10 = vsel %vm3715_vm13, %v21126_v18, %v21148_v34 }
 0xa4b   : > { %v21150_v52 = vpop.permute.xlu0 %12327 }
 0xa4c   : > { %13406 = vmatpush2.bf16.msra.mxu0 %v11929_v13 }
 0xa4d   : > { %v21155_v59 = vpop.permute.xlu1 %12329  ;;  %13407 = vmatprep.subr.bf16.mxu0 %v20943_v60  ;;  %v11923_v60 = vsel %vm5736_vm3, %v20901_v12, %v20895_v5  ;;  %v16121_v5 = vld [vmem:[%s21719_s12 + $0x34] ss:$24 sps:$4 sm:$0xff]   ;;  %v12081_v12 = vsel %vm1031_vm5, %v21006_v43, %v21040_v48  ;;  %v12078_v43 = vsel %vm1031_vm5, %v21048_v38, %v21069_v26  ;;  %v16119_v48 = vld [vmem:[%s21719_s12 + $0x30] ss:$24 sps:$4 sm:$0xff]   ;;  %v16124_v38 = vld [vmem:[%s21719_s12 + $0x64] ss:$24 sps:$4 sm:$0xff]   ;;  %v12075_v26 = vsel %vm1031_vm5, %v21080_v0, %v21100_v61 }
 0xa4e   : > { %v12349_v16 = vsel %vm3871_vm15, %v21134_v33, %v21155_v59 }
 0xa4f   : > { %v21158_v42 = vpop.permute.xlu0 %12247 }
 0xa50   : > { %13408 = vmatpush2.bf16.msra.mxu0 %v20940_v28 }
 0xa51   : > { %v12060_v24 = vpop.permute.xlu1 %12059  ;;  %13409 = vmatprep.subr.bf16.mxu0 %v11917_v19 }
 0xa52   : > { %v12084_v21 = vsel %vm1031_vm5, %v12060_v24, %v21027_v17  ;;  %v12072_v31 = vsel %vm1031_vm5, %v21027_v17, %v12060_v24  ;;  %vm12489_vm5 = vcmask 965632   ;;  %v16128_v24 = vld [vmem:[%s21719_s12 + $0xc0] ss:$24 sps:$4 sm:$0xff]  }
 0xa53   : > { %v12412_v6 = vpop.permute.xlu0 %12411  ;;  %13480 = vmatprep.subr.bf16.mxu1 %v12072_v31 }
 0xa54   : > { %v12428_v28 = vsel %vm9680_vm6, %v12412_v6, %v20992_v58  ;;  %13410 = vmatpush2.bf16.msra.mxu0 %v11923_v60  ;;  %13481 = vmatpush1.bf16.msra.mxu1 %v12084_v21  ;;  %v12416_v25 = vsel %vm9680_vm6, %v20992_v58, %v12412_v6  ;;  %v12415_v58 = vsel %vm9680_vm6, %v21022_v8, %v21053_v27  ;;  %v16133_v60 = vld [vmem:[%s21719_s12 + $0xf4] ss:$24 sps:$4 sm:$0xff]  }
 0xa55   : > { %v21179_v56 = vpop.permute.xlu1 %12249  ;;  %13482 = vmatprep.subr.bf16.mxu1 %v12071_v3  ;;  %13565 = vmatprep.subr.bf16.mxu0 %v12428_v28  ;;  %v12414_v27 = vsel %vm9680_vm6, %v21064_v47, %v21085_v23  ;;  %v12413_v47 = vsel %vm9680_vm6, %v21108_v36, %v21113_v57  ;;  %v12263_v36 = vsel %vm3715_vm13, %v21148_v34, %v21126_v18 }
 0xa56   : > { %v12270_v57 = vsel %vm3715_vm13, %v21143_v54, %v21179_v56  ;;  %v12262_v18 = vsel %vm3715_vm13, %v21179_v56, %v21143_v54 }
 0xa57   : > { %v21181_v17 = vpop.permute.xlu0 %12323  ;;  %13412 = vmatmul.mubr.bf16.vlgmr.msra.gmra.mxu0 %v16116_v9 }
 0xa58   : > { %13483 = vmatpush1.bf16.msra.mxu1 %v12081_v12  ;;  %13566 = vmatpush1.bf16.msra.mxu0 %v12416_v25 }
 0xa59   : > { %v21197_v37 = vpop.permute.xlu1 %12325  ;;  %13484 = vmatprep.subr.bf16.mxu1 %v12070_v46  ;;  %13567 = vmatprep.subr.bf16.mxu0 %v12425_v15  ;;  %v16131_v46 = vld [vmem:[%s21719_s12 + $0xf0] ss:$24 sps:$4 sm:$0xff]  }
 0xa5a   : > { %13421 = vmatprep.mubr.bf16.mxu0 %v16121_v5  ;;  %v12346_v63 = vsel %vm3871_vm15, %v21150_v52, %v21197_v37  ;;  %v12338_v22 = vsel %vm3871_vm15, %v21197_v37, %v21150_v52 }
 0xa5b   : > { %v21199_v49 = vpop.permute.xlu0 %12179 }
 0xa5c   : > { %13485 = vmatpush1.bf16.msra.mxu1 %v12078_v43  ;;  %13568 = vmatpush1.bf16.msra.mxu0 %v12415_v58 }
 0xa5d   : > { %v12246_v44 = vpop.permute.xlu1 %12245  ;;  %13486 = vmatprep.subr.bf16.mxu1 %v12069_v29  ;;  %13569 = vmatprep.subr.bf16.mxu0 %v12422_v14  ;;  %v16134_v29 = vld [vmem:[%s21719_s12 + $0x8] ss:$24 sps:$4 sm:$0xff]   ;;  %v16142_v14 = vld [vmem:[%s21719_s12 + $0x3c] ss:$24 sps:$4 sm:$0xff]  }
 0xa5e   : > { %v12261_v54 = vsel %vm3715_vm13, %v12246_v44, %v21158_v42 }
 0xa5f   : > { %v12260_v8 = vpop.permute.xlu0 %12259  ;;  %13422 = vmatmul.mubr.bf16.gmra.mxu0 %v16119_v48 }
 0xa60   : > { %v12276_v32 = vsel %vm3715_vm13, %v12260_v8, %v21124_v2  ;;  %13487 = vmatpush1.bf16.msra.mxu1 %v12075_v26  ;;  %13570 = vmatpush1.bf16.msra.mxu0 %v12414_v27  ;;  %v12264_v0 = vsel %vm3715_vm13, %v21124_v2, %v12260_v8  ;;  %v12339_v2 = vsel %vm3871_vm15, %v21155_v59, %v21134_v33  ;;  %v16137_v26 = vld [vmem:[%s21719_s12 + $0x10] ss:$24 sps:$4 sm:$0xff]  }
 0xa61   : > { %v12322_v35 = vpop.permute.xlu1 %12321  ;;  %13488 = vmatprep.subr.bf16.mxu1 %v12276_v32  ;;  %13571 = vmatprep.subr.bf16.mxu0 %v12419_v40  ;;  %v16143_v32 = vld [vmem:[%s21719_s12 + $0x44] ss:$24 sps:$4 sm:$0xff]   ;;  %v16140_v40 = vld [vmem:[%s21719_s12 + $0x38] ss:$24 sps:$4 sm:$0xff]  }
 0xa62   : > { %13431 = vmatprep.mubr.bf16.mxu0 %v16124_v38  ;;  %v12343_v34 = vsel %vm3871_vm15, %v21181_v17, %v12322_v35  ;;  %v12337_v52 = vsel %vm3871_vm15, %v12322_v35, %v21181_v17  ;;  %v16148_v35 = vld [vmem:[%s21719_s12 + $0x6c] ss:$24 sps:$4 sm:$0xff]  }
 0xa63   : > { %v12336_v39 = vpop.permute.xlu0 %12335 }
 0xa64   : > { %v12352_v23 = vsel %vm3871_vm15, %v12336_v39, %v21132_v30  ;;  %13489 = vmatpush2.bf16.msra.mxu1 %v12264_v0  ;;  %13572 = vmatpush1.bf16.msra.mxu0 %v12413_v47  ;;  %v12340_v7 = vsel %vm3871_vm15, %v21132_v30, %v12336_v39  ;;  %v12267_v30 = vsel %vm3715_vm13, %v21158_v42, %v12246_v44  ;;  %v16145_v39 = vld [vmem:[%s21719_s12 + $0x40] ss:$24 sps:$4 sm:$0xff]   ;;  %v16149_v47 = vld [vmem:[%s21719_s12 + $0x74] ss:$24 sps:$4 sm:$0xff]  }
 0xa65   : > { %v12182_v61 = vpop.permute.xlu1 %12181  ;;  %13490 = vmatprep.subr.bf16.mxu1 %v12273_v10  ;;  %13573 = vmatprep.subr.bf16.mxu0 %v12352_v23  ;;  %v16146_v0 = vld [vmem:[%s21719_s12 + $0x68] ss:$24 sps:$4 sm:$0xff]   ;;  %v16154_v23 = vld [vmem:[%s21719_s12 + $0x9c] ss:$24 sps:$4 sm:$0xff]  }
 0xa66   : > { %v16155_v10 = vld [vmem:[%s21719_s12 + $0xa4] ss:$24 sps:$4 sm:$0xff]  }
 0xa67   : > { %v21243_v62 = vpop.permute.xlu0 %12483  ;;  %13432 = vmatmul.mubr.bf16.gmra.mxu0 %v16122_v45  ;;  %v16151_v45 = vld [vmem:[%s21719_s12 + $0x70] ss:$24 sps:$4 sm:$0xff]  }
 0xa68   : > { %13491 = vmatpush2.bf16.msra.mxu1 %v12263_v36  ;;  %13574 = vmatpush1.bf16.msra.mxu0 %v12340_v7  ;;  %v16161_v36 = vld [vmem:[%s21719_s12 + $0xd4] ss:$24 sps:$4 sm:$0xff]   ;;  %v16158_v7 = vld [vmem:[%s21719_s12 + $0xc8] ss:$24 sps:$4 sm:$0xff]  }
 0xa69   : > { %v12486_v4 = vpop.permute.xlu1 %12485  ;;  %13492 = vmatprep.subr.bf16.mxu1 %v12270_v57  ;;  %13575 = vmatprep.subr.bf16.mxu0 %v12349_v16  ;;  %v16166_v57 = vld [vmem:[%s21719_s12 + $0xfc] ss:$24 sps:$4 sm:$0xff]   ;;  %v16163_v16 = vld [vmem:[%s21719_s12 + $0xd0] ss:$24 sps:$4 sm:$0xff]  }
 0xa6a   : > { %13441 = vmatprep.mubr.bf16.mxu0 %v16127_v51  ;;  %v16157_v51 = vld [vmem:[%s21719_s12 + $0xa0] ss:$24 sps:$4 sm:$0xff]  }
 0xa6b   : > { %v12176_v50 = vpop.permute.xlu0 %12175 }
 0xa6c   : > { %13493 = vmatpush2.bf16.msra.mxu1 %v12262_v18  ;;  %13576 = vmatpush1.bf16.msra.mxu0 %v12339_v2  ;;  %v16169_v2 = vld [vmem:[%s21719_s12 + $0x100] ss:$24 sps:$4 sm:$0xff]   ;;  %v21993_v18 = vmov 0  }
 0xa6d   : > { %v12178_v55 = vpop.permute.xlu1 %12177  ;;  %13494 = vmatprep.subr.bf16.mxu1 %v12267_v30  ;;  %13577 = vmatprep.subr.bf16.mxu0 %v12346_v63 }
 0xa6e   : > { %v12197_v21 = vsel %vm1707_vm8, %v21199_v49, %v12178_v55  ;;  %v12187_v28 = vsel %vm1707_vm8, %v12178_v55, %v21199_v49  ;;  %v16139_v49 = vld [vmem:[%s21719_s12 + $0x14] ss:$24 sps:$4 sm:$0xff]  }
 0xa6f   : > { %v12184_v33 = vpop.permute.xlu0 %12183  ;;  %13442 = vmatmul.mubr.bf16.gmra.mxu0 %v16125_v53 }
 0xa70   : > { %v12200_v41 = vsel %vm1707_vm8, %v12184_v33, %v12182_v61  ;;  %13495 = vmatpush2.bf16.msra.mxu1 %v12261_v54  ;;  %13578 = vmatpush1.bf16.msra.mxu0 %v12338_v22  ;;  %v12188_v19 = vsel %vm1707_vm8, %v12182_v61, %v12184_v33  ;;  %v16152_v61 = vld [vmem:[%s21719_s12 + $0x98] ss:$24 sps:$4 sm:$0xff]  }
 0xa71   : > { %v12482_v13 = vpop.permute.xlu1 %12481  ;;  %13496 = vmatprep.subr.bf16.mxu1 %v12200_v41  ;;  %13579 = vmatprep.subr.bf16.mxu0 %v12343_v34 }
 0xa72   : > { %13451 = vmatprep.mubr.bf16.mxu0 %v16130_v11  ;;  %v12503_v56 = vsel %vm12489_vm5, %v21243_v62, %v12482_v13  ;;  %v12492_v5 = vsel %vm12489_vm5, %v12482_v13, %v21243_v62  ;;  %v16160_v62 = vld [vmem:[%s21719_s12 + $0xcc] ss:$24 sps:$4 sm:$0xff]  }
 0xa73   : > { %v12488_v59 = vpop.permute.xlu0 %12487 }
 0xa74   : > { %v12506_v42 = vsel %vm12489_vm5, %v12488_v59, %v12486_v4  ;;  %13497 = vmatpush2.bf16.msra.mxu1 %v12188_v19  ;;  %13580 = vmatpush1.bf16.msra.mxu0 %v12337_v52  ;;  %v12493_v9 = vsel %vm12489_vm5, %v12486_v4, %v12488_v59  ;;  %v16167_v4 = vld [vmem:[%s21719_s12 + $0x104] ss:$24 sps:$4 sm:$0xff]  }
 0xa75   : > { %v12174_v6 = vpop.permute.xlu1 %12173  ;;  %13498 = vmatprep.subr.bf16.mxu1 %v12197_v21  ;;  %13589 = vmatprep.subr.bf16.mxu0 %v12506_v42 }
 0xa76   : > { %v12194_v3 = vsel %vm1707_vm8, %v12176_v50, %v12174_v6  ;;  %v12186_v12 = vsel %vm1707_vm8, %v12174_v6, %v12176_v50  ;;  %v16164_v50 = vld [vmem:[%s21719_s12 + $0xf8] ss:$24 sps:$4 sm:$0xff]  }
 0xa77   : > { %v12480_v31 = vpop.permute.xlu0 %12479  ;;  %13452 = vmatmul.mubr.bf16.gmra.mxu0 %v16128_v24 }
 0xa78   : > { %13499 = vmatpush2.bf16.msra.mxu1 %v12187_v28  ;;  %13590 = vmatpush2.bf16.msra.mxu0 %v12493_v9 }
 0xa79   : > { %v12478_v17 = vpop.permute.xlu1 %12477  ;;  %13500 = vmatprep.subr.bf16.mxu1 %v12194_v3  ;;  %13591 = vmatprep.subr.bf16.mxu0 %v12503_v56 }
 0xa7a   : > { %13461 = vmatprep.mubr.bf16.mxu0 %v16133_v60  ;;  %v12500_v15 = vsel %vm12489_vm5, %v12480_v31, %v12478_v17  ;;  %v12491_v48 = vsel %vm12489_vm5, %v12478_v17, %v12480_v31 }
 0xa7b   : > { %v12172_v25 = vpop.permute.xlu0 %12171 }
 0xa7c   : > { %13501 = vmatpush2.bf16.msra.mxu1 %v12186_v12  ;;  %13592 = vmatpush2.bf16.msra.mxu0 %v12492_v5 }
 0xa7d   : > { %v12170_v37 = vpop.permute.xlu1 %12169  ;;  %13593 = vmatprep.subr.bf16.mxu0 %v12500_v15 }
 0xa7e   : > { %v12185_v58 = vsel %vm1707_vm8, %v12170_v37, %v12172_v25  ;;  %v12191_v43 = vsel %vm1707_vm8, %v12172_v25, %v12170_v37  ;;  %vm16271_vm8 = vmmov 0  }
 0xa7f   : > { %13462 = vmatmul.mubr.bf16.gmra.mxu0 %v16131_v46  ;;  %13502 = vmatprep.subr.bf16.mxu1 %v12191_v43  ;;  %v12476_v44 = vpop.permute.xlu0 %12475 }
 0xa80   : > { %13503 = vmatpush2.bf16.msra.mxu1 %v12185_v58  ;;  %13594 = vmatpush2.bf16.msra.mxu0 %v12491_v48 }
 0xa81   : > { %v12474_v8 = vpop.permute.xlu1 %12473  ;;  %15700 = vmatprep.mubr.msk.bf16.mxu0 %vm858_vm2, %v16139_v49 }
 0xa82   : > { %v12490_v38 = vsel %vm12489_vm5, %v12474_v8, %v12476_v44  ;;  %v12497_v27 = vsel %vm12489_vm5, %v12476_v44, %v12474_v8 }
 0xa83   : > { %13505 = vmatmul.mubr.bf16.vlgmr.msra.gmra.mxu1 %v16134_v29  ;;  %13595 = vmatprep.subr.bf16.mxu0 %v12497_v27 }
 0xa84   : > { %13596 = vmatpush2.bf16.msra.mxu0 %v12490_v38  ;;  %13514 = vmatprep.mubr.bf16.mxu1 %v16142_v14 }
 0xa87   : > { %13598 = vmatmul.mubr.bf16.vlgmr.msra.gmra.mxu0 %v16137_v26 }
 0xa88   : > { %15701 = vmatprep.mubr.msk.bf16.mxu0 %vm858_vm2, %v16143_v32 }
 0xa8b   : > { %13515 = vmatmul.mubr.bf16.gmra.mxu1 %v16140_v40 }
 0xa8c   : > { %13524 = vmatprep.mubr.bf16.mxu1 %v16148_v35  ;;  %v21396_v13 = vpop.permute.xlu0 %12744 }
 0xa8e   : > { %v21390_v22 = vpop.permute.xlu1 %12739 }
 0xa8f   : > { %13608 = vmatmul.mubr.bf16.gmra.mxu0 %v16145_v39 }
 0xa90   : > { %15702 = vmatprep.mubr.msk.bf16.mxu0 %vm858_vm2, %v16149_v47  ;;  %v21406_v24 = vpop.permute.xlu0 %12734 }
 0xa92   : > { %v21398_v59 = vpop.permute.xlu1 %12729 }
 0xa93   : > { %13525 = vmatmul.mubr.bf16.gmra.mxu1 %v16146_v0 }
 0xa94   : > { %13534 = vmatprep.mubr.bf16.mxu1 %v16154_v23  ;;  %v21416_v28 = vpop.permute.xlu0 %12724 }
 0xa96   : > { %v21408_v21 = vpop.permute.xlu1 %12719 }
 0xa97   : > { %13618 = vmatmul.mubr.bf16.gmra.mxu0 %v16151_v45 }
 0xa98   : > { %15703 = vmatprep.mubr.msk.bf16.mxu0 %vm858_vm2, %v16155_v10  ;;  %v21426_v5 = vpop.permute.xlu0 %12714 }
 0xa9a   : > { %v21418_v9 = vpop.permute.xlu1 %12709 }
 0xa9b   : > { %13535 = vmatmul.mubr.bf16.gmra.mxu1 %v16152_v61 }
 0xa9c   : > { %13544 = vmatprep.mubr.bf16.mxu1 %v16160_v62  ;;  %v12705_v37 = vpop.permute.xlu0 %12704 }
 0xa9e   : > { %v12700_v12 = vpop.permute.xlu1 %12699 }
 0xa9f   : > { %13628 = vmatmul.mubr.bf16.gmra.mxu0 %v16157_v51 }
 0xaa0   : > { %15704 = vmatprep.mubr.msk.bf16.mxu0 %vm858_vm2, %v16161_v36  ;;  %v12695_v38 = vpop.permute.xlu0 %12694 }
 0xaa2   : > { %v12690_v49 = vpop.permute.xlu1 %12689 }
 0xaa3   : > { %13545 = vmatmul.mubr.bf16.gmra.mxu1 %v16158_v7 }
 0xaa4   : > { %13554 = vmatprep.mubr.bf16.mxu1 %v16166_v57 }
 0xaa7   : > { %13638 = vmatmul.mubr.bf16.gmra.mxu0 %v16163_v16 }
 0xaa8   : > { %15705 = vmatprep.mubr.msk.bf16.mxu0 %vm858_vm2, %v16167_v4  ;;  %vm13832_vm2 = vcmask 785408  }
 0xaab   : > { %13555 = vmatmul.mubr.bf16.gmra.mxu1 %v16164_v50 }
 0xaac   : > { %13883 = vmatprep.mubr.bf16.mxu1 %v21993_v18 }
 0xaaf   : > { %13648 = vmatmul.mubr.bf16.gmra.mxu0 %v16169_v2 }
 0xb17   : > { %v13413_v53 = vpop.f32.mrf.mxu0 }
 0xb18   : > { %v13414_v43 = vadd.f32 %v13413_v53, %v12690_v49 }
 0xb19   : > { %v13415_v30 = vpop.f32.mrf.mxu0 }
 0xb1a   : > { %v13416_v27 = vadd.f32 %v13415_v30, %v12690_v49 }
 0xb1b   : > { %v13417_v63 = vpop.f32.mrf.mxu0 }
 0xb1c   : > { %v13418_v40 = vadd.f32 %v13417_v63, %v12695_v38 }
 0xb1d   : > { %v13419_v55 = vpop.f32.mrf.mxu0 }
 0xb1e   : > { %v13420_v23 = vadd.f32 %v13419_v55, %v12695_v38 }
 0xb1f   : > { %v13423_v33 = vpop.f32.mrf.mxu0 }
 0xb20   : > { %v13424_v51 = vadd.f32 %v13423_v33, %v12700_v12 }
 0xb21   : > { %v13425_v11 = vpop.f32.mrf.mxu0 }
 0xb22   : > { %v13426_v63 = vadd.f32 %v13425_v11, %v12700_v12 }
 0xb23   : > { %v13427_v54 = vpop.f32.mrf.mxu0 }
 0xb24   : > { %v13428_v49 = vadd.f32 %v13427_v54, %v12705_v37 }
 0xb25   : > { %v21392_v41 = vpop.f32.mrf.mxu0 }
 0xb26   : > { %v13430_v38 = vadd.f32 %v21392_v41, %v12705_v37 }
 0xb27   : > { %v21394_v34 = vpop.f32.mrf.mxu0 }
 0xb29   : > { %v21400_v52 = vpop.f32.mrf.mxu0 }
 0xb2b   : > { %v21402_v19 = vpop.f32.mrf.mxu0 }
 0xb2d   : > { %v21404_v42 = vpop.f32.mrf.mxu0 }
 0xb2f   : > { %v21410_v6 = vpop.f32.mrf.mxu0 }
 0xb31   : > { %v21412_v31 = vpop.f32.mrf.mxu0 }
 0xb33   : > { %v21414_v60 = vpop.f32.mrf.mxu0 }
 0xb35   : > { %v21420_v3 = vpop.f32.mrf.mxu0 }
 0xb37   : > { %v21422_v56 = vpop.f32.mrf.mxu0 }
 0xb39   : > { %v21424_v17 = vpop.f32.mrf.mxu0 }
 0xb3b   : > { %v21428_v25 = vpop.f32.mrf.mxu0 }
 0xb3d   : > { %v21430_v46 = vpop.f32.mrf.mxu0 }
 0xb3f   : > { %v21432_v15 = vpop.f32.mrf.mxu0 }
 0xb41   : > { %v21434_v58 = vpop.f32.mrf.mxu0 }
 0xb43   : > { %v21436_v48 = vpop.f32.mrf.mxu0  ;;  %v13506_v29 = vpop.f32.mrf.mxu1 }
 0xb44   : > { %v13507_v14 = vadd.f32 %v13506_v29, %v13414_v43 }
 0xb45   : > { %v21438_v44 = vpop.f32.mrf.mxu0  ;;  %v13508_v8 = vpop.f32.mrf.mxu1 }
 0xb46   : > { %v13509_v35 = vadd.f32 %v13508_v8, %v13416_v27 }
 0xb47   : > { %v13510_v26 = vpop.f32.mrf.mxu1  ;;  %v13599_v32 = vpop.f32.mrf.mxu0 }
 0xb48   : > { %v13600_v39 = vadd.f32 %v13599_v32, %v13507_v14  ;;  %v13511_v45 = vadd.f32 %v13510_v26, %v13418_v40 }
 0xb49   : > { %v13512_v47 = vpop.f32.mrf.mxu1  ;;  %v13601_v0 = vpop.f32.mrf.mxu0 }
 0xb4a   : > { %v13602_v10 = vadd.f32 %v13601_v0, %v13509_v35  ;;  %v13658_v36 = vmax.f32 %v13600_v39, 0.0  ;;  %v13513_v7 = vadd.f32 %v13512_v47, %v13420_v23  ;;  %v13434_v35 = vadd.f32 %v21394_v34, %v21418_v9 }
 0xb4b   : > { %v13516_v61 = vpop.f32.mrf.mxu1  ;;  %v13603_v62 = vpop.f32.mrf.mxu0  ;;  %v13438_v34 = vadd.f32 %v21402_v19, %v21426_v5 }
 0xb4c   : > { %v13604_v57 = vadd.f32 %v13603_v62, %v13511_v45  ;;  %v13659_v50 = vmax.f32 %v13602_v10, 0.0  ;;  %v13517_v2 = vadd.f32 %v13516_v61, %v13424_v51  ;;  %v21441_v55 = vmul.f32 %v13658_v36, %v21966_v20 }
 0xb4d   : > { %v13518_v16 = vpop.f32.mrf.mxu1  ;;  %v13605_v4 = vpop.f32.mrf.mxu0 }
 0xb4e   : > { %v13660_v53 = vmax.f32 %v13604_v57, 0.0  ;;  %v13606_v30 = vadd.f32 %v13605_v4, %v13513_v7  ;;  %v13519_v27 = vadd.f32 %v13518_v16, %v13426_v63  ;;  %v21448_v40 = vmul.f32 %v13659_v50, %v21967_v1 }
 0xb4f   : > { %v13520_v43 = vpop.f32.mrf.mxu1  ;;  %v13609_v29 = vpop.f32.mrf.mxu0  ;;  %v13436_v57 = vadd.f32 %v21400_v52, %v21418_v9  ;;  %v13440_v63 = vadd.f32 %v21404_v42, %v21426_v5 }
 0xb50   : > { %v21444_v14 = vmul.f32 %v13660_v53, %v21966_v20  ;;  %v13661_v33 = vmax.f32 %v13606_v30, 0.0  ;;  %v13610_v8 = vadd.f32 %v13609_v29, %v13517_v2  ;;  %v13521_v12 = vadd.f32 %v13520_v43, %v13428_v49 }
 0xb51   : > { %v13522_v26 = vpop.f32.mrf.mxu1  ;;  %v13611_v32 = vpop.f32.mrf.mxu0 }
 0xb52   : > { %v13706_v11 = vpack.c.bf16 %v21444_v14, %v21441_v55  ;;  %v21453_v54 = vmul.f32 %v13661_v33, %v21967_v1  ;;  %v13612_v39 = vadd.f32 %v13611_v32, %v13519_v27  ;;  %v13662_v41 = vmax.f32 %v13610_v8, 0.0  ;;  %v16173_v55 = vld [vmem:[%s21721_s14 + $0x18] sm:$0xff]   ;;  %v16174_v14 = vld [vmem:[%s21721_s14 + $0x20] sm:$0xff]  }
 0xb53   : > { %v13526_v47 = vpop.f32.mrf.mxu1  ;;  %v13613_v0 = vpop.f32.mrf.mxu0  ;;  %v13523_v37 = vadd.f32 %v13522_v26, %v13430_v38  ;;  %v13444_v8 = vadd.f32 %v21410_v6, %v21408_v21  ;;  %v13448_v6 = vadd.f32 %v21414_v60, %v21416_v28 }
 0xb54   : > { %v13614_v23 = vadd.f32 %v13613_v0, %v13521_v12  ;;  %v13707_v45 = vpack.c.bf16 %v21453_v54, %v21448_v40  ;;  %v13663_v62 = vmax.f32 %v13612_v39, 0.0  ;;  %v13527_v51 = vadd.f32 %v13526_v47, %v13434_v35  ;;  %v16172_v40 = vld [vmem:[%s21721_s14 + $0x10] sm:$0xff]   ;;  %v21589_v54 = vld [vmem:[%s21710_s3] sm:$0xff] }
 0xb55   : > { %v13528_v10 = vpop.f32.mrf.mxu1  ;;  %v13615_v61 = vpop.f32.mrf.mxu0  ;;  %v21464_v50 = vmul.f32 %v13662_v41, %v21966_v20 }
 0xb56   : > { %v13664_v36 = vmax.f32 %v13614_v23, 0.0  ;;  %v13616_v7 = vadd.f32 %v13615_v61, %v13523_v37  ;;  %v13529_v49 = vadd.f32 %v13528_v10, %v13436_v57  ;;  %v21472_v52 = vmul.f32 %v13663_v62, %v21967_v1 }
 0xb57   : > { %v13530_v16 = vpop.f32.mrf.mxu1  ;;  %v13619_v4 = vpop.f32.mrf.mxu0  ;;  %v13446_v23 = vadd.f32 %v21412_v31, %v21408_v21  ;;  %v13450_v57 = vadd.f32 %v21420_v3, %v21416_v28 }
 0xb58   : > { %v21467_v2 = vmul.f32 %v13664_v36, %v21966_v20  ;;  %v13665_v53 = vmax.f32 %v13616_v7, 0.0  ;;  %v13620_v30 = vadd.f32 %v13619_v4, %v13527_v51  ;;  %v13531_v33 = vadd.f32 %v13530_v16, %v13438_v34 }
 0xb59   : > { %v13532_v43 = vpop.f32.mrf.mxu1  ;;  %v13621_v29 = vpop.f32.mrf.mxu0 }
 0xb5a   : > { %v13708_v19 = vpack.c.bf16 %v21467_v2, %v21464_v50  ;;  %v21477_v9 = vmul.f32 %v13665_v53, %v21967_v1  ;;  %v13622_v38 = vadd.f32 %v13621_v29, %v13529_v49  ;;  %v13666_v42 = vmax.f32 %v13620_v30, 0.0  ;;  %v16171_v50 = vld [vmem:[%s21721_s14 + $0x8] sm:$0xff]  }
 0xb5b   : > { %v13536_v27 = vpop.f32.mrf.mxu1  ;;  %v13623_v26 = vpop.f32.mrf.mxu0  ;;  %v13533_v5 = vadd.f32 %v13532_v43, %v13440_v63 }
 0xb5c   : > { %v13624_v32 = vadd.f32 %v13623_v26, %v13531_v33  ;;  %v13709_v12 = vpack.c.bf16 %v21477_v9, %v21472_v52  ;;  %v13667_v47 = vmax.f32 %v13622_v38, 0.0  ;;  %v13537_v0 = vadd.f32 %v13536_v27, %v13444_v8 }
 0xb5d   : > { %v13538_v35 = vpop.f32.mrf.mxu1  ;;  %v13625_v39 = vpop.f32.mrf.mxu0  ;;  %v21488_v62 = vmul.f32 %v13666_v42, %v21966_v20 }
 0xb5e   : > { %v13668_v41 = vmax.f32 %v13624_v32, 0.0  ;;  %v13626_v37 = vadd.f32 %v13625_v39, %v13533_v5  ;;  %v13539_v34 = vadd.f32 %v13538_v35, %v13446_v23  ;;  %v21496_v21 = vmul.f32 %v13667_v47, %v21967_v1 }
 0xb5f   : > { %v13540_v10 = vpop.f32.mrf.mxu1  ;;  %v13629_v61 = vpop.f32.mrf.mxu0 }
 0xb60   : > { %v21491_v51 = vmul.f32 %v13668_v41, %v21966_v20  ;;  %v13669_v36 = vmax.f32 %v13626_v37, 0.0  ;;  %v13630_v7 = vadd.f32 %v13629_v61, %v13537_v0  ;;  %v13541_v53 = vadd.f32 %v13540_v10, %v13448_v6 }
 0xb61   : > { %v13542_v16 = vpop.f32.mrf.mxu1  ;;  %v13631_v4 = vpop.f32.mrf.mxu0 }
 0xb62   : > { %v13710_v31 = vpack.c.bf16 %v21491_v51, %v21488_v62  ;;  %v21501_v60 = vmul.f32 %v13669_v36, %v21967_v1  ;;  %v13632_v30 = vadd.f32 %v13631_v4, %v13539_v34  ;;  %v13670_v43 = vmax.f32 %v13630_v7, 0.0 }
 0xb63   : > { %v13546_v63 = vpop.f32.mrf.mxu1  ;;  %v13633_v49 = vpop.f32.mrf.mxu0  ;;  %v13543_v29 = vadd.f32 %v13542_v16, %v13450_v57  ;;  %v13460_v57 = vadd.f32 %v21430_v46, %v21406_v24  ;;  %v13464_v34 = vadd.f32 %v21432_v15, %v21390_v22  ;;  %v13466_v16 = vadd.f32 %v21434_v58, %v21390_v22 }
 0xb64   : > { %v13634_v33 = vadd.f32 %v13633_v49, %v13541_v53  ;;  %v13711_v28 = vpack.c.bf16 %v21501_v60, %v21496_v21  ;;  %v13671_v38 = vmax.f32 %v13632_v30, 0.0  ;;  %v21506_v32 = vmul.f32 %v13670_v43, %v21966_v20  ;;  %v16170_v21 = vld [vmem:[%s21721_s14] sm:$0xff]  }
 0xb65   : > { %v13548_v3 = vpop.f32.mrf.mxu1  ;;  %v13635_v8 = vpop.f32.mrf.mxu0  ;;  %v13456_v30 = vadd.f32 %v21424_v17, %v21398_v59  ;;  %v13468_v49 = vadd.f32 %v21436_v48, %v21396_v13  ;;  %v13470_v15 = vadd.f32 %v21438_v44, %v21396_v13  ;;  %v13454_v17 = vadd.f32 %v21422_v56, %v21398_v59 }
 0xb66   : > { %v13672_v27 = vmax.f32 %v13634_v33, 0.0  ;;  %v13636_v26 = vadd.f32 %v13635_v8, %v13543_v29  ;;  %v13695_v41 = vmul.f32 %v13671_v38, %v21967_v1  ;;  %v13458_v29 = vadd.f32 %v21428_v25, %v21406_v24 }
 0xb67   : > { %v13550_v42 = vpop.f32.mrf.mxu1  ;;  %v13639_v5 = vpop.f32.mrf.mxu0  ;;  %v13549_v22 = vadd.f32 %v13548_v3, %v13456_v30  ;;  %v13547_v25 = vadd.f32 %v13546_v63, %v13454_v17 }
 0xb68   : > { %v21509_v35 = vmul.f32 %v13672_v27, %v21966_v20  ;;  %v13673_v39 = vmax.f32 %v13636_v26, 0.0  ;;  %v13551_v26 = vadd.f32 %v13550_v42, %v13458_v29  ;;  %v13800_v17 = vpop.permute.xlu1 %13799 }
 0xb69   : > { %v13552_v47 = vpop.f32.mrf.mxu1  ;;  %v13641_v0 = vpop.f32.mrf.mxu0  ;;  %v13640_v44 = vadd.f32 %v13639_v5, %v13547_v25 }
 0xb6a   : > { %v13712_v37 = vpack.c.bf16 %v21509_v35, %v21506_v32  ;;  %v13697_v23 = vmul.f32 %v13673_v39, %v21967_v1  ;;  %v13553_v43 = vadd.f32 %v13552_v47, %v13460_v57  ;;  %v13642_v39 = vadd.f32 %v13641_v0, %v13549_v22 }
 0xb6b   : > { %v13556_v6 = vpop.f32.mrf.mxu1  ;;  %v13643_v10 = vpop.f32.mrf.mxu0  ;;  %v13674_v63 = vmax.f32 %v13640_v44, 0.0 }
 0xb6c   : > { %v13713_v61 = vpack.c.bf16 %v13697_v23, %v13695_v41  ;;  %v13557_v33 = vadd.f32 %v13556_v6, %v13464_v34  ;;  %v13644_v41 = vadd.f32 %v13643_v10, %v13551_v26  ;;  %v13790_v25 = vpop.permute.xlu1 %13789 }
 0xb6d   : > { %v13558_v36 = vpop.f32.mrf.mxu1  ;;  %v13645_v7 = vpop.f32.mrf.mxu0 }
 0xb6e   : > { %v13559_v46 = vadd.f32 %v13558_v36, %v13466_v16  ;;  %v13646_v58 = vadd.f32 %v13645_v7, %v13553_v43  ;;  %v13675_v7 = vmax.f32 %v13642_v39, 0.0  ;;  %v13676_v16 = vmax.f32 %v13644_v41, 0.0 }
 0xb6f   : > { %v13560_v4 = vpop.f32.mrf.mxu1  ;;  %v13649_v53 = vpop.f32.mrf.mxu0  ;;  %v13698_v43 = vmul.f32 %v13674_v63, %v21966_v20 }
 0xb70   : > { %v13561_v27 = vadd.f32 %v13560_v4, %v13468_v49  ;;  %v13650_v32 = vadd.f32 %v13649_v53, %v13557_v33  ;;  %v13677_v6 = vmax.f32 %v13646_v58, 0.0  ;;  %v13699_v4 = vmul.f32 %v13675_v7, %v21967_v1 }
 0xb71   : > { %v13562_v8 = vpop.f32.mrf.mxu1  ;;  %v13651_v38 = vpop.f32.mrf.mxu0  ;;  %v13700_v5 = vmul.f32 %v13676_v16, %v21966_v20 }
 0xb72   : > { %v13652_v48 = vadd.f32 %v13651_v38, %v13559_v46  ;;  %v13563_v47 = vadd.f32 %v13562_v8, %v13470_v15  ;;  %v13678_v3 = vmax.f32 %v13650_v32, 0.0  ;;  %v13701_v56 = vmul.f32 %v13677_v6, %v21967_v1  ;;  %v13795_v32 = vpop.permute.xlu0 %13794 }
 0xb73   : > { %v13653_v35 = vpop.f32.mrf.mxu0  ;;  %v13714_v29 = vpack.c.bf16 %v13700_v5, %v13698_v43 }
 0xb74   : > { %v13654_v24 = vadd.f32 %v13653_v35, %v13561_v27  ;;  %v13679_v36 = vmax.f32 %v13652_v48, 0.0  ;;  %v13702_v10 = vmul.f32 %v13678_v3, %v21966_v20  ;;  %v13715_v49 = vpack.c.bf16 %v13701_v56, %v13699_v4 }
 0xb75   : > { %v13655_v23 = vpop.f32.mrf.mxu0 }
 0xb76   : > { %v13680_v57 = vmax.f32 %v13654_v24, 0.0  ;;  %v13656_v13 = vadd.f32 %v13655_v23, %v13563_v47  ;;  %v13703_v42 = vmul.f32 %v13679_v36, %v21967_v1  ;;  %v13785_v44 = vpop.permute.xlu0 %13784 }
 0xb78   : > { %v13681_v34 = vmax.f32 %v13656_v13, 0.0  ;;  %v13704_v59 = vmul.f32 %v13680_v57, %v21966_v20 }
 0xb7a   : > { %v13705_v0 = vmul.f32 %v13681_v34, %v21967_v1  ;;  %v13716_v30 = vpack.c.bf16 %v13704_v59, %v13702_v10 }
 0xb7c   : > { %v13717_v53 = vpack.c.bf16 %v13705_v0, %v13703_v42  ;;  %v13780_v42 = vpop.permute.xlu1 %13779 }
 0xb7e   : > { %13855 = vmatprep.subr.bf16.mxu1 %v13717_v53 }
 0xb7f   : > { %13856 = vmatpush1.bf16.msra.mxu1 %v13716_v30  ;;  %v13775_v30 = vpop.permute.xlu0 %13774 }
 0xb80   : > { %13857 = vmatprep.subr.bf16.mxu1 %v13715_v49 }
 0xb83   : > { %13858 = vmatpush1.bf16.msra.mxu1 %v13714_v29 }
 0xb84   : > { %13859 = vmatprep.subr.bf16.mxu1 %v13713_v61 }
 0xb87   : > { %13860 = vmatpush1.bf16.msra.mxu1 %v13712_v37 }
 0xb88   : > { %13861 = vmatprep.subr.bf16.mxu1 %v13711_v28 }
 0xb8b   : > { %13862 = vmatpush1.bf16.msra.mxu1 %v13710_v31 }
 0xb8c   : > { %13863 = vmatprep.subr.bf16.mxu1 %v13709_v12 }
 0xb8f   : > { %13864 = vmatpush1.bf16.msra.mxu1 %v13708_v19 }
 0xb90   : > { %13865 = vmatprep.subr.bf16.mxu1 %v13707_v45  ;;  %v13994_v45 = vcombine.high %v21589_v54, %v21589_v54 }
 0xb92   : > { %14060 = vmatprep.mubr.f32.mxu0 %v13994_v45 }
 0xb93   : > { %13866 = vmatpush1.bf16.msra.mxu1 %v13706_v11  ;;  %v16175_v11 = vld [vmem:[%s21721_s14 + $0x28] sm:$0xff]  }
 0xb96   : > { %15712 = vmatmul.mubr.msk.bf16.vlgmr.msra.gmra.mxu1 %vm13832_vm2, %v16170_v21 }
 0xb97   : > { %13893 = vmatprep.mubr.bf16.mxu1 %v21993_v18 }
 0xb9e   : > { %15713 = vmatmul.mubr.msk.bf16.gmra.mxu1 %vm13832_vm2, %v16171_v50 }
 0xb9f   : > { %13903 = vmatprep.mubr.bf16.mxu1 %v21993_v18 }
 0xba6   : > { %15714 = vmatmul.mubr.msk.bf16.gmra.mxu1 %vm13832_vm2, %v16172_v40 }
 0xba7   : > { %13913 = vmatprep.mubr.bf16.mxu1 %v21993_v18 }
 0xbae   : > { %15715 = vmatmul.mubr.msk.bf16.gmra.mxu1 %vm13832_vm2, %v16173_v55  ;;  %v13770_v55 = vpop.permute.xlu1 %13769 }
 0xbaf   : > { %13923 = vmatprep.mubr.bf16.mxu1 %v21993_v18 }
 0xbb6   : > { %15716 = vmatmul.mubr.msk.bf16.gmra.mxu1 %vm13832_vm2, %v16174_v14 }
 0xbb7   : > { %13933 = vmatprep.mubr.bf16.mxu1 %v21993_v18 }
 0xbbe   : > { %15717 = vmatmul.mubr.msk.bf16.gmra.mxu1 %vm13832_vm2, %v16175_v11 }
 0xc56   : > { %v21593_v2 = vpop.f32.mrf.mxu1 }
 0xc58   : > { %v21595_v52 = vpop.f32.mrf.mxu1 }
 0xc5a   : > { %v21597_v18 = vpop.f32.mrf.mxu1 }
 0xc5c   : > { %v21599_v19 = vpop.f32.mrf.mxu1 }
 0xc5e   : > { %v21601_v9 = vpop.f32.mrf.mxu1 }
 0xc60   : > { %v21603_v12 = vpop.f32.mrf.mxu1 }
 0xc62   : > { %v21605_v62 = vpop.f32.mrf.mxu1 }
 0xc64   : > { %v21607_v51 = vpop.f32.mrf.mxu1 }
 0xc66   : > { %v21609_v31 = vpop.f32.mrf.mxu1 }
 0xc68   : > { %v21611_v60 = vpop.f32.mrf.mxu1 }
 0xc6a   : > { %v21613_v28 = vpop.f32.mrf.mxu1 }
 0xc6c   : > { %v13911_v37 = vpop.f32.mrf.mxu1 }
 0xc6e   : > { %v13915_v61 = vpop.f32.mrf.mxu1 }
 0xc6f   : > { %v13916_v14 = vadd.f32 %v13915_v61, %v13775_v30 }
 0xc70   : > { %v13917_v33 = vpop.f32.mrf.mxu1 }
 0xc71   : > { %v13918_v21 = vadd.f32 %v13917_v33, %v13775_v30  ;;  %v13956_v33 = vmax.f32 %v13916_v14, 0.0  ;;  %v16182_v30 = vld [vmem:[%s21723_s16] sm:$0xff]  }
 0xc72   : > { %v13919_v46 = vpop.f32.mrf.mxu1 }
 0xc73   : > { %v13920_v49 = vadd.f32 %v13919_v46, %v13780_v42  ;;  %v13765_v46 = vpop.permute.xlu0 %13764 }
 0xc74   : > { %v13921_v8 = vpop.f32.mrf.mxu1 }
 0xc75   : > { %v13922_v4 = vadd.f32 %v13921_v8, %v13780_v42  ;;  %v13958_v11 = vmax.f32 %v13920_v49, 0.0  ;;  %v13912_v8 = vadd.f32 %v13911_v37, %v13770_v55  ;;  %v13906_v37 = vadd.f32 %v21609_v31, %v13765_v46 }
 0xc76   : > { %v13925_v38 = vpop.f32.mrf.mxu1 }
 0xc77   : > { %v13926_v0 = vadd.f32 %v13925_v38, %v13785_v44  ;;  %v13959_v50 = vmax.f32 %v13922_v4, 0.0  ;;  %v13957_v38 = vmax.f32 %v13918_v21, 0.0  ;;  %v15718_v21 = vld [vmem:[%s21724_s17] ss:$0 sm:$0xff] }
 0xc78   : > { %v13927_v15 = vpop.f32.mrf.mxu1 }
 0xc79   : > { %v13928_v16 = vadd.f32 %v13927_v15, %v13785_v44  ;;  %v13960_v43 = vmax.f32 %v13926_v0, 0.0  ;;  %v13983_v15 = vmul.f32 %v13959_v50, %v21967_v1  ;;  %v13981_v61 = vmul.f32 %v13957_v38, %v21967_v1 }
 0xc7a   : > { %v13929_v22 = vpop.f32.mrf.mxu1 }
 0xc7b   : > { %v13930_v3 = vadd.f32 %v13929_v22, %v13790_v25  ;;  %v13961_v53 = vmax.f32 %v13928_v16, 0.0  ;;  %v13984_v45 = vmul.f32 %v13960_v43, %v21966_v20  ;;  %v13910_v22 = vadd.f32 %v21613_v28, %v13770_v55 }
 0xc7c   : > { %v13931_v58 = vpop.f32.mrf.mxu1 }
 0xc7d   : > { %v13932_v6 = vadd.f32 %v13931_v58, %v13790_v25  ;;  %v13962_v63 = vmax.f32 %v13930_v3, 0.0  ;;  %v13985_v40 = vmul.f32 %v13961_v53, %v21967_v1  ;;  %v13982_v58 = vmul.f32 %v13958_v11, %v21966_v20 }
 0xc7e   : > { %v13935_v27 = vpop.f32.mrf.mxu1  ;;  %v16270_v53 = vmov 0.0  }
 0xc7f   : > { %v13936_v41 = vadd.f32 %v13935_v27, %v13795_v32  ;;  %v13963_v59 = vmax.f32 %v13932_v6, 0.0  ;;  %v13986_v29 = vmul.f32 %v13962_v63, %v21966_v20  ;;  %v13908_v27 = vadd.f32 %v21611_v60, %v13765_v46 }
 0xc80   : > { %v13937_v26 = vpop.f32.mrf.mxu1 }
 0xc81   : > { %v13938_v35 = vadd.f32 %v13937_v26, %v13795_v32  ;;  %v13964_v7 = vmax.f32 %v13936_v41, 0.0  ;;  %v13987_v5 = vmul.f32 %v13963_v59, %v21967_v1  ;;  %v13760_v26 = vpop.permute.xlu1 %13759  ;;  %v13954_v32 = vmax.f32 %v13910_v22, 0.0 }
 0xc82   : > { %v13939_v48 = vpop.f32.mrf.mxu1  ;;  %v13900_v60 = vadd.f32 %v21605_v62, %v13760_v26 }
 0xc83   : > { %v13940_v39 = vadd.f32 %v13939_v48, %v13800_v17  ;;  %v13965_v36 = vmax.f32 %v13938_v35, 0.0  ;;  %v13988_v10 = vmul.f32 %v13964_v7, %v21966_v20  ;;  %v13980_v48 = vmul.f32 %v13956_v33, %v21966_v20 }
 0xc84   : > { %v13941_v47 = vpop.f32.mrf.mxu1  ;;  %v13902_v35 = vadd.f32 %v21607_v51, %v13760_v26  ;;  %v13978_v25 = vmul.f32 %v13954_v32, %v21966_v20 }
 0xc85   : > { %v13942_v24 = vadd.f32 %v13941_v47, %v13800_v17  ;;  %v13966_v23 = vmax.f32 %v13940_v39, 0.0  ;;  %v13989_v56 = vmul.f32 %v13965_v36, %v21967_v1  ;;  %v13955_v17 = vmax.f32 %v13912_v8, 0.0  ;;  %v13755_v47 = vpop.permute.xlu0 %13754  ;;  %v13750_v6 = vpop.permute.xlu1 %13749 }
 0xc86   : > { %v13953_v39 = vmax.f32 %v13908_v27, 0.0  ;;  %v13898_v41 = vadd.f32 %v21603_v12, %v13755_v47  ;;  %v13896_v51 = vadd.f32 %v21601_v9, %v13755_v47  ;;  %v13950_v36 = vmax.f32 %v13900_v60, 0.0 }
 0xc87   : > { %v13967_v57 = vmax.f32 %v13942_v24, 0.0  ;;  %v13990_v34 = vmul.f32 %v13966_v23, %v21966_v20  ;;  %v13979_v28 = vmul.f32 %v13955_v17, %v21967_v1  ;;  %v13952_v24 = vmax.f32 %v13906_v37, 0.0 }
 0xc88   : > { %v13951_v23 = vmax.f32 %v13902_v35, 0.0  ;;  %v13977_v31 = vmul.f32 %v13953_v39, %v21967_v1  ;;  %v13949_v44 = vmax.f32 %v13898_v41, 0.0  ;;  %v13890_v12 = vadd.f32 %v21597_v18, %v13750_v6 }
 0xc89   : > { %v13991_v13 = vmul.f32 %v13967_v57, %v21967_v1  ;;  %v13976_v57 = vmul.f32 %v13952_v24, %v21966_v20  ;;  %v13745_v3 = vpop.permute.xlu0 %13744  ;;  %v13948_v7 = vmax.f32 %v13896_v51, 0.0 }
 0xc8a   : > { %v13975_v62 = vmul.f32 %v13951_v23, %v21967_v1  ;;  %v13888_v16 = vadd.f32 %v21595_v52, %v13745_v3  ;;  %v13973_v9 = vmul.f32 %v13949_v44, %v21967_v1 }
 0xc8b   : > { %14004 = vmatprep.subr.mxu0 %v13991_v13  ;;  %v13892_v13 = vadd.f32 %v21599_v19, %v13750_v6  ;;  %v13886_v19 = vadd.f32 %v21593_v2, %v13745_v3  ;;  %v13972_v42 = vmul.f32 %v13948_v7, %v21966_v20  ;;  %v16177_v2 = vld [vmem:[%s21723_s16 + $0x28] sm:$0xff]  }
 0xc8c   : > { %14005 = vmatpush1.xpose.msra.mxu0 %v13990_v34  ;;  %v13974_v34 = vmul.f32 %v13950_v36, %v21966_v20  ;;  %v13945_v0 = vmax.f32 %v13888_v16, 0.0 }
 0xc8d   : > { %14006 = vmatprep.subr.mxu0 %v13989_v56  ;;  %v13947_v59 = vmax.f32 %v13892_v13, 0.0  ;;  %v13946_v56 = vmax.f32 %v13890_v12, 0.0  ;;  %v13944_v18 = vmax.f32 %v13886_v19, 0.0 }
 0xc8e   : > { %v13969_v52 = vmul.f32 %v13945_v0, %v21967_v1 }
 0xc8f   : > { %v13971_v63 = vmul.f32 %v13947_v59, %v21967_v1  ;;  %v13968_v4 = vmul.f32 %v13944_v18, %v21966_v20  ;;  %v16180_v1 = vld [vmem:[%s21723_s16 + $0x10] sm:$0xff]  }
 0xc90   : > { %14007 = vmatpush1.xpose.msra.mxu0 %v13988_v10  ;;  %v13970_v10 = vmul.f32 %v13946_v56, %v21966_v20  ;;  %v16179_v20 = vld [vmem:[%s21723_s16 + $0x18] sm:$0xff]  }
 0xc91   : > { %14008 = vmatprep.subr.mxu0 %v13987_v5  ;;  %v16178_v5 = vld [vmem:[%s21723_s16 + $0x20] sm:$0xff]  }
 0xc94   : > { %14009 = vmatpush1.xpose.msra.mxu0 %v13986_v29 }
 0xc95   : > { %14010 = vmatprep.subr.mxu0 %v13985_v40 }
 0xc98   : > { %14011 = vmatpush1.xpose.msra.mxu0 %v13984_v45 }
 0xc99   : > { %14012 = vmatprep.subr.mxu0 %v13983_v15 }
 0xc9c   : > { %14013 = vmatpush1.xpose.msra.mxu0 %v13982_v58 }
 0xc9d   : > { %14014 = vmatprep.subr.mxu0 %v13981_v61 }
 0xca0   : > { %14015 = vmatpush1.xpose.msra.mxu0 %v13980_v48 }
 0xca1   : > { %14016 = vmatprep.subr.mxu0 %v13979_v28 }
 0xca4   : > { %14017 = vmatpush1.xpose.msra.mxu0 %v13978_v25 }
 0xca5   : > { %14018 = vmatprep.subr.mxu0 %v13977_v31 }
 0xca8   : > { %14019 = vmatpush1.xpose.msra.mxu0 %v13976_v57 }
 0xca9   : > { %14020 = vmatprep.subr.mxu0 %v13975_v62 }
 0xcac   : > { %14021 = vmatpush1.xpose.msra.mxu0 %v13974_v34 }
 0xcad   : > { %14022 = vmatprep.subr.mxu0 %v13973_v9 }
 0xcb0   : > { %14023 = vmatpush1.xpose.msra.mxu0 %v13972_v42 }
 0xcb1   : > { %14024 = vmatprep.subr.mxu0 %v13971_v63 }
 0xcb4   : > { %14025 = vmatpush1.xpose.msra.mxu0 %v13970_v10 }
 0xcb5   : > { %14026 = vmatprep.subr.mxu0 %v13969_v52 }
 0xcb8   : > { %14027 = vmatpush1.xpose.msra.mxu0 %v13968_v4 }
 0xcb9   : > { %15811 = vmatprep.subr.bf16.mxu0 %v16270_v53 }
 0xcbb   : > { %14061 = vmatmul.mubr.f32.vlgmr.msra.gmra.mxu0 %v21589_v54  ;;  %v16181_v54 = vld [vmem:[%s21723_s16 + $0x8] sm:$0xff]  }
 0xcbc   : > { %15812 = vmatpush3.bf16.msra.mxu0 %v16177_v2  ;;  %15823 = vmatprep.mubr.msk.bf16.mxu0 %vm16271_vm8, %v16270_v53 }
 0xcbd   : > { %15813 = vmatprep.subr.bf16.mxu0 %v16270_v53 }
 0xcc0   : > { %15814 = vmatpush3.bf16.msra.mxu0 %v16178_v5 }
 0xcc1   : > { %15815 = vmatprep.subr.bf16.mxu0 %v16270_v53 }
 0xcc4   : > { %15816 = vmatpush3.bf16.msra.mxu0 %v16179_v20 }
 0xcc5   : > { %15817 = vmatprep.subr.bf16.mxu0 %v16270_v53 }
 0xcc8   : > { %15818 = vmatpush3.bf16.msra.mxu0 %v16180_v1 }
 0xcc9   : > { %15819 = vmatprep.subr.bf16.mxu0 %v16270_v53 }
 0xccc   : > { %15820 = vmatpush3.bf16.msra.mxu0 %v16181_v54 }
 0xccd   : > { %15821 = vmatprep.subr.bf16.mxu0 %v16270_v53 }
 0xcd0   : > { %15822 = vmatpush3.bf16.msra.mxu0 %v16182_v30 }
 0xd7b   : > { %v14062_v49 = vpop.f32.mrf.mxu0 }
 0xd7c   : > { %v14066_v43 = vpack.c.bf16 %v14062_v49, %v14062_v49 }
 0xd7d   : > { %v14064_v29 = vpop.f32.mrf.mxu0 }
 0xd7e   : > { %15824 = vmatmul.mubr.msk.bf16.vlgmr.msra.gmra.mxu0 %vm13832_vm2, %v14066_v43 }
 0xe3e   : > { %v14159_v50 = vpop.f32.mrf.mxu0 }
 0xe3f   : > { %v14160_v40 = vadd.f32 %v15718_v21, %v14159_v50 }
 0xe40   : > { %v15825_v55 = vpop.f32.mrf.mxu0 }
 0xe41   : > { %v14166_v14 = vsel %vm14165_vm10, %v14160_v40, -inf }
 0xe42   : > { %14167 = vmax.xlane.f32.xlu1 %v14166_v14  ;;  %v14162_v11 = vpop.f32.mrf.mxu0 }
 0xe44   : > { %v15826_v45 = vpop.f32.mrf.mxu0 }
 0xecb   : > { %v14168_v8 = vpop.xlane.xlu1 %14167 }
 0xecc   : > { %v14169_v38 = vsub.f32 %v14160_v40, %v14168_v8 }
 0xece   : > { %v14170_v15 = vmul.f32 1.442695, %v14169_v38 }
 0xed0   : > { %16183 = vpow2.f32 %v14170_v15 }
 0xedd   : > { %v16184_v46 = vpop.eup %16183 }
 0xede   : > { %v14172_v22 = vsel %vm14165_vm10, %v16184_v46, 0.0 }
 0xedf   : > { %14173 = vadd.xlane.f32.xlu0 %v14172_v22 }
 0xf68   : > { %v14174_v33 = vpop.xlane.xlu0 %14173 }
 0xf69   : > { %16185 = vlog2.f32 %v14174_v33 }
 0xf76   : > { %v16186_v58 = vpop.eup %16185 }
 0xf77   : > { %v14176_v27 = vmul.f32 0.6931472, %v16186_v58 }
 0xf79   : > { %v14177_v17 = vadd.f32 %v14176_v27, %v14168_v8 }
 0xf7b   : > { %v14178_v61 = vsub.f32 %v14160_v40, %v14177_v17 }
 0xf7d   : > { %14179 = vst [vmem:[%s571_s19] sm:$0xf] %v14178_v61 }
 0xf7e   : > { %16200 = shalt.err (!%p16197_p3)
}
 0xf7f   : > { %s16201_s1 = scalar_lea.hbm %s14192_s21, 64  ;;  %s16205_s24 = scalar_lea.hbm %s21997_s7, 128 }
 0xf80   : > { %p16202_p4 = scmp.ne.s32.totalorder %s14192_s21, %s16201_s1  ;;  %p16206_p9 = scmp.lt.s32.totalorder %s14192_s21, %s21997_s7 }
 0xf81   : > { %p16207_p10 = scmp.lt.s32.totalorder %s16205_s24, %s16201_s1 }
 0xf82   : > { %p16203_p7 = pnand %p16202_p4, %p16406_p5 }
 0xf83   : > { %p16208_p11 = por %p16207_p10, %p16206_p9 }
 0xf84   : > { %p16204_p8 = pneg %p16203_p7 }
 0xf86   : > { %p16209_p12 = pnand %p16208_p11, %p16204_p8 }
 0xf88   : > { %16212 = shalt.err (!%p16209_p12)
}
 0xf89   : > { %15828 = dma.vmem_to_hbm [thread:$0]  (%p16406_p5), %s14195_s4, 64, %s14192_s21, %s14181_s18  }
 0xf8a PF: > { %s21998_s22 = sld [smem:[#allocation8_spill]] }
 0xf8b   : > { %s21999_s19 = sld [smem:[#allocation6_spill]] }
 0xf90   : > { %p15834_p13 = scmp.ge.s32.totalorder %s21998_s22, 2 }
 0xf91   : > { %s14206_s29 = sand.u32 1, %s21999_s19  }
 0xf92   : > { %p15831_p0 = pnand %p15834_p13, %p16410_p6  ;;  %s14207_s30 = scalar_lea.sflag [#allocation4], %s14206_s29 }
 0xf94   : > { %p15832_p1 = pneg %p15831_p0 }
 0xf96   : > { %16230 = dma.done.wait (%p15832_p1), %s14207_s30, 64  }
 0xf97   : > { %16232 = vsyncadd (%p15832_p1), %s14207_s30, 4294967232  ;;  %s22001_s30 = sld [smem:[#allocation10_spill]]  ;;  %s22004_s27 = smov %s16239_s28 }
 0xf98   : > { %s22002_s26 = sld [smem:[#allocation7_spill]] }
 0xf99   : > { %s22003_s29 = sld [smem:[#allocation11_spill]] }
 0xf9d   : > { %p28_p2 = scmp.ge.s32.totalorder %s22001_s30, 4  }
 0xf9e   : > { %s22005_s28 = smov %s22002_s26 }
 0xf9f   :  { %30 = sbr.rel (!%p28_p2) target bundleno = 13 (0xd), region = 130 }
 0xfa4   :  { %14212 = vsyncpa [#allocation4], 1 }
 0xfa5   :  { %14214 = vsyncpa [#allocation4 + $0x1], 1 }

</bundles_post_ra>
